<compile_context>
chip_gen: v7x
topology: tpu7x:2x2x1
jax: 0.10.0
libtpu: 0.0.40
codegen_flags: <defaults>
</compile_context>

<pallas_src>
import numpy as np
import jax
import jax.numpy as jnp
from jax.experimental import pallas as pl
from jax.experimental.pallas import tpu as pltpu


TILE_R = 256  # row tile: multiple of 256 for MXU occupancy on v6e/v7x


def _ceil(a, b):
    return ((a + b - 1) // b) * b


# ---------------------------------------------------------------------------
# Pallas MLP kernels (bf16 operands, f32 accumulation)
# ---------------------------------------------------------------------------
def _mlp2_kernel(x_ref, w1_ref, b1_ref, w2_ref, b2_ref, o_ref):
    x = x_ref[...].astype(jnp.bfloat16)
    h = jnp.dot(x, w1_ref[...], preferred_element_type=jnp.float32) + b1_ref[...]
    h = jnp.maximum(h, 0.0).astype(jnp.bfloat16)
    o_ref[...] = jnp.dot(h, w2_ref[...], preferred_element_type=jnp.float32) + b2_ref[...]


def _mlp3_kernel(x_ref, w1_ref, b1_ref, w2_ref, b2_ref, w3_ref, b3_ref, o_ref):
    x = x_ref[...].astype(jnp.bfloat16)
    h = jnp.dot(x, w1_ref[...], preferred_element_type=jnp.float32) + b1_ref[...]
    h = jnp.maximum(h, 0.0).astype(jnp.bfloat16)
    h = jnp.dot(h, w2_ref[...], preferred_element_type=jnp.float32) + b2_ref[...]
    h = jnp.maximum(h, 0.0).astype(jnp.bfloat16)
    o_ref[...] = jnp.dot(h, w3_ref[...], preferred_element_type=jnp.float32) + b3_ref[...]


def _init_linear(key, din, dout):
    kw, kb = jax.random.split(key)
    bound = 1.0 / float(np.sqrt(din))
    w = jax.random.uniform(kw, (din, dout), jnp.float32, -bound, bound)
    b = jax.random.uniform(kb, (dout,), jnp.float32, -bound, bound)
    return w, b


class PallasMLP:
    """Linear/ReLU/.../Linear executed as a single row-tiled Pallas kernel.

    Weights are padded + cast to bf16 once at construction and kept resident
    in VMEM across row tiles; only x / out tiles stream per grid step.
    """

    def __init__(self, key, dims):
        self.dims = tuple(int(d) for d in dims)
        self.din_p = _ceil(self.dims[0], 128)
        self.dout_p = _ceil(self.dims[-1], 128)
        keys = jax.random.split(key, len(dims) - 1)
        self.padded = []  # [(w_bf16 [din_p, dout_p], b_f32 [1, dout_p]), ...]
        for i, k in enumerate(keys):
            din, dout = self.dims[i], self.dims[i + 1]
            w, b = _init_linear(k, din, dout)
            dp_in, dp_out = _ceil(din, 128), _ceil(dout, 128)
            wp = jnp.zeros((dp_in, dp_out), jnp.bfloat16).at[:din, :dout].set(
                w.astype(jnp.bfloat16))
            bp = jnp.zeros((1, dp_out), jnp.float32).at[0, :dout].set(b)
            self.padded.append((wp, bp))
        self._kernel = _mlp2_kernel if len(self.padded) == 2 else _mlp3_kernel

    def __call__(self, x):
        x = jnp.asarray(x, jnp.float32)
        R, d0 = x.shape
        dout = self.dims[-1]
        if R == 0:
            return jnp.zeros((0, dout), jnp.float32)
        # bucket rows to a multiple of TILE_R -> one compile per MLP config
        Rp = _ceil(max(R, 1), TILE_R)

        xp = jnp.zeros((Rp, self.din_p), jnp.float32).at[:R, :d0].set(x)
        args = [xp]
        in_specs = [pl.BlockSpec((TILE_R, self.din_p), lambda i: (i, 0))]
        for wp, bp in self.padded:
            args.extend([wp, bp])
            # constant block index -> weights/biases stay resident across grid
            in_specs.append(pl.BlockSpec(wp.shape, lambda i: (0, 0)))
            in_specs.append(pl.BlockSpec(bp.shape, lambda i: (0, 0)))

        out = pl.pallas_call(
            self._kernel,
            out_shape=jax.ShapeDtypeStruct((Rp, self.dout_p), jnp.float32),
            grid_spec=pltpu.PrefetchScalarGridSpec(
                num_scalar_prefetch=0,
                grid=(Rp // TILE_R,),
                in_specs=in_specs,
                out_specs=pl.BlockSpec((TILE_R, self.dout_p), lambda i: (i, 0)),
            ),
            compiler_params=pltpu.CompilerParams(
                dimension_semantics=("parallel",),
                vmem_limit_bytes=32 * 1024 * 1024,
            ),
        )(*args)
        return out[:R, :dout]


# ---------------------------------------------------------------------------
# LorentzVector helpers (LV.*)
# ---------------------------------------------------------------------------
def lv_tensor_to_pxpypze(t):  # t = [pt, eta, phi, e]
    pt, eta, phi, e = t[:, 0:1], t[:, 1:2], t[:, 2:3], t[:, 3:4]
    return jnp.concatenate([pt * jnp.cos(phi), pt * jnp.sin(phi), pt * jnp.sinh(eta), e], axis=1)


def lv_mass_from_pxpypze(p):
    # TODO(synk): exact negative-m^2 handling of LV.MassFromPxPyPzE unknown; using sqrt(|m^2|).
    m2 = p[:, 3:4] ** 2 - p[:, 0:1] ** 2 - p[:, 1:2] ** 2 - p[:, 2:3] ** 2
    return jnp.sqrt(jnp.abs(m2))


def lv_tensor_to_ptetaphie(p):
    # TODO(synk): no epsilon on pz/pt, matching the reference (pt==0 -> inf eta).
    px, py, pz, e = p[:, 0:1], p[:, 1:2], p[:, 2:3], p[:, 3:4]
    pt = jnp.sqrt(px ** 2 + py ** 2)
    eta = jnp.arcsinh(pz / pt)
    phi = jnp.arctan2(py, px)
    return jnp.concatenate([pt, eta, phi, e], axis=1)


# ---------------------------------------------------------------------------
# BaseLineModelAdvanced (recursive message passing, aggr='max')
# ---------------------------------------------------------------------------
class BaseLineModelAdvanced:
    def __init__(self, key):
        k1, k2, k3, k4 = jax.random.split(key, 4)
        self.mlp = PallasMLP(k1, (11, 256, 1024, 12))
        self.mlp_dr = PallasMLP(k2, (1, 256, 1024, 12))
        self.mlp_m = PallasMLP(k3, (1, 1024, 1024, 2))
        self.mlp_edge = PallasMLP(k4, (26, 256, 2))

    def __call__(self, edge_index, N_pT, N_eta, N_phi, N_energy):
        P_mu = lv_tensor_to_pxpypze(jnp.concatenate([N_pT, N_eta, N_phi, N_energy], axis=1))
        n_nodes = P_mu.shape[0]
        O_Topo = None
        ei = np.asarray(edge_index)
        # TODO(synk): recursion control (edge filtering by pred==1) stays on host;
        # shape bucketing inside PallasMLP avoids per-iteration recompiles.
        for it in range(4):
            if it > 2 or ei.shape[1] == 0:
                return O_Topo
            src = jnp.asarray(ei[0])
            dst = jnp.asarray(ei[1])
            # PyG MessagePassing (flow='source_to_target'): x_i = x[dst], x_j = x[src]
            x_i = P_mu[dst]
            x_j = P_mu[src]
            edge_vec = x_i + x_j                       # == P_mu[src] + P_mu[dst]
            edge_mass = lv_mass_from_pxpypze(edge_vec)
            # score (in message) and mass (in update) come from identical inputs
            # through the same mlp_m -> compute ONCE, reuse (halves the 1024x1024 work).
            mass_score = self.mlp_m(edge_mass)
            msg = self.mlp(jnp.concatenate([x_i, edge_vec, edge_mass, mass_score], axis=1))
            prop = jax.ops.segment_max(msg, dst, num_segments=n_nodes)
            prop = jnp.where(jnp.isneginf(prop), 0.0, prop)  # nodes with no in-edges -> 0
            d_eta = (N_eta[src] - N_eta[dst]) ** 2
            d_phi = (N_phi[src] - N_phi[dst]) ** 2
            dr = self.mlp_dr(jnp.sqrt(d_eta + d_phi))
            upd = self.mlp_edge(jnp.concatenate([prop[src], mass_score, dr], axis=1))
            if it == 0:
                O_Topo = upd
            else:
                # torch `O_Topo[idx] += upd` (non-accumulating indexed add; dup idx -> last write wins)
                O_Topo = O_Topo.at[src].set(O_Topo[src] + upd)
            pred = jnp.argmax(O_Topo[src], axis=1)
            keep = np.asarray(pred == 1)
            ei = ei[:, keep]
        return O_Topo


# ---------------------------------------------------------------------------
# BaseLineModelEvent
# ---------------------------------------------------------------------------
class BaseLineModelEvent:
    def __init__(self, key):
        k0, k1, k2, k3, k4 = jax.random.split(key, 5)
        self.advanced = BaseLineModelAdvanced(k0)
        self.mlp_Topo = PallasMLP(k1, (2 + 1 + 4 + 4, 256, 256, 2))
        self.mlp_mu = PallasMLP(k2, (6, 256, 1024, 1))
        self.mlp_nTops = PallasMLP(k3, (4, 256, 256, 5))
        self.mlp_mNodeTops = PallasMLP(k4, (1 + 4, 256, 256, 4))

    def __call__(self, edge_index, i, N_pT, N_eta, N_phi, N_energy,
                 G_mu, G_met, G_met_phi, G_pileup, G_nTruthJets):
        batch_len = i.shape[0]
        n_nodes = N_pT.shape[0]
        P_mu = lv_tensor_to_pxpypze(jnp.concatenate([N_pT, N_eta, N_phi, N_energy], axis=1))

        Topo_pred = self.advanced(edge_index, N_pT, N_eta, N_phi, N_energy)
        e_i_active = jnp.argmax(Topo_pred, axis=1)
        keep = np.asarray(e_i_active == 1)
        ei = np.asarray(edge_index)
        e_s = jnp.asarray(ei[0][keep])
        e_r = jnp.asarray(ei[1][keep])

        # scatter_(reduce='add'): accumulate receiver four-vectors into sender slots
        cols = [jnp.zeros((n_nodes,), jnp.float32).at[e_s].add(P_mu[e_r, c]) for c in range(4)]
        P_mu_p = jnp.stack(cols, axis=1)

        t_m = lv_mass_from_pxpypze(P_mu_p)
        # TODO(synk): per-event count of unique positive masses (torch.unique loop) stays on host.
        t_np = np.asarray(t_m).reshape(batch_len, -1)
        nTops_np = np.zeros((batch_len, 1), np.float32)
        for j in range(batch_len):
            vals = t_np[j][t_np[j] > 0]
            nTops_np[j, 0] = np.unique(vals).shape[0]
        nTops = jnp.asarray(nTops_np)

        P_mu_b = P_mu.reshape(batch_len, -1, 4).sum(axis=1)
        calc = lv_tensor_to_ptetaphie(P_mu_b)
        MET_Meas = -calc[:, 0:1]
        MET_Phi = -calc[:, 2:3]

        O_mu_actual = self.mlp_mu(
            jnp.concatenate([nTops, G_mu, G_pileup, MET_Meas - G_met,
                             MET_Phi - G_met_phi, G_nTruthJets], axis=1))
        O_nTops = self.mlp_nTops(
            jnp.concatenate([nTops, MET_Meas, MET_Phi, G_nTruthJets], axis=1))

        src0 = jnp.asarray(ei[0])
        dst0 = jnp.asarray(ei[1])
        O_Topo = self.mlp_Topo(
            jnp.concatenate([Topo_pred,
                             e_i_active[:, None].astype(jnp.float32),
                             P_mu_p[src0].reshape(-1, 4),
                             P_mu_p[dst0].reshape(-1, 4)], axis=1))
        O_Index = self.mlp_mNodeTops(jnp.concatenate([t_m, P_mu_p - P_mu], axis=1))
        return O_Topo, O_mu_actual, O_nTops, O_Index


# ---------------------------------------------------------------------------
if __name__ == "__main__":
    key = jax.random.PRNGKey(0)
    kparams, kdata = jax.random.split(key)
    model = BaseLineModelEvent(kparams)

    B, nodes_per_event = 2, 4
    N = B * nodes_per_event
    # complete directed graph (no self-loops) within each event -> E0 = 24 >= N
    edges = []
    for b in range(B):
        off = b * nodes_per_event
        for a in range(nodes_per_event):
            for c in range(nodes_per_event):
                if a != c:
                    edges.append((off + a, off + c))
    edge_index = jnp.asarray(np.array(edges, np.int32).T)  # [2, E0]

    kd = jax.random.split(kdata, 9)
    N_pT = jax.random.uniform(kd[0], (N, 1), jnp.float32, minval=20.0, maxval=100.0)
    N_eta = jax.random.uniform(kd[1], (N, 1), jnp.float32, minval=-2.5, maxval=2.5)
    N_phi = jax.random.uniform(kd[2], (N, 1), jnp.float32, minval=-np.pi, maxval=np.pi)
    N_energy = N_pT * jnp.cosh(N_eta) * (1.0 + jax.random.uniform(kd[3], (N, 1), jnp.float32,
                                                                  minval=0.01, maxval=0.2))
    i = jnp.arange(B, dtype=jnp.int32)
    G_mu = jax.random.uniform(kd[4], (B, 1), jnp.float32, minval=20.0, maxval=60.0)
    G_met = jax.random.uniform(kd[5], (B, 1), jnp.float32, minval=10.0, maxval=100.0)
    G_met_phi = jax.random.uniform(kd[6], (B, 1), jnp.float32, minval=-np.pi, maxval=np.pi)
    G_pileup = jax.random.uniform(kd[7], (B, 1), jnp.float32, minval=10.0, maxval=60.0)
    G_nTruthJets = jnp.round(jax.random.uniform(kd[8], (B, 1), jnp.float32, minval=0.0, maxval=6.0))

    outs = model(edge_index, i, N_pT, N_eta, N_phi, N_energy,
                 G_mu, G_met, G_met_phi, G_pileup, G_nTruthJets)
    for o in outs:
        jax.block_until_ready(o)
    print("KERNEL_OK")
</pallas_src>

<mosaic_0001>
module attributes {stable_mosaic.version = 11 : i64} {
  func.func @_mlp3_kernel(%arg0: i32, %arg1: memref<256x128xf32, #tpu.memory_space<vmem>>, %arg2: memref<128x1024xbf16, #tpu.memory_space<vmem>>, %arg3: memref<1x1024xf32, #tpu.memory_space<vmem>>, %arg4: memref<1024x1024xbf16, #tpu.memory_space<vmem>>, %arg5: memref<1x1024xf32, #tpu.memory_space<vmem>>, %arg6: memref<1024x128xbf16, #tpu.memory_space<vmem>>, %arg7: memref<1x128xf32, #tpu.memory_space<vmem>>, %arg8: memref<256x128xf32, #tpu.memory_space<vmem>>) attributes {dimension_semantics = [#tpu.dimension_semantics<parallel>], iteration_bounds = array<i64: 1>, scalar_prefetch = 0 : i64, scratch_operands = 0 : i64, tpu.core_type = #tpu.core_type<tc>, window_params = [{transform_indices = @transform_0, window_bounds = array<i64: 256, 128>}, {pipeline_mode = #tpu.pipeline_mode<synchronous>, transform_indices = @transform_1, window_bounds = array<i64: 128, 1024>}, {pipeline_mode = #tpu.pipeline_mode<synchronous>, transform_indices = @transform_2, window_bounds = array<i64: 1, 1024>}, {pipeline_mode = #tpu.pipeline_mode<synchronous>, transform_indices = @transform_3, window_bounds = array<i64: 1024, 1024>}, {pipeline_mode = #tpu.pipeline_mode<synchronous>, transform_indices = @transform_4, window_bounds = array<i64: 1, 1024>}, {pipeline_mode = #tpu.pipeline_mode<synchronous>, transform_indices = @transform_5, window_bounds = array<i64: 1024, 128>}, {pipeline_mode = #tpu.pipeline_mode<synchronous>, transform_indices = @transform_6, window_bounds = array<i64: 1, 128>}, {transform_indices = @transform_7, window_bounds = array<i64: 256, 128>}]} {
    %c0 = arith.constant 0 : index
    %c0_0 = arith.constant 0 : index
    %0 = vector.load %arg1[%c0, %c0_0] : memref<256x128xf32, #tpu.memory_space<vmem>>, vector<256x128xf32>
    %1 = arith.truncf %0 : vector<256x128xf32> to vector<256x128xbf16>
    %c0_1 = arith.constant 0 : index
    %c0_2 = arith.constant 0 : index
    %2 = vector.load %arg2[%c0_1, %c0_2] : memref<128x1024xbf16, #tpu.memory_space<vmem>>, vector<128x1024xbf16>
    %cst = arith.constant dense<0.000000e+00> : vector<256x1024xf32>
    %3 = tpu.matmul %1, %2, %cst {dimension_numbers = #tpu.dot_dimension_numbers<[1], [0], [0], [1], [0, 0, 1, 1], [], []>} : vector<256x128xbf16>, vector<128x1024xbf16>, vector<256x1024xf32> -> vector<256x1024xf32>
    %c0_3 = arith.constant 0 : index
    %c0_4 = arith.constant 0 : index
    %4 = vector.load %arg3[%c0_3, %c0_4] : memref<1x1024xf32, #tpu.memory_space<vmem>>, vector<1x1024xf32>
    %5 = vector.broadcast %4 : vector<1x1024xf32> to vector<256x1024xf32>
    %6 = arith.addf %3, %5 : vector<256x1024xf32>
    %cst_5 = arith.constant 0.000000e+00 : f32
    %7 = vector.broadcast %cst_5 : f32 to vector<256x1024xf32>
    %8 = arith.maximumf %6, %7 : vector<256x1024xf32>
    %9 = arith.truncf %8 : vector<256x1024xf32> to vector<256x1024xbf16>
    %c0_6 = arith.constant 0 : index
    %c0_7 = arith.constant 0 : index
    %10 = vector.load %arg4[%c0_6, %c0_7] : memref<1024x1024xbf16, #tpu.memory_space<vmem>>, vector<1024x1024xbf16>
    %cst_8 = arith.constant dense<0.000000e+00> : vector<256x1024xf32>
    %11 = tpu.matmul %9, %10, %cst_8 {dimension_numbers = #tpu.dot_dimension_numbers<[1], [0], [0], [1], [0, 0, 1, 1], [], []>} : vector<256x1024xbf16>, vector<1024x1024xbf16>, vector<256x1024xf32> -> vector<256x1024xf32>
    %c0_9 = arith.constant 0 : index
    %c0_10 = arith.constant 0 : index
    %12 = vector.load %arg5[%c0_9, %c0_10] : memref<1x1024xf32, #tpu.memory_space<vmem>>, vector<1x1024xf32>
    %13 = vector.broadcast %12 : vector<1x1024xf32> to vector<256x1024xf32>
    %14 = arith.addf %11, %13 : vector<256x1024xf32>
    %cst_11 = arith.constant 0.000000e+00 : f32
    %15 = vector.broadcast %cst_11 : f32 to vector<256x1024xf32>
    %16 = arith.maximumf %14, %15 : vector<256x1024xf32>
    %17 = arith.truncf %16 : vector<256x1024xf32> to vector<256x1024xbf16>
    %c0_12 = arith.constant 0 : index
    %c0_13 = arith.constant 0 : index
    %18 = vector.load %arg6[%c0_12, %c0_13] : memref<1024x128xbf16, #tpu.memory_space<vmem>>, vector<1024x128xbf16>
    %cst_14 = arith.constant dense<0.000000e+00> : vector<256x128xf32>
    %19 = tpu.matmul %17, %18, %cst_14 {dimension_numbers = #tpu.dot_dimension_numbers<[1], [0], [0], [1], [0, 0, 1, 1], [], []>} : vector<256x1024xbf16>, vector<1024x128xbf16>, vector<256x128xf32> -> vector<256x128xf32>
    %c0_15 = arith.constant 0 : index
    %c0_16 = arith.constant 0 : index
    %20 = vector.load %arg7[%c0_15, %c0_16] : memref<1x128xf32, #tpu.memory_space<vmem>>, vector<1x128xf32>
    %21 = vector.broadcast %20 : vector<1x128xf32> to vector<256x128xf32>
    %22 = arith.addf %19, %21 : vector<256x128xf32>
    %c0_17 = arith.constant 0 : index
    %c0_18 = arith.constant 0 : index
    %23 = vector.load %arg8[%c0_17, %c0_18] : memref<256x128xf32, #tpu.memory_space<vmem>>, vector<256x128xf32>
    tpu.vector_store %arg8[%c0_17, %c0_18], %22 {strides = array<i32>} : memref<256x128xf32, #tpu.memory_space<vmem>>, vector<256x128xf32>,
    return
  }
  func.func @transform_0(%arg0: i32) -> (i32, i32) {
    %c0_i32 = arith.constant 0 : i32
    %c0_i32_0 = arith.constant 0 : i32
    return %arg0, %c0_i32 : i32, i32
  }
  func.func @transform_1(%arg0: i32) -> (i32, i32) {
    %c0_i32 = arith.constant 0 : i32
    %c0_i32_0 = arith.constant 0 : i32
    %c0_i32_1 = arith.constant 0 : i32
    return %c0_i32, %c0_i32_0 : i32, i32
  }
  func.func @transform_2(%arg0: i32) -> (i32, i32) {
    %c0_i32 = arith.constant 0 : i32
    %c0_i32_0 = arith.constant 0 : i32
    %c0_i32_1 = arith.constant 0 : i32
    return %c0_i32, %c0_i32_0 : i32, i32
  }
  func.func @transform_3(%arg0: i32) -> (i32, i32) {
    %c0_i32 = arith.constant 0 : i32
    %c0_i32_0 = arith.constant 0 : i32
    %c0_i32_1 = arith.constant 0 : i32
    return %c0_i32, %c0_i32_0 : i32, i32
  }
  func.func @transform_4(%arg0: i32) -> (i32, i32) {
    %c0_i32 = arith.constant 0 : i32
    %c0_i32_0 = arith.constant 0 : i32
    %c0_i32_1 = arith.constant 0 : i32
    return %c0_i32, %c0_i32_0 : i32, i32
  }
  func.func @transform_5(%arg0: i32) -> (i32, i32) {
    %c0_i32 = arith.constant 0 : i32
    %c0_i32_0 = arith.constant 0 : i32
    %c0_i32_1 = arith.constant 0 : i32
    return %c0_i32, %c0_i32_0 : i32, i32
  }
  func.func @transform_6(%arg0: i32) -> (i32, i32) {
    %c0_i32 = arith.constant 0 : i32
    %c0_i32_0 = arith.constant 0 : i32
    %c0_i32_1 = arith.constant 0 : i32
    return %c0_i32, %c0_i32_0 : i32, i32
  }
  func.func @transform_7(%arg0: i32) -> (i32, i32) {
    %c0_i32 = arith.constant 0 : i32
    %c0_i32_0 = arith.constant 0 : i32
    return %arg0, %c0_i32 : i32, i32
  }
}

</mosaic_0001>

<bundles_post_ra>
// kernel: tpu_custom_call.1
= control target key start
LH: loop header
LB: loop body
LE: loop exit
PB: predicated region body
PF: predicated region fallthrough
CT: control target
= control target key end

     0   :  { %12 = vsyncpa [#allocation3], 0  ;;  %s14981_s0 = inlined_call_operand.hbm [shape: f32[256,128], index: 0, kind: input, shape index: {}]   ;;  %s14982_s1 = inlined_call_operand.hbm [shape: bf16[128,1024], index: 1, kind: input, shape index: {}]   ;;  %s14983_s2 = inlined_call_operand.hbm [shape: f32[1,1024], index: 2, kind: input, shape index: {}]   ;;  %s14984_s3 = inlined_call_operand.hbm [shape: bf16[1024,1024], index: 3, kind: input, shape index: {}]   ;;  %s14985_s4 = inlined_call_operand.hbm [shape: f32[1,1024], index: 4, kind: input, shape index: {}]   ;;  %s14986_s5 = inlined_call_operand.hbm [shape: bf16[1024,128], index: 5, kind: input, shape index: {}]   ;;  %s14987_s6 = inlined_call_operand.hbm [shape: f32[1,128], index: 6, kind: input, shape index: {}]   ;;  %s14988_s7 = inlined_call_operand.hbm [shape: f32[256,128], index: 7, kind: output, shape index: {}]  }
   0x1   :  { %13 = vsyncpa [#allocation6], 0 }
   0x2   :  { %14 = vsyncpa [#allocation9], 0 }
   0x3   :  { %15 = vsyncpa [#allocation12], 0 }
   0x4   :  { %16 = vsyncpa [#allocation4], 0  ;;  %s11928_s24 = smov [#allocation5]   ;;  %s11742_s28 = scalar_lea.hbm %s14982_s1, 8192 }
   0x5   :  { %s34_s25 = sshll.u32 %s11928_s24, 4  ;;  %p11743_p0 = scmp.ne.s32.totalorder %s14982_s1, %s11742_s28  ;;  %s35_s25 = int_to_ptr.vmem [resolvable:$true] %s34_s25 }
   0x6   :  { %p11746_p1 = scmp.lt.u32.totalorder %s11742_s28, %s14982_s1 }
   0x8   :  { %p11748_p2 = pnand %p11746_p1, %p11743_p0 }
   0xa   :  { %11751 = shalt.err (!%p11748_p2)
}
   0xb   :  { %s11752_s10 = scalar_lea.vmem %s35_s25, 8192  ;;  %p11757_p4 = scmp.lt.s32.totalorder %s35_s25, %s35_s25 }
   0xc   :  { %p11753_p3 = scmp.ne.s32.totalorder %s35_s25, %s11752_s10  ;;  %p11758_p5 = scmp.lt.s32.totalorder %s11752_s10, %s11752_s10 }
   0xe   :  { %p11759_p6 = por %p11758_p5, %p11757_p4 }
  0x10   :  { %p11760_p7 = pnand %p11759_p6, %p11753_p3 }
  0x12   :  { %11763 = shalt.err (!%p11760_p7)
}
  0x13   :  { %s11929_s11 = smov 512   ;;  %s11930_s12 = smov 32  }
  0x14   :  { %40 = dma.hbm_to_vmem [thread:$0]  %s14982_s1, 8192, %s35_s25, [#allocation6], %s11929_s11, %s11929_s11, %s11930_s12  }
  0x15   :  { %s11931_s15 = smov [#allocation8]   ;;  %s11932_s17 = smov [#allocation11]  }
  0x16   :  { %s56_s16 = sshll.u32 %s11931_s15, 4  ;;  %s78_s18 = sshll.u32 %s11932_s17, 4  ;;  %s57_s16 = int_to_ptr.vmem [resolvable:$true] %s56_s16  ;;  %s79_s18 = int_to_ptr.vmem [resolvable:$true] %s78_s18 }
  0x17   :  { %s11764_s21 = scalar_lea.hbm %s14984_s3, 65536 }
  0x18   :  { %p11765_p8 = scmp.ne.s32.totalorder %s14984_s3, %s11764_s21  ;;  %p11768_p9 = scmp.lt.u32.totalorder %s11764_s21, %s14984_s3 }
  0x1a   :  { %p11770_p10 = pnand %p11768_p9, %p11765_p8 }
  0x1c   :  { %11773 = shalt.err (!%p11770_p10)
}
  0x1d   :  { %s11774_s1 = scalar_lea.vmem %s57_s16, 65536  ;;  %p11779_p12 = scmp.lt.s32.totalorder %s57_s16, %s57_s16 }
  0x1e   :  { %p11775_p11 = scmp.ne.s32.totalorder %s57_s16, %s11774_s1  ;;  %p11780_p13 = scmp.lt.s32.totalorder %s11774_s1, %s11774_s1 }
  0x20   :  { %p11781_p0 = por %p11780_p13, %p11779_p12 }
  0x22   :  { %p11782_p1 = pnand %p11781_p0, %p11775_p11 }
  0x24   :  { %11785 = shalt.err (!%p11782_p1)
}
  0x25   :  { %62 = dma.hbm_to_vmem [thread:$0]  %s14984_s3, 65536, %s57_s16, [#allocation9], %s11929_s11, %s11929_s11, %s11930_s12  }
  0x26   :  { %s11786_s30 = scalar_lea.hbm %s14986_s5, 8192 }
  0x27   :  { %p11787_p2 = scmp.ne.s32.totalorder %s14986_s5, %s11786_s30  ;;  %p11790_p3 = scmp.lt.u32.totalorder %s11786_s30, %s14986_s5 }
  0x29   :  { %p11792_p4 = pnand %p11790_p3, %p11787_p2 }
  0x2b   :  { %11795 = shalt.err (!%p11792_p4)
}
  0x2c   :  { %s11796_s14 = scalar_lea.vmem %s79_s18, 8192  ;;  %p11801_p6 = scmp.lt.s32.totalorder %s79_s18, %s79_s18 }
  0x2d   :  { %p11797_p5 = scmp.ne.s32.totalorder %s79_s18, %s11796_s14  ;;  %p11802_p7 = scmp.lt.s32.totalorder %s11796_s14, %s11796_s14 }
  0x2f   :  { %p11803_p8 = por %p11802_p7, %p11801_p6 }
  0x31   :  { %p11804_p9 = pnand %p11803_p8, %p11797_p5 }
  0x33   :  { %11807 = shalt.err (!%p11804_p9)
}
  0x34   :  { %s11933_s3 = smov 64   ;;  %s11934_s11 = smov 4  }
  0x35   :  { %84 = dma.hbm_to_vmem [thread:$0]  %s14986_s5, 8192, %s79_s18, [#allocation12], %s11933_s3, %s11933_s3, %s11934_s11  }
  0x36   :  { %s11935_s16 = smov [#allocation2]   ;;  %s11808_s21 = scalar_lea.hbm %s14981_s0, 4096 }
  0x37   :  { %s22_s17 = sshll.u32 %s11935_s16, 4  ;;  %p11809_p10 = scmp.ne.s32.totalorder %s14981_s0, %s11808_s21  ;;  %s23_s17 = int_to_ptr.vmem [resolvable:$true] %s22_s17 }
  0x38   :  { %p11812_p11 = scmp.lt.u32.totalorder %s11808_s21, %s14981_s0 }
  0x3a   :  { %p11814_p12 = pnand %p11812_p11, %p11809_p10 }
  0x3c   :  { %11817 = shalt.err (!%p11814_p12)
}
  0x3d   :  { %s11818_s1 = scalar_lea.vmem %s23_s17, 4096  ;;  %p11823_p0 = scmp.lt.s32.totalorder %s23_s17, %s23_s17 }
  0x3e   :  { %p11819_p13 = scmp.ne.s32.totalorder %s23_s17, %s11818_s1  ;;  %p11824_p1 = scmp.lt.s32.totalorder %s11818_s1, %s11818_s1 }
  0x40   :  { %p11825_p2 = por %p11824_p1, %p11823_p0 }
  0x42   :  { %p11826_p3 = pnand %p11825_p2, %p11819_p13 }
  0x44   :  { %11829 = shalt.err (!%p11826_p3)
}
  0x45   :  { %s11936_s5 = smov 128   ;;  %s11937_s18 = smov 8  }
  0x46   :  { %28 = dma.hbm_to_vmem [thread:$0]  %s14981_s0, 4096, %s23_s17, [#allocation3], %s11936_s5, %s11936_s5, %s11937_s18  }
  0x47   :  { %s11938_s28 = smov [#allocation7]   ;;  %s11939_s30 = smov [#allocation10]  }
  0x48   :  { %s47_s29 = sshll.u32 %s11938_s28, 4  ;;  %s69_s8 = sshll.u32 %s11939_s30, 4  ;;  %s48_s29 = int_to_ptr.vmem [resolvable:$true] %s47_s29  ;;  %s70_s8 = int_to_ptr.vmem [resolvable:$true] %s69_s8 }
  0x49   :  { %s11830_s13 = scalar_lea.hbm %s14983_s2, 128 }
  0x4a   :  { %p11831_p4 = scmp.ne.s32.totalorder %s14983_s2, %s11830_s13  ;;  %p11834_p5 = scmp.lt.u32.totalorder %s11830_s13, %s14983_s2 }
  0x4c   :  { %p11836_p6 = pnand %p11834_p5, %p11831_p4 }
  0x4e   :  { %11839 = shalt.err (!%p11836_p6)
}
  0x4f   :  { %s11840_s0 = scalar_lea.vmem %s48_s29, 128  ;;  %p11845_p8 = scmp.lt.s32.totalorder %s48_s29, %s48_s29 }
  0x50   :  { %p11841_p7 = scmp.ne.s32.totalorder %s48_s29, %s11840_s0  ;;  %p11846_p9 = scmp.lt.s32.totalorder %s11840_s0, %s11840_s0 }
  0x52   :  { %p11847_p10 = por %p11846_p9, %p11845_p8 }
  0x54   :  { %p11848_p11 = pnand %p11847_p10, %p11841_p7 }
  0x56   :  { %11851 = shalt.err (!%p11848_p11)
}
  0x57   :  { %50 = dma.hbm_to_vmem [thread:$0]  %s14983_s2, 128, %s48_s29, [#allocation6]  }
  0x58   :  { %s11852_s20 = scalar_lea.hbm %s14985_s4, 128 }
  0x59   :  { %p11853_p12 = scmp.ne.s32.totalorder %s14985_s4, %s11852_s20  ;;  %p11856_p13 = scmp.lt.u32.totalorder %s11852_s20, %s14985_s4 }
  0x5b   :  { %p11858_p0 = pnand %p11856_p13, %p11853_p12 }
  0x5d   :  { %11861 = shalt.err (!%p11858_p0)
}
  0x5e   :  { %s11862_s26 = scalar_lea.vmem %s70_s8, 128  ;;  %p11867_p2 = scmp.lt.s32.totalorder %s70_s8, %s70_s8 }
  0x5f   :  { %p11863_p1 = scmp.ne.s32.totalorder %s70_s8, %s11862_s26  ;;  %p11868_p3 = scmp.lt.s32.totalorder %s11862_s26, %s11862_s26 }
  0x61   :  { %p11869_p4 = por %p11868_p3, %p11867_p2 }
  0x63   :  { %p11870_p5 = pnand %p11869_p4, %p11863_p1 }
  0x65   :  { %11873 = shalt.err (!%p11870_p5)
}
  0x66   :  { %72 = dma.hbm_to_vmem [thread:$0]  %s14985_s4, 128, %s70_s8, [#allocation9]  }
  0x67   :  { %s11940_s25 = smov [#allocation13]   ;;  %s11874_s30 = scalar_lea.hbm %s14987_s6, 16 }
  0x68   :  { %s91_s27 = sshll.u32 %s11940_s25, 4  ;;  %p11875_p6 = scmp.ne.s32.totalorder %s14987_s6, %s11874_s30  ;;  %s92_s27 = int_to_ptr.vmem [resolvable:$true] %s91_s27 }
  0x69   :  { %p11878_p7 = scmp.lt.u32.totalorder %s11874_s30, %s14987_s6 }
  0x6b   :  { %p11880_p8 = pnand %p11878_p7, %p11875_p6 }
  0x6d   :  { %11883 = shalt.err (!%p11880_p8)
}
  0x6e   :  { %s11884_s3 = scalar_lea.vmem %s92_s27, 16  ;;  %s11888_s4 = scalar_lea.vmem %s92_s27, 32 }
  0x6f   :  { %p11885_p9 = scmp.ne.s32.totalorder %s92_s27, %s11884_s3  ;;  %p11889_p10 = scmp.lt.s32.totalorder %s92_s27, %s92_s27 }
  0x70   :  { %p11890_p11 = scmp.lt.s32.totalorder %s11888_s4, %s11884_s3 }
  0x72   :  { %p11891_p12 = por %p11890_p11, %p11889_p10 }
  0x74   :  { %p11892_p13 = pnand %p11891_p12, %p11885_p9 }
  0x76   :  { %11895 = shalt.err (!%p11892_p13)
}
  0x77   :  { %94 = dma.hbm_to_vmem [thread:$0]  %s14987_s6, 16, %s92_s27, [#allocation12]  }
  0x78   :  { %11918 = dma.done.wait [#allocation3], 4096  }
  0x79   :  { %11919 = vsyncadd [#allocation3], 4294963200 }
  0x7a   :  { %11920 = dma.done.wait [#allocation6], 8320  }
  0x7b   :  { %11921 = vsyncadd [#allocation6], 4294958976 }
  0x7c   :  { %11922 = dma.done.wait [#allocation9], 65664  }
  0x7d   :  { %11923 = vsyncadd [#allocation9], 4294901632 }
  0x7e   :  { %11924 = dma.done.wait [#allocation12], 8208  }
  0x7f   :  { %11925 = vsyncadd [#allocation12], 4294959088  ;;  %v11941_v0 = vmov 0   ;;  %v165_v1 = vld [vmem:[#allocation5] sm:$0xff]  ;;  %v166_v3 = vld [vmem:[#allocation5 + $0x8] sm:$0xff]  ;;  %s11942_s6 = smov [#allocation14]  }
  0x80   :  { %623 = vmatprep.mubr.bf16.mxu0 %v11941_v0  ;;  %816 = vmatprep.mubr.bf16.mxu1 %v11941_v0  ;;  %v169_v2 = vld [vmem:[#allocation5 + $0x20] sm:$0xff]  ;;  %v170_v5 = vld [vmem:[#allocation5 + $0x28] sm:$0xff]  ;;  %v167_v63 = vld [vmem:[#allocation5 + $0x10] sm:$0xff]  ;;  %s9533_s12 = sshll.u32 %s11942_s6, 4  ;;  %s9534_s12 = int_to_ptr.vmem [resolvable:$true] %s9533_s12 }
  0x81   :  { %v9549_v4 = vcombine.high %v165_v1, %v169_v2  ;;  %v9548_v6 = vcombine.low %v165_v1, %v169_v2  ;;  %v173_v7 = vld [vmem:[#allocation5 + $0x40] sm:$0xff]  ;;  %v9551_v9 = vcombine.high %v166_v3, %v170_v5  ;;  %v9550_v10 = vcombine.low %v166_v3, %v170_v5  ;;  %v174_v12 = vld [vmem:[#allocation5 + $0x48] sm:$0xff]  ;;  %v171_v1 = vld [vmem:[#allocation5 + $0x30] sm:$0xff]  ;;  %s11896_s0 = scalar_lea.vmem %s9534_s12, 4096  ;;  %p11901_p1 = scmp.lt.s32.totalorder %s9534_s12, %s9534_s12 }
  0x82   :  { %v177_v8 = vld [vmem:[#allocation5 + $0x60] sm:$0xff]  ;;  %v178_v13 = vld [vmem:[#allocation5 + $0x68] sm:$0xff]  ;;  %v168_v2 = vld [vmem:[#allocation5 + $0x18] sm:$0xff]  ;;  %p11897_p0 = scmp.ne.s32.totalorder %s9534_s12, %s11896_s0  ;;  %p11902_p2 = scmp.lt.s32.totalorder %s11896_s0, %s11896_s0 }
  0x83   :  { %v9557_v11 = vcombine.high %v173_v7, %v177_v8  ;;  %v181_v14 = vld [vmem:[#allocation5 + $0x80] sm:$0xff]  ;;  %591 = vmatprep.subr.bf16.mxu0 %v9549_v4  ;;  %v9559_v15 = vcombine.high %v174_v12, %v178_v13  ;;  %v182_v17 = vld [vmem:[#allocation5 + $0x88] sm:$0xff]  ;;  %784 = vmatprep.subr.bf16.mxu1 %v9551_v9  ;;  %v9556_v19 = vcombine.low %v173_v7, %v177_v8  ;;  %v172_v3 = vld [vmem:[#allocation5 + $0x38] sm:$0xff] }
  0x84   :  { %v185_v16 = vld [vmem:[#allocation5 + $0xa0] sm:$0xff]  ;;  %v186_v18 = vld [vmem:[#allocation5 + $0xa8] sm:$0xff]  ;;  %592 = vmatpush1.bf16.msra.mxu0 %v9548_v6  ;;  %785 = vmatpush1.bf16.msra.mxu1 %v9550_v10  ;;  %v9558_v20 = vcombine.low %v174_v12, %v178_v13  ;;  %v9553_v8 = vcombine.high %v167_v63, %v171_v1  ;;  %v9555_v9 = vcombine.high %v168_v2, %v172_v3  ;;  %v175_v10 = vld [vmem:[#allocation5 + $0x50] sm:$0xff]  ;;  %p11903_p3 = por %p11902_p2, %p11901_p1 }
  0x85   :  { %593 = vmatprep.subr.bf16.mxu0 %v9557_v11  ;;  %v9565_v21 = vcombine.high %v181_v14, %v185_v16  ;;  %786 = vmatprep.subr.bf16.mxu1 %v9559_v15  ;;  %v9567_v22 = vcombine.high %v182_v17, %v186_v18  ;;  %v189_v23 = vld [vmem:[#allocation5 + $0xc0] sm:$0xff]  ;;  %v190_v25 = vld [vmem:[#allocation5 + $0xc8] sm:$0xff]  ;;  %v9564_v27 = vcombine.low %v181_v14, %v185_v16  ;;  %v179_v12 = vld [vmem:[#allocation5 + $0x70] sm:$0xff] }
  0x86   :  { %v193_v24 = vld [vmem:[#allocation5 + $0xe0] sm:$0xff]  ;;  %v194_v26 = vld [vmem:[#allocation5 + $0xe8] sm:$0xff]  ;;  %v9566_v28 = vcombine.low %v182_v17, %v186_v18  ;;  %v176_v13 = vld [vmem:[#allocation5 + $0x58] sm:$0xff]  ;;  %v9552_v15 = vcombine.low %v167_v63, %v171_v1  ;;  %v9554_v18 = vcombine.low %v168_v2, %v172_v3  ;;  %p11904_p4 = pnand %p11903_p3, %p11897_p0 }
  0x87   :  { %v9573_v29 = vcombine.high %v189_v23, %v193_v24  ;;  %v9575_v30 = vcombine.high %v190_v25, %v194_v26  ;;  %v197_v31 = vld [vmem:[#allocation5 + $0x100] sm:$0xff]  ;;  %v198_v33 = vld [vmem:[#allocation5 + $0x108] sm:$0xff]  ;;  %v9572_v35 = vcombine.low %v189_v23, %v193_v24  ;;  %v9574_v36 = vcombine.low %v190_v25, %v194_v26  ;;  %v180_v14 = vld [vmem:[#allocation5 + $0x78] sm:$0xff] }
  0x88   :  { %594 = vmatpush1.bf16.msra.mxu0 %v9556_v19  ;;  %787 = vmatpush1.bf16.msra.mxu1 %v9558_v20  ;;  %v201_v32 = vld [vmem:[#allocation5 + $0x120] sm:$0xff]  ;;  %v202_v34 = vld [vmem:[#allocation5 + $0x128] sm:$0xff]  ;;  %v183_v16 = vld [vmem:[#allocation5 + $0x90] sm:$0xff]  ;;  %v9561_v23 = vcombine.high %v175_v10, %v179_v12  ;;  %v9563_v24 = vcombine.high %v176_v13, %v180_v14  ;;  %v9560_v25 = vcombine.low %v175_v10, %v179_v12 }
  0x89   :  { %595 = vmatprep.subr.bf16.mxu0 %v9565_v21  ;;  %788 = vmatprep.subr.bf16.mxu1 %v9567_v22  ;;  %v9581_v37 = vcombine.high %v197_v31, %v201_v32  ;;  %v9583_v38 = vcombine.high %v198_v33, %v202_v34  ;;  %v205_v39 = vld [vmem:[#allocation5 + $0x140] sm:$0xff]  ;;  %v206_v41 = vld [vmem:[#allocation5 + $0x148] sm:$0xff]  ;;  %v9580_v43 = vcombine.low %v197_v31, %v201_v32  ;;  %v187_v17 = vld [vmem:[#allocation5 + $0xb0] sm:$0xff] }
  0x8a   :  { %v209_v40 = vld [vmem:[#allocation5 + $0x160] sm:$0xff]  ;;  %v210_v42 = vld [vmem:[#allocation5 + $0x168] sm:$0xff]  ;;  %v9582_v44 = vcombine.low %v198_v33, %v202_v34  ;;  %v184_v19 = vld [vmem:[#allocation5 + $0x98] sm:$0xff] }
  0x8b   :  { %v9589_v45 = vcombine.high %v205_v39, %v209_v40  ;;  %v9591_v46 = vcombine.high %v206_v41, %v210_v42  ;;  %v213_v47 = vld [vmem:[#allocation5 + $0x180] sm:$0xff]  ;;  %v214_v49 = vld [vmem:[#allocation5 + $0x188] sm:$0xff]  ;;  %v9588_v51 = vcombine.low %v205_v39, %v209_v40  ;;  %v9590_v52 = vcombine.low %v206_v41, %v210_v42  ;;  %v188_v20 = vld [vmem:[#allocation5 + $0xb8] sm:$0xff] }
  0x8c   :  { %596 = vmatpush1.bf16.msra.mxu0 %v9564_v27  ;;  %789 = vmatpush1.bf16.msra.mxu1 %v9566_v28  ;;  %v217_v48 = vld [vmem:[#allocation5 + $0x1a0] sm:$0xff]  ;;  %v218_v50 = vld [vmem:[#allocation5 + $0x1a8] sm:$0xff]  ;;  %v119_v21 = vld [vmem:[#allocation2 + $0x10] sm:$0xff]  ;;  %v9568_v40 = vcombine.low %v183_v16, %v187_v17 }
  0x8d   :  { %597 = vmatprep.subr.bf16.mxu0 %v9573_v29  ;;  %790 = vmatprep.subr.bf16.mxu1 %v9575_v30  ;;  %v9597_v53 = vcombine.high %v213_v47, %v217_v48  ;;  %v9599_v54 = vcombine.high %v214_v49, %v218_v50  ;;  %v221_v55 = vld [vmem:[#allocation5 + $0x1c0] sm:$0xff]  ;;  %v222_v57 = vld [vmem:[#allocation5 + $0x1c8] sm:$0xff]  ;;  %v9596_v59 = vcombine.low %v213_v47, %v217_v48  ;;  %v120_v22 = vld [vmem:[#allocation2 + $0x18] sm:$0xff] }
  0x8e   :  { %v225_v56 = vld [vmem:[#allocation5 + $0x1e0] sm:$0xff]  ;;  %v226_v58 = vld [vmem:[#allocation5 + $0x1e8] sm:$0xff]  ;;  %v9598_v60 = vcombine.low %v214_v49, %v218_v50  ;;  %v12080_v28 = vld [vmem:[#allocation8 + $0x8] sm:$0xff]  ;;  %v9562_v29 = vcombine.low %v176_v13, %v180_v14  ;;  %v9569_v30 = vcombine.high %v183_v16, %v187_v17  ;;  %v12090_v39 = vpack.c.bf16 %v120_v22, %v119_v21 }
  0x8f   :  { %v9605_v61 = vcombine.high %v221_v55, %v225_v56  ;;  %v9607_v62 = vcombine.high %v222_v57, %v226_v58  ;;  %v9604_v4 = vcombine.low %v221_v55, %v225_v56  ;;  %v117_v5 = vld [vmem:[#allocation2] sm:$0xff]  ;;  %v118_v6 = vld [vmem:[#allocation2 + $0x8] sm:$0xff]  ;;  %v9606_v7 = vcombine.low %v222_v57, %v226_v58  ;;  %v191_v31 = vld [vmem:[#allocation5 + $0xd0] sm:$0xff] }
  0x90   :  { %598 = vmatpush1.bf16.msra.mxu0 %v9572_v35  ;;  %791 = vmatpush1.bf16.msra.mxu1 %v9574_v36  ;;  %v12072_v11 = vpack.c.bf16 %v118_v6, %v117_v5  ;;  %v12076_v26 = vld [vmem:[#allocation8] sm:$0xff]  ;;  %v195_v32 = vld [vmem:[#allocation5 + $0xf0] sm:$0xff]  ;;  %v9571_v35 = vcombine.high %v184_v19, %v188_v20  ;;  %v192_v36 = vld [vmem:[#allocation5 + $0xd8] sm:$0xff] }
  0x91   :  { %599 = vmatprep.subr.bf16.mxu0 %v9581_v37  ;;  %792 = vmatprep.subr.bf16.mxu1 %v9583_v38  ;;  %v12078_v27 = vld [vmem:[#allocation8 + $0x20] sm:$0xff]  ;;  %v12085_v34 = vld [vmem:[#allocation8 + $0x28] sm:$0xff]  ;;  %v196_v37 = vld [vmem:[#allocation5 + $0xf8] sm:$0xff]  ;;  %v9576_v50 = vcombine.low %v191_v31, %v195_v32 }
  0x92   :  { %v9612_v33 = vcombine.low %v12076_v26, %v12078_v27  ;;  %v9614_v38 = vcombine.low %v12080_v28, %v12085_v34  ;;  %v199_v41 = vld [vmem:[#allocation5 + $0x110] sm:$0xff]  ;;  %v122_v47 = vld [vmem:[#allocation2 + $0x28] sm:$0xff]  ;;  %v200_v48 = vld [vmem:[#allocation5 + $0x118] sm:$0xff] }
  0x93   :  { %v203_v42 = vld [vmem:[#allocation5 + $0x130] sm:$0xff]  ;;  %v204_v49 = vld [vmem:[#allocation5 + $0x138] sm:$0xff]  ;;  %v126_v21 = vld [vmem:[#allocation2 + $0x48] sm:$0xff] }
  0x94   :  { %600 = vmatpush1.bf16.msra.mxu0 %v9580_v43  ;;  %793 = vmatpush1.bf16.msra.mxu1 %v9582_v44  ;;  %v121_v43 = vld [vmem:[#allocation2 + $0x20] sm:$0xff]  ;;  %v9570_v44 = vcombine.low %v184_v19, %v188_v20  ;;  %v208_v55 = vld [vmem:[#allocation5 + $0x158] sm:$0xff]  ;;  %v9587_v58 = vcombine.high %v200_v48, %v204_v49  ;;  %v9586_v63 = vcombine.low %v200_v48, %v204_v49 }
  0x95   :  { %601 = vmatprep.subr.bf16.mxu0 %v9589_v45  ;;  %794 = vmatprep.subr.bf16.mxu1 %v9591_v46  ;;  %v9577_v45 = vcombine.high %v191_v31, %v195_v32  ;;  %v9579_v46 = vcombine.high %v192_v36, %v196_v37  ;;  %v212_v56 = vld [vmem:[#allocation5 + $0x178] sm:$0xff]  ;;  %v12096_v57 = vpack.c.bf16 %v122_v47, %v121_v43  ;;  %v125_v20 = vld [vmem:[#allocation2 + $0x40] sm:$0xff] }
  0x96   :  { %v9595_v2 = vcombine.high %v208_v55, %v212_v56  ;;  %v124_v3 = vld [vmem:[#allocation2 + $0x38] sm:$0xff]  ;;  %v133_v43 = vld [vmem:[#allocation2 + $0x80] sm:$0xff] }
  0x97   :  { %v220_v5 = vld [vmem:[#allocation5 + $0x1b8] sm:$0xff]  ;;  %v137_v49 = vld [vmem:[#allocation2 + $0xa0] sm:$0xff] }
  0x98   :  { %602 = vmatpush1.bf16.msra.mxu0 %v9588_v51  ;;  %795 = vmatpush1.bf16.msra.mxu1 %v9590_v52  ;;  %v207_v51 = vld [vmem:[#allocation5 + $0x150] sm:$0xff]  ;;  %v224_v12 = vld [vmem:[#allocation5 + $0x1d8] sm:$0xff] }
  0x99   :  { %603 = vmatprep.subr.bf16.mxu0 %v9597_v53  ;;  %796 = vmatprep.subr.bf16.mxu1 %v9599_v54  ;;  %v211_v52 = vld [vmem:[#allocation5 + $0x170] sm:$0xff]  ;;  %v9578_v53 = vcombine.low %v192_v36, %v196_v37  ;;  %v9585_v54 = vcombine.high %v199_v41, %v203_v42  ;;  %v228_v13 = vld [vmem:[#allocation5 + $0x1f8] sm:$0xff]  ;;  %v130_v36 = vld [vmem:[#allocation2 + $0x68] sm:$0xff] }
  0x9a   :  { %v9593_v1 = vcombine.high %v207_v51, %v211_v52  ;;  %v9592_v6 = vcombine.low %v207_v51, %v211_v52  ;;  %v9611_v19 = vcombine.high %v224_v12, %v228_v13  ;;  %v128_v31 = vld [vmem:[#allocation2 + $0x58] sm:$0xff]  ;;  %v139_v52 = vld [vmem:[#allocation2 + $0xb0] sm:$0xff] }
  0x9b   :  { %v136_v47 = vld [vmem:[#allocation2 + $0x98] sm:$0xff] }
  0x9c   :  { %604 = vmatpush1.bf16.msra.mxu0 %v9596_v59  ;;  %797 = vmatpush1.bf16.msra.mxu1 %v9598_v60  ;;  %v9584_v59 = vcombine.low %v199_v41, %v203_v42  ;;  %v215_v60 = vld [vmem:[#allocation5 + $0x190] sm:$0xff]  ;;  %v132_v41 = vld [vmem:[#allocation2 + $0x78] sm:$0xff] }
  0x9d   :  { %605 = vmatprep.subr.bf16.mxu0 %v9605_v61  ;;  %798 = vmatprep.subr.bf16.mxu1 %v9607_v62  ;;  %v219_v61 = vld [vmem:[#allocation5 + $0x1b0] sm:$0xff] }
  0x9e   :  { %v123_v62 = vld [vmem:[#allocation2 + $0x30] sm:$0xff]  ;;  %v9601_v10 = vcombine.high %v215_v60, %v219_v61  ;;  %v9600_v16 = vcombine.low %v215_v60, %v219_v61  ;;  %v144_v60 = vld [vmem:[#allocation2 + $0xd8] sm:$0xff] }
  0x9f   :  { %v12102_v14 = vpack.c.bf16 %v124_v3, %v123_v62  ;;  %v145_v62 = vld [vmem:[#allocation2 + $0xe0] sm:$0xff]  ;;  %v148_v3 = vld [vmem:[#allocation2 + $0xf8] sm:$0xff] }
  0xa0   :  { %606 = vmatpush1.bf16.msra.mxu0 %v9604_v4  ;;  %799 = vmatpush1.bf16.msra.mxu1 %v9606_v7  ;;  %v216_v4 = vld [vmem:[#allocation5 + $0x198] sm:$0xff]  ;;  %v223_v7 = vld [vmem:[#allocation5 + $0x1d0] sm:$0xff] }
  0xa1   :  { %977 = vmatprep.subr.bf16.mxu0 %v9553_v8  ;;  %1170 = vmatprep.subr.bf16.mxu1 %v9555_v9  ;;  %v227_v8 = vld [vmem:[#allocation5 + $0x1f0] sm:$0xff]  ;;  %v9594_v9 = vcombine.low %v208_v55, %v212_v56  ;;  %v9602_v17 = vcombine.low %v216_v4, %v220_v5  ;;  %v141_v55 = vld [vmem:[#allocation2 + $0xc0] sm:$0xff]  ;;  %v142_v56 = vld [vmem:[#allocation2 + $0xc8] sm:$0xff] }
  0xa2   :  { %v9608_v22 = vcombine.low %v223_v7, %v227_v8 }
  0xa3   :  { %624 = vmatmul.mubr.bf16.vlgmr.msra.gmra.mrb[0].mxu0 %v12072_v11  ;;  %817 = vmatmul.mubr.bf16.vlgmr.msra.gmra.mrb[0].mxu1 %v12072_v11 }
  0xa4   :  { %978 = vmatpush1.bf16.msra.mxu0 %v9552_v15  ;;  %1171 = vmatpush1.bf16.msra.mxu1 %v9554_v18  ;;  %v9603_v15 = vcombine.high %v216_v4, %v220_v5  ;;  %v9609_v18 = vcombine.high %v223_v7, %v227_v8  ;;  %v1755_v5 = vld [vmem:[#allocation8 + $0x40] sm:$0xff]  ;;  %v1756_v7 = vld [vmem:[#allocation8 + $0x48] sm:$0xff] }
  0xa5   :  { %633 = vmatprep.mubr.bf16.mxu0 %v11941_v0  ;;  %826 = vmatprep.mubr.bf16.mxu1 %v11941_v0  ;;  %v1760_v8 = vld [vmem:[#allocation8 + $0x68] sm:$0xff] }
  0xa6   :  { %979 = vmatprep.subr.bf16.mxu0 %v9561_v23  ;;  %1172 = vmatprep.subr.bf16.mxu1 %v9563_v24  ;;  %v9610_v23 = vcombine.low %v224_v12, %v228_v13  ;;  %v9613_v24 = vcombine.high %v12076_v26, %v12078_v27  ;;  %v1767_v12 = vld [vmem:[#allocation8 + $0xa0] sm:$0xff]  ;;  %v9623_v13 = vcombine.high %v1756_v7, %v1760_v8  ;;  %v12198_v27 = vld [vmem:[#allocation8 + $0x408] sm:$0xff] }
  0xa7   :  { %v12196_v26 = vld [vmem:[#allocation8 + $0x420] sm:$0xff] }
  0xa8   :  { %980 = vmatpush1.bf16.msra.mxu0 %v9560_v25  ;;  %1173 = vmatpush1.bf16.msra.mxu1 %v9562_v29  ;;  %v12110_v25 = vpack.c.bf16 %v126_v21, %v125_v20  ;;  %v9615_v29 = vcombine.high %v12080_v28, %v12085_v34  ;;  %v1771_v21 = vld [vmem:[#allocation8 + $0xc0] sm:$0xff]  ;;  %v1772_v28 = vld [vmem:[#allocation8 + $0xc8] sm:$0xff] }
  0xa9   :  { %981 = vmatprep.subr.bf16.mxu0 %v9569_v30  ;;  %1174 = vmatprep.subr.bf16.mxu1 %v9571_v35  ;;  %v127_v30 = vld [vmem:[#allocation2 + $0x50] sm:$0xff]  ;;  %v129_v35 = vld [vmem:[#allocation2 + $0x60] sm:$0xff] }
  0xaa   :  { %v12118_v32 = vpack.c.bf16 %v128_v31, %v127_v30  ;;  %v12124_v37 = vpack.c.bf16 %v130_v36, %v129_v35  ;;  %v1779_v35 = vld [vmem:[#allocation8 + $0x100] sm:$0xff] }
  0xab   :  { %634 = vmatmul.mubr.bf16.gmra.mrb[4].mxu0 %v12090_v39  ;;  %827 = vmatmul.mubr.bf16.gmra.mrb[4].mxu1 %v12090_v39  ;;  %v1783_v36 = vld [vmem:[#allocation8 + $0x120] sm:$0xff] }
  0xac   :  { %643 = vmatprep.mubr.bf16.mxu0 %v11941_v0  ;;  %836 = vmatprep.mubr.bf16.mxu1 %v11941_v0 }
  0xad   :  { %982 = vmatpush1.bf16.msra.mxu0 %v9568_v40  ;;  %1175 = vmatpush1.bf16.msra.mxu1 %v9570_v44  ;;  %v131_v40 = vld [vmem:[#allocation2 + $0x70] sm:$0xff]  ;;  %v134_v44 = vld [vmem:[#allocation2 + $0x88] sm:$0xff] }
  0xae   :  { %983 = vmatprep.subr.bf16.mxu0 %v9577_v45  ;;  %1176 = vmatprep.subr.bf16.mxu1 %v9579_v46  ;;  %v12130_v42 = vpack.c.bf16 %v132_v41, %v131_v40  ;;  %v12136_v45 = vpack.c.bf16 %v134_v44, %v133_v43  ;;  %v135_v46 = vld [vmem:[#allocation2 + $0x90] sm:$0xff] }
  0xaf   :  { %v12142_v48 = vpack.c.bf16 %v136_v47, %v135_v46  ;;  %v1780_v40 = vld [vmem:[#allocation8 + $0x108] sm:$0xff]  ;;  %v9645_v46 = vcombine.high %v1779_v35, %v1783_v36 }
  0xb0   :  { %v1784_v41 = vld [vmem:[#allocation8 + $0x128] sm:$0xff] }
  0xb1   :  { %984 = vmatpush1.bf16.msra.mxu0 %v9576_v50  ;;  %1177 = vmatpush1.bf16.msra.mxu1 %v9578_v53  ;;  %v138_v50 = vld [vmem:[#allocation2 + $0xa8] sm:$0xff]  ;;  %v140_v53 = vld [vmem:[#allocation2 + $0xb8] sm:$0xff]  ;;  %v9647_v47 = vcombine.high %v1780_v40, %v1784_v41 }
  0xb2   :  { %985 = vmatprep.subr.bf16.mxu0 %v9585_v54  ;;  %1178 = vmatprep.subr.bf16.mxu1 %v9587_v58  ;;  %v12148_v51 = vpack.c.bf16 %v138_v50, %v137_v49  ;;  %v12154_v54 = vpack.c.bf16 %v140_v53, %v139_v52  ;;  %v12160_v58 = vpack.c.bf16 %v142_v56, %v141_v55  ;;  %v1787_v49 = vld [vmem:[#allocation8 + $0x140] sm:$0xff]  ;;  %v1788_v52 = vld [vmem:[#allocation8 + $0x148] sm:$0xff] }
  0xb3   :  { %644 = vmatmul.mubr.bf16.gmra.mrb[8].mxu0 %v12096_v57  ;;  %837 = vmatmul.mubr.bf16.gmra.mrb[8].mxu1 %v12096_v57  ;;  %v1791_v50 = vld [vmem:[#allocation8 + $0x160] sm:$0xff]  ;;  %v1792_v53 = vld [vmem:[#allocation8 + $0x168] sm:$0xff]  ;;  %v9646_v55 = vcombine.low %v1780_v40, %v1784_v41 }
  0xb4   :  { %653 = vmatprep.mubr.bf16.mxu0 %v11941_v0  ;;  %846 = vmatprep.mubr.bf16.mxu1 %v11941_v0  ;;  %v9653_v56 = vcombine.high %v1787_v49, %v1791_v50  ;;  %v1827_v41 = vld [vmem:[#allocation8 + $0x280] sm:$0xff] }
  0xb5   :  { %986 = vmatpush1.bf16.msra.mxu0 %v9584_v59  ;;  %1179 = vmatpush1.bf16.msra.mxu1 %v9586_v63  ;;  %v143_v59 = vld [vmem:[#allocation2 + $0xd0] sm:$0xff]  ;;  %v146_v63 = vld [vmem:[#allocation2 + $0xe8] sm:$0xff] }
  0xb6   :  { %987 = vmatprep.subr.bf16.mxu0 %v9593_v1  ;;  %1180 = vmatprep.subr.bf16.mxu1 %v9595_v2  ;;  %v12166_v61 = vpack.c.bf16 %v144_v60, %v143_v59  ;;  %v12172_v1 = vpack.c.bf16 %v146_v63, %v145_v62  ;;  %v147_v2 = vld [vmem:[#allocation2 + $0xf0] sm:$0xff]  ;;  %v9655_v59 = vcombine.high %v1788_v52, %v1792_v53  ;;  %v1795_v60 = vld [vmem:[#allocation8 + $0x180] sm:$0xff] }
  0xb7   :  { %v12178_v4 = vpack.c.bf16 %v148_v3, %v147_v2  ;;  %v1799_v62 = vld [vmem:[#allocation8 + $0x1a0] sm:$0xff]  ;;  %v1796_v63 = vld [vmem:[#allocation8 + $0x188] sm:$0xff]  ;;  %v9652_v3 = vcombine.low %v1787_v49, %v1791_v50 }
  0xb8   :  { %v1800_v2 = vld [vmem:[#allocation8 + $0x1a8] sm:$0xff] }
  0xb9   :  { %988 = vmatpush1.bf16.msra.mxu0 %v9592_v6  ;;  %1181 = vmatpush1.bf16.msra.mxu1 %v9594_v9  ;;  %v1759_v6 = vld [vmem:[#allocation8 + $0x60] sm:$0xff] }
  0xba   :  { %989 = vmatprep.subr.bf16.mxu0 %v9601_v10  ;;  %1182 = vmatprep.subr.bf16.mxu1 %v9603_v15  ;;  %v9621_v9 = vcombine.high %v1755_v5, %v1759_v6  ;;  %v1763_v10 = vld [vmem:[#allocation8 + $0x80] sm:$0xff]  ;;  %v1764_v15 = vld [vmem:[#allocation8 + $0x88] sm:$0xff] }
  0xbb   :  { %654 = vmatmul.mubr.bf16.gmra.mrb[12].mxu0 %v12102_v14  ;;  %847 = vmatmul.mubr.bf16.gmra.mrb[12].mxu1 %v12102_v14 }
  0xbc   :  { %663 = vmatprep.mubr.bf16.mxu0 %v11941_v0  ;;  %856 = vmatprep.mubr.bf16.mxu1 %v11941_v0 }
  0xbd   :  { %990 = vmatpush1.bf16.msra.mxu0 %v9600_v16  ;;  %1183 = vmatpush1.bf16.msra.mxu1 %v9602_v17  ;;  %v1768_v16 = vld [vmem:[#allocation8 + $0xa8] sm:$0xff]  ;;  %v9620_v17 = vcombine.low %v1755_v5, %v1759_v6  ;;  %v9654_v5 = vcombine.low %v1788_v52, %v1792_v53  ;;  %v9661_v6 = vcombine.high %v1795_v60, %v1799_v62  ;;  %v1835_v53 = vld [vmem:[#allocation8 + $0x2c0] sm:$0xff] }
  0xbe   :  { %991 = vmatprep.subr.bf16.mxu0 %v9609_v18  ;;  %1184 = vmatprep.subr.bf16.mxu1 %v9611_v19  ;;  %v9622_v18 = vcombine.low %v1756_v7, %v1760_v8  ;;  %v9629_v19 = vcombine.high %v1763_v10, %v1767_v12  ;;  %v9631_v20 = vcombine.high %v1764_v15, %v1768_v16  ;;  %v1803_v8 = vld [vmem:[#allocation8 + $0x1c0] sm:$0xff] }
  0xbf   :  { %v9663_v7 = vcombine.high %v1796_v63, %v1800_v2 }
  0xc1   :  { %992 = vmatpush1.bf16.msra.mxu0 %v9608_v22  ;;  %1185 = vmatpush1.bf16.msra.mxu1 %v9610_v23  ;;  %v1775_v22 = vld [vmem:[#allocation8 + $0xe0] sm:$0xff]  ;;  %v9628_v23 = vcombine.low %v1763_v10, %v1767_v12  ;;  %v1804_v10 = vld [vmem:[#allocation8 + $0x1c8] sm:$0xff] }
  0xc2   :  { %4861 = vmatprep.subr.bf16.mxu0 %v9613_v24  ;;  %5633 = vmatprep.subr.bf16.mxu1 %v9615_v29  ;;  %v9630_v29 = vcombine.low %v1764_v15, %v1768_v16  ;;  %v9637_v30 = vcombine.high %v1771_v21, %v1775_v22  ;;  %v9636_v43 = vcombine.low %v1771_v21, %v1775_v22  ;;  %v1808_v12 = vld [vmem:[#allocation8 + $0x1e8] sm:$0xff] }
  0xc3   :  { %664 = vmatmul.mubr.bf16.gmra.mrb[16].mxu0 %v12110_v25  ;;  %857 = vmatmul.mubr.bf16.gmra.mrb[16].mxu1 %v12110_v25  ;;  %v9671_v16 = vcombine.high %v1804_v10, %v1808_v12  ;;  %v9670_v22 = vcombine.low %v1804_v10, %v1808_v12  ;;  %v1851_v10 = vld [vmem:[#allocation8 + $0x340] sm:$0xff] }
  0xc4   :  { %673 = vmatprep.mubr.bf16.mxu0 %v11941_v0  ;;  %866 = vmatprep.mubr.bf16.mxu1 %v11941_v0  ;;  %v1855_v12 = vld [vmem:[#allocation8 + $0x360] sm:$0xff] }
  0xcb   :  { %674 = vmatmul.mubr.bf16.gmra.mrb[20].mxu0 %v12118_v32  ;;  %867 = vmatmul.mubr.bf16.gmra.mrb[20].mxu1 %v12118_v32 }
  0xcc   :  { %683 = vmatprep.mubr.bf16.mxu0 %v11941_v0  ;;  %876 = vmatprep.mubr.bf16.mxu1 %v11941_v0 }
  0xd3   :  { %684 = vmatmul.mubr.bf16.gmra.mrb[24].mxu0 %v12124_v37  ;;  %877 = vmatmul.mubr.bf16.gmra.mrb[24].mxu1 %v12124_v37 }
  0xd4   :  { %693 = vmatprep.mubr.bf16.mxu0 %v11941_v0  ;;  %886 = vmatprep.mubr.bf16.mxu1 %v11941_v0 }
  0xdb   :  { %694 = vmatmul.mubr.bf16.gmra.mrb[28].mxu0 %v12130_v42  ;;  %887 = vmatmul.mubr.bf16.gmra.mrb[28].mxu1 %v12130_v42 }
  0xdc   :  { %703 = vmatprep.mubr.bf16.mxu0 %v11941_v0  ;;  %896 = vmatprep.mubr.bf16.mxu1 %v11941_v0 }
  0xe3   :  { %704 = vmatmul.mubr.bf16.gmra.mrb[32].mxu0 %v12136_v45  ;;  %897 = vmatmul.mubr.bf16.gmra.mrb[32].mxu1 %v12136_v45 }
  0xe4   :  { %713 = vmatprep.mubr.bf16.mxu0 %v11941_v0  ;;  %906 = vmatprep.mubr.bf16.mxu1 %v11941_v0 }
  0xeb   :  { %714 = vmatmul.mubr.bf16.gmra.mrb[36].mxu0 %v12142_v48  ;;  %907 = vmatmul.mubr.bf16.gmra.mrb[36].mxu1 %v12142_v48 }
  0xec   :  { %723 = vmatprep.mubr.bf16.mxu0 %v11941_v0  ;;  %916 = vmatprep.mubr.bf16.mxu1 %v11941_v0 }
  0xf3   :  { %724 = vmatmul.mubr.bf16.gmra.mrb[40].mxu0 %v12148_v51  ;;  %917 = vmatmul.mubr.bf16.gmra.mrb[40].mxu1 %v12148_v51 }
  0xf4   :  { %733 = vmatprep.mubr.bf16.mxu0 %v11941_v0  ;;  %926 = vmatprep.mubr.bf16.mxu1 %v11941_v0 }
  0xfb   :  { %734 = vmatmul.mubr.bf16.gmra.mrb[44].mxu0 %v12154_v54  ;;  %927 = vmatmul.mubr.bf16.gmra.mrb[44].mxu1 %v12154_v54 }
  0xfc   :  { %743 = vmatprep.mubr.bf16.mxu0 %v11941_v0  ;;  %936 = vmatprep.mubr.bf16.mxu1 %v11941_v0 }
 0x103   :  { %744 = vmatmul.mubr.bf16.gmra.mrb[48].mxu0 %v12160_v58  ;;  %937 = vmatmul.mubr.bf16.gmra.mrb[48].mxu1 %v12160_v58 }
 0x104   :  { %753 = vmatprep.mubr.bf16.mxu0 %v11941_v0  ;;  %946 = vmatprep.mubr.bf16.mxu1 %v11941_v0 }
 0x10b   :  { %754 = vmatmul.mubr.bf16.gmra.mrb[52].mxu0 %v12166_v61  ;;  %947 = vmatmul.mubr.bf16.gmra.mrb[52].mxu1 %v12166_v61 }
 0x10c   :  { %763 = vmatprep.mubr.bf16.mxu0 %v11941_v0  ;;  %956 = vmatprep.mubr.bf16.mxu1 %v11941_v0 }
 0x113   :  { %764 = vmatmul.mubr.bf16.gmra.mrb[56].mxu0 %v12172_v1  ;;  %957 = vmatmul.mubr.bf16.gmra.mrb[56].mxu1 %v12172_v1 }
 0x114   :  { %773 = vmatprep.mubr.bf16.mxu0 %v11941_v0  ;;  %966 = vmatprep.mubr.bf16.mxu1 %v11941_v0 }
 0x11b   :  { %774 = vmatmul.mubr.bf16.gmra.mrb[60].mxu0 %v12178_v4  ;;  %967 = vmatmul.mubr.bf16.gmra.mrb[60].mxu1 %v12178_v4 }
 0x11c   :  { %1009 = vmatprep.mubr.bf16.mxu0 %v11941_v0  ;;  %1202 = vmatprep.mubr.bf16.mxu1 %v11941_v0 }
 0x123   :  { %1010 = vmatmul.mubr.bf16.vlgmr.msra.gmra.mrb[64].mxu0 %v12072_v11  ;;  %1203 = vmatmul.mubr.bf16.vlgmr.msra.gmra.mrb[64].mxu1 %v12072_v11  ;;  %v12194_v11 = vld [vmem:[#allocation8 + $0x400] sm:$0xff] }
 0x124   :  { %4862 = vmatpush1.bf16.msra.mxu0 %v9612_v33  ;;  %5634 = vmatpush1.bf16.msra.mxu1 %v9614_v38  ;;  %v1776_v33 = vld [vmem:[#allocation8 + $0xe8] sm:$0xff]  ;;  %v9740_v34 = vcombine.low %v12194_v11, %v12196_v26 }
 0x125   :  { %1019 = vmatprep.mubr.bf16.mxu0 %v11941_v0  ;;  %1212 = vmatprep.mubr.bf16.mxu1 %v11941_v0  ;;  %v12202_v38 = vld [vmem:[#allocation8 + $0x428] sm:$0xff]  ;;  %v9639_v31 = vcombine.high %v1772_v28, %v1776_v33  ;;  %v9638_v44 = vcombine.low %v1772_v28, %v1776_v33 }
 0x126   :  { %4863 = vmatprep.subr.bf16.mxu0 %v9621_v9  ;;  %5635 = vmatprep.subr.bf16.mxu1 %v9623_v13  ;;  %v9742_v24 = vcombine.low %v12198_v27, %v12202_v38  ;;  %v1807_v9 = vld [vmem:[#allocation8 + $0x1e0] sm:$0xff]  ;;  %v9662_v13 = vcombine.low %v1796_v63, %v1800_v2 }
 0x127   :  { %v9669_v15 = vcombine.high %v1803_v8, %v1807_v9  ;;  %v9668_v21 = vcombine.low %v1803_v8, %v1807_v9  ;;  %v1843_v63 = vld [vmem:[#allocation8 + $0x300] sm:$0xff] }
 0x128   :  { %4864 = vmatpush1.bf16.msra.mxu0 %v9620_v17  ;;  %5636 = vmatpush1.bf16.msra.mxu1 %v9622_v18  ;;  %v1811_v17 = vld [vmem:[#allocation8 + $0x200] sm:$0xff] }
 0x129   :  { %4865 = vmatprep.subr.bf16.mxu0 %v9629_v19  ;;  %5637 = vmatprep.subr.bf16.mxu1 %v9631_v20  ;;  %v1815_v18 = vld [vmem:[#allocation8 + $0x220] sm:$0xff]  ;;  %v1812_v19 = vld [vmem:[#allocation8 + $0x208] sm:$0xff] }
 0x12a   :  { %v1816_v20 = vld [vmem:[#allocation8 + $0x228] sm:$0xff]  ;;  %v9677_v28 = vcombine.high %v1811_v17, %v1815_v18  ;;  %v1847_v2 = vld [vmem:[#allocation8 + $0x320] sm:$0xff] }
 0x12b   :  { %1020 = vmatmul.mubr.bf16.gmra.mrb[68].mxu0 %v12090_v39  ;;  %1213 = vmatmul.mubr.bf16.gmra.mrb[68].mxu1 %v12090_v39  ;;  %v9644_v39 = vcombine.low %v1779_v35, %v1783_v36  ;;  %v9679_v33 = vcombine.high %v1812_v19, %v1816_v20  ;;  %v9678_v35 = vcombine.low %v1812_v19, %v1816_v20  ;;  %v1863_v19 = vld [vmem:[#allocation8 + $0x3a0] sm:$0xff]  ;;  %v1860_v20 = vld [vmem:[#allocation8 + $0x388] sm:$0xff] }
 0x12c   :  { %1029 = vmatprep.mubr.bf16.mxu0 %v11941_v0  ;;  %1222 = vmatprep.mubr.bf16.mxu1 %v11941_v0  ;;  %v9709_v8 = vcombine.high %v1843_v63, %v1847_v2 }
 0x12d   :  { %4866 = vmatpush1.bf16.msra.mxu0 %v9628_v23  ;;  %5638 = vmatpush1.bf16.msra.mxu1 %v9630_v29  ;;  %v1819_v23 = vld [vmem:[#allocation8 + $0x240] sm:$0xff] }
 0x12e   :  { %4867 = vmatprep.subr.bf16.mxu0 %v9637_v30  ;;  %5639 = vmatprep.subr.bf16.mxu1 %v9639_v31  ;;  %v1823_v29 = vld [vmem:[#allocation8 + $0x260] sm:$0xff]  ;;  %v1820_v30 = vld [vmem:[#allocation8 + $0x248] sm:$0xff] }
 0x12f   :  { %v1824_v31 = vld [vmem:[#allocation8 + $0x268] sm:$0xff]  ;;  %v9685_v36 = vcombine.high %v1819_v23, %v1823_v29 }
 0x130   :  { %v9687_v40 = vcombine.high %v1820_v30, %v1824_v31  ;;  %v9686_v49 = vcombine.low %v1820_v30, %v1824_v31  ;;  %v1871_v30 = vld [vmem:[#allocation8 + $0x3e0] sm:$0xff]  ;;  %v1868_v31 = vld [vmem:[#allocation8 + $0x3c8] sm:$0xff] }
 0x131   :  { %4868 = vmatpush1.bf16.msra.mxu0 %v9636_v43  ;;  %5640 = vmatpush1.bf16.msra.mxu1 %v9638_v44  ;;  %v1831_v43 = vld [vmem:[#allocation8 + $0x2a0] sm:$0xff]  ;;  %v1828_v44 = vld [vmem:[#allocation8 + $0x288] sm:$0xff] }
 0x132   :  { %4869 = vmatprep.subr.bf16.mxu0 %v9645_v46  ;;  %5641 = vmatprep.subr.bf16.mxu1 %v9647_v47  ;;  %v1832_v46 = vld [vmem:[#allocation8 + $0x2a8] sm:$0xff]  ;;  %v9684_v47 = vcombine.low %v1819_v23, %v1823_v29  ;;  %v9693_v50 = vcombine.high %v1827_v41, %v1831_v43  ;;  %v1867_v29 = vld [vmem:[#allocation8 + $0x3c0] sm:$0xff] }
 0x133   :  { %1030 = vmatmul.mubr.bf16.gmra.mrb[72].mxu0 %v12096_v57  ;;  %1223 = vmatmul.mubr.bf16.gmra.mrb[72].mxu1 %v12096_v57  ;;  %v9660_v57 = vcombine.low %v1795_v60, %v1799_v62  ;;  %v9695_v52 = vcombine.high %v1828_v44, %v1832_v46 }
 0x134   :  { %1039 = vmatprep.mubr.bf16.mxu0 %v11941_v0  ;;  %1232 = vmatprep.mubr.bf16.mxu1 %v11941_v0 }
 0x135   :  { %4870 = vmatpush1.bf16.msra.mxu0 %v9644_v39  ;;  %5642 = vmatpush1.bf16.msra.mxu1 %v9646_v55  ;;  %v1839_v39 = vld [vmem:[#allocation8 + $0x2e0] sm:$0xff]  ;;  %v1836_v55 = vld [vmem:[#allocation8 + $0x2c8] sm:$0xff] }
 0x136   :  { %4871 = vmatprep.subr.bf16.mxu0 %v9653_v56  ;;  %5643 = vmatprep.subr.bf16.mxu1 %v9655_v59  ;;  %v1840_v56 = vld [vmem:[#allocation8 + $0x2e8] sm:$0xff]  ;;  %v9694_v59 = vcombine.low %v1828_v44, %v1832_v46  ;;  %v9701_v60 = vcombine.high %v1835_v53, %v1839_v39  ;;  %v9741_v44 = vcombine.high %v12194_v11, %v12196_v26  ;;  %v12424_v26 = vld [vmem:[#allocation8 + $0x4e0] sm:$0xff] }
 0x137   :  { %v9703_v62 = vcombine.high %v1836_v55, %v1840_v56  ;;  %v9743_v46 = vcombine.high %v12198_v27, %v12202_v38 }
 0x139   :  { %4872 = vmatpush1.bf16.msra.mxu0 %v9652_v3  ;;  %5644 = vmatpush1.bf16.msra.mxu1 %v9654_v5  ;;  %v1844_v3 = vld [vmem:[#allocation8 + $0x308] sm:$0xff] }
 0x13a   :  { %4873 = vmatprep.subr.bf16.mxu0 %v9661_v6  ;;  %5645 = vmatprep.subr.bf16.mxu1 %v9663_v7  ;;  %v1848_v5 = vld [vmem:[#allocation8 + $0x328] sm:$0xff]  ;;  %v9700_v6 = vcombine.low %v1835_v53, %v1839_v39  ;;  %v9702_v7 = vcombine.low %v1836_v55, %v1840_v56 }
 0x13b   :  { %1040 = vmatmul.mubr.bf16.gmra.mrb[76].mxu0 %v12102_v14  ;;  %1233 = vmatmul.mubr.bf16.gmra.mrb[76].mxu1 %v12102_v14  ;;  %v9676_v14 = vcombine.low %v1811_v17, %v1815_v18  ;;  %v9711_v9 = vcombine.high %v1844_v3, %v1848_v5  ;;  %v1859_v18 = vld [vmem:[#allocation8 + $0x380] sm:$0xff] }
 0x13c   :  { %1049 = vmatprep.mubr.bf16.mxu0 %v11941_v0  ;;  %1242 = vmatprep.mubr.bf16.mxu1 %v11941_v0 }
 0x13d   :  { %4874 = vmatpush1.bf16.msra.mxu0 %v9660_v57  ;;  %5646 = vmatpush1.bf16.msra.mxu1 %v9662_v13  ;;  %v1852_v57 = vld [vmem:[#allocation8 + $0x348] sm:$0xff] }
 0x13e   :  { %4875 = vmatprep.subr.bf16.mxu0 %v9669_v15  ;;  %5647 = vmatprep.subr.bf16.mxu1 %v9671_v16  ;;  %v1856_v13 = vld [vmem:[#allocation8 + $0x368] sm:$0xff]  ;;  %v9710_v15 = vcombine.low %v1844_v3, %v1848_v5  ;;  %v9717_v16 = vcombine.high %v1851_v10, %v1855_v12 }
 0x13f   :  { %v9719_v17 = vcombine.high %v1852_v57, %v1856_v13 }
 0x141   :  { %4876 = vmatpush1.bf16.msra.mxu0 %v9668_v21  ;;  %5648 = vmatpush1.bf16.msra.mxu1 %v9670_v22  ;;  %v1864_v21 = vld [vmem:[#allocation8 + $0x3a8] sm:$0xff]  ;;  %v9716_v22 = vcombine.low %v1851_v10, %v1855_v12 }
 0x142   :  { %4877 = vmatprep.subr.bf16.mxu0 %v9677_v28  ;;  %5649 = vmatprep.subr.bf16.mxu1 %v9679_v33  ;;  %v9718_v28 = vcombine.low %v1852_v57, %v1856_v13  ;;  %v9725_v33 = vcombine.high %v1859_v18, %v1863_v19  ;;  %v9727_v23 = vcombine.high %v1860_v20, %v1864_v21 }
 0x143   :  { %1050 = vmatmul.mubr.bf16.gmra.mrb[80].mxu0 %v12110_v25  ;;  %1243 = vmatmul.mubr.bf16.gmra.mrb[80].mxu1 %v12110_v25  ;;  %v9692_v25 = vcombine.low %v1827_v41, %v1831_v43  ;;  %v9732_v41 = vcombine.low %v1867_v29, %v1871_v30 }
 0x144   :  { %1059 = vmatprep.mubr.bf16.mxu0 %v11941_v0  ;;  %1252 = vmatprep.mubr.bf16.mxu1 %v11941_v0 }
 0x145   :  { %4878 = vmatpush1.bf16.msra.mxu0 %v9676_v14  ;;  %5650 = vmatpush1.bf16.msra.mxu1 %v9678_v35  ;;  %v1872_v14 = vld [vmem:[#allocation8 + $0x3e8] sm:$0xff]  ;;  %v9726_v35 = vcombine.low %v1860_v20, %v1864_v21 }
 0x146   :  { %4879 = vmatprep.subr.bf16.mxu0 %v9685_v36  ;;  %5651 = vmatprep.subr.bf16.mxu1 %v9687_v40  ;;  %v9733_v36 = vcombine.high %v1867_v29, %v1871_v30  ;;  %v9735_v40 = vcombine.high %v1868_v31, %v1872_v14  ;;  %v9734_v43 = vcombine.low %v1868_v31, %v1872_v14 }
 0x149   :  { %4880 = vmatpush1.bf16.msra.mxu0 %v9684_v47  ;;  %5652 = vmatpush1.bf16.msra.mxu1 %v9686_v49 }
 0x14a   :  { %4881 = vmatprep.subr.bf16.mxu0 %v9693_v50  ;;  %5653 = vmatprep.subr.bf16.mxu1 %v9695_v52  ;;  %v229_v50 = vld [vmem:[#allocation7] sm:$0xff] }
 0x14b   :  { %1060 = vmatmul.mubr.bf16.gmra.mrb[84].mxu0 %v12118_v32  ;;  %1253 = vmatmul.mubr.bf16.gmra.mrb[84].mxu1 %v12118_v32  ;;  %v9708_v32 = vcombine.low %v1843_v63, %v1847_v2 }
 0x14c   :  { %1069 = vmatprep.mubr.bf16.mxu0 %v11941_v0  ;;  %1262 = vmatprep.mubr.bf16.mxu1 %v11941_v0 }
 0x14d   :  { %4882 = vmatpush1.bf16.msra.mxu0 %v9692_v25  ;;  %5654 = vmatpush1.bf16.msra.mxu1 %v9694_v59 }
 0x14e   :  { %4883 = vmatprep.subr.bf16.mxu0 %v9701_v60  ;;  %5655 = vmatprep.subr.bf16.mxu1 %v9703_v62 }
 0x151   :  { %4884 = vmatpush1.bf16.msra.mxu0 %v9700_v6  ;;  %5656 = vmatpush1.bf16.msra.mxu1 %v9702_v7 }
 0x152   :  { %4885 = vmatprep.subr.bf16.mxu0 %v9709_v8  ;;  %5657 = vmatprep.subr.bf16.mxu1 %v9711_v9 }
 0x153   :  { %1070 = vmatmul.mubr.bf16.gmra.mrb[88].mxu0 %v12124_v37  ;;  %1263 = vmatmul.mubr.bf16.gmra.mrb[88].mxu1 %v12124_v37  ;;  %v9724_v37 = vcombine.low %v1859_v18, %v1863_v19 }
 0x154   :  { %1079 = vmatprep.mubr.bf16.mxu0 %v11941_v0  ;;  %1272 = vmatprep.mubr.bf16.mxu1 %v11941_v0 }
 0x155   :  { %4886 = vmatpush1.bf16.msra.mxu0 %v9708_v32  ;;  %5658 = vmatpush1.bf16.msra.mxu1 %v9710_v15 }
 0x156   :  { %4887 = vmatprep.subr.bf16.mxu0 %v9717_v16  ;;  %5659 = vmatprep.subr.bf16.mxu1 %v9719_v17 }
 0x159   :  { %4888 = vmatpush1.bf16.msra.mxu0 %v9716_v22  ;;  %5660 = vmatpush1.bf16.msra.mxu1 %v9718_v28 }
 0x15a   :  { %4889 = vmatprep.subr.bf16.mxu0 %v9725_v33  ;;  %5661 = vmatprep.subr.bf16.mxu1 %v9727_v23 }
 0x15b   :  { %1080 = vmatmul.mubr.bf16.gmra.mrb[92].mxu0 %v12130_v42  ;;  %1273 = vmatmul.mubr.bf16.gmra.mrb[92].mxu1 %v12130_v42  ;;  %v231_v42 = vlaneseq }
 0x15c   :  { %1089 = vmatprep.mubr.bf16.mxu0 %v11941_v0  ;;  %1282 = vmatprep.mubr.bf16.mxu1 %v11941_v0 }
 0x15d   :  { %4890 = vmatpush1.bf16.msra.mxu0 %v9724_v37  ;;  %5662 = vmatpush1.bf16.msra.mxu1 %v9726_v35  ;;  %v12243_v47 = vshrl.u32 %v231_v42, 7 }
 0x15e   :  { %4891 = vmatprep.subr.bf16.mxu0 %v9733_v36  ;;  %5663 = vmatprep.subr.bf16.mxu1 %v9735_v40 }
 0x15f   :  { %15204 = vst [vmem:[#allocation20_spill] sm:$0xff] %v12243_v47  ;;  %v14992_v49 = vsub.s32 0, %v12243_v47  ;;  %v14990_v52 = vsub.s32 1, %v12243_v47  ;;  %v14989_v53 = vsub.s32 3, %v12243_v47 }
 0x161   :  { %4892 = vmatpush1.bf16.msra.mxu0 %v9732_v41  ;;  %5664 = vmatpush1.bf16.msra.mxu1 %v9734_v43  ;;  %v12255_v39 = vrot.slane %v229_v50, %v14992_v49  ;;  %v12264_v55 = vrot.slane %v229_v50, %v14990_v52  ;;  %v12269_v56 = vrot.slane %v229_v50, %v14989_v53  ;;  %v12463_v52 = vld [vmem:[#allocation8 + $0x500] sm:$0xff] }
 0x162   :  { %5054 = vmatprep.subr.bf16.mxu0 %v9741_v44  ;;  %5826 = vmatprep.subr.bf16.mxu1 %v9743_v46 }
 0x163   :  { %1090 = vmatmul.mubr.bf16.gmra.mrb[96].mxu0 %v12136_v45  ;;  %1283 = vmatmul.mubr.bf16.gmra.mrb[96].mxu1 %v12136_v45  ;;  %v14991_v45 = vsub.s32 2, %v12243_v47 }
 0x164   :  { %1099 = vmatprep.mubr.bf16.mxu0 %v11941_v0  ;;  %1292 = vmatprep.mubr.bf16.mxu1 %v11941_v0 }
 0x16b   :  { %1100 = vmatmul.mubr.bf16.gmra.mrb[100].mxu0 %v12142_v48  ;;  %1293 = vmatmul.mubr.bf16.gmra.mrb[100].mxu1 %v12142_v48  ;;  %v12260_v48 = vrot.slane %v229_v50, %v14991_v45 }
 0x16c   :  { %1109 = vmatprep.mubr.bf16.mxu0 %v11941_v0  ;;  %1302 = vmatprep.mubr.bf16.mxu1 %v11941_v0 }
 0x173   :  { %1110 = vmatmul.mubr.bf16.gmra.mrb[104].mxu0 %v12148_v51  ;;  %1303 = vmatmul.mubr.bf16.gmra.mrb[104].mxu1 %v12148_v51 }
 0x174   :  { %1119 = vmatprep.mubr.bf16.mxu0 %v11941_v0  ;;  %1312 = vmatprep.mubr.bf16.mxu1 %v11941_v0 }
 0x176   :  { %v625_v25 = vpop.f32.mrb[0].mxu0  ;;  %v818_v51 = vpop.f32.mrb[0].mxu1 }
 0x177   :  { %v626_v59 = vadd.f32 %v625_v25, %v12255_v39  ;;  %v627_v60 = vpop.f32.mrb[1].mxu0  ;;  %v819_v62 = vadd.f32 %v818_v51, %v12260_v48  ;;  %v820_v2 = vpop.f32.mrb[1].mxu1 }
 0x178   :  { %v628_v63 = vadd.f32 %v627_v60, %v12264_v55  ;;  %v629_v3 = vpop.f32.mrb[2].mxu0  ;;  %v821_v5 = vadd.f32 %v820_v2, %v12269_v56  ;;  %v822_v7 = vpop.f32.mrb[2].mxu1 }
 0x179   :  { %v630_v6 = vadd.f32 %v629_v3, %v12255_v39  ;;  %v631_v8 = vpop.f32.mrb[3].mxu0  ;;  %v1365_v9 = vmax.f32 %v819_v62, 0.0  ;;  %v823_v10 = vadd.f32 %v822_v7, %v12260_v48  ;;  %v824_v57 = vpop.f32.mrb[3].mxu1  ;;  %v1363_v13 = vmax.f32 %v626_v59, 0.0 }
 0x17a   :  { %v632_v12 = vadd.f32 %v631_v8, %v12264_v55  ;;  %v1366_v32 = vmax.f32 %v821_v5, 0.0  ;;  %v825_v16 = vadd.f32 %v824_v57, %v12269_v56  ;;  %v1364_v17 = vmax.f32 %v628_v63, 0.0 }
 0x17b   :  { %v1371_v15 = vmax.f32 %v630_v6, 0.0  ;;  %1120 = vmatmul.mubr.bf16.gmra.mrb[108].mxu0 %v12154_v54  ;;  %v1373_v18 = vmax.f32 %v823_v10, 0.0  ;;  %1313 = vmatmul.mubr.bf16.gmra.mrb[108].mxu1 %v12154_v54 }
 0x17c   :  { %v1372_v19 = vmax.f32 %v632_v12, 0.0  ;;  %1129 = vmatprep.mubr.bf16.mxu0 %v11941_v0  ;;  %v1374_v21 = vmax.f32 %v825_v16, 0.0  ;;  %1322 = vmatprep.mubr.bf16.mxu1 %v11941_v0 }
 0x17d   :  { %v12283_v20 = vpack.c.bf16 %v1371_v15, %v1363_v13  ;;  %v12286_v22 = vpack.c.bf16 %v1373_v18, %v1365_v9 }
 0x17e   :  { %v12288_v28 = vpack.c.bf16 %v1372_v19, %v1364_v17  ;;  %v635_v33 = vpop.f32.mrb[4].mxu0  ;;  %v12290_v23 = vpack.c.bf16 %v1374_v21, %v1366_v32  ;;  %v828_v30 = vpop.f32.mrb[4].mxu1 }
 0x17f   :  { %15205 = vst [vmem:[#allocation21_spill] sm:$0xff] %v12283_v20  ;;  %15206 = vst [vmem:[#allocation22_spill] sm:$0xff] %v12286_v22  ;;  %v636_v29 = vadd.f32 %v635_v33, %v12255_v39  ;;  %v637_v31 = vpop.f32.mrb[5].mxu0  ;;  %v829_v54 = vadd.f32 %v828_v30, %v12260_v48  ;;  %v830_v37 = vpop.f32.mrb[5].mxu1 }
 0x180   :  { %15207 = vst [vmem:[#allocation23_spill] sm:$0xff] %v12288_v28  ;;  %15208 = vst [vmem:[#allocation24_spill] sm:$0xff] %v12290_v23  ;;  %v638_v14 = vadd.f32 %v637_v31, %v12264_v55  ;;  %v639_v35 = vpop.f32.mrb[6].mxu0  ;;  %v831_v36 = vadd.f32 %v830_v37, %v12269_v56  ;;  %v832_v41 = vpop.f32.mrb[6].mxu1 }
 0x181   :  { %v640_v40 = vadd.f32 %v639_v35, %v12255_v39  ;;  %v641_v43 = vpop.f32.mrb[7].mxu0  ;;  %v1381_v44 = vmax.f32 %v829_v54, 0.0  ;;  %v833_v46 = vadd.f32 %v832_v41, %v12260_v48  ;;  %v834_v50 = vpop.f32.mrb[7].mxu1  ;;  %v1379_v25 = vmax.f32 %v636_v29, 0.0 }
 0x182   :  { %v642_v42 = vadd.f32 %v641_v43, %v12264_v55  ;;  %v1382_v59 = vmax.f32 %v831_v36, 0.0  ;;  %v835_v60 = vadd.f32 %v834_v50, %v12269_v56  ;;  %v1380_v62 = vmax.f32 %v638_v14, 0.0 }
 0x183   :  { %v1387_v51 = vmax.f32 %v640_v40, 0.0  ;;  %1130 = vmatmul.mubr.bf16.gmra.mrb[112].mxu0 %v12160_v58  ;;  %v1389_v63 = vmax.f32 %v833_v46, 0.0  ;;  %1323 = vmatmul.mubr.bf16.gmra.mrb[112].mxu1 %v12160_v58 }
 0x184   :  { %v1388_v2 = vmax.f32 %v642_v42, 0.0  ;;  %1139 = vmatprep.mubr.bf16.mxu0 %v11941_v0  ;;  %v1390_v5 = vmax.f32 %v835_v60, 0.0  ;;  %1332 = vmatprep.mubr.bf16.mxu1 %v11941_v0 }
 0x185   :  { %v12303_v3 = vpack.c.bf16 %v1387_v51, %v1379_v25  ;;  %v12306_v6 = vpack.c.bf16 %v1389_v63, %v1381_v44 }
 0x186   :  { %v12308_v7 = vpack.c.bf16 %v1388_v2, %v1380_v62  ;;  %v645_v8 = vpop.f32.mrb[8].mxu0  ;;  %v12310_v9 = vpack.c.bf16 %v1390_v5, %v1382_v59  ;;  %v838_v12 = vpop.f32.mrb[8].mxu1 }
 0x187   :  { %15209 = vst [vmem:[#allocation25_spill] sm:$0xff] %v12303_v3  ;;  %15210 = vst [vmem:[#allocation26_spill] sm:$0xff] %v12306_v6  ;;  %v646_v10 = vadd.f32 %v645_v8, %v12255_v39  ;;  %v647_v57 = vpop.f32.mrb[9].mxu0  ;;  %v839_v58 = vadd.f32 %v838_v12, %v12260_v48  ;;  %v840_v32 = vpop.f32.mrb[9].mxu1 }
 0x188   :  { %15211 = vst [vmem:[#allocation27_spill] sm:$0xff] %v12308_v7  ;;  %15212 = vst [vmem:[#allocation28_spill] sm:$0xff] %v12310_v9  ;;  %v648_v13 = vadd.f32 %v647_v57, %v12264_v55  ;;  %v649_v15 = vpop.f32.mrb[10].mxu0  ;;  %v841_v16 = vadd.f32 %v840_v32, %v12269_v56  ;;  %v842_v18 = vpop.f32.mrb[10].mxu1 }
 0x189   :  { %v650_v17 = vadd.f32 %v649_v15, %v12255_v39  ;;  %v651_v19 = vpop.f32.mrb[11].mxu0  ;;  %v1397_v21 = vmax.f32 %v839_v58, 0.0  ;;  %v843_v33 = vadd.f32 %v842_v18, %v12260_v48  ;;  %v844_v30 = vpop.f32.mrb[11].mxu1  ;;  %v1395_v31 = vmax.f32 %v646_v10, 0.0 }
 0x18a   :  { %v652_v29 = vadd.f32 %v651_v19, %v12264_v55  ;;  %v1398_v54 = vmax.f32 %v841_v16, 0.0  ;;  %v845_v37 = vadd.f32 %v844_v30, %v12269_v56  ;;  %v1396_v35 = vmax.f32 %v648_v13, 0.0 }
 0x18b   :  { %v1403_v14 = vmax.f32 %v650_v17, 0.0  ;;  %1140 = vmatmul.mubr.bf16.gmra.mrb[116].mxu0 %v12166_v61  ;;  %v1405_v36 = vmax.f32 %v843_v33, 0.0  ;;  %1333 = vmatmul.mubr.bf16.gmra.mrb[116].mxu1 %v12166_v61 }
 0x18c   :  { %v1404_v40 = vmax.f32 %v652_v29, 0.0  ;;  %1149 = vmatprep.mubr.bf16.mxu0 %v11941_v0  ;;  %v1406_v43 = vmax.f32 %v845_v37, 0.0  ;;  %1342 = vmatprep.mubr.bf16.mxu1 %v11941_v0 }
 0x18d   :  { %v12323_v41 = vpack.c.bf16 %v1403_v14, %v1395_v31  ;;  %v12326_v44 = vpack.c.bf16 %v1405_v36, %v1397_v21 }
 0x18e   :  { %v12328_v46 = vpack.c.bf16 %v1404_v40, %v1396_v35  ;;  %v655_v42 = vpop.f32.mrb[12].mxu0  ;;  %v12330_v50 = vpack.c.bf16 %v1406_v43, %v1398_v54  ;;  %v848_v59 = vpop.f32.mrb[12].mxu1 }
 0x18f   :  { %15213 = vst [vmem:[#allocation29_spill] sm:$0xff] %v12323_v41  ;;  %15214 = vst [vmem:[#allocation30_spill] sm:$0xff] %v12326_v44  ;;  %v656_v25 = vadd.f32 %v655_v42, %v12255_v39  ;;  %v657_v51 = vpop.f32.mrb[13].mxu0  ;;  %v849_v61 = vadd.f32 %v848_v59, %v12260_v48  ;;  %v850_v62 = vpop.f32.mrb[13].mxu1 }
 0x190   :  { %15215 = vst [vmem:[#allocation31_spill] sm:$0xff] %v12328_v46  ;;  %15216 = vst [vmem:[#allocation32_spill] sm:$0xff] %v12330_v50  ;;  %v658_v60 = vadd.f32 %v657_v51, %v12264_v55  ;;  %v659_v63 = vpop.f32.mrb[14].mxu0  ;;  %v851_v2 = vadd.f32 %v850_v62, %v12269_v56  ;;  %v852_v8 = vpop.f32.mrb[14].mxu1 }
 0x191   :  { %v660_v5 = vadd.f32 %v659_v63, %v12255_v39  ;;  %v661_v10 = vpop.f32.mrb[15].mxu0  ;;  %v1413_v12 = vmax.f32 %v849_v61, 0.0  ;;  %v853_v57 = vadd.f32 %v852_v8, %v12260_v48  ;;  %v854_v13 = vpop.f32.mrb[15].mxu1  ;;  %v1411_v32 = vmax.f32 %v656_v25, 0.0 }
 0x192   :  { %v662_v58 = vadd.f32 %v661_v10, %v12264_v55  ;;  %v1414_v15 = vmax.f32 %v851_v2, 0.0  ;;  %v855_v17 = vadd.f32 %v854_v13, %v12269_v56  ;;  %v1412_v18 = vmax.f32 %v658_v60, 0.0 }
 0x193   :  { %v1419_v16 = vmax.f32 %v660_v5, 0.0  ;;  %1150 = vmatmul.mubr.bf16.gmra.mrb[120].mxu0 %v12172_v1  ;;  %v1421_v19 = vmax.f32 %v853_v57, 0.0  ;;  %1343 = vmatmul.mubr.bf16.gmra.mrb[120].mxu1 %v12172_v1 }
 0x194   :  { %v1420_v21 = vmax.f32 %v662_v58, 0.0  ;;  %1159 = vmatprep.mubr.bf16.mxu0 %v11941_v0  ;;  %v1422_v29 = vmax.f32 %v855_v17, 0.0  ;;  %1352 = vmatprep.mubr.bf16.mxu1 %v11941_v0 }
 0x195   :  { %v12343_v33 = vpack.c.bf16 %v1419_v16, %v1411_v32  ;;  %v12346_v30 = vpack.c.bf16 %v1421_v19, %v1413_v12  ;;  %v12372_v19 = vld [vmem:[#allocation8 + $0x460] sm:$0xff] }
 0x196   :  { %v12348_v31 = vpack.c.bf16 %v1420_v21, %v1412_v18  ;;  %v665_v54 = vpop.f32.mrb[16].mxu0  ;;  %v12350_v14 = vpack.c.bf16 %v1422_v29, %v1414_v15  ;;  %v858_v35 = vpop.f32.mrb[16].mxu1  ;;  %v12370_v18 = vld [vmem:[#allocation8 + $0x440] sm:$0xff] }
 0x197   :  { %15217 = vst [vmem:[#allocation33_spill] sm:$0xff] %v12343_v33  ;;  %15218 = vst [vmem:[#allocation34_spill] sm:$0xff] %v12346_v30  ;;  %v666_v37 = vadd.f32 %v665_v54, %v12255_v39  ;;  %v667_v36 = vpop.f32.mrb[17].mxu0  ;;  %v859_v1 = vadd.f32 %v858_v35, %v12260_v48  ;;  %v860_v43 = vpop.f32.mrb[17].mxu1  ;;  %v12379_v35 = vld [vmem:[#allocation8 + $0x468] sm:$0xff] }
 0x198   :  { %15219 = vst [vmem:[#allocation35_spill] sm:$0xff] %v12348_v31  ;;  %15220 = vst [vmem:[#allocation36_spill] sm:$0xff] %v12350_v14  ;;  %v668_v40 = vadd.f32 %v667_v36, %v12264_v55  ;;  %v669_v42 = vpop.f32.mrb[18].mxu0  ;;  %v861_v25 = vadd.f32 %v860_v43, %v12269_v56  ;;  %v862_v59 = vpop.f32.mrb[18].mxu1 }
 0x199   :  { %v670_v0 = vadd.f32 %v669_v42, %v12255_v39  ;;  %v671_v51 = vpop.f32.mrb[19].mxu0  ;;  %v1429_v61 = vmax.f32 %v859_v1, 0.0  ;;  %v863_v60 = vadd.f32 %v862_v59, %v12260_v48  ;;  %v864_v63 = vpop.f32.mrb[19].mxu1  ;;  %v1427_v2 = vmax.f32 %v666_v37, 0.0  ;;  %v12377_v37 = vld [vmem:[#allocation8 + $0x448] sm:$0xff] }
 0x19a   :  { %v672_v62 = vadd.f32 %v671_v51, %v12264_v55  ;;  %v1430_v5 = vmax.f32 %v861_v25, 0.0  ;;  %v865_v10 = vadd.f32 %v864_v63, %v12269_v56  ;;  %v1428_v12 = vmax.f32 %v668_v40, 0.0 }
 0x19b   :  { %v1435_v8 = vmax.f32 %v670_v0, 0.0  ;;  %1160 = vmatmul.mubr.bf16.gmra.mrb[124].mxu0 %v12178_v4  ;;  %v1437_v57 = vmax.f32 %v863_v60, 0.0  ;;  %1353 = vmatmul.mubr.bf16.gmra.mrb[124].mxu1 %v12178_v4  ;;  %v9749_v51 = vcombine.high %v12370_v18, %v12372_v19 }
 0x19c   :  { %v1436_v58 = vmax.f32 %v672_v62, 0.0  ;;  %4893 = vmatprep.mubr.bf16.mxu0 %v12288_v28  ;;  %v1438_v32 = vmax.f32 %v865_v10, 0.0  ;;  %5665 = vmatprep.mubr.bf16.mxu1 %v12288_v28 }
 0x19d   :  { %v12363_v13 = vpack.c.bf16 %v1435_v8, %v1427_v2  ;;  %v12366_v15 = vpack.c.bf16 %v1437_v57, %v1429_v61  ;;  %v9751_v2 = vcombine.high %v12377_v37, %v12379_v35  ;;  %v12393_v57 = vld [vmem:[#allocation8 + $0x480] sm:$0xff] }
 0x19e   :  { %v12368_v16 = vpack.c.bf16 %v1436_v58, %v1428_v12  ;;  %v675_v17 = vpop.f32.mrb[20].mxu0  ;;  %v12374_v21 = vpack.c.bf16 %v1438_v32, %v1430_v5  ;;  %v868_v29 = vpop.f32.mrb[20].mxu1  ;;  %v12395_v58 = vld [vmem:[#allocation8 + $0x4a0] sm:$0xff] }
 0x19f   :  { %15221 = vst [vmem:[#allocation37_spill] sm:$0xff] %v12363_v13  ;;  %15222 = vst [vmem:[#allocation38_spill] sm:$0xff] %v12366_v15  ;;  %v676_v4 = vadd.f32 %v675_v17, %v12255_v39  ;;  %v677_v54 = vpop.f32.mrb[21].mxu0  ;;  %v869_v36 = vadd.f32 %v868_v29, %v12260_v48  ;;  %v870_v40 = vpop.f32.mrb[21].mxu1  ;;  %v9757_v11 = vcombine.high %v12393_v57, %v12395_v58 }
 0x1a0   :  { %15223 = vst [vmem:[#allocation39_spill] sm:$0xff] %v12368_v16  ;;  %15224 = vst [vmem:[#allocation40_spill] sm:$0xff] %v12374_v21  ;;  %v678_v1 = vadd.f32 %v677_v54, %v12264_v55  ;;  %v679_v43 = vpop.f32.mrb[22].mxu0  ;;  %v871_v42 = vadd.f32 %v870_v40, %v12269_v56  ;;  %v872_v0 = vpop.f32.mrb[22].mxu1  ;;  %v12399_v54 = vld [vmem:[#allocation8 + $0x488] sm:$0xff]  ;;  %v9756_v27 = vcombine.low %v12393_v57, %v12395_v58 }
 0x1a1   :  { %v680_v25 = vadd.f32 %v679_v43, %v12255_v39  ;;  %v681_v59 = vpop.f32.mrb[23].mxu0  ;;  %v1445_v61 = vmax.f32 %v869_v36, 0.0  ;;  %v873_v60 = vadd.f32 %v872_v0, %v12260_v48  ;;  %v874_v63 = vpop.f32.mrb[23].mxu1  ;;  %v1443_v5 = vmax.f32 %v676_v4, 0.0  ;;  %v12401_v4 = vld [vmem:[#allocation8 + $0x4a8] sm:$0xff] }
 0x1a2   :  { %v682_v62 = vadd.f32 %v681_v59, %v12264_v55  ;;  %v1446_v8 = vmax.f32 %v871_v42, 0.0  ;;  %v875_v12 = vadd.f32 %v874_v63, %v12269_v56  ;;  %v1444_v32 = vmax.f32 %v678_v1, 0.0  ;;  %v12413_v42 = vld [vmem:[#allocation8 + $0x4c0] sm:$0xff] }
 0x1a3   :  { %v1451_v10 = vmax.f32 %v680_v25, 0.0  ;;  %4894 = vmatmul.mubr.bf16.vlgmr.msra.gmra.mrb[128].mxu0 %v12283_v20  ;;  %v1453_v17 = vmax.f32 %v873_v60, 0.0  ;;  %5666 = vmatmul.mubr.bf16.vlgmr.msra.gmra.mrb[128].mxu1 %v12283_v20  ;;  %v9748_v1 = vcombine.low %v12370_v18, %v12372_v19  ;;  %v9750_v43 = vcombine.low %v12377_v37, %v12379_v35  ;;  %v12428_v18 = vld [vmem:[#allocation8 + $0x4e8] sm:$0xff] }
 0x1a4   :  { %v1452_v29 = vmax.f32 %v682_v62, 0.0  ;;  %4903 = vmatprep.mubr.bf16.mxu0 %v12308_v7  ;;  %v1454_v40 = vmax.f32 %v875_v12, 0.0  ;;  %5055 = vmatpush1.bf16.msra.mxu0 %v9740_v34  ;;  %v12426_v34 = vld [vmem:[#allocation8 + $0x4c8] sm:$0xff]  ;;  %v9759_v38 = vcombine.high %v12399_v54, %v12401_v4 }
 0x1a5   :  { %v12403_v36 = vpack.c.bf16 %v1451_v10, %v1443_v5  ;;  %5675 = vmatprep.mubr.bf16.mxu1 %v12308_v7  ;;  %v12415_v25 = vpack.c.bf16 %v1453_v17, %v1445_v61  ;;  %5827 = vmatpush1.bf16.msra.mxu1 %v9742_v24  ;;  %v12437_v24 = vld [vmem:[#allocation8 + $0x800] sm:$0xff]  ;;  %v12441_v60 = vld [vmem:[#allocation8 + $0x808] sm:$0xff] }
 0x1a6   :  { %v12417_v0 = vpack.c.bf16 %v1452_v29, %v1444_v32  ;;  %v685_v59 = vpop.f32.mrb[24].mxu0  ;;  %5056 = vmatprep.subr.bf16.mxu0 %v9749_v51  ;;  %v12430_v19 = vpack.c.bf16 %v1454_v40, %v1446_v8  ;;  %v878_v35 = vpop.f32.mrb[24].mxu1  ;;  %5828 = vmatprep.subr.bf16.mxu1 %v9751_v2  ;;  %v12439_v51 = vld [vmem:[#allocation8 + $0x820] sm:$0xff]  ;;  %v9758_v2 = vcombine.low %v12399_v54, %v12401_v4  ;;  %v12449_v12 = vld [vmem:[#allocation8 + $0x828] sm:$0xff] }
 0x1a7   :  { %15225 = vst [vmem:[#allocation41_spill] sm:$0xff] %v12403_v36  ;;  %15226 = vst [vmem:[#allocation42_spill] sm:$0xff] %v12415_v25  ;;  %v686_v37 = vadd.f32 %v685_v59, %v12255_v39  ;;  %v687_v61 = vpop.f32.mrb[25].mxu0  ;;  %v879_v62 = vadd.f32 %v878_v35, %v12260_v48  ;;  %v880_v5 = vpop.f32.mrb[25].mxu1  ;;  %v9765_v29 = vcombine.high %v12413_v42, %v12424_v26 }
 0x1a8   :  { %15227 = vst [vmem:[#allocation43_spill] sm:$0xff] %v12417_v0  ;;  %15228 = vst [vmem:[#allocation44_spill] sm:$0xff] %v12430_v19  ;;  %v688_v63 = vadd.f32 %v687_v61, %v12264_v55  ;;  %v689_v8 = vpop.f32.mrb[26].mxu0  ;;  %v881_v57 = vadd.f32 %v880_v5, %v12269_v56  ;;  %v882_v32 = vpop.f32.mrb[26].mxu1  ;;  %5057 = vmatpush1.bf16.msra.mxu0 %v9748_v1  ;;  %v9767_v61 = vcombine.high %v12426_v34, %v12428_v18 }
 0x1a9   :  { %v690_v58 = vadd.f32 %v689_v8, %v12255_v39  ;;  %v691_v17 = vpop.f32.mrb[27].mxu0  ;;  %v1461_v59 = vmax.f32 %v879_v62, 0.0  ;;  %v883_v54 = vadd.f32 %v882_v32, %v12260_v48  ;;  %v884_v35 = vpop.f32.mrb[27].mxu1  ;;  %5829 = vmatpush1.bf16.msra.mxu1 %v9750_v43  ;;  %5058 = vmatprep.subr.bf16.mxu0 %v9757_v11  ;;  %v1459_v5 = vmax.f32 %v686_v37, 0.0  ;;  %v12465_v62 = vld [vmem:[#allocation8 + $0x520] sm:$0xff]  ;;  %v12469_v43 = vld [vmem:[#allocation8 + $0x508] sm:$0xff] }
 0x1aa   :  { %v692_v4 = vadd.f32 %v691_v17, %v12264_v55  ;;  %v1462_v8 = vmax.f32 %v881_v57, 0.0  ;;  %v885_v53 = vadd.f32 %v884_v35, %v12269_v56  ;;  %5830 = vmatprep.subr.bf16.mxu1 %v9759_v38  ;;  %v1460_v32 = vmax.f32 %v688_v63, 0.0  ;;  %v12471_v11 = vld [vmem:[#allocation8 + $0x528] sm:$0xff] }
 0x1ab   :  { %v1467_v1 = vmax.f32 %v690_v58, 0.0  ;;  %4904 = vmatmul.mubr.bf16.gmra.mrb[132].mxu0 %v12303_v3  ;;  %v1469_v17 = vmax.f32 %v883_v54, 0.0  ;;  %5676 = vmatmul.mubr.bf16.gmra.mrb[132].mxu1 %v12303_v3  ;;  %v9764_v38 = vcombine.low %v12413_v42, %v12424_v26  ;;  %v9766_v63 = vcombine.low %v12426_v34, %v12428_v18  ;;  %v12495_v18 = vld [vmem:[#allocation8 + $0x548] sm:$0xff] }
 0x1ac   :  { %v1468_v45 = vmax.f32 %v692_v4, 0.0  ;;  %4913 = vmatprep.mubr.bf16.mxu0 %v12328_v46  ;;  %v1470_v57 = vmax.f32 %v885_v53, 0.0  ;;  %5685 = vmatprep.mubr.bf16.mxu1 %v12328_v46  ;;  %v9773_v35 = vcombine.high %v12463_v52, %v12465_v62  ;;  %v12486_v53 = vld [vmem:[#allocation8 + $0x540] sm:$0xff]  ;;  %v9774_v49 = vcombine.low %v12469_v43, %v12471_v11 }
 0x1ad   :  { %v12473_v37 = vpack.c.bf16 %v1467_v1, %v1459_v5  ;;  %5059 = vmatpush1.bf16.msra.mxu0 %v9756_v27  ;;  %v12480_v58 = vpack.c.bf16 %v1469_v17, %v1461_v59  ;;  %5831 = vmatpush1.bf16.msra.mxu1 %v9758_v2  ;;  %v12488_v5 = vld [vmem:[#allocation8 + $0x560] sm:$0xff]  ;;  %v12497_v2 = vld [vmem:[#allocation8 + $0x568] sm:$0xff] }
 0x1ae   :  { %v12482_v54 = vpack.c.bf16 %v1468_v45, %v1460_v32  ;;  %v695_v4 = vpop.f32.mrb[28].mxu0  ;;  %5060 = vmatprep.subr.bf16.mxu0 %v9765_v29  ;;  %v12490_v27 = vpack.c.bf16 %v1470_v57, %v1462_v8  ;;  %v888_v26 = vpop.f32.mrb[28].mxu1  ;;  %5832 = vmatprep.subr.bf16.mxu1 %v9767_v61  ;;  %v9775_v45 = vcombine.high %v12469_v43, %v12471_v11  ;;  %v12515_v43 = vld [vmem:[#allocation8 + $0x580] sm:$0xff] }
 0x1af   :  { %15229 = vst [vmem:[#allocation45_spill] sm:$0xff] %v12473_v37  ;;  %15230 = vst [vmem:[#allocation46_spill] sm:$0xff] %v12480_v58  ;;  %v696_v42 = vadd.f32 %v695_v4, %v12255_v39  ;;  %v697_v34 = vpop.f32.mrb[29].mxu0  ;;  %v889_v29 = vadd.f32 %v888_v26, %v12260_v48  ;;  %v890_v1 = vpop.f32.mrb[29].mxu1  ;;  %v9772_v8 = vcombine.low %v12463_v52, %v12465_v62  ;;  %v12517_v11 = vld [vmem:[#allocation8 + $0x5a0] sm:$0xff] }
 0x1b0   :  { %15231 = vst [vmem:[#allocation47_spill] sm:$0xff] %v12482_v54  ;;  %15232 = vst [vmem:[#allocation48_spill] sm:$0xff] %v12490_v27  ;;  %v698_v59 = vadd.f32 %v697_v34, %v12264_v55  ;;  %v699_v32 = vpop.f32.mrb[30].mxu0  ;;  %v891_v17 = vadd.f32 %v890_v1, %v12269_v56  ;;  %v892_v57 = vpop.f32.mrb[30].mxu1  ;;  %v9781_v26 = vcombine.high %v12486_v53, %v12488_v5 }
 0x1b1   :  { %v700_v61 = vadd.f32 %v699_v32, %v12255_v39  ;;  %v701_v4 = vpop.f32.mrb[31].mxu0  ;;  %5061 = vmatpush1.bf16.msra.mxu0 %v9764_v38  ;;  %v1477_v40 = vmax.f32 %v889_v29, 0.0  ;;  %v893_v34 = vadd.f32 %v892_v57, %v12260_v48  ;;  %v894_v46 = vpop.f32.mrb[31].mxu1  ;;  %5833 = vmatpush1.bf16.msra.mxu1 %v9766_v63  ;;  %v9783_v52 = vcombine.high %v12495_v18, %v12497_v2  ;;  %v12521_v63 = vld [vmem:[#allocation8 + $0x588] sm:$0xff] }
 0x1b2   :  { %v702_v10 = vadd.f32 %v701_v4, %v12264_v55  ;;  %5062 = vmatprep.subr.bf16.mxu0 %v9773_v35  ;;  %v1475_v62 = vmax.f32 %v696_v42, 0.0  ;;  %v1478_v1 = vmax.f32 %v891_v17, 0.0  ;;  %v895_v32 = vadd.f32 %v894_v46, %v12269_v56  ;;  %5834 = vmatprep.subr.bf16.mxu1 %v9775_v45  ;;  %v12523_v35 = vld [vmem:[#allocation8 + $0x5a8] sm:$0xff] }
 0x1b3   :  { %v1483_v38 = vmax.f32 %v700_v61, 0.0  ;;  %4914 = vmatmul.mubr.bf16.gmra.mrb[136].mxu0 %v12323_v41  ;;  %v1476_v29 = vmax.f32 %v698_v59, 0.0  ;;  %v1485_v57 = vmax.f32 %v893_v34, 0.0  ;;  %5686 = vmatmul.mubr.bf16.gmra.mrb[136].mxu1 %v12323_v41  ;;  %v9780_v45 = vcombine.low %v12486_v53, %v12488_v5 }
 0x1b4   :  { %v1484_v4 = vmax.f32 %v702_v10, 0.0  ;;  %4923 = vmatprep.mubr.bf16.mxu0 %v12348_v31  ;;  %v1486_v46 = vmax.f32 %v895_v32, 0.0  ;;  %5695 = vmatprep.mubr.bf16.mxu1 %v12348_v31  ;;  %v9782_v10 = vcombine.low %v12495_v18, %v12497_v2  ;;  %v9789_v34 = vcombine.high %v12515_v43, %v12517_v11  ;;  %v12547_v2 = vld [vmem:[#allocation8 + $0x5c8] sm:$0xff] }
 0x1b5   :  { %v12525_v42 = vpack.c.bf16 %v1483_v38, %v1475_v62  ;;  %5063 = vmatpush1.bf16.msra.mxu0 %v9772_v8  ;;  %v12532_v59 = vpack.c.bf16 %v1485_v57, %v1477_v40  ;;  %5835 = vmatpush1.bf16.msra.mxu1 %v9774_v49  ;;  %v12538_v62 = vld [vmem:[#allocation8 + $0x5c0] sm:$0xff]  ;;  %v9791_v40 = vcombine.high %v12521_v63, %v12523_v35  ;;  %v12549_v49 = vld [vmem:[#allocation8 + $0x5e8] sm:$0xff] }
 0x1b6   :  { %v12534_v17 = vpack.c.bf16 %v1484_v4, %v1476_v29  ;;  %v705_v61 = vpop.f32.mrb[32].mxu0  ;;  %5064 = vmatprep.subr.bf16.mxu0 %v9781_v26  ;;  %v12540_v38 = vld [vmem:[#allocation8 + $0x5e0] sm:$0xff]  ;;  %v12542_v8 = vpack.c.bf16 %v1486_v46, %v1478_v1  ;;  %v898_v5 = vpop.f32.mrb[32].mxu1  ;;  %5836 = vmatprep.subr.bf16.mxu1 %v9783_v52  ;;  %v9788_v1 = vcombine.low %v12515_v43, %v12517_v11 }
 0x1b7   :  { %15233 = vst [vmem:[#allocation49_spill] sm:$0xff] %v12525_v42  ;;  %15234 = vst [vmem:[#allocation50_spill] sm:$0xff] %v12532_v59  ;;  %v706_v53 = vadd.f32 %v705_v61, %v12255_v39  ;;  %v707_v18 = vpop.f32.mrb[33].mxu0  ;;  %v899_v26 = vadd.f32 %v898_v5, %v12260_v48  ;;  %v900_v29 = vpop.f32.mrb[33].mxu1  ;;  %v9790_v31 = vcombine.low %v12521_v63, %v12523_v35  ;;  %v12567_v63 = vld [vmem:[#allocation8 + $0x600] sm:$0xff] }
 0x1b8   :  { %15235 = vst [vmem:[#allocation51_spill] sm:$0xff] %v12534_v17  ;;  %15236 = vst [vmem:[#allocation52_spill] sm:$0xff] %v12542_v8  ;;  %v708_v32 = vadd.f32 %v707_v18, %v12264_v55  ;;  %v709_v57 = vpop.f32.mrb[34].mxu0  ;;  %v901_v4 = vadd.f32 %v900_v29, %v12269_v56  ;;  %v902_v46 = vpop.f32.mrb[34].mxu1  ;;  %v9797_v5 = vcombine.high %v12538_v62, %v12540_v38  ;;  %v12569_v35 = vld [vmem:[#allocation8 + $0x620] sm:$0xff] }
 0x1b9   :  { %v710_v52 = vadd.f32 %v709_v57, %v12255_v39  ;;  %v711_v61 = vpop.f32.mrb[35].mxu0  ;;  %5065 = vmatpush1.bf16.msra.mxu0 %v9780_v45  ;;  %v1493_v41 = vmax.f32 %v899_v26, 0.0  ;;  %v903_v18 = vadd.f32 %v902_v46, %v12260_v48  ;;  %v904_v7 = vpop.f32.mrb[35].mxu1  ;;  %5837 = vmatpush1.bf16.msra.mxu1 %v9782_v10  ;;  %v9799_v43 = vcombine.high %v12547_v2, %v12549_v49  ;;  %v12573_v10 = vld [vmem:[#allocation8 + $0x608] sm:$0xff] }
 0x1ba   :  { %v712_v3 = vadd.f32 %v711_v61, %v12264_v55  ;;  %5066 = vmatprep.subr.bf16.mxu0 %v9789_v34  ;;  %v1491_v11 = vmax.f32 %v706_v53, 0.0  ;;  %v1494_v29 = vmax.f32 %v901_v4, 0.0  ;;  %v905_v57 = vadd.f32 %v904_v7, %v12269_v56  ;;  %5838 = vmatprep.subr.bf16.mxu1 %v9791_v40  ;;  %v12575_v34 = vld [vmem:[#allocation8 + $0x628] sm:$0xff] }
 0x1bb   :  { %v1499_v45 = vmax.f32 %v710_v52, 0.0  ;;  %4924 = vmatmul.mubr.bf16.gmra.mrb[140].mxu0 %v12343_v33  ;;  %v1492_v26 = vmax.f32 %v708_v32, 0.0  ;;  %v1501_v46 = vmax.f32 %v903_v18, 0.0  ;;  %5696 = vmatmul.mubr.bf16.gmra.mrb[140].mxu1 %v12343_v33  ;;  %v9796_v40 = vcombine.low %v12538_v62, %v12540_v38 }
 0x1bc   :  { %v1500_v61 = vmax.f32 %v712_v3, 0.0  ;;  %4933 = vmatprep.mubr.bf16.mxu0 %v12368_v16  ;;  %v1502_v7 = vmax.f32 %v905_v57, 0.0  ;;  %5705 = vmatprep.mubr.bf16.mxu1 %v12368_v16  ;;  %v9798_v3 = vcombine.low %v12547_v2, %v12549_v49  ;;  %v9805_v18 = vcombine.high %v12567_v63, %v12569_v35  ;;  %v12599_v49 = vld [vmem:[#allocation8 + $0x648] sm:$0xff] }
 0x1bd   :  { %v12577_v53 = vpack.c.bf16 %v1499_v45, %v1491_v11  ;;  %5067 = vmatpush1.bf16.msra.mxu0 %v9788_v1  ;;  %v12584_v32 = vpack.c.bf16 %v1501_v46, %v1493_v41  ;;  %5839 = vmatpush1.bf16.msra.mxu1 %v9790_v31  ;;  %v12590_v11 = vld [vmem:[#allocation8 + $0x640] sm:$0xff]  ;;  %v9807_v41 = vcombine.high %v12573_v10, %v12575_v34  ;;  %v12601_v31 = vld [vmem:[#allocation8 + $0x668] sm:$0xff] }
 0x1be   :  { %v12586_v4 = vpack.c.bf16 %v1500_v61, %v1492_v26  ;;  %v715_v52 = vpop.f32.mrb[36].mxu0  ;;  %5068 = vmatprep.subr.bf16.mxu0 %v9797_v5  ;;  %v12592_v45 = vld [vmem:[#allocation8 + $0x660] sm:$0xff]  ;;  %v12594_v1 = vpack.c.bf16 %v1502_v7, %v1494_v29  ;;  %v908_v38 = vpop.f32.mrb[36].mxu1  ;;  %5840 = vmatprep.subr.bf16.mxu1 %v9799_v43  ;;  %v9804_v29 = vcombine.low %v12567_v63, %v12569_v35 }
 0x1bf   :  { %15237 = vst [vmem:[#allocation53_spill] sm:$0xff] %v12577_v53  ;;  %15238 = vst [vmem:[#allocation54_spill] sm:$0xff] %v12584_v32  ;;  %v716_v62 = vadd.f32 %v715_v52, %v12255_v39  ;;  %v717_v2 = vpop.f32.mrb[37].mxu0  ;;  %v909_v5 = vadd.f32 %v908_v38, %v12260_v48  ;;  %v910_v26 = vpop.f32.mrb[37].mxu1  ;;  %v9806_v16 = vcombine.low %v12573_v10, %v12575_v34  ;;  %v12619_v10 = vld [vmem:[#allocation8 + $0x680] sm:$0xff] }
 0x1c0   :  { %15239 = vst [vmem:[#allocation55_spill] sm:$0xff] %v12586_v4  ;;  %15240 = vst [vmem:[#allocation56_spill] sm:$0xff] %v12594_v1  ;;  %v718_v57 = vadd.f32 %v717_v2, %v12264_v55  ;;  %v719_v46 = vpop.f32.mrb[38].mxu0  ;;  %v911_v61 = vadd.f32 %v910_v26, %v12269_v56  ;;  %v912_v7 = vpop.f32.mrb[38].mxu1  ;;  %v9813_v38 = vcombine.high %v12590_v11, %v12592_v45  ;;  %v12621_v34 = vld [vmem:[#allocation8 + $0x6a0] sm:$0xff] }
 0x1c1   :  { %v720_v43 = vadd.f32 %v719_v46, %v12255_v39  ;;  %v721_v52 = vpop.f32.mrb[39].mxu0  ;;  %5069 = vmatpush1.bf16.msra.mxu0 %v9796_v40  ;;  %v1509_v33 = vmax.f32 %v909_v5, 0.0  ;;  %v913_v2 = vadd.f32 %v912_v7, %v12260_v48  ;;  %v914_v28 = vpop.f32.mrb[39].mxu1  ;;  %5841 = vmatpush1.bf16.msra.mxu1 %v9798_v3  ;;  %v9815_v63 = vcombine.high %v12599_v49, %v12601_v31  ;;  %v12625_v3 = vld [vmem:[#allocation8 + $0x688] sm:$0xff] }
 0x1c2   :  { %v722_v20 = vadd.f32 %v721_v52, %v12264_v55  ;;  %5070 = vmatprep.subr.bf16.mxu0 %v9805_v18  ;;  %v1507_v35 = vmax.f32 %v716_v62, 0.0  ;;  %v1510_v26 = vmax.f32 %v911_v61, 0.0  ;;  %v915_v46 = vadd.f32 %v914_v28, %v12269_v56  ;;  %5842 = vmatprep.subr.bf16.mxu1 %v9807_v41  ;;  %v12627_v18 = vld [vmem:[#allocation8 + $0x6a8] sm:$0xff] }
 0x1c3   :  { %v1515_v40 = vmax.f32 %v720_v43, 0.0  ;;  %4934 = vmatmul.mubr.bf16.gmra.mrb[144].mxu0 %v12363_v13  ;;  %v1508_v5 = vmax.f32 %v718_v57, 0.0  ;;  %v1517_v7 = vmax.f32 %v913_v2, 0.0  ;;  %5706 = vmatmul.mubr.bf16.gmra.mrb[144].mxu1 %v12363_v13  ;;  %v9812_v41 = vcombine.low %v12590_v11, %v12592_v45 }
 0x1c4   :  { %v1516_v52 = vmax.f32 %v722_v20, 0.0  ;;  %4943 = vmatprep.mubr.bf16.mxu0 %v12417_v0  ;;  %v1518_v28 = vmax.f32 %v915_v46, 0.0  ;;  %5715 = vmatprep.mubr.bf16.mxu1 %v12417_v0  ;;  %v9814_v20 = vcombine.low %v12599_v49, %v12601_v31  ;;  %v9821_v2 = vcombine.high %v12619_v10, %v12621_v34  ;;  %v12651_v31 = vld [vmem:[#allocation8 + $0x6c8] sm:$0xff] }
 0x1c5   :  { %v12629_v62 = vpack.c.bf16 %v1515_v40, %v1507_v35  ;;  %5071 = vmatpush1.bf16.msra.mxu0 %v9804_v29  ;;  %v12636_v57 = vpack.c.bf16 %v1517_v7, %v1509_v33  ;;  %5843 = vmatpush1.bf16.msra.mxu1 %v9806_v16  ;;  %v12642_v35 = vld [vmem:[#allocation8 + $0x6c0] sm:$0xff]  ;;  %v9823_v33 = vcombine.high %v12625_v3, %v12627_v18  ;;  %v12653_v16 = vld [vmem:[#allocation8 + $0x6e8] sm:$0xff] }
 0x1c6   :  { %v12638_v61 = vpack.c.bf16 %v1516_v52, %v1508_v5  ;;  %v725_v43 = vpop.f32.mrb[40].mxu0  ;;  %5072 = vmatprep.subr.bf16.mxu0 %v9813_v38  ;;  %v12644_v40 = vld [vmem:[#allocation8 + $0x6e0] sm:$0xff]  ;;  %v12646_v29 = vpack.c.bf16 %v1518_v28, %v1510_v26  ;;  %v918_v45 = vpop.f32.mrb[40].mxu1  ;;  %5844 = vmatprep.subr.bf16.mxu1 %v9815_v63  ;;  %v9820_v26 = vcombine.low %v12619_v10, %v12621_v34 }
 0x1c7   :  { %15241 = vst [vmem:[#allocation57_spill] sm:$0xff] %v12629_v62  ;;  %15242 = vst [vmem:[#allocation58_spill] sm:$0xff] %v12636_v57  ;;  %v726_v11 = vadd.f32 %v725_v43, %v12255_v39  ;;  %v727_v49 = vpop.f32.mrb[41].mxu0  ;;  %v919_v38 = vadd.f32 %v918_v45, %v12260_v48  ;;  %v920_v5 = vpop.f32.mrb[41].mxu1  ;;  %v9822_v0 = vcombine.low %v12625_v3, %v12627_v18  ;;  %v12671_v3 = vld [vmem:[#allocation8 + $0x700] sm:$0xff] }
 0x1c8   :  { %15243 = vst [vmem:[#allocation59_spill] sm:$0xff] %v12638_v61  ;;  %15244 = vst [vmem:[#allocation60_spill] sm:$0xff] %v12646_v29  ;;  %v728_v46 = vadd.f32 %v727_v49, %v12264_v55  ;;  %v729_v7 = vpop.f32.mrb[42].mxu0  ;;  %v921_v52 = vadd.f32 %v920_v5, %v12269_v56  ;;  %v922_v28 = vpop.f32.mrb[42].mxu1  ;;  %v9829_v45 = vcombine.high %v12642_v35, %v12644_v40  ;;  %v12673_v18 = vld [vmem:[#allocation8 + $0x720] sm:$0xff] }
 0x1c9   :  { %v730_v63 = vadd.f32 %v729_v7, %v12255_v39  ;;  %v731_v43 = vpop.f32.mrb[43].mxu0  ;;  %5073 = vmatpush1.bf16.msra.mxu0 %v9812_v41  ;;  %v1525_v13 = vmax.f32 %v919_v38, 0.0  ;;  %v923_v49 = vadd.f32 %v922_v28, %v12260_v48  ;;  %v924_v29 = vpop.f32.mrb[43].mxu1  ;;  %5845 = vmatpush1.bf16.msra.mxu1 %v9814_v20  ;;  %v9831_v10 = vcombine.high %v12651_v31, %v12653_v16  ;;  %v12677_v20 = vld [vmem:[#allocation8 + $0x708] sm:$0xff] }
 0x1ca   :  { %v732_v57 = vadd.f32 %v731_v43, %v12264_v55  ;;  %5074 = vmatprep.subr.bf16.mxu0 %v9821_v2  ;;  %v1523_v34 = vmax.f32 %v726_v11, 0.0  ;;  %v1526_v5 = vmax.f32 %v921_v52, 0.0  ;;  %v925_v7 = vadd.f32 %v924_v29, %v12269_v56  ;;  %5846 = vmatprep.subr.bf16.mxu1 %v9823_v33  ;;  %v12679_v2 = vld [vmem:[#allocation8 + $0x728] sm:$0xff] }
 0x1cb   :  { %v1531_v41 = vmax.f32 %v730_v63, 0.0  ;;  %4944 = vmatmul.mubr.bf16.gmra.mrb[148].mxu0 %v12403_v36  ;;  %v1524_v38 = vmax.f32 %v728_v46, 0.0  ;;  %v1533_v28 = vmax.f32 %v923_v49, 0.0  ;;  %5716 = vmatmul.mubr.bf16.gmra.mrb[148].mxu1 %v12403_v36  ;;  %v9828_v33 = vcombine.low %v12642_v35, %v12644_v40 }
 0x1cc   :  { %v1532_v43 = vmax.f32 %v732_v57, 0.0  ;;  %4953 = vmatprep.mubr.bf16.mxu0 %v12482_v54  ;;  %v1534_v29 = vmax.f32 %v925_v7, 0.0  ;;  %5725 = vmatprep.mubr.bf16.mxu1 %v12482_v54  ;;  %v9830_v57 = vcombine.low %v12651_v31, %v12653_v16  ;;  %v9837_v49 = vcombine.high %v12671_v3, %v12673_v18  ;;  %v12703_v16 = vld [vmem:[#allocation8 + $0x748] sm:$0xff] }
 0x1cd   :  { %v12681_v11 = vpack.c.bf16 %v1531_v41, %v1523_v34  ;;  %5075 = vmatpush1.bf16.msra.mxu0 %v9820_v26  ;;  %v12688_v46 = vpack.c.bf16 %v1533_v28, %v1525_v13  ;;  %5847 = vmatpush1.bf16.msra.mxu1 %v9822_v0  ;;  %v12694_v34 = vld [vmem:[#allocation8 + $0x740] sm:$0xff]  ;;  %v9839_v13 = vcombine.high %v12677_v20, %v12679_v2  ;;  %v12705_v0 = vld [vmem:[#allocation8 + $0x768] sm:$0xff] }
 0x1ce   :  { %v12690_v52 = vpack.c.bf16 %v1532_v43, %v1524_v38  ;;  %v735_v63 = vpop.f32.mrb[44].mxu0  ;;  %5076 = vmatprep.subr.bf16.mxu0 %v9829_v45  ;;  %v12696_v41 = vld [vmem:[#allocation8 + $0x760] sm:$0xff]  ;;  %v12698_v26 = vpack.c.bf16 %v1534_v29, %v1526_v5  ;;  %v928_v40 = vpop.f32.mrb[44].mxu1  ;;  %5848 = vmatprep.subr.bf16.mxu1 %v9831_v10  ;;  %v9836_v5 = vcombine.low %v12671_v3, %v12673_v18 }
 0x1cf   :  { %15245 = vst [vmem:[#allocation61_spill] sm:$0xff] %v12681_v11  ;;  %15246 = vst [vmem:[#allocation62_spill] sm:$0xff] %v12688_v46  ;;  %v736_v35 = vadd.f32 %v735_v63, %v12255_v39  ;;  %v737_v31 = vpop.f32.mrb[45].mxu0  ;;  %v929_v45 = vadd.f32 %v928_v40, %v12260_v48  ;;  %v930_v38 = vpop.f32.mrb[45].mxu1  ;;  %v9838_v54 = vcombine.low %v12677_v20, %v12679_v2  ;;  %v12723_v20 = vld [vmem:[#allocation8 + $0x780] sm:$0xff] }
 0x1d0   :  { %15247 = vst [vmem:[#allocation63_spill] sm:$0xff] %v12690_v52  ;;  %15248 = vst [vmem:[#allocation64_spill] sm:$0xff] %v12698_v26  ;;  %v738_v7 = vadd.f32 %v737_v31, %v12264_v55  ;;  %v739_v28 = vpop.f32.mrb[46].mxu0  ;;  %v931_v43 = vadd.f32 %v930_v38, %v12269_v56  ;;  %v932_v29 = vpop.f32.mrb[46].mxu1  ;;  %v9845_v40 = vcombine.high %v12694_v34, %v12696_v41  ;;  %v12725_v2 = vld [vmem:[#allocation8 + $0x7a0] sm:$0xff] }
 0x1d1   :  { %v740_v10 = vadd.f32 %v739_v28, %v12255_v39  ;;  %v741_v63 = vpop.f32.mrb[47].mxu0  ;;  %5077 = vmatpush1.bf16.msra.mxu0 %v9828_v33  ;;  %v1541_v36 = vmax.f32 %v929_v45, 0.0  ;;  %v933_v31 = vadd.f32 %v932_v29, %v12260_v48  ;;  %v934_v26 = vpop.f32.mrb[47].mxu1  ;;  %5849 = vmatpush1.bf16.msra.mxu1 %v9830_v57  ;;  %v9847_v3 = vcombine.high %v12703_v16, %v12705_v0  ;;  %v12729_v57 = vld [vmem:[#allocation8 + $0x788] sm:$0xff] }
 0x1d2   :  { %v742_v46 = vadd.f32 %v741_v63, %v12264_v55  ;;  %5078 = vmatprep.subr.bf16.mxu0 %v9837_v49  ;;  %v1539_v18 = vmax.f32 %v736_v35, 0.0  ;;  %v1542_v38 = vmax.f32 %v931_v43, 0.0  ;;  %v935_v28 = vadd.f32 %v934_v26, %v12269_v56  ;;  %5850 = vmatprep.subr.bf16.mxu1 %v9839_v13  ;;  %v1992_v49 = vld [vmem:[#allocation8 + $0x7a8] sm:$0xff] }
 0x1d3   :  { %v1547_v33 = vmax.f32 %v740_v10, 0.0  ;;  %4954 = vmatmul.mubr.bf16.gmra.mrb[152].mxu0 %v12473_v37  ;;  %v1540_v45 = vmax.f32 %v738_v7, 0.0  ;;  %v1549_v29 = vmax.f32 %v933_v31, 0.0  ;;  %5726 = vmatmul.mubr.bf16.gmra.mrb[152].mxu1 %v12473_v37  ;;  %v9844_v13 = vcombine.low %v12694_v34, %v12696_v41 }
 0x1d4   :  { %v1548_v63 = vmax.f32 %v742_v46, 0.0  ;;  %4963 = vmatprep.mubr.bf16.mxu0 %v12534_v17  ;;  %v1550_v26 = vmax.f32 %v935_v28, 0.0  ;;  %5735 = vmatprep.mubr.bf16.mxu1 %v12534_v17  ;;  %v9846_v7 = vcombine.low %v12703_v16, %v12705_v0  ;;  %v9853_v31 = vcombine.high %v12723_v20, %v12725_v2  ;;  %v12752_v0 = vld [vmem:[#allocation8 + $0x7c8] sm:$0xff] }
 0x1d5   :  { %v12731_v35 = vpack.c.bf16 %v1547_v33, %v1539_v18  ;;  %5079 = vmatpush1.bf16.msra.mxu0 %v9836_v5  ;;  %v12738_v46 = vpack.c.bf16 %v1549_v29, %v1541_v36  ;;  %5851 = vmatpush1.bf16.msra.mxu1 %v9838_v54  ;;  %v12744_v18 = vld [vmem:[#allocation8 + $0x7c0] sm:$0xff]  ;;  %v9855_v36 = vcombine.high %v12729_v57, %v1992_v49  ;;  %v2000_v54 = vld [vmem:[#allocation8 + $0x7e8] sm:$0xff] }
 0x1d6   :  { %v12740_v43 = vpack.c.bf16 %v1548_v63, %v1540_v45  ;;  %v745_v10 = vpop.f32.mrb[48].mxu0  ;;  %5080 = vmatprep.subr.bf16.mxu0 %v9845_v40  ;;  %v12746_v33 = vld [vmem:[#allocation8 + $0x7e0] sm:$0xff]  ;;  %v12748_v5 = vpack.c.bf16 %v1550_v26, %v1542_v38  ;;  %v938_v41 = vpop.f32.mrb[48].mxu1  ;;  %5852 = vmatprep.subr.bf16.mxu1 %v9847_v3  ;;  %v9852_v38 = vcombine.low %v12723_v20, %v12725_v2 }
 0x1d7   :  { %15249 = vst [vmem:[#allocation65_spill] sm:$0xff] %v12731_v35  ;;  %15250 = vst [vmem:[#allocation66_spill] sm:$0xff] %v12738_v46  ;;  %v746_v34 = vadd.f32 %v745_v10, %v12255_v39  ;;  %v747_v16 = vpop.f32.mrb[49].mxu0  ;;  %v939_v40 = vadd.f32 %v938_v41, %v12260_v48  ;;  %v940_v45 = vpop.f32.mrb[49].mxu1  ;;  %v9854_v17 = vcombine.low %v12729_v57, %v1992_v49 }
 0x1d8   :  { %15251 = vst [vmem:[#allocation67_spill] sm:$0xff] %v12740_v43  ;;  %15252 = vst [vmem:[#allocation68_spill] sm:$0xff] %v12748_v5  ;;  %v748_v28 = vadd.f32 %v747_v16, %v12264_v55  ;;  %v749_v29 = vpop.f32.mrb[50].mxu0  ;;  %v941_v63 = vadd.f32 %v940_v45, %v12269_v56  ;;  %v942_v10 = vpop.f32.mrb[50].mxu1  ;;  %v9861_v37 = vcombine.high %v12744_v18, %v12746_v33 }
 0x1d9   :  { %v750_v26 = vadd.f32 %v749_v29, %v12255_v39  ;;  %v751_v3 = vpop.f32.mrb[51].mxu0  ;;  %5081 = vmatpush1.bf16.msra.mxu0 %v9844_v13  ;;  %v1557_v41 = vmax.f32 %v939_v40, 0.0  ;;  %v943_v16 = vadd.f32 %v942_v10, %v12260_v48  ;;  %v944_v5 = vpop.f32.mrb[51].mxu1  ;;  %5853 = vmatpush1.bf16.msra.mxu1 %v9846_v7  ;;  %v9863_v20 = vcombine.high %v12752_v0, %v2000_v54 }
 0x1da   :  { %v752_v46 = vadd.f32 %v751_v3, %v12264_v55  ;;  %5082 = vmatprep.subr.bf16.mxu0 %v9853_v31  ;;  %v1555_v2 = vmax.f32 %v746_v34, 0.0  ;;  %v1558_v45 = vmax.f32 %v941_v63, 0.0  ;;  %v945_v13 = vadd.f32 %v944_v5, %v12269_v56  ;;  %5854 = vmatprep.subr.bf16.mxu1 %v9855_v36 }
 0x1db   :  { %v1563_v29 = vmax.f32 %v750_v26, 0.0  ;;  %4964 = vmatmul.mubr.bf16.gmra.mrb[156].mxu0 %v12525_v42  ;;  %v1556_v57 = vmax.f32 %v748_v28, 0.0  ;;  %v1565_v49 = vmax.f32 %v943_v16, 0.0  ;;  %5736 = vmatmul.mubr.bf16.gmra.mrb[156].mxu1 %v12525_v42  ;;  %v9860_v31 = vcombine.low %v12744_v18, %v12746_v33 }
 0x1dc   :  { %v1564_v40 = vmax.f32 %v752_v46, 0.0  ;;  %4973 = vmatprep.mubr.bf16.mxu0 %v12586_v4  ;;  %v1566_v7 = vmax.f32 %v945_v13, 0.0  ;;  %5745 = vmatprep.mubr.bf16.mxu1 %v12586_v4  ;;  %v9862_v5 = vcombine.low %v12752_v0, %v2000_v54  ;;  %v9869_v28 = vcombine.high %v12437_v24, %v12439_v51 }
 0x1dd   :  { %v12770_v10 = vpack.c.bf16 %v1563_v29, %v1555_v2  ;;  %5083 = vmatpush1.bf16.msra.mxu0 %v9852_v38  ;;  %v12776_v34 = vpack.c.bf16 %v1565_v49, %v1557_v41  ;;  %5855 = vmatpush1.bf16.msra.mxu1 %v9854_v17  ;;  %v9871_v18 = vcombine.high %v12441_v60, %v12449_v12 }
 0x1de   :  { %v12778_v36 = vpack.c.bf16 %v1564_v40, %v1556_v57  ;;  %v755_v46 = vpop.f32.mrb[52].mxu0  ;;  %5084 = vmatprep.subr.bf16.mxu0 %v9861_v37  ;;  %v12782_v63 = vpack.c.bf16 %v1566_v7, %v1558_v45  ;;  %v948_v38 = vpop.f32.mrb[52].mxu1  ;;  %5856 = vmatprep.subr.bf16.mxu1 %v9863_v20 }
 0x1df   :  { %15253 = vst [vmem:[#allocation69_spill] sm:$0xff] %v12770_v10  ;;  %v756_v26 = vadd.f32 %v755_v46, %v12255_v39  ;;  %v757_v3 = vpop.f32.mrb[53].mxu0  ;;  %v949_v33 = vadd.f32 %v948_v38, %v12260_v48  ;;  %v950_v54 = vpop.f32.mrb[53].mxu1 }
 0x1e0   :  { %15254 = vst [vmem:[#allocation70_spill] sm:$0xff] %v12778_v36  ;;  %v758_v0 = vadd.f32 %v757_v3, %v12264_v55  ;;  %v759_v17 = vpop.f32.mrb[54].mxu0  ;;  %v951_v37 = vadd.f32 %v950_v54, %v12269_v56  ;;  %v952_v16 = vpop.f32.mrb[54].mxu1 }
 0x1e1   :  { %v760_v41 = vadd.f32 %v759_v17, %v12255_v39  ;;  %v761_v2 = vpop.f32.mrb[55].mxu0  ;;  %5085 = vmatpush1.bf16.msra.mxu0 %v9860_v31  ;;  %v1573_v45 = vmax.f32 %v949_v33, 0.0  ;;  %v953_v29 = vadd.f32 %v952_v16, %v12260_v48  ;;  %v954_v13 = vpop.f32.mrb[55].mxu1  ;;  %5857 = vmatpush1.bf16.msra.mxu1 %v9862_v5  ;;  %v1571_v57 = vmax.f32 %v756_v26, 0.0 }
 0x1e2   :  { %v762_v20 = vadd.f32 %v761_v2, %v12264_v55  ;;  %5247 = vmatprep.subr.bf16.mxu0 %v9869_v28  ;;  %v1574_v49 = vmax.f32 %v951_v37, 0.0  ;;  %v955_v7 = vadd.f32 %v954_v13, %v12269_v56  ;;  %6019 = vmatprep.subr.bf16.mxu1 %v9871_v18  ;;  %v1572_v46 = vmax.f32 %v758_v0, 0.0 }
 0x1e3   :  { %v1579_v40 = vmax.f32 %v760_v41, 0.0  ;;  %4974 = vmatmul.mubr.bf16.gmra.mrb[160].mxu0 %v12577_v53  ;;  %v1581_v38 = vmax.f32 %v953_v29, 0.0  ;;  %5746 = vmatmul.mubr.bf16.gmra.mrb[160].mxu1 %v12577_v53 }
 0x1e4   :  { %v1580_v3 = vmax.f32 %v762_v20, 0.0  ;;  %4983 = vmatprep.mubr.bf16.mxu0 %v12638_v61  ;;  %v1582_v33 = vmax.f32 %v955_v7, 0.0  ;;  %5755 = vmatprep.mubr.bf16.mxu1 %v12638_v61 }
 0x1e5   :  { %v12797_v31 = vpack.c.bf16 %v1579_v40, %v1571_v57  ;;  %v12800_v5 = vpack.c.bf16 %v1581_v38, %v1573_v45 }
 0x1e6   :  { %v12802_v28 = vpack.c.bf16 %v1580_v3, %v1572_v46  ;;  %v765_v26 = vpop.f32.mrb[56].mxu0  ;;  %v12804_v54 = vpack.c.bf16 %v1582_v33, %v1574_v49  ;;  %v958_v0 = vpop.f32.mrb[56].mxu1 }
 0x1e7   :  { %15255 = vst [vmem:[#allocation71_spill] sm:$0xff] %v12797_v31  ;;  %v766_v18 = vadd.f32 %v765_v26, %v12255_v39  ;;  %v767_v17 = vpop.f32.mrb[57].mxu0  ;;  %v959_v37 = vadd.f32 %v958_v0, %v12260_v48  ;;  %v960_v16 = vpop.f32.mrb[57].mxu1 }
 0x1e8   :  { %15256 = vst [vmem:[#allocation72_spill] sm:$0xff] %v12802_v28  ;;  %v768_v41 = vadd.f32 %v767_v17, %v12264_v55  ;;  %v769_v2 = vpop.f32.mrb[58].mxu0  ;;  %v961_v29 = vadd.f32 %v960_v16, %v12269_v56  ;;  %v962_v20 = vpop.f32.mrb[58].mxu1 }
 0x1e9   :  { %v770_v45 = vadd.f32 %v769_v2, %v12255_v39  ;;  %v771_v13 = vpop.f32.mrb[59].mxu0  ;;  %v1589_v57 = vmax.f32 %v959_v37, 0.0  ;;  %v963_v49 = vadd.f32 %v962_v20, %v12260_v48  ;;  %v964_v7 = vpop.f32.mrb[59].mxu1  ;;  %v1587_v46 = vmax.f32 %v766_v18, 0.0 }
 0x1ea   :  { %v772_v40 = vadd.f32 %v771_v13, %v12264_v55  ;;  %v1590_v38 = vmax.f32 %v961_v29, 0.0  ;;  %v965_v33 = vadd.f32 %v964_v7, %v12269_v56  ;;  %v1588_v26 = vmax.f32 %v768_v41, 0.0 }
 0x1eb   :  { %v1595_v3 = vmax.f32 %v770_v45, 0.0  ;;  %4984 = vmatmul.mubr.bf16.gmra.mrb[164].mxu0 %v12629_v62  ;;  %v1597_v0 = vmax.f32 %v963_v49, 0.0  ;;  %5756 = vmatmul.mubr.bf16.gmra.mrb[164].mxu1 %v12629_v62  ;;  %v15037_v18 = vsub.s32 4, %v12243_v47 }
 0x1ec   :  { %v1596_v17 = vmax.f32 %v772_v40, 0.0  ;;  %4993 = vmatprep.mubr.bf16.mxu0 %v12690_v52  ;;  %v1598_v16 = vmax.f32 %v965_v33, 0.0  ;;  %5765 = vmatprep.mubr.bf16.mxu1 %v12690_v52 }
 0x1ed   :  { %v12817_v37 = vpack.c.bf16 %v1595_v3, %v1587_v46  ;;  %v12821_v2 = vpack.c.bf16 %v1597_v0, %v1589_v57  ;;  %v15260_v57 = vsub.s32 5, %v12243_v47 }
 0x1ee   :  { %v12823_v29 = vpack.c.bf16 %v1596_v17, %v1588_v26  ;;  %v775_v45 = vpop.f32.mrb[60].mxu0  ;;  %v12826_v20 = vpack.c.bf16 %v1598_v16, %v1590_v38  ;;  %v968_v49 = vpop.f32.mrb[60].mxu1  ;;  %v11740_v38 = vld [vmem:[#allocation7] sm:$0xff] }
 0x1ef   :  { %15257 = vst [vmem:[#allocation73_spill] sm:$0xff] %v12817_v37  ;;  %15258 = vst [vmem:[#allocation74_spill] sm:$0xff] %v12821_v2  ;;  %v776_v13 = vadd.f32 %v775_v45, %v12255_v39  ;;  %v777_v40 = vpop.f32.mrb[61].mxu0  ;;  %v969_v7 = vadd.f32 %v968_v49, %v12260_v48  ;;  %v970_v3 = vpop.f32.mrb[61].mxu1  ;;  %v12836_v16 = vrot.slane %v11740_v38, %v15037_v18 }
 0x1f0   :  { %15259 = vst [vmem:[#allocation75_spill] sm:$0xff] %v12823_v29  ;;  %v778_v46 = vadd.f32 %v777_v40, %v12264_v55  ;;  %v779_v33 = vpop.f32.mrb[62].mxu0  ;;  %v971_v26 = vadd.f32 %v970_v3, %v12269_v56  ;;  %v972_v17 = vpop.f32.mrb[62].mxu1  ;;  %v12843_v3 = vrot.slane %v11740_v38, %v15260_v57 }
 0x1f1   :  { %v780_v0 = vadd.f32 %v779_v33, %v12255_v39  ;;  %v781_v41 = vpop.f32.mrb[63].mxu0  ;;  %v1605_v49 = vmax.f32 %v969_v7, 0.0  ;;  %v973_v40 = vadd.f32 %v972_v17, %v12260_v48  ;;  %v974_v62 = vpop.f32.mrb[63].mxu1  ;;  %v1603_v39 = vmax.f32 %v776_v13, 0.0 }
 0x1f2   :  { %v782_v52 = vadd.f32 %v781_v41, %v12264_v55  ;;  %v1606_v33 = vmax.f32 %v971_v26, 0.0  ;;  %v975_v53 = vadd.f32 %v974_v62, %v12269_v56  ;;  %v1604_v18 = vmax.f32 %v778_v46, 0.0 }
 0x1f3   :  { %v1611_v61 = vmax.f32 %v780_v0, 0.0  ;;  %4994 = vmatmul.mubr.bf16.gmra.mrb[168].mxu0 %v12681_v11  ;;  %v1613_v4 = vmax.f32 %v973_v40, 0.0  ;;  %5766 = vmatmul.mubr.bf16.gmra.mrb[168].mxu1 %v12681_v11  ;;  %v15261_v48 = vsub.s32 6, %v12243_v47  ;;  %v15263_v56 = vsub.s32 7, %v12243_v47 }
 0x1f4   :  { %v1612_v45 = vmax.f32 %v782_v52, 0.0  ;;  %5003 = vmatprep.mubr.bf16.mxu0 %v12740_v43  ;;  %v1614_v13 = vmax.f32 %v975_v53, 0.0  ;;  %5775 = vmatprep.mubr.bf16.mxu1 %v12740_v43 }
 0x1f5   :  { %v12851_v55 = vrot.slane %v11740_v38, %v15261_v48  ;;  %v12853_v41 = vpack.c.bf16 %v1611_v61, %v1603_v39  ;;  %v12858_v62 = vrot.slane %v11740_v38, %v15263_v56  ;;  %v12860_v7 = vpack.c.bf16 %v1613_v4, %v1605_v49 }
 0x1f6   :  { %v12862_v52 = vpack.c.bf16 %v1612_v45, %v1604_v18  ;;  %v1011_v46 = vpop.f32.mrb[64].mxu0  ;;  %v12864_v57 = vpack.c.bf16 %v1614_v13, %v1606_v33  ;;  %v1204_v0 = vpop.f32.mrb[64].mxu1 }
 0x1f7   :  { %15262 = vst [vmem:[#allocation76_spill] sm:$0xff] %v12853_v41  ;;  %15264 = vst [vmem:[#allocation77_spill] sm:$0xff] %v12860_v7  ;;  %v1012_v26 = vadd.f32 %v1011_v46, %v12836_v16  ;;  %v1013_v17 = vpop.f32.mrb[65].mxu0  ;;  %v1205_v61 = vadd.f32 %v1204_v0, %v12851_v55  ;;  %v1206_v40 = vpop.f32.mrb[65].mxu1 }
 0x1f8   :  { %15265 = vst [vmem:[#allocation78_spill] sm:$0xff] %v12862_v52  ;;  %15266 = vst [vmem:[#allocation79_spill] sm:$0xff] %v12864_v57  ;;  %v1014_v53 = vadd.f32 %v1013_v17, %v12843_v3  ;;  %v1015_v39 = vpop.f32.mrb[66].mxu0  ;;  %v1207_v38 = vadd.f32 %v1206_v40, %v12858_v62  ;;  %v1208_v49 = vpop.f32.mrb[66].mxu1 }
 0x1f9   :  { %v1016_v4 = vadd.f32 %v1015_v39, %v12836_v16  ;;  %v1017_v18 = vpop.f32.mrb[67].mxu0  ;;  %v1369_v45 = vmax.f32 %v1205_v61, 0.0  ;;  %v1209_v33 = vadd.f32 %v1208_v49, %v12851_v55  ;;  %v1210_v13 = vpop.f32.mrb[67].mxu1  ;;  %v1367_v56 = vmax.f32 %v1012_v26, 0.0 }
 0x1fa   :  { %v1018_v48 = vadd.f32 %v1017_v18, %v12843_v3  ;;  %v1370_v46 = vmax.f32 %v1207_v38, 0.0  ;;  %v1211_v0 = vadd.f32 %v1210_v13, %v12858_v62  ;;  %v1368_v17 = vmax.f32 %v1014_v53, 0.0 }
 0x1fb   :  { %v1375_v43 = vmax.f32 %v1016_v4, 0.0  ;;  %5004 = vmatmul.mubr.bf16.gmra.mrb[172].mxu0 %v12731_v35  ;;  %v1377_v47 = vmax.f32 %v1209_v33, 0.0  ;;  %5776 = vmatmul.mubr.bf16.gmra.mrb[172].mxu1 %v12731_v35 }
 0x1fc   :  { %v1376_v40 = vmax.f32 %v1018_v48, 0.0  ;;  %5013 = vmatprep.mubr.bf16.mxu0 %v12778_v36  ;;  %v1378_v39 = vmax.f32 %v1211_v0, 0.0  ;;  %5785 = vmatprep.mubr.bf16.mxu1 %v12778_v36 }
 0x1fd   :  { %v12877_v61 = vpack.c.bf16 %v1375_v43, %v1367_v56  ;;  %v12880_v49 = vpack.c.bf16 %v1377_v47, %v1369_v45 }
 0x1fe   :  { %v12882_v26 = vpack.c.bf16 %v1376_v40, %v1368_v17  ;;  %v1021_v38 = vpop.f32.mrb[68].mxu0  ;;  %v12884_v4 = vpack.c.bf16 %v1378_v39, %v1370_v46  ;;  %v1214_v18 = vpop.f32.mrb[68].mxu1 }
 0x1ff   :  { %15267 = vst [vmem:[#allocation80_spill] sm:$0xff] %v12877_v61  ;;  %15268 = vst [vmem:[#allocation81_spill] sm:$0xff] %v12880_v49  ;;  %v1022_v53 = vadd.f32 %v1021_v38, %v12836_v16  ;;  %v1023_v33 = vpop.f32.mrb[69].mxu0  ;;  %v1215_v48 = vadd.f32 %v1214_v18, %v12851_v55  ;;  %v1216_v43 = vpop.f32.mrb[69].mxu1 }
 0x200   :  { %15269 = vst [vmem:[#allocation82_spill] sm:$0xff] %v12882_v26  ;;  %15270 = vst [vmem:[#allocation83_spill] sm:$0xff] %v12884_v4  ;;  %v1024_v13 = vadd.f32 %v1023_v33, %v12843_v3  ;;  %v1025_v56 = vpop.f32.mrb[70].mxu0  ;;  %v1217_v0 = vadd.f32 %v1216_v43, %v12858_v62  ;;  %v1218_v45 = vpop.f32.mrb[70].mxu1 }
 0x201   :  { %v1026_v47 = vadd.f32 %v1025_v56, %v12836_v16  ;;  %v1027_v17 = vpop.f32.mrb[71].mxu0  ;;  %v1385_v40 = vmax.f32 %v1215_v48, 0.0  ;;  %v1219_v46 = vadd.f32 %v1218_v45, %v12851_v55  ;;  %v1220_v38 = vpop.f32.mrb[71].mxu1  ;;  %v1383_v36 = vmax.f32 %v1022_v53, 0.0 }
 0x202   :  { %v1028_v39 = vadd.f32 %v1027_v17, %v12843_v3  ;;  %v1386_v35 = vmax.f32 %v1217_v0, 0.0  ;;  %v1221_v18 = vadd.f32 %v1220_v38, %v12858_v62  ;;  %v1384_v33 = vmax.f32 %v1024_v13, 0.0 }
 0x203   :  { %v1391_v11 = vmax.f32 %v1026_v47, 0.0  ;;  %5014 = vmatmul.mubr.bf16.gmra.mrb[176].mxu0 %v12770_v10  ;;  %v1393_v42 = vmax.f32 %v1219_v46, 0.0  ;;  %5786 = vmatmul.mubr.bf16.gmra.mrb[176].mxu1 %v12770_v10 }
 0x204   :  { %v1392_v43 = vmax.f32 %v1028_v39, 0.0  ;;  %5023 = vmatprep.mubr.bf16.mxu0 %v12802_v28  ;;  %v1394_v56 = vmax.f32 %v1221_v18, 0.0  ;;  %5795 = vmatprep.mubr.bf16.mxu1 %v12802_v28 }
 0x205   :  { %v12897_v48 = vpack.c.bf16 %v1391_v11, %v1383_v36  ;;  %v12900_v45 = vpack.c.bf16 %v1393_v42, %v1385_v40 }
 0x206   :  { %v12902_v53 = vpack.c.bf16 %v1392_v43, %v1384_v33  ;;  %v1031_v0 = vpop.f32.mrb[72].mxu0  ;;  %v12904_v47 = vpack.c.bf16 %v1394_v56, %v1386_v35  ;;  %v1224_v17 = vpop.f32.mrb[72].mxu1 }
 0x207   :  { %15271 = vst [vmem:[#allocation84_spill] sm:$0xff] %v12897_v48  ;;  %15272 = vst [vmem:[#allocation85_spill] sm:$0xff] %v12900_v45  ;;  %v1032_v13 = vadd.f32 %v1031_v0, %v12836_v16  ;;  %v1033_v46 = vpop.f32.mrb[73].mxu0  ;;  %v1225_v39 = vadd.f32 %v1224_v17, %v12851_v55  ;;  %v1226_v11 = vpop.f32.mrb[73].mxu1 }
 0x208   :  { %15273 = vst [vmem:[#allocation86_spill] sm:$0xff] %v12902_v53  ;;  %15274 = vst [vmem:[#allocation87_spill] sm:$0xff] %v12904_v47  ;;  %v1034_v38 = vadd.f32 %v1033_v46, %v12843_v3  ;;  %v1035_v36 = vpop.f32.mrb[74].mxu0  ;;  %v1227_v18 = vadd.f32 %v1226_v11, %v12858_v62  ;;  %v1228_v40 = vpop.f32.mrb[74].mxu1 }
 0x209   :  { %v1036_v42 = vadd.f32 %v1035_v36, %v12836_v16  ;;  %v1037_v33 = vpop.f32.mrb[75].mxu0  ;;  %v1401_v43 = vmax.f32 %v1225_v39, 0.0  ;;  %v1229_v35 = vadd.f32 %v1228_v40, %v12851_v55  ;;  %v1230_v0 = vpop.f32.mrb[75].mxu1  ;;  %v1399_v28 = vmax.f32 %v1032_v13, 0.0 }
 0x20a   :  { %v1038_v56 = vadd.f32 %v1037_v33, %v12843_v3  ;;  %v1402_v10 = vmax.f32 %v1227_v18, 0.0  ;;  %v1231_v17 = vadd.f32 %v1230_v0, %v12858_v62  ;;  %v1400_v46 = vmax.f32 %v1034_v38, 0.0 }
 0x20b   :  { %v1407_v45 = vmax.f32 %v1036_v42, 0.0  ;;  %5024 = vmatmul.mubr.bf16.gmra.mrb[180].mxu0 %v12797_v31  ;;  %v1409_v47 = vmax.f32 %v1229_v35, 0.0  ;;  %5796 = vmatmul.mubr.bf16.gmra.mrb[180].mxu1 %v12797_v31 }
 0x20c   :  { %v1408_v11 = vmax.f32 %v1038_v56, 0.0  ;;  %5033 = vmatprep.mubr.bf16.mxu0 %v12823_v29  ;;  %v1410_v36 = vmax.f32 %v1231_v17, 0.0  ;;  %5805 = vmatprep.mubr.bf16.mxu1 %v12823_v29 }
 0x20d   :  { %v12917_v39 = vpack.c.bf16 %v1407_v45, %v1399_v28  ;;  %v12920_v40 = vpack.c.bf16 %v1409_v47, %v1401_v43 }
 0x20e   :  { %v12922_v13 = vpack.c.bf16 %v1408_v11, %v1400_v46  ;;  %v1041_v18 = vpop.f32.mrb[76].mxu0  ;;  %v12924_v42 = vpack.c.bf16 %v1410_v36, %v1402_v10  ;;  %v1234_v33 = vpop.f32.mrb[76].mxu1 }
 0x20f   :  { %15275 = vst [vmem:[#allocation88_spill] sm:$0xff] %v12917_v39  ;;  %15276 = vst [vmem:[#allocation89_spill] sm:$0xff] %v12920_v40  ;;  %v1042_v38 = vadd.f32 %v1041_v18, %v12836_v16  ;;  %v1043_v35 = vpop.f32.mrb[77].mxu0  ;;  %v1235_v56 = vadd.f32 %v1234_v33, %v12851_v55  ;;  %v1236_v28 = vpop.f32.mrb[77].mxu1  ;;  %v15288_v39 = vcombine.low %v12437_v24, %v12439_v51  ;;  %v13026_v51 = vld [vmem:[#allocation8 + $0x8c0] sm:$0xff] }
 0x210   :  { %15277 = vst [vmem:[#allocation90_spill] sm:$0xff] %v12922_v13  ;;  %15278 = vst [vmem:[#allocation91_spill] sm:$0xff] %v12924_v42  ;;  %v1044_v0 = vadd.f32 %v1043_v35, %v12843_v3  ;;  %v1045_v45 = vpop.f32.mrb[78].mxu0  ;;  %v1237_v17 = vadd.f32 %v1236_v28, %v12858_v62  ;;  %v1238_v43 = vpop.f32.mrb[78].mxu1  ;;  %v15291_v24 = vcombine.low %v12441_v60, %v12449_v12  ;;  %v13037_v60 = vld [vmem:[#allocation8 + $0x8c8] sm:$0xff] }
 0x211   :  { %v1046_v47 = vadd.f32 %v1045_v45, %v12836_v16  ;;  %v1047_v46 = vpop.f32.mrb[79].mxu0  ;;  %v1417_v11 = vmax.f32 %v1235_v56, 0.0  ;;  %v1239_v10 = vadd.f32 %v1238_v43, %v12851_v55  ;;  %v1240_v18 = vpop.f32.mrb[79].mxu1  ;;  %v1415_v29 = vmax.f32 %v1042_v38, 0.0  ;;  %v13039_v12 = vld [vmem:[#allocation8 + $0x8e8] sm:$0xff] }
 0x212   :  { %v1048_v36 = vadd.f32 %v1047_v46, %v12843_v3  ;;  %v1418_v31 = vmax.f32 %v1237_v17, 0.0  ;;  %v1241_v33 = vadd.f32 %v1240_v18, %v12858_v62  ;;  %v1416_v35 = vmax.f32 %v1044_v0, 0.0 }
 0x213   :  { %v1423_v40 = vmax.f32 %v1046_v47, 0.0  ;;  %5034 = vmatmul.mubr.bf16.gmra.mrb[184].mxu0 %v12817_v37  ;;  %v1425_v42 = vmax.f32 %v1239_v10, 0.0  ;;  %5806 = vmatmul.mubr.bf16.gmra.mrb[184].mxu1 %v12817_v37 }
 0x214   :  { %v1424_v28 = vmax.f32 %v1048_v36, 0.0  ;;  %5043 = vmatprep.mubr.bf16.mxu0 %v12862_v52  ;;  %v1426_v45 = vmax.f32 %v1241_v33, 0.0  ;;  %5815 = vmatprep.mubr.bf16.mxu1 %v12862_v52 }
 0x215   :  { %v12937_v56 = vpack.c.bf16 %v1423_v40, %v1415_v29  ;;  %v12940_v43 = vpack.c.bf16 %v1425_v42, %v1417_v11 }
 0x216   :  { %v12942_v38 = vpack.c.bf16 %v1424_v28, %v1416_v35  ;;  %v1051_v17 = vpop.f32.mrb[80].mxu0  ;;  %v12944_v47 = vpack.c.bf16 %v1426_v45, %v1418_v31  ;;  %v1244_v46 = vpop.f32.mrb[80].mxu1 }
 0x217   :  { %15279 = vst [vmem:[#allocation92_spill] sm:$0xff] %v12937_v56  ;;  %15280 = vst [vmem:[#allocation93_spill] sm:$0xff] %v12940_v43  ;;  %v1052_v0 = vadd.f32 %v1051_v17, %v12836_v16  ;;  %v1053_v10 = vpop.f32.mrb[81].mxu0  ;;  %v1245_v36 = vadd.f32 %v1244_v46, %v12851_v55  ;;  %v1246_v29 = vpop.f32.mrb[81].mxu1 }
 0x218   :  { %15281 = vst [vmem:[#allocation94_spill] sm:$0xff] %v12942_v38  ;;  %15282 = vst [vmem:[#allocation95_spill] sm:$0xff] %v12944_v47  ;;  %v1054_v18 = vadd.f32 %v1053_v10, %v12843_v3  ;;  %v1055_v40 = vpop.f32.mrb[82].mxu0  ;;  %v1247_v33 = vadd.f32 %v1246_v29, %v12858_v62  ;;  %v1248_v11 = vpop.f32.mrb[82].mxu1  ;;  %v12999_v38 = vld [vmem:[#allocation8 + $0x888] sm:$0xff] }
 0x219   :  { %v1056_v42 = vadd.f32 %v1055_v40, %v12836_v16  ;;  %v1057_v35 = vpop.f32.mrb[83].mxu0  ;;  %v1433_v28 = vmax.f32 %v1245_v36, 0.0  ;;  %v1249_v31 = vadd.f32 %v1248_v11, %v12851_v55  ;;  %v1250_v17 = vpop.f32.mrb[83].mxu1  ;;  %v1431_v52 = vmax.f32 %v1052_v0, 0.0 }
 0x21a   :  { %v1058_v45 = vadd.f32 %v1057_v35, %v12843_v3  ;;  %v1434_v37 = vmax.f32 %v1247_v33, 0.0  ;;  %v1251_v46 = vadd.f32 %v1250_v17, %v12858_v62  ;;  %v1432_v10 = vmax.f32 %v1054_v18, 0.0  ;;  %v12966_v35 = vld [vmem:[#allocation8 + $0x860] sm:$0xff] }
 0x21b   :  { %v1439_v43 = vmax.f32 %v1056_v42, 0.0  ;;  %5044 = vmatmul.mubr.bf16.gmra.mrb[188].mxu0 %v12853_v41  ;;  %v1441_v47 = vmax.f32 %v1249_v31, 0.0  ;;  %5816 = vmatmul.mubr.bf16.gmra.mrb[188].mxu1 %v12853_v41  ;;  %v12964_v42 = vld [vmem:[#allocation8 + $0x840] sm:$0xff] }
 0x21c   :  { %v1440_v29 = vmax.f32 %v1058_v45, 0.0  ;;  %5086 = vmatprep.mubr.bf16.mxu0 %v12290_v23  ;;  %v1442_v40 = vmax.f32 %v1251_v46, 0.0  ;;  %5858 = vmatprep.mubr.bf16.mxu1 %v12290_v23  ;;  %v9877_v41 = vcombine.high %v12964_v42, %v12966_v35 }
 0x21d   :  { %v12957_v36 = vpack.c.bf16 %v1439_v43, %v1431_v52  ;;  %v12960_v11 = vpack.c.bf16 %v1441_v47, %v1433_v28  ;;  %v12971_v52 = vld [vmem:[#allocation8 + $0x848] sm:$0xff] }
 0x21e   :  { %v12962_v0 = vpack.c.bf16 %v1440_v29, %v1432_v10  ;;  %v1061_v33 = vpop.f32.mrb[84].mxu0  ;;  %v12968_v18 = vpack.c.bf16 %v1442_v40, %v1434_v37  ;;  %v1254_v45 = vpop.f32.mrb[84].mxu1  ;;  %v12973_v43 = vld [vmem:[#allocation8 + $0x868] sm:$0xff] }
 0x21f   :  { %15283 = vst [vmem:[#allocation96_spill] sm:$0xff] %v12957_v36  ;;  %15284 = vst [vmem:[#allocation97_spill] sm:$0xff] %v12960_v11  ;;  %v1062_v31 = vadd.f32 %v1061_v33, %v12836_v16  ;;  %v1063_v17 = vpop.f32.mrb[85].mxu0  ;;  %v1255_v47 = vadd.f32 %v1254_v45, %v12851_v55  ;;  %v1256_v46 = vpop.f32.mrb[85].mxu1  ;;  %v9876_v33 = vcombine.low %v12964_v42, %v12966_v35  ;;  %v12993_v42 = vld [vmem:[#allocation8 + $0xc00] sm:$0xff] }
 0x220   :  { %15285 = vst [vmem:[#allocation98_spill] sm:$0xff] %v12962_v0  ;;  %15286 = vst [vmem:[#allocation99_spill] sm:$0xff] %v12968_v18  ;;  %v1064_v28 = vadd.f32 %v1063_v17, %v12843_v3  ;;  %v1065_v10 = vpop.f32.mrb[86].mxu0  ;;  %v1257_v29 = vadd.f32 %v1256_v46, %v12858_v62  ;;  %v1258_v37 = vpop.f32.mrb[86].mxu1  ;;  %v9879_v49 = vcombine.high %v12971_v52, %v12973_v43  ;;  %v12987_v46 = vld [vmem:[#allocation8 + $0x880] sm:$0xff] }
 0x221   :  { %v1066_v23 = vadd.f32 %v1065_v10, %v12836_v16  ;;  %v1067_v40 = vpop.f32.mrb[87].mxu0  ;;  %v1449_v11 = vmax.f32 %v1255_v47, 0.0  ;;  %v1259_v18 = vadd.f32 %v1258_v37, %v12851_v55  ;;  %v1260_v17 = vpop.f32.mrb[87].mxu1  ;;  %v12989_v10 = vld [vmem:[#allocation8 + $0x8a0] sm:$0xff]  ;;  %v1447_v4 = vmax.f32 %v1062_v31, 0.0  ;;  %v13001_v31 = vld [vmem:[#allocation8 + $0x8a8] sm:$0xff] }
 0x222   :  { %v1068_v45 = vadd.f32 %v1067_v40, %v12843_v3  ;;  %v1450_v36 = vmax.f32 %v1257_v29, 0.0  ;;  %v1261_v56 = vadd.f32 %v1260_v17, %v12858_v62  ;;  %v12995_v35 = vld [vmem:[#allocation8 + $0xc20] sm:$0xff]  ;;  %v1448_v47 = vmax.f32 %v1064_v28, 0.0 }
 0x223   :  { %v1455_v0 = vmax.f32 %v1066_v23, 0.0  ;;  %5087 = vmatmul.mubr.bf16.vlgmr.msra.gmra.mrb[128].mxu0 %v12286_v22  ;;  %v1457_v37 = vmax.f32 %v1259_v18, 0.0  ;;  %5859 = vmatmul.mubr.bf16.vlgmr.msra.gmra.mrb[128].mxu1 %v12286_v22  ;;  %v9878_v18 = vcombine.low %v12971_v52, %v12973_v43  ;;  %v9885_v28 = vcombine.high %v12987_v46, %v12989_v10  ;;  %v13017_v22 = vld [vmem:[#allocation8 + $0xc28] sm:$0xff] }
 0x224   :  { %v1456_v40 = vmax.f32 %v1068_v45, 0.0  ;;  %5096 = vmatprep.mubr.bf16.mxu0 %v12310_v9  ;;  %v1458_v17 = vmax.f32 %v1261_v56, 0.0  ;;  %5248 = vmatpush1.bf16.msra.mxu0 %v15288_v39  ;;  %v13015_v45 = vld [vmem:[#allocation8 + $0xc08] sm:$0xff]  ;;  %v13028_v39 = vld [vmem:[#allocation8 + $0x8e0] sm:$0xff] }
 0x225   :  { %v13005_v29 = vpack.c.bf16 %v1455_v0, %v1447_v4  ;;  %5868 = vmatprep.mubr.bf16.mxu1 %v12310_v9  ;;  %v13019_v23 = vpack.c.bf16 %v1457_v37, %v1449_v11  ;;  %6020 = vmatpush1.bf16.msra.mxu1 %v15291_v24  ;;  %v9887_v37 = vcombine.high %v12999_v38, %v13001_v31 }
 0x226   :  { %v13021_v4 = vpack.c.bf16 %v1456_v40, %v1448_v47  ;;  %v1071_v56 = vpop.f32.mrb[88].mxu0  ;;  %5249 = vmatprep.subr.bf16.mxu0 %v9877_v41  ;;  %v13032_v52 = vpack.c.bf16 %v1458_v17, %v1450_v36  ;;  %v1264_v43 = vpop.f32.mrb[88].mxu1  ;;  %6021 = vmatprep.subr.bf16.mxu1 %v9879_v49  ;;  %v9884_v36 = vcombine.low %v12987_v46, %v12989_v10 }
 0x227   :  { %15287 = vst [vmem:[#allocation100_spill] sm:$0xff] %v13005_v29  ;;  %15289 = vst [vmem:[#allocation101_spill] sm:$0xff] %v13019_v23  ;;  %v1072_v11 = vadd.f32 %v1071_v56, %v12836_v16  ;;  %v1073_v47 = vpop.f32.mrb[89].mxu0  ;;  %v1265_v41 = vadd.f32 %v1264_v43, %v12851_v55  ;;  %v1266_v24 = vpop.f32.mrb[89].mxu1  ;;  %v9886_v23 = vcombine.low %v12999_v38, %v13001_v31  ;;  %v13057_v38 = vld [vmem:[#allocation8 + $0x900] sm:$0xff] }
 0x228   :  { %15290 = vst [vmem:[#allocation102_spill] sm:$0xff] %v13021_v4  ;;  %15292 = vst [vmem:[#allocation103_spill] sm:$0xff] %v13032_v52  ;;  %v1074_v40 = vadd.f32 %v1073_v47, %v12843_v3  ;;  %v1075_v0 = vpop.f32.mrb[90].mxu0  ;;  %v1267_v17 = vadd.f32 %v1266_v24, %v12858_v62  ;;  %v1268_v56 = vpop.f32.mrb[90].mxu1  ;;  %5250 = vmatpush1.bf16.msra.mxu0 %v9876_v33  ;;  %v9893_v43 = vcombine.high %v13026_v51, %v13028_v39  ;;  %v13059_v31 = vld [vmem:[#allocation8 + $0x920] sm:$0xff] }
 0x229   :  { %v1076_v49 = vadd.f32 %v1075_v0, %v12836_v16  ;;  %v1077_v9 = vpop.f32.mrb[91].mxu0  ;;  %v1465_v52 = vmax.f32 %v1265_v41, 0.0  ;;  %v1269_v47 = vadd.f32 %v1268_v56, %v12851_v55  ;;  %v1270_v4 = vpop.f32.mrb[91].mxu1  ;;  %6022 = vmatpush1.bf16.msra.mxu1 %v9878_v18  ;;  %5251 = vmatprep.subr.bf16.mxu0 %v9885_v28  ;;  %v9895_v46 = vcombine.high %v13037_v60, %v13039_v12  ;;  %v13063_v18 = vld [vmem:[#allocation8 + $0x908] sm:$0xff] }
 0x22a   :  { %v1078_v29 = vadd.f32 %v1077_v9, %v12843_v3  ;;  %v1463_v10 = vmax.f32 %v1072_v11, 0.0  ;;  %v1466_v0 = vmax.f32 %v1267_v17, 0.0  ;;  %v1271_v24 = vadd.f32 %v1270_v4, %v12858_v62  ;;  %6023 = vmatprep.subr.bf16.mxu1 %v9887_v37  ;;  %v13065_v28 = vld [vmem:[#allocation8 + $0x928] sm:$0xff] }
 0x22b   :  { %v1471_v33 = vmax.f32 %v1076_v49, 0.0  ;;  %5097 = vmatmul.mubr.bf16.gmra.mrb[132].mxu0 %v12306_v6  ;;  %v1464_v41 = vmax.f32 %v1074_v40, 0.0  ;;  %v1473_v9 = vmax.f32 %v1269_v47, 0.0  ;;  %5869 = vmatmul.mubr.bf16.gmra.mrb[132].mxu1 %v12306_v6  ;;  %v9892_v37 = vcombine.low %v13026_v51, %v13028_v39 }
 0x22c   :  { %v1472_v56 = vmax.f32 %v1078_v29, 0.0  ;;  %5106 = vmatprep.mubr.bf16.mxu0 %v12330_v50  ;;  %v1474_v4 = vmax.f32 %v1271_v24, 0.0  ;;  %5878 = vmatprep.mubr.bf16.mxu1 %v12330_v50  ;;  %v9894_v29 = vcombine.low %v13037_v60, %v13039_v12  ;;  %v9901_v47 = vcombine.high %v13057_v38, %v13059_v31  ;;  %v13089_v12 = vld [vmem:[#allocation8 + $0x948] sm:$0xff] }
 0x22d   :  { %v13067_v11 = vpack.c.bf16 %v1471_v33, %v1463_v10  ;;  %5252 = vmatpush1.bf16.msra.mxu0 %v9884_v36  ;;  %v13074_v40 = vpack.c.bf16 %v1473_v9, %v1465_v52  ;;  %6024 = vmatpush1.bf16.msra.mxu1 %v9886_v23  ;;  %v13080_v10 = vld [vmem:[#allocation8 + $0x940] sm:$0xff]  ;;  %v9903_v52 = vcombine.high %v13063_v18, %v13065_v28  ;;  %v13091_v23 = vld [vmem:[#allocation8 + $0x968] sm:$0xff] }
 0x22e   :  { %v13076_v17 = vpack.c.bf16 %v1472_v56, %v1464_v41  ;;  %v1081_v49 = vpop.f32.mrb[92].mxu0  ;;  %5253 = vmatprep.subr.bf16.mxu0 %v9893_v43  ;;  %v13082_v33 = vld [vmem:[#allocation8 + $0x960] sm:$0xff]  ;;  %v13084_v36 = vpack.c.bf16 %v1474_v4, %v1466_v0  ;;  %v1274_v39 = vpop.f32.mrb[92].mxu1  ;;  %6025 = vmatprep.subr.bf16.mxu1 %v9895_v46  ;;  %v9900_v0 = vcombine.low %v13057_v38, %v13059_v31 }
 0x22f   :  { %15293 = vst [vmem:[#allocation104_spill] sm:$0xff] %v13074_v40  ;;  %v1082_v51 = vadd.f32 %v1081_v49, %v12836_v16  ;;  %v1083_v60 = vpop.f32.mrb[93].mxu0  ;;  %v1275_v43 = vadd.f32 %v1274_v39, %v12851_v55  ;;  %v1276_v41 = vpop.f32.mrb[93].mxu1  ;;  %v9902_v50 = vcombine.low %v13063_v18, %v13065_v28  ;;  %v9909_v39 = vcombine.high %v13080_v10, %v13082_v33  ;;  %v13109_v18 = vld [vmem:[#allocation8 + $0x980] sm:$0xff] }
 0x230   :  { %15294 = vst [vmem:[#allocation105_spill] sm:$0xff] %v13084_v36  ;;  %v1084_v24 = vadd.f32 %v1083_v60, %v12843_v3  ;;  %v1085_v9 = vpop.f32.mrb[94].mxu0  ;;  %v1277_v56 = vadd.f32 %v1276_v41, %v12858_v62  ;;  %v1278_v4 = vpop.f32.mrb[94].mxu1  ;;  %v9911_v38 = vcombine.high %v13089_v12, %v13091_v23  ;;  %v13111_v28 = vld [vmem:[#allocation8 + $0x9a0] sm:$0xff] }
 0x231   :  { %v1086_v46 = vadd.f32 %v1085_v9, %v12836_v16  ;;  %v1087_v49 = vpop.f32.mrb[95].mxu0  ;;  %5254 = vmatpush1.bf16.msra.mxu0 %v9892_v37  ;;  %v1481_v6 = vmax.f32 %v1275_v43, 0.0  ;;  %v1279_v60 = vadd.f32 %v1278_v4, %v12851_v55  ;;  %v1280_v36 = vpop.f32.mrb[95].mxu1  ;;  %6026 = vmatpush1.bf16.msra.mxu1 %v9894_v29  ;;  %v1479_v31 = vmax.f32 %v1082_v51, 0.0  ;;  %v13115_v29 = vld [vmem:[#allocation8 + $0x988] sm:$0xff] }
 0x232   :  { %v1088_v40 = vadd.f32 %v1087_v49, %v12843_v3  ;;  %5255 = vmatprep.subr.bf16.mxu0 %v9901_v47  ;;  %v1482_v41 = vmax.f32 %v1277_v56, 0.0  ;;  %v1281_v9 = vadd.f32 %v1280_v36, %v12858_v62  ;;  %6027 = vmatprep.subr.bf16.mxu1 %v9903_v52  ;;  %v1480_v43 = vmax.f32 %v1084_v24, 0.0  ;;  %v13117_v47 = vld [vmem:[#allocation8 + $0x9a8] sm:$0xff] }
 0x233   :  { %v1487_v37 = vmax.f32 %v1086_v46, 0.0  ;;  %5107 = vmatmul.mubr.bf16.gmra.mrb[136].mxu0 %v12326_v44  ;;  %v1489_v4 = vmax.f32 %v1279_v60, 0.0  ;;  %5879 = vmatmul.mubr.bf16.gmra.mrb[136].mxu1 %v12326_v44  ;;  %v9908_v52 = vcombine.low %v13080_v10, %v13082_v33  ;;  %v9917_v60 = vcombine.high %v13109_v18, %v13111_v28 }
 0x234   :  { %v1488_v49 = vmax.f32 %v1088_v40, 0.0  ;;  %5116 = vmatprep.mubr.bf16.mxu0 %v12350_v14  ;;  %v1490_v36 = vmax.f32 %v1281_v9, 0.0  ;;  %5888 = vmatprep.mubr.bf16.mxu1 %v12350_v14  ;;  %v9910_v40 = vcombine.low %v13089_v12, %v13091_v23  ;;  %v13141_v23 = vld [vmem:[#allocation8 + $0x9c8] sm:$0xff]  ;;  %v9918_v14 = vcombine.low %v13115_v29, %v13117_v47 }
 0x235   :  { %v13119_v51 = vpack.c.bf16 %v1487_v37, %v1479_v31  ;;  %5256 = vmatpush1.bf16.msra.mxu0 %v9900_v0  ;;  %v13126_v24 = vpack.c.bf16 %v1489_v4, %v1481_v6  ;;  %6028 = vmatpush1.bf16.msra.mxu1 %v9902_v50  ;;  %v13132_v31 = vld [vmem:[#allocation8 + $0x9c0] sm:$0xff]  ;;  %v9919_v6 = vcombine.high %v13115_v29, %v13117_v47  ;;  %v13143_v50 = vld [vmem:[#allocation8 + $0x9e8] sm:$0xff] }
 0x236   :  { %v13128_v56 = vpack.c.bf16 %v1488_v49, %v1480_v43  ;;  %v1091_v46 = vpop.f32.mrb[96].mxu0  ;;  %5257 = vmatprep.subr.bf16.mxu0 %v9909_v39  ;;  %v13134_v37 = vld [vmem:[#allocation8 + $0x9e0] sm:$0xff]  ;;  %v13136_v0 = vpack.c.bf16 %v1490_v36, %v1482_v41  ;;  %v1284_v33 = vpop.f32.mrb[96].mxu1  ;;  %6029 = vmatprep.subr.bf16.mxu1 %v9911_v38  ;;  %v9916_v41 = vcombine.low %v13109_v18, %v13111_v28 }
 0x237   :  { %15295 = vst [vmem:[#allocation106_spill] sm:$0xff] %v13126_v24  ;;  %v1092_v10 = vadd.f32 %v1091_v46, %v12836_v16  ;;  %v1093_v12 = vpop.f32.mrb[97].mxu0  ;;  %v1285_v39 = vadd.f32 %v1284_v33, %v12851_v55  ;;  %v1286_v43 = vpop.f32.mrb[97].mxu1  ;;  %v9925_v33 = vcombine.high %v13132_v31, %v13134_v37  ;;  %v9927_v18 = vcombine.high %v13141_v23, %v13143_v50  ;;  %v13161_v29 = vld [vmem:[#allocation8 + $0xa00] sm:$0xff] }
 0x238   :  { %15296 = vst [vmem:[#allocation107_spill] sm:$0xff] %v13136_v0  ;;  %v1094_v9 = vadd.f32 %v1093_v12, %v12843_v3  ;;  %v1095_v4 = vpop.f32.mrb[98].mxu0  ;;  %v1287_v49 = vadd.f32 %v1286_v43, %v12858_v62  ;;  %v1288_v36 = vpop.f32.mrb[98].mxu1  ;;  %v13163_v47 = vld [vmem:[#allocation8 + $0xa20] sm:$0xff] }
 0x239   :  { %v1096_v38 = vadd.f32 %v1095_v4, %v12836_v16  ;;  %v1097_v46 = vpop.f32.mrb[99].mxu0  ;;  %5258 = vmatpush1.bf16.msra.mxu0 %v9908_v52  ;;  %v1497_v44 = vmax.f32 %v1285_v39, 0.0  ;;  %v1289_v12 = vadd.f32 %v1288_v36, %v12851_v55  ;;  %v1290_v0 = vpop.f32.mrb[99].mxu1  ;;  %6030 = vmatpush1.bf16.msra.mxu1 %v9910_v40  ;;  %v1495_v28 = vmax.f32 %v1092_v10, 0.0  ;;  %v13167_v40 = vld [vmem:[#allocation8 + $0xa08] sm:$0xff] }
 0x23a   :  { %v1098_v24 = vadd.f32 %v1097_v46, %v12843_v3  ;;  %5259 = vmatprep.subr.bf16.mxu0 %v9917_v60  ;;  %v1498_v43 = vmax.f32 %v1287_v49, 0.0  ;;  %v1291_v4 = vadd.f32 %v1290_v0, %v12858_v62  ;;  %6031 = vmatprep.subr.bf16.mxu1 %v9919_v6  ;;  %v1496_v39 = vmax.f32 %v1094_v9, 0.0  ;;  %v13169_v60 = vld [vmem:[#allocation8 + $0xa28] sm:$0xff] }
 0x23b   :  { %v1503_v52 = vmax.f32 %v1096_v38, 0.0  ;;  %5117 = vmatmul.mubr.bf16.gmra.mrb[140].mxu0 %v12346_v30  ;;  %v1505_v36 = vmax.f32 %v1289_v12, 0.0  ;;  %5889 = vmatmul.mubr.bf16.gmra.mrb[140].mxu1 %v12346_v30  ;;  %v9924_v6 = vcombine.low %v13132_v31, %v13134_v37  ;;  %v9933_v12 = vcombine.high %v13161_v29, %v13163_v47 }
 0x23c   :  { %v1504_v46 = vmax.f32 %v1098_v24, 0.0  ;;  %5126 = vmatprep.mubr.bf16.mxu0 %v12374_v21  ;;  %v1506_v0 = vmax.f32 %v1291_v4, 0.0  ;;  %5898 = vmatprep.mubr.bf16.mxu1 %v12374_v21  ;;  %v9926_v24 = vcombine.low %v13141_v23, %v13143_v50  ;;  %v13193_v50 = vld [vmem:[#allocation8 + $0xa48] sm:$0xff]  ;;  %v9934_v21 = vcombine.low %v13167_v40, %v13169_v60 }
 0x23d   :  { %v13171_v10 = vpack.c.bf16 %v1503_v52, %v1495_v28  ;;  %5260 = vmatpush1.bf16.msra.mxu0 %v9916_v41  ;;  %v13178_v9 = vpack.c.bf16 %v1505_v36, %v1497_v44  ;;  %6032 = vmatpush1.bf16.msra.mxu1 %v9918_v14  ;;  %v13184_v28 = vld [vmem:[#allocation8 + $0xa40] sm:$0xff]  ;;  %v9935_v44 = vcombine.high %v13167_v40, %v13169_v60  ;;  %v13195_v14 = vld [vmem:[#allocation8 + $0xa68] sm:$0xff] }
 0x23e   :  { %v13180_v49 = vpack.c.bf16 %v1504_v46, %v1496_v39  ;;  %v1101_v38 = vpop.f32.mrb[100].mxu0  ;;  %5261 = vmatprep.subr.bf16.mxu0 %v9925_v33  ;;  %v13186_v52 = vld [vmem:[#allocation8 + $0xa60] sm:$0xff]  ;;  %v13188_v41 = vpack.c.bf16 %v1506_v0, %v1498_v43  ;;  %v1294_v37 = vpop.f32.mrb[100].mxu1  ;;  %6033 = vmatprep.subr.bf16.mxu1 %v9927_v18  ;;  %v9932_v43 = vcombine.low %v13161_v29, %v13163_v47 }
 0x23f   :  { %15297 = vst [vmem:[#allocation108_spill] sm:$0xff] %v13178_v9  ;;  %v1102_v31 = vadd.f32 %v1101_v38, %v12836_v16  ;;  %v1103_v23 = vpop.f32.mrb[101].mxu0  ;;  %v1295_v33 = vadd.f32 %v1294_v37, %v12851_v55  ;;  %v1296_v39 = vpop.f32.mrb[101].mxu1  ;;  %v9941_v37 = vcombine.high %v13184_v28, %v13186_v52  ;;  %v9943_v29 = vcombine.high %v13193_v50, %v13195_v14  ;;  %v13213_v40 = vld [vmem:[#allocation8 + $0xa80] sm:$0xff] }
 0x240   :  { %15298 = vst [vmem:[#allocation109_spill] sm:$0xff] %v13188_v41  ;;  %v1104_v4 = vadd.f32 %v1103_v23, %v12843_v3  ;;  %v1105_v36 = vpop.f32.mrb[102].mxu0  ;;  %v1297_v46 = vadd.f32 %v1296_v39, %v12858_v62  ;;  %v1298_v0 = vpop.f32.mrb[102].mxu1  ;;  %v13215_v60 = vld [vmem:[#allocation8 + $0xaa0] sm:$0xff] }
 0x241   :  { %v1106_v18 = vadd.f32 %v1105_v36, %v12836_v16  ;;  %v1107_v38 = vpop.f32.mrb[103].mxu0  ;;  %5262 = vmatpush1.bf16.msra.mxu0 %v9924_v6  ;;  %v1513_v30 = vmax.f32 %v1295_v33, 0.0  ;;  %v1299_v23 = vadd.f32 %v1298_v0, %v12851_v55  ;;  %v1300_v41 = vpop.f32.mrb[103].mxu1  ;;  %6034 = vmatpush1.bf16.msra.mxu1 %v9926_v24  ;;  %v1511_v47 = vmax.f32 %v1102_v31, 0.0  ;;  %v13219_v24 = vld [vmem:[#allocation8 + $0xa88] sm:$0xff] }
 0x242   :  { %v1108_v9 = vadd.f32 %v1107_v38, %v12843_v3  ;;  %5263 = vmatprep.subr.bf16.mxu0 %v9933_v12  ;;  %v1514_v39 = vmax.f32 %v1297_v46, 0.0  ;;  %v1301_v36 = vadd.f32 %v1300_v41, %v12858_v62  ;;  %6035 = vmatprep.subr.bf16.mxu1 %v9935_v44  ;;  %v1512_v33 = vmax.f32 %v1104_v4, 0.0  ;;  %v13221_v12 = vld [vmem:[#allocation8 + $0xaa8] sm:$0xff] }
 0x243   :  { %v1519_v6 = vmax.f32 %v1106_v18, 0.0  ;;  %5127 = vmatmul.mubr.bf16.gmra.mrb[144].mxu0 %v12366_v15  ;;  %v1521_v0 = vmax.f32 %v1299_v23, 0.0  ;;  %5899 = vmatmul.mubr.bf16.gmra.mrb[144].mxu1 %v12366_v15  ;;  %v9940_v44 = vcombine.low %v13184_v28, %v13186_v52  ;;  %v9949_v23 = vcombine.high %v13213_v40, %v13215_v60 }
 0x244   :  { %v1520_v38 = vmax.f32 %v1108_v9, 0.0  ;;  %5136 = vmatprep.mubr.bf16.mxu0 %v12430_v19  ;;  %v1522_v41 = vmax.f32 %v1301_v36, 0.0  ;;  %5908 = vmatprep.mubr.bf16.mxu1 %v12430_v19  ;;  %v9942_v9 = vcombine.low %v13193_v50, %v13195_v14  ;;  %v13245_v14 = vld [vmem:[#allocation8 + $0xac8] sm:$0xff]  ;;  %v9950_v19 = vcombine.low %v13219_v24, %v13221_v12 }
 0x245   :  { %v13223_v31 = vpack.c.bf16 %v1519_v6, %v1511_v47  ;;  %5264 = vmatpush1.bf16.msra.mxu0 %v9932_v43  ;;  %v13230_v4 = vpack.c.bf16 %v1521_v0, %v1513_v30  ;;  %6036 = vmatpush1.bf16.msra.mxu1 %v9934_v21  ;;  %v13236_v47 = vld [vmem:[#allocation8 + $0xac0] sm:$0xff]  ;;  %v9951_v30 = vcombine.high %v13219_v24, %v13221_v12  ;;  %v13247_v21 = vld [vmem:[#allocation8 + $0xae8] sm:$0xff] }
 0x246   :  { %v13232_v46 = vpack.c.bf16 %v1520_v38, %v1512_v33  ;;  %v1111_v18 = vpop.f32.mrb[104].mxu0  ;;  %5265 = vmatprep.subr.bf16.mxu0 %v9941_v37  ;;  %v13238_v6 = vld [vmem:[#allocation8 + $0xae0] sm:$0xff]  ;;  %v13240_v43 = vpack.c.bf16 %v1522_v41, %v1514_v39  ;;  %v1304_v52 = vpop.f32.mrb[104].mxu1  ;;  %6037 = vmatprep.subr.bf16.mxu1 %v9943_v29  ;;  %v9948_v39 = vcombine.low %v13213_v40, %v13215_v60 }
 0x247   :  { %15299 = vst [vmem:[#allocation110_spill] sm:$0xff] %v13230_v4  ;;  %v1112_v28 = vadd.f32 %v1111_v18, %v12836_v16  ;;  %v1113_v50 = vpop.f32.mrb[105].mxu0  ;;  %v1305_v37 = vadd.f32 %v1304_v52, %v12851_v55  ;;  %v1306_v33 = vpop.f32.mrb[105].mxu1  ;;  %v9957_v52 = vcombine.high %v13236_v47, %v13238_v6  ;;  %v9959_v40 = vcombine.high %v13245_v14, %v13247_v21  ;;  %v13265_v24 = vld [vmem:[#allocation8 + $0xb00] sm:$0xff] }
 0x248   :  { %15300 = vst [vmem:[#allocation111_spill] sm:$0xff] %v13240_v43  ;;  %v1114_v36 = vadd.f32 %v1113_v50, %v12843_v3  ;;  %v1115_v0 = vpop.f32.mrb[106].mxu0  ;;  %v1307_v38 = vadd.f32 %v1306_v33, %v12858_v62  ;;  %v1308_v41 = vpop.f32.mrb[106].mxu1  ;;  %v13267_v12 = vld [vmem:[#allocation8 + $0xb20] sm:$0xff] }
 0x249   :  { %v1116_v29 = vadd.f32 %v1115_v0, %v12836_v16  ;;  %v1117_v18 = vpop.f32.mrb[107].mxu0  ;;  %5266 = vmatpush1.bf16.msra.mxu0 %v9940_v44  ;;  %v1529_v15 = vmax.f32 %v1305_v37, 0.0  ;;  %v1309_v50 = vadd.f32 %v1308_v41, %v12851_v55  ;;  %v1310_v43 = vpop.f32.mrb[107].mxu1  ;;  %6038 = vmatpush1.bf16.msra.mxu1 %v9942_v9  ;;  %v1527_v60 = vmax.f32 %v1112_v28, 0.0  ;;  %v13271_v9 = vld [vmem:[#allocation8 + $0xb08] sm:$0xff] }
 0x24a   :  { %v1118_v4 = vadd.f32 %v1117_v18, %v12843_v3  ;;  %5267 = vmatprep.subr.bf16.mxu0 %v9949_v23  ;;  %v1530_v33 = vmax.f32 %v1307_v38, 0.0  ;;  %v1311_v0 = vadd.f32 %v1310_v43, %v12858_v62  ;;  %6039 = vmatprep.subr.bf16.mxu1 %v9951_v30  ;;  %v1528_v37 = vmax.f32 %v1114_v36, 0.0  ;;  %v13273_v23 = vld [vmem:[#allocation8 + $0xb28] sm:$0xff] }
 0x24b   :  { %v1535_v44 = vmax.f32 %v1116_v29, 0.0  ;;  %5137 = vmatmul.mubr.bf16.gmra.mrb[148].mxu0 %v12415_v25  ;;  %v1537_v41 = vmax.f32 %v1309_v50, 0.0  ;;  %5909 = vmatmul.mubr.bf16.gmra.mrb[148].mxu1 %v12415_v25  ;;  %v9956_v30 = vcombine.low %v13236_v47, %v13238_v6  ;;  %v9965_v50 = vcombine.high %v13265_v24, %v13267_v12 }
 0x24c   :  { %v1536_v18 = vmax.f32 %v1118_v4, 0.0  ;;  %5146 = vmatprep.mubr.bf16.mxu0 %v12490_v27  ;;  %v1538_v43 = vmax.f32 %v1311_v0, 0.0  ;;  %5918 = vmatprep.mubr.bf16.mxu1 %v12490_v27  ;;  %v9958_v4 = vcombine.low %v13245_v14, %v13247_v21  ;;  %v13297_v21 = vld [vmem:[#allocation8 + $0xb48] sm:$0xff]  ;;  %v9966_v27 = vcombine.low %v13271_v9, %v13273_v23 }
 0x24d   :  { %v13275_v28 = vpack.c.bf16 %v1535_v44, %v1527_v60  ;;  %5268 = vmatpush1.bf16.msra.mxu0 %v9948_v39  ;;  %v13282_v36 = vpack.c.bf16 %v1537_v41, %v1529_v15  ;;  %6040 = vmatpush1.bf16.msra.mxu1 %v9950_v19  ;;  %v13288_v60 = vld [vmem:[#allocation8 + $0xb40] sm:$0xff]  ;;  %v9967_v15 = vcombine.high %v13271_v9, %v13273_v23  ;;  %v13299_v19 = vld [vmem:[#allocation8 + $0xb68] sm:$0xff] }
 0x24e   :  { %v13284_v38 = vpack.c.bf16 %v1536_v18, %v1528_v37  ;;  %v1121_v29 = vpop.f32.mrb[108].mxu0  ;;  %5269 = vmatprep.subr.bf16.mxu0 %v9957_v52  ;;  %v13290_v44 = vld [vmem:[#allocation8 + $0xb60] sm:$0xff]  ;;  %v13292_v39 = vpack.c.bf16 %v1538_v43, %v1530_v33  ;;  %v1314_v6 = vpop.f32.mrb[108].mxu1  ;;  %6041 = vmatprep.subr.bf16.mxu1 %v9959_v40  ;;  %v9964_v33 = vcombine.low %v13265_v24, %v13267_v12 }
 0x24f   :  { %15301 = vst [vmem:[#allocation112_spill] sm:$0xff] %v13282_v36  ;;  %v1122_v47 = vadd.f32 %v1121_v29, %v12836_v16  ;;  %v1123_v14 = vpop.f32.mrb[109].mxu0  ;;  %v1315_v52 = vadd.f32 %v1314_v6, %v12851_v55  ;;  %v1316_v37 = vpop.f32.mrb[109].mxu1  ;;  %v9973_v6 = vcombine.high %v13288_v60, %v13290_v44  ;;  %v9975_v24 = vcombine.high %v13297_v21, %v13299_v19  ;;  %v13317_v9 = vld [vmem:[#allocation8 + $0xb80] sm:$0xff] }
 0x250   :  { %15302 = vst [vmem:[#allocation113_spill] sm:$0xff] %v13292_v39  ;;  %v1124_v0 = vadd.f32 %v1123_v14, %v12843_v3  ;;  %v1125_v41 = vpop.f32.mrb[110].mxu0  ;;  %v1317_v18 = vadd.f32 %v1316_v37, %v12858_v62  ;;  %v1318_v43 = vpop.f32.mrb[110].mxu1  ;;  %v13319_v23 = vld [vmem:[#allocation8 + $0xba0] sm:$0xff] }
 0x251   :  { %v1126_v40 = vadd.f32 %v1125_v41, %v12836_v16  ;;  %v1127_v29 = vpop.f32.mrb[111].mxu0  ;;  %5270 = vmatpush1.bf16.msra.mxu0 %v9956_v30  ;;  %v1545_v25 = vmax.f32 %v1315_v52, 0.0  ;;  %v1319_v14 = vadd.f32 %v1318_v43, %v12851_v55  ;;  %v1320_v39 = vpop.f32.mrb[111].mxu1  ;;  %6042 = vmatpush1.bf16.msra.mxu1 %v9958_v4  ;;  %v1543_v12 = vmax.f32 %v1122_v47, 0.0  ;;  %v13323_v4 = vld [vmem:[#allocation8 + $0xb88] sm:$0xff] }
 0x252   :  { %v1128_v36 = vadd.f32 %v1127_v29, %v12843_v3  ;;  %5271 = vmatprep.subr.bf16.mxu0 %v9965_v50  ;;  %v1546_v37 = vmax.f32 %v1317_v18, 0.0  ;;  %v1321_v41 = vadd.f32 %v1320_v39, %v12858_v62  ;;  %6043 = vmatprep.subr.bf16.mxu1 %v9967_v15  ;;  %v1544_v52 = vmax.f32 %v1124_v0, 0.0  ;;  %v2120_v50 = vld [vmem:[#allocation8 + $0xba8] sm:$0xff] }
 0x253   :  { %v1551_v30 = vmax.f32 %v1126_v40, 0.0  ;;  %5147 = vmatmul.mubr.bf16.gmra.mrb[152].mxu0 %v12480_v58  ;;  %v1553_v43 = vmax.f32 %v1319_v14, 0.0  ;;  %5919 = vmatmul.mubr.bf16.gmra.mrb[152].mxu1 %v12480_v58  ;;  %v9972_v15 = vcombine.low %v13288_v60, %v13290_v44  ;;  %v9974_v0 = vcombine.low %v13297_v21, %v13299_v19  ;;  %v13346_v19 = vld [vmem:[#allocation8 + $0xbc8] sm:$0xff] }
 0x254   :  { %v1552_v29 = vmax.f32 %v1128_v36, 0.0  ;;  %5156 = vmatprep.mubr.bf16.mxu0 %v12542_v8  ;;  %v1554_v39 = vmax.f32 %v1321_v41, 0.0  ;;  %5928 = vmatprep.mubr.bf16.mxu1 %v12542_v8  ;;  %v9981_v14 = vcombine.high %v13317_v9, %v13319_v23  ;;  %v9982_v8 = vcombine.low %v13323_v4, %v2120_v50 }
 0x255   :  { %v13325_v47 = vpack.c.bf16 %v1551_v30, %v1543_v12  ;;  %5272 = vmatpush1.bf16.msra.mxu0 %v9964_v33  ;;  %v13332_v36 = vpack.c.bf16 %v1553_v43, %v1545_v25  ;;  %6044 = vmatpush1.bf16.msra.mxu1 %v9966_v27  ;;  %v13338_v12 = vld [vmem:[#allocation8 + $0xbc0] sm:$0xff]  ;;  %v9983_v25 = vcombine.high %v13323_v4, %v2120_v50  ;;  %v2128_v27 = vld [vmem:[#allocation8 + $0xbe8] sm:$0xff] }
 0x256   :  { %v13334_v18 = vpack.c.bf16 %v1552_v29, %v1544_v52  ;;  %v1131_v40 = vpop.f32.mrb[112].mxu0  ;;  %5273 = vmatprep.subr.bf16.mxu0 %v9973_v6  ;;  %v13340_v30 = vld [vmem:[#allocation8 + $0xbe0] sm:$0xff]  ;;  %v13342_v33 = vpack.c.bf16 %v1554_v39, %v1546_v37  ;;  %v1324_v44 = vpop.f32.mrb[112].mxu1  ;;  %6045 = vmatprep.subr.bf16.mxu1 %v9975_v24  ;;  %v9980_v37 = vcombine.low %v13317_v9, %v13319_v23 }
 0x257   :  { %15303 = vst [vmem:[#allocation114_spill] sm:$0xff] %v13332_v36  ;;  %v1132_v60 = vadd.f32 %v1131_v40, %v12836_v16  ;;  %v1133_v21 = vpop.f32.mrb[113].mxu0  ;;  %v1325_v6 = vadd.f32 %v1324_v44, %v12851_v55  ;;  %v1326_v52 = vpop.f32.mrb[113].mxu1  ;;  %v9989_v58 = vcombine.high %v13338_v12, %v13340_v30  ;;  %v9991_v9 = vcombine.high %v13346_v19, %v2128_v27 }
 0x258   :  { %15304 = vst [vmem:[#allocation115_spill] sm:$0xff] %v13342_v33  ;;  %v1134_v41 = vadd.f32 %v1133_v21, %v12843_v3  ;;  %v1135_v43 = vpop.f32.mrb[114].mxu0  ;;  %v1327_v29 = vadd.f32 %v1326_v52, %v12858_v62  ;;  %v1328_v40 = vpop.f32.mrb[114].mxu1 }
 0x259   :  { %v1136_v39 = vadd.f32 %v1135_v43, %v12836_v16  ;;  %v1137_v24 = vpop.f32.mrb[115].mxu0  ;;  %5274 = vmatpush1.bf16.msra.mxu0 %v9972_v15  ;;  %v1561_v44 = vmax.f32 %v1325_v6, 0.0  ;;  %v1329_v21 = vadd.f32 %v1328_v40, %v12851_v55  ;;  %v1330_v33 = vpop.f32.mrb[115].mxu1  ;;  %6046 = vmatpush1.bf16.msra.mxu1 %v9974_v0  ;;  %v1559_v23 = vmax.f32 %v1132_v60, 0.0 }
 0x25a   :  { %v1138_v36 = vadd.f32 %v1137_v24, %v12843_v3  ;;  %5275 = vmatprep.subr.bf16.mxu0 %v9981_v14  ;;  %v1562_v52 = vmax.f32 %v1327_v29, 0.0  ;;  %v1331_v15 = vadd.f32 %v1330_v33, %v12858_v62  ;;  %6047 = vmatprep.subr.bf16.mxu1 %v9983_v25  ;;  %v1560_v4 = vmax.f32 %v1134_v41, 0.0 }
 0x25b   :  { %v1567_v43 = vmax.f32 %v1136_v39, 0.0  ;;  %5157 = vmatmul.mubr.bf16.gmra.mrb[156].mxu0 %v12532_v59  ;;  %v1569_v50 = vmax.f32 %v1329_v21, 0.0  ;;  %5929 = vmatmul.mubr.bf16.gmra.mrb[156].mxu1 %v12532_v59  ;;  %v9988_v14 = vcombine.low %v13338_v12, %v13340_v30  ;;  %v9990_v33 = vcombine.low %v13346_v19, %v2128_v27 }
 0x25c   :  { %v1568_v6 = vmax.f32 %v1138_v36, 0.0  ;;  %5166 = vmatprep.mubr.bf16.mxu0 %v12594_v1  ;;  %v1570_v0 = vmax.f32 %v1331_v15, 0.0  ;;  %5938 = vmatprep.mubr.bf16.mxu1 %v12594_v1  ;;  %v9997_v41 = vcombine.high %v12993_v42, %v12995_v35  ;;  %v9999_v12 = vcombine.high %v13015_v45, %v13017_v22 }
 0x25d   :  { %v13364_v40 = vpack.c.bf16 %v1567_v43, %v1559_v23  ;;  %5276 = vmatpush1.bf16.msra.mxu0 %v9980_v37  ;;  %v13370_v60 = vpack.c.bf16 %v1569_v50, %v1561_v44  ;;  %6048 = vmatpush1.bf16.msra.mxu1 %v9982_v8 }
 0x25e   :  { %v13372_v25 = vpack.c.bf16 %v1568_v6, %v1560_v4  ;;  %v1141_v36 = vpop.f32.mrb[116].mxu0  ;;  %5277 = vmatprep.subr.bf16.mxu0 %v9989_v58  ;;  %v13376_v29 = vpack.c.bf16 %v1570_v0, %v1562_v52  ;;  %v1334_v37 = vpop.f32.mrb[116].mxu1  ;;  %6049 = vmatprep.subr.bf16.mxu1 %v9991_v9 }
 0x25f   :  { %15305 = vst [vmem:[#allocation116_spill] sm:$0xff] %v13370_v60  ;;  %v1142_v39 = vadd.f32 %v1141_v36, %v12836_v16  ;;  %v1143_v24 = vpop.f32.mrb[117].mxu0  ;;  %v1335_v30 = vadd.f32 %v1334_v37, %v12851_v55  ;;  %v1336_v27 = vpop.f32.mrb[117].mxu1 }
 0x260   :  { %15306 = vst [vmem:[#allocation117_spill] sm:$0xff] %v13376_v29  ;;  %v1144_v19 = vadd.f32 %v1143_v24, %v12843_v3  ;;  %v1145_v8 = vpop.f32.mrb[118].mxu0  ;;  %v1337_v58 = vadd.f32 %v1336_v27, %v12858_v62  ;;  %v1338_v21 = vpop.f32.mrb[118].mxu1 }
 0x261   :  { %v1146_v44 = vadd.f32 %v1145_v8, %v12836_v16  ;;  %v1147_v23 = vpop.f32.mrb[119].mxu0  ;;  %5278 = vmatpush1.bf16.msra.mxu0 %v9988_v14  ;;  %v1577_v52 = vmax.f32 %v1335_v30, 0.0  ;;  %v1339_v43 = vadd.f32 %v1338_v21, %v12851_v55  ;;  %v1340_v15 = vpop.f32.mrb[119].mxu1  ;;  %6050 = vmatpush1.bf16.msra.mxu1 %v9990_v33  ;;  %v1575_v4 = vmax.f32 %v1142_v39, 0.0  ;;  %v15307_v14 = vld [vmem:[#allocation60_spill] sm:$0xff] }
 0x262   :  { %v1148_v9 = vadd.f32 %v1147_v23, %v12843_v3  ;;  %5440 = vmatprep.subr.bf16.mxu0 %v9997_v41  ;;  %v1578_v50 = vmax.f32 %v1337_v58, 0.0  ;;  %v1341_v0 = vadd.f32 %v1340_v15, %v12858_v62  ;;  %6212 = vmatprep.subr.bf16.mxu1 %v9999_v12  ;;  %v1576_v36 = vmax.f32 %v1144_v19, 0.0 }
 0x263   :  { %v1583_v6 = vmax.f32 %v1146_v44, 0.0  ;;  %5167 = vmatmul.mubr.bf16.gmra.mrb[160].mxu0 %v12584_v32  ;;  %v1585_v37 = vmax.f32 %v1339_v43, 0.0  ;;  %5939 = vmatmul.mubr.bf16.gmra.mrb[160].mxu1 %v12584_v32 }
 0x264   :  { %v1584_v24 = vmax.f32 %v1148_v9, 0.0  ;;  %5176 = vmatprep.mubr.bf16.mxu0 %v15307_v14  ;;  %v1586_v27 = vmax.f32 %v1341_v0, 0.0  ;;  %5948 = vmatprep.mubr.bf16.mxu1 %v15307_v14 }
 0x265   :  { %v13391_v30 = vpack.c.bf16 %v1583_v6, %v1575_v4  ;;  %v13394_v33 = vpack.c.bf16 %v1585_v37, %v1577_v52 }
 0x266   :  { %v13396_v41 = vpack.c.bf16 %v1584_v24, %v1576_v36  ;;  %v1151_v39 = vpop.f32.mrb[120].mxu0  ;;  %v13398_v8 = vpack.c.bf16 %v1586_v27, %v1578_v50  ;;  %v1344_v19 = vpop.f32.mrb[120].mxu1 }
 0x267   :  { %15308 = vst [vmem:[#allocation118_spill] sm:$0xff] %v13394_v33  ;;  %v1152_v12 = vadd.f32 %v1151_v39, %v12836_v16  ;;  %v1153_v58 = vpop.f32.mrb[121].mxu0  ;;  %v1345_v44 = vadd.f32 %v1344_v19, %v12851_v55  ;;  %v1346_v23 = vpop.f32.mrb[121].mxu1  ;;  %v15310_v19 = vld [vmem:[#allocation58_spill] sm:$0xff] }
 0x268   :  { %15309 = vst [vmem:[#allocation119_spill] sm:$0xff] %v13398_v8  ;;  %v1154_v21 = vadd.f32 %v1153_v58, %v12843_v3  ;;  %v1155_v43 = vpop.f32.mrb[122].mxu0  ;;  %v1347_v9 = vadd.f32 %v1346_v23, %v12858_v62  ;;  %v1348_v15 = vpop.f32.mrb[122].mxu1 }
 0x269   :  { %v1156_v52 = vadd.f32 %v1155_v43, %v12836_v16  ;;  %v1157_v4 = vpop.f32.mrb[123].mxu0  ;;  %v1593_v6 = vmax.f32 %v1345_v44, 0.0  ;;  %v1349_v50 = vadd.f32 %v1348_v15, %v12851_v55  ;;  %v1350_v36 = vpop.f32.mrb[123].mxu1  ;;  %v1591_v37 = vmax.f32 %v1152_v12, 0.0  ;;  %v15311_v43 = vld [vmem:[#allocation64_spill] sm:$0xff] }
 0x26a   :  { %v1158_v0 = vadd.f32 %v1157_v4, %v12843_v3  ;;  %v1594_v24 = vmax.f32 %v1347_v9, 0.0  ;;  %v1351_v39 = vadd.f32 %v1350_v36, %v12858_v62  ;;  %v1592_v58 = vmax.f32 %v1154_v21, 0.0 }
 0x26b   :  { %v1599_v27 = vmax.f32 %v1156_v52, 0.0  ;;  %5177 = vmatmul.mubr.bf16.gmra.mrb[164].mxu0 %v15310_v19  ;;  %v1601_v14 = vmax.f32 %v1349_v50, 0.0  ;;  %5949 = vmatmul.mubr.bf16.gmra.mrb[164].mxu1 %v15310_v19 }
 0x26c   :  { %v1600_v23 = vmax.f32 %v1158_v0, 0.0  ;;  %5186 = vmatprep.mubr.bf16.mxu0 %v15311_v43  ;;  %v1602_v15 = vmax.f32 %v1351_v39, 0.0  ;;  %5958 = vmatprep.mubr.bf16.mxu1 %v15311_v43 }
 0x26d   :  { %v13411_v44 = vpack.c.bf16 %v1599_v27, %v1591_v37  ;;  %v13414_v4 = vpack.c.bf16 %v1601_v14, %v1593_v6 }
 0x26e   :  { %v13416_v12 = vpack.c.bf16 %v1600_v23, %v1592_v58  ;;  %v1161_v9 = vpop.f32.mrb[124].mxu0  ;;  %v13418_v52 = vpack.c.bf16 %v1602_v15, %v1594_v24  ;;  %v1354_v50 = vpop.f32.mrb[124].mxu1 }
 0x26f   :  { %15312 = vst [vmem:[#allocation120_spill] sm:$0xff] %v13411_v44  ;;  %15313 = vst [vmem:[#allocation121_spill] sm:$0xff] %v13414_v4  ;;  %v1162_v21 = vadd.f32 %v1161_v9, %v12836_v16  ;;  %v1163_v0 = vpop.f32.mrb[125].mxu0  ;;  %v1355_v36 = vadd.f32 %v1354_v50, %v12851_v55  ;;  %v1356_v37 = vpop.f32.mrb[125].mxu1 }
 0x270   :  { %15314 = vst [vmem:[#allocation122_spill] sm:$0xff] %v13418_v52  ;;  %v1164_v19 = vadd.f32 %v1163_v0, %v12843_v3  ;;  %v1165_v27 = vpop.f32.mrb[126].mxu0  ;;  %v1357_v39 = vadd.f32 %v1356_v37, %v12858_v62  ;;  %v1358_v6 = vpop.f32.mrb[126].mxu1  ;;  %v15315_v0 = vld [vmem:[#allocation62_spill] sm:$0xff] }
 0x271   :  { %v1166_v14 = vadd.f32 %v1165_v27, %v12836_v16  ;;  %v1167_v58 = vpop.f32.mrb[127].mxu0  ;;  %v1609_v23 = vmax.f32 %v1355_v36, 0.0  ;;  %v1359_v24 = vadd.f32 %v1358_v6, %v12851_v55  ;;  %v1360_v9 = vpop.f32.mrb[127].mxu1  ;;  %v1607_v43 = vmax.f32 %v1162_v21, 0.0  ;;  %v15316_v16 = vld [vmem:[#allocation68_spill] sm:$0xff] }
 0x272   :  { %v1168_v15 = vadd.f32 %v1167_v58, %v12843_v3  ;;  %v1610_v32 = vmax.f32 %v1357_v39, 0.0  ;;  %v1361_v50 = vadd.f32 %v1360_v9, %v12858_v62  ;;  %v1608_v59 = vmax.f32 %v1164_v19, 0.0  ;;  %v15321_v62 = vld [vmem:[#allocation66_spill] sm:$0xff]  ;;  %v2144_v19 = vld [vmem:[#allocation8 + $0xc68] sm:$0xff] }
 0x273   :  { %v1615_v1 = vmax.f32 %v1166_v14, 0.0  ;;  %5187 = vmatmul.mubr.bf16.gmra.mrb[168].mxu0 %v15315_v0  ;;  %v1617_v4 = vmax.f32 %v1359_v24, 0.0  ;;  %5959 = vmatmul.mubr.bf16.gmra.mrb[168].mxu1 %v15315_v0  ;;  %v2147_v39 = vld [vmem:[#allocation8 + $0xc80] sm:$0xff]  ;;  %v2148_v6 = vld [vmem:[#allocation8 + $0xc88] sm:$0xff]  ;;  %v13465_v24 = vld [vmem:[#allocation8 + $0x30] sm:$0xff] }
 0x274   :  { %v1616_v37 = vmax.f32 %v1168_v15, 0.0  ;;  %5196 = vmatprep.mubr.bf16.mxu0 %v15316_v16  ;;  %v1618_v55 = vmax.f32 %v1361_v50, 0.0  ;;  %5968 = vmatprep.mubr.bf16.mxu1 %v15316_v16  ;;  %v2151_v14 = vld [vmem:[#allocation8 + $0xca0] sm:$0xff]  ;;  %v2152_v58 = vld [vmem:[#allocation8 + $0xca8] sm:$0xff]  ;;  %v15322_v15 = vcombine.low %v12993_v42, %v12995_v35 }
 0x275   :  { %v13431_v36 = vpack.c.bf16 %v1615_v1, %v1607_v43  ;;  %v13434_v3 = vpack.c.bf16 %v1617_v4, %v1609_v23  ;;  %v2140_v1 = vld [vmem:[#allocation8 + $0xc48] sm:$0xff]  ;;  %v13463_v23 = vld [vmem:[#allocation8 + $0x10] sm:$0xff]  ;;  %v10015_v35 = vcombine.high %v2148_v6, %v2152_v58 }
 0x276   :  { %v13436_v21 = vpack.c.bf16 %v1616_v37, %v1608_v59  ;;  %v13438_v27 = vpack.c.bf16 %v1618_v55, %v1610_v32  ;;  %v2139_v59 = vld [vmem:[#allocation8 + $0xc40] sm:$0xff]  ;;  %v10007_v4 = vcombine.high %v2140_v1, %v2144_v19  ;;  %v13473_v37 = vld [vmem:[#allocation8 + $0x18] sm:$0xff]  ;;  %v2160_v50 = vld [vmem:[#allocation8 + $0xce8] sm:$0xff] }
 0x277   :  { %15317 = vst [vmem:[#allocation62_spill] sm:$0xff] %v13431_v36  ;;  %15318 = vst [vmem:[#allocation68_spill] sm:$0xff] %v13434_v3  ;;  %v2143_v32 = vld [vmem:[#allocation8 + $0xc60] sm:$0xff]  ;;  %v13475_v55 = vld [vmem:[#allocation8 + $0x38] sm:$0xff] }
 0x278   :  { %15319 = vst [vmem:[#allocation123_spill] sm:$0xff] %v13436_v21  ;;  %15320 = vst [vmem:[#allocation124_spill] sm:$0xff] %v13438_v27  ;;  %v10005_v43 = vcombine.high %v2139_v59, %v2143_v32  ;;  %v10004_v9 = vcombine.low %v2139_v59, %v2143_v32  ;;  %v2155_v59 = vld [vmem:[#allocation8 + $0xcc0] sm:$0xff] }
 0x279   :  { %v2159_v32 = vld [vmem:[#allocation8 + $0xce0] sm:$0xff] }
 0x27b   :  { %5197 = vmatmul.mubr.bf16.gmra.mrb[172].mxu0 %v15321_v62  ;;  %5969 = vmatmul.mubr.bf16.gmra.mrb[172].mxu1 %v15321_v62 }
 0x27c   :  { %5206 = vmatprep.mubr.bf16.mxu0 %v12782_v63  ;;  %5978 = vmatprep.mubr.bf16.mxu1 %v12782_v63 }
 0x283   :  { %5207 = vmatmul.mubr.bf16.gmra.mrb[176].mxu0 %v12776_v34  ;;  %5979 = vmatmul.mubr.bf16.gmra.mrb[176].mxu1 %v12776_v34 }
 0x284   :  { %5216 = vmatprep.mubr.bf16.mxu0 %v12804_v54  ;;  %5988 = vmatprep.mubr.bf16.mxu1 %v12804_v54 }
 0x28b   :  { %5217 = vmatmul.mubr.bf16.gmra.mrb[180].mxu0 %v12800_v5  ;;  %5989 = vmatmul.mubr.bf16.gmra.mrb[180].mxu1 %v12800_v5 }
 0x28c   :  { %5226 = vmatprep.mubr.bf16.mxu0 %v12826_v20  ;;  %5998 = vmatprep.mubr.bf16.mxu1 %v12826_v20 }
 0x293   :  { %5227 = vmatmul.mubr.bf16.gmra.mrb[184].mxu0 %v12821_v2  ;;  %5999 = vmatmul.mubr.bf16.gmra.mrb[184].mxu1 %v12821_v2  ;;  %v10021_v2 = vcombine.high %v2155_v59, %v2159_v32 }
 0x294   :  { %5236 = vmatprep.mubr.bf16.mxu0 %v12864_v57  ;;  %6008 = vmatprep.mubr.bf16.mxu1 %v12864_v57  ;;  %v10014_v57 = vcombine.low %v2148_v6, %v2152_v58  ;;  %v2172_v6 = vld [vmem:[#allocation8 + $0xd48] sm:$0xff] }
 0x295   :  { %v2176_v58 = vld [vmem:[#allocation8 + $0xd68] sm:$0xff] }
 0x29b   :  { %5237 = vmatmul.mubr.bf16.gmra.mrb[188].mxu0 %v12860_v7  ;;  %6009 = vmatmul.mubr.bf16.gmra.mrb[188].mxu1 %v12860_v7  ;;  %v10013_v7 = vcombine.high %v2147_v39, %v2151_v14 }
 0x29c   :  { %5279 = vmatprep.mubr.bf16.mxu0 %v12882_v26  ;;  %6051 = vmatprep.mubr.bf16.mxu1 %v12882_v26  ;;  %v10006_v26 = vcombine.low %v2140_v1, %v2144_v19  ;;  %v2164_v1 = vld [vmem:[#allocation8 + $0xd08] sm:$0xff] }
 0x29d   :  { %v2168_v19 = vld [vmem:[#allocation8 + $0xd28] sm:$0xff] }
 0x2a3   :  { %5280 = vmatmul.mubr.bf16.vlgmr.msra.gmra.mrb[128].mxu0 %v12877_v61  ;;  %6052 = vmatmul.mubr.bf16.vlgmr.msra.gmra.mrb[128].mxu1 %v12877_v61  ;;  %v15323_v61 = vcombine.low %v13015_v45, %v13017_v22  ;;  %v2167_v45 = vld [vmem:[#allocation8 + $0xd20] sm:$0xff] }
 0x2a4   :  { %5289 = vmatprep.mubr.bf16.mxu0 %v12902_v53  ;;  %5441 = vmatpush1.bf16.msra.mxu0 %v15322_v15  ;;  %v2156_v15 = vld [vmem:[#allocation8 + $0xcc8] sm:$0xff] }
 0x2a5   :  { %6061 = vmatprep.mubr.bf16.mxu1 %v12902_v53  ;;  %6213 = vmatpush1.bf16.msra.mxu1 %v15323_v61  ;;  %v10012_v53 = vcombine.low %v2147_v39, %v2151_v14  ;;  %v10023_v22 = vcombine.high %v2156_v15, %v2160_v50  ;;  %v2163_v61 = vld [vmem:[#allocation8 + $0xd00] sm:$0xff] }
 0x2a6   :  { %5442 = vmatprep.subr.bf16.mxu0 %v10005_v43  ;;  %6214 = vmatprep.subr.bf16.mxu1 %v10007_v4  ;;  %v10020_v43 = vcombine.low %v2155_v59, %v2159_v32  ;;  %v10031_v4 = vcombine.high %v2164_v1, %v2168_v19  ;;  %v2171_v39 = vld [vmem:[#allocation8 + $0xd40] sm:$0xff]  ;;  %v2180_v59 = vld [vmem:[#allocation8 + $0xd88] sm:$0xff] }
 0x2a7   :  { %v2175_v14 = vld [vmem:[#allocation8 + $0xd60] sm:$0xff]  ;;  %v2184_v32 = vld [vmem:[#allocation8 + $0xda8] sm:$0xff] }
 0x2a8   :  { %5443 = vmatpush1.bf16.msra.mxu0 %v10004_v9  ;;  %v10028_v9 = vcombine.low %v2163_v61, %v2167_v45  ;;  %v10037_v42 = vcombine.high %v2171_v39, %v2175_v14 }
 0x2a9   :  { %6215 = vmatpush1.bf16.msra.mxu1 %v10006_v26  ;;  %5444 = vmatprep.subr.bf16.mxu0 %v10013_v7  ;;  %v10022_v7 = vcombine.low %v2156_v15, %v2160_v50  ;;  %v10029_v26 = vcombine.high %v2163_v61, %v2167_v45  ;;  %v15325_v50 = vld [vmem:[#allocation94_spill] sm:$0xff]  ;;  %v10036_v15 = vcombine.low %v2171_v39, %v2175_v14 }
 0x2aa   :  { %6216 = vmatprep.subr.bf16.mxu1 %v10015_v35  ;;  %v10030_v35 = vcombine.low %v2164_v1, %v2168_v19  ;;  %v10047_v45 = vcombine.high %v2180_v59, %v2184_v32  ;;  %v2187_v1 = vld [vmem:[#allocation8 + $0xdc0] sm:$0xff] }
 0x2ab   :  { %5290 = vmatmul.mubr.bf16.gmra.mrb[132].mxu0 %v12897_v48  ;;  %6062 = vmatmul.mubr.bf16.gmra.mrb[132].mxu1 %v12897_v48  ;;  %v15324_v48 = vld [vmem:[#allocation88_spill] sm:$0xff]  ;;  %v2191_v19 = vld [vmem:[#allocation8 + $0xde0] sm:$0xff] }
 0x2ac   :  { %5299 = vmatprep.mubr.bf16.mxu0 %v12922_v13  ;;  %6071 = vmatprep.mubr.bf16.mxu1 %v12922_v13  ;;  %v15326_v13 = vld [vmem:[#allocation92_spill] sm:$0xff]  ;;  %v2195_v14 = vld [vmem:[#allocation8 + $0xe00] sm:$0xff] }
 0x2ad   :  { %5445 = vmatpush1.bf16.msra.mxu0 %v10012_v53  ;;  %6217 = vmatpush1.bf16.msra.mxu1 %v10014_v57  ;;  %v10039_v53 = vcombine.high %v2172_v6, %v2176_v58  ;;  %v2179_v57 = vld [vmem:[#allocation8 + $0xd80] sm:$0xff] }
 0x2ae   :  { %5446 = vmatprep.subr.bf16.mxu0 %v10021_v2  ;;  %6218 = vmatprep.subr.bf16.mxu1 %v10023_v22  ;;  %v2183_v2 = vld [vmem:[#allocation8 + $0xda0] sm:$0xff]  ;;  %v10038_v22 = vcombine.low %v2172_v6, %v2176_v58  ;;  %v2196_v58 = vld [vmem:[#allocation8 + $0xe08] sm:$0xff] }
 0x2af   :  { %v10045_v61 = vcombine.high %v2179_v57, %v2183_v2  ;;  %v15327_v6 = vld [vmem:[#allocation98_spill] sm:$0xff] }
 0x2b1   :  { %5447 = vmatpush1.bf16.msra.mxu0 %v10020_v43  ;;  %6219 = vmatpush1.bf16.msra.mxu1 %v10022_v7  ;;  %v2188_v43 = vld [vmem:[#allocation8 + $0xdc8] sm:$0xff] }
 0x2b2   :  { %5448 = vmatprep.subr.bf16.mxu0 %v10029_v26  ;;  %6220 = vmatprep.subr.bf16.mxu1 %v10031_v4  ;;  %v2192_v7 = vld [vmem:[#allocation8 + $0xde8] sm:$0xff]  ;;  %v10044_v26 = vcombine.low %v2179_v57, %v2183_v2  ;;  %v10046_v4 = vcombine.low %v2180_v59, %v2184_v32  ;;  %v2203_v59 = vld [vmem:[#allocation8 + $0xe40] sm:$0xff] }
 0x2b3   :  { %5300 = vmatmul.mubr.bf16.gmra.mrb[136].mxu0 %v15324_v48  ;;  %6072 = vmatmul.mubr.bf16.gmra.mrb[136].mxu1 %v15324_v48  ;;  %v10053_v48 = vcombine.high %v2187_v1, %v2191_v19  ;;  %v10055_v39 = vcombine.high %v2188_v43, %v2192_v7  ;;  %v2207_v32 = vld [vmem:[#allocation8 + $0xe60] sm:$0xff] }
 0x2b4   :  { %5309 = vmatprep.mubr.bf16.mxu0 %v15325_v50  ;;  %6081 = vmatprep.mubr.bf16.mxu1 %v15325_v50  ;;  %v15328_v50 = vld [vmem:[#allocation96_spill] sm:$0xff] }
 0x2b5   :  { %5449 = vmatpush1.bf16.msra.mxu0 %v10028_v9  ;;  %6221 = vmatpush1.bf16.msra.mxu1 %v10030_v35  ;;  %v2200_v9 = vld [vmem:[#allocation8 + $0xe28] sm:$0xff]  ;;  %v10052_v35 = vcombine.low %v2187_v1, %v2191_v19  ;;  %v2211_v19 = vld [vmem:[#allocation8 + $0xe80] sm:$0xff] }
 0x2b6   :  { %5450 = vmatprep.subr.bf16.mxu0 %v10037_v42  ;;  %6222 = vmatprep.subr.bf16.mxu1 %v10039_v53  ;;  %v2199_v42 = vld [vmem:[#allocation8 + $0xe20] sm:$0xff]  ;;  %v10054_v53 = vcombine.low %v2188_v43, %v2192_v7  ;;  %v10063_v2 = vcombine.high %v2196_v58, %v2200_v9  ;;  %v2212_v7 = vld [vmem:[#allocation8 + $0xe88] sm:$0xff] }
 0x2b7   :  { %v10061_v57 = vcombine.high %v2195_v14, %v2199_v42  ;;  %v15329_v43 = vld [vmem:[#allocation102_spill] sm:$0xff] }
 0x2b9   :  { %5451 = vmatpush1.bf16.msra.mxu0 %v10036_v15  ;;  %6223 = vmatpush1.bf16.msra.mxu1 %v10038_v22  ;;  %v2204_v15 = vld [vmem:[#allocation8 + $0xe48] sm:$0xff] }
 0x2ba   :  { %5452 = vmatprep.subr.bf16.mxu0 %v10045_v61  ;;  %6224 = vmatprep.subr.bf16.mxu1 %v10047_v45  ;;  %v2208_v22 = vld [vmem:[#allocation8 + $0xe68] sm:$0xff]  ;;  %v10060_v61 = vcombine.low %v2195_v14, %v2199_v42  ;;  %v10062_v45 = vcombine.low %v2196_v58, %v2200_v9  ;;  %v2219_v58 = vld [vmem:[#allocation8 + $0xec0] sm:$0xff] }
 0x2bb   :  { %5310 = vmatmul.mubr.bf16.gmra.mrb[140].mxu0 %v15326_v13  ;;  %6082 = vmatmul.mubr.bf16.gmra.mrb[140].mxu1 %v15326_v13  ;;  %v10069_v13 = vcombine.high %v2203_v59, %v2207_v32  ;;  %v10071_v1 = vcombine.high %v2204_v15, %v2208_v22  ;;  %v2223_v9 = vld [vmem:[#allocation8 + $0xee0] sm:$0xff] }
 0x2bc   :  { %5319 = vmatprep.mubr.bf16.mxu0 %v15327_v6  ;;  %6091 = vmatprep.mubr.bf16.mxu1 %v15327_v6  ;;  %v15330_v6 = vld [vmem:[#allocation100_spill] sm:$0xff] }
 0x2bd   :  { %5453 = vmatpush1.bf16.msra.mxu0 %v10044_v26  ;;  %6225 = vmatpush1.bf16.msra.mxu1 %v10046_v4  ;;  %v2216_v26 = vld [vmem:[#allocation8 + $0xea8] sm:$0xff]  ;;  %v10068_v4 = vcombine.low %v2203_v59, %v2207_v32  ;;  %v2227_v32 = vld [vmem:[#allocation8 + $0xf00] sm:$0xff] }
 0x2be   :  { %5454 = vmatprep.subr.bf16.mxu0 %v10053_v48  ;;  %6226 = vmatprep.subr.bf16.mxu1 %v10055_v39  ;;  %v2215_v48 = vld [vmem:[#allocation8 + $0xea0] sm:$0xff]  ;;  %v10070_v39 = vcombine.low %v2204_v15, %v2208_v22  ;;  %v10079_v42 = vcombine.high %v2212_v7, %v2216_v26  ;;  %v2228_v15 = vld [vmem:[#allocation8 + $0xf08] sm:$0xff] }
 0x2bf   :  { %v10077_v14 = vcombine.high %v2211_v19, %v2215_v48  ;;  %v2232_v22 = vld [vmem:[#allocation8 + $0xf28] sm:$0xff] }
 0x2c1   :  { %5455 = vmatpush1.bf16.msra.mxu0 %v10052_v35  ;;  %6227 = vmatpush1.bf16.msra.mxu1 %v10054_v53  ;;  %v2220_v35 = vld [vmem:[#allocation8 + $0xec8] sm:$0xff] }
 0x2c2   :  { %5456 = vmatprep.subr.bf16.mxu0 %v10061_v57  ;;  %6228 = vmatprep.subr.bf16.mxu1 %v10063_v2  ;;  %v2224_v53 = vld [vmem:[#allocation8 + $0xee8] sm:$0xff]  ;;  %v10076_v57 = vcombine.low %v2211_v19, %v2215_v48  ;;  %v10078_v2 = vcombine.low %v2212_v7, %v2216_v26  ;;  %v10095_v19 = vcombine.high %v2228_v15, %v2232_v22  ;;  %v2235_v48 = vld [vmem:[#allocation8 + $0xf40] sm:$0xff] }
 0x2c3   :  { %5320 = vmatmul.mubr.bf16.gmra.mrb[144].mxu0 %v15328_v50  ;;  %6092 = vmatmul.mubr.bf16.gmra.mrb[144].mxu1 %v15328_v50  ;;  %v10085_v50 = vcombine.high %v2219_v58, %v2223_v9  ;;  %v10087_v59 = vcombine.high %v2220_v35, %v2224_v53  ;;  %v2239_v7 = vld [vmem:[#allocation8 + $0xf60] sm:$0xff]  ;;  %v2236_v26 = vld [vmem:[#allocation8 + $0xf48] sm:$0xff] }
 0x2c4   :  { %5329 = vmatprep.mubr.bf16.mxu0 %v15329_v43  ;;  %6101 = vmatprep.mubr.bf16.mxu1 %v15329_v43 }
 0x2c5   :  { %5457 = vmatpush1.bf16.msra.mxu0 %v10060_v61  ;;  %6229 = vmatpush1.bf16.msra.mxu1 %v10062_v45  ;;  %v10084_v61 = vcombine.low %v2219_v58, %v2223_v9  ;;  %v10086_v45 = vcombine.low %v2220_v35, %v2224_v53  ;;  %v2243_v9 = vld [vmem:[#allocation8 + $0xf80] sm:$0xff]  ;;  %v2244_v35 = vld [vmem:[#allocation8 + $0xf88] sm:$0xff] }
 0x2c6   :  { %5458 = vmatprep.subr.bf16.mxu0 %v10069_v13  ;;  %6230 = vmatprep.subr.bf16.mxu1 %v10071_v1  ;;  %v2231_v13 = vld [vmem:[#allocation8 + $0xf20] sm:$0xff]  ;;  %v2248_v53 = vld [vmem:[#allocation8 + $0xfa8] sm:$0xff] }
 0x2c7   :  { %v10093_v1 = vcombine.high %v2227_v32, %v2231_v13 }
 0x2c9   :  { %5459 = vmatpush1.bf16.msra.mxu0 %v10068_v4  ;;  %6231 = vmatpush1.bf16.msra.mxu1 %v10070_v39  ;;  %v2240_v4 = vld [vmem:[#allocation8 + $0xf68] sm:$0xff]  ;;  %v10092_v39 = vcombine.low %v2227_v32, %v2231_v13  ;;  %v10111_v32 = vcombine.high %v2244_v35, %v2248_v53  ;;  %v2251_v13 = vld [vmem:[#allocation8 + $0xfc0] sm:$0xff] }
 0x2ca   :  { %5460 = vmatprep.subr.bf16.mxu0 %v10077_v14  ;;  %6232 = vmatprep.subr.bf16.mxu1 %v10079_v42  ;;  %v10094_v14 = vcombine.low %v2228_v15, %v2232_v22  ;;  %v10101_v42 = vcombine.high %v2235_v48, %v2239_v7  ;;  %v10103_v58 = vcombine.high %v2236_v26, %v2240_v4  ;;  %v2255_v15 = vld [vmem:[#allocation8 + $0xfe0] sm:$0xff]  ;;  %v2252_v22 = vld [vmem:[#allocation8 + $0xfc8] sm:$0xff] }
 0x2cb   :  { %5330 = vmatmul.mubr.bf16.gmra.mrb[148].mxu0 %v15330_v6  ;;  %6102 = vmatmul.mubr.bf16.gmra.mrb[148].mxu1 %v15330_v6 }
 0x2cc   :  { %5339 = vmatprep.mubr.bf16.mxu0 %v13076_v17  ;;  %6111 = vmatprep.mubr.bf16.mxu1 %v13076_v17 }
 0x2cd   :  { %5461 = vmatpush1.bf16.msra.mxu0 %v10076_v57  ;;  %6233 = vmatpush1.bf16.msra.mxu1 %v10078_v2  ;;  %v10100_v57 = vcombine.low %v2235_v48, %v2239_v7  ;;  %v10102_v2 = vcombine.low %v2236_v26, %v2240_v4  ;;  %v10116_v7 = vcombine.low %v2251_v13, %v2255_v15 }
 0x2ce   :  { %5462 = vmatprep.subr.bf16.mxu0 %v10085_v50  ;;  %6234 = vmatprep.subr.bf16.mxu1 %v10087_v59  ;;  %v2247_v50 = vld [vmem:[#allocation8 + $0xfa0] sm:$0xff]  ;;  %v9617_v4 = vcombine.high %v13463_v23, %v13465_v24 }
 0x2cf   :  { %v10109_v59 = vcombine.high %v2243_v9, %v2247_v50 }
 0x2d1   :  { %5463 = vmatpush1.bf16.msra.mxu0 %v10084_v61  ;;  %6235 = vmatpush1.bf16.msra.mxu1 %v10086_v45  ;;  %v2256_v61 = vld [vmem:[#allocation8 + $0xfe8] sm:$0xff]  ;;  %v10108_v45 = vcombine.low %v2243_v9, %v2247_v50  ;;  %v1758_v9 = vld [vmem:[#allocation8 + $0x58] sm:$0xff] }
 0x2d2   :  { %5464 = vmatprep.subr.bf16.mxu0 %v10093_v1  ;;  %6236 = vmatprep.subr.bf16.mxu1 %v10095_v19  ;;  %v10110_v1 = vcombine.low %v2244_v35, %v2248_v53  ;;  %v10117_v19 = vcombine.high %v2251_v13, %v2255_v15  ;;  %v10119_v48 = vcombine.high %v2252_v22, %v2256_v61  ;;  %v1762_v50 = vld [vmem:[#allocation8 + $0x78] sm:$0xff]  ;;  %v1765_v53 = vld [vmem:[#allocation8 + $0x90] sm:$0xff]  ;;  %v15333_v15 = vld [vmem:[#allocation87_spill] sm:$0xff] }
 0x2d3   :  { %5340 = vmatmul.mubr.bf16.gmra.mrb[152].mxu0 %v13067_v11  ;;  %6112 = vmatmul.mubr.bf16.gmra.mrb[152].mxu1 %v13067_v11  ;;  %v10118_v26 = vcombine.low %v2252_v22, %v2256_v61  ;;  %v13549_v13 = vld [vmem:[#allocation8 + $0x430] sm:$0xff]  ;;  %v1766_v22 = vld [vmem:[#allocation8 + $0x98] sm:$0xff] }
 0x2d4   :  { %5349 = vmatprep.mubr.bf16.mxu0 %v13128_v56  ;;  %6121 = vmatprep.mubr.bf16.mxu1 %v13128_v56  ;;  %v1770_v61 = vld [vmem:[#allocation8 + $0xb8] sm:$0xff] }
 0x2d5   :  { %5465 = vmatpush1.bf16.msra.mxu0 %v10092_v39  ;;  %6237 = vmatpush1.bf16.msra.mxu1 %v10094_v14  ;;  %v9619_v39 = vcombine.high %v13473_v37, %v13475_v55  ;;  %v15331_v14 = vld [vmem:[#allocation83_spill] sm:$0xff] }
 0x2d6   :  { %5466 = vmatprep.subr.bf16.mxu0 %v10101_v42  ;;  %6238 = vmatprep.subr.bf16.mxu1 %v10103_v58  ;;  %v1757_v42 = vld [vmem:[#allocation8 + $0x50] sm:$0xff] }
 0x2d7   :  { %v1761_v58 = vld [vmem:[#allocation8 + $0x70] sm:$0xff] }
 0x2d8   :  { %v9625_v35 = vcombine.high %v1757_v42, %v1761_v58 }
 0x2d9   :  { %5467 = vmatpush1.bf16.msra.mxu0 %v10100_v57  ;;  %6239 = vmatpush1.bf16.msra.mxu1 %v10102_v2  ;;  %v15332_v57 = vld [vmem:[#allocation81_spill] sm:$0xff]  ;;  %v9627_v2 = vcombine.high %v1758_v9, %v1762_v50 }
 0x2da   :  { %5468 = vmatprep.subr.bf16.mxu0 %v10109_v59  ;;  %6240 = vmatprep.subr.bf16.mxu1 %v10111_v32  ;;  %v1769_v59 = vld [vmem:[#allocation8 + $0xb0] sm:$0xff] }
 0x2db   :  { %5350 = vmatmul.mubr.bf16.gmra.mrb[156].mxu0 %v13119_v51  ;;  %6122 = vmatmul.mubr.bf16.gmra.mrb[156].mxu1 %v13119_v51  ;;  %v13547_v32 = vld [vmem:[#allocation8 + $0x410] sm:$0xff] }
 0x2dc   :  { %5359 = vmatprep.mubr.bf16.mxu0 %v13180_v49  ;;  %6131 = vmatprep.mubr.bf16.mxu1 %v13180_v49 }
 0x2dd   :  { %5469 = vmatpush1.bf16.msra.mxu0 %v10108_v45  ;;  %6241 = vmatpush1.bf16.msra.mxu1 %v10110_v1  ;;  %v15334_v1 = vcombine.low %v13463_v23, %v13465_v24  ;;  %v1777_v23 = vld [vmem:[#allocation8 + $0xf0] sm:$0xff]  ;;  %v1774_v24 = vld [vmem:[#allocation8 + $0xd8] sm:$0xff] }
 0x2de   :  { %5470 = vmatprep.subr.bf16.mxu0 %v10117_v19  ;;  %6242 = vmatprep.subr.bf16.mxu1 %v10119_v48  ;;  %v9624_v19 = vcombine.low %v1757_v42, %v1761_v58  ;;  %v13559_v48 = vld [vmem:[#allocation8 + $0x418] sm:$0xff]  ;;  %v9632_v58 = vcombine.low %v1765_v53, %v1769_v59 }
 0x2df   :  { %v1778_v42 = vld [vmem:[#allocation8 + $0xf8] sm:$0xff] }
 0x2e1   :  { %5471 = vmatpush1.bf16.msra.mxu0 %v10116_v7  ;;  %6243 = vmatpush1.bf16.msra.mxu1 %v10118_v26  ;;  %v13561_v7 = vld [vmem:[#allocation8 + $0x438] sm:$0xff]  ;;  %v15335_v26 = vcombine.low %v13473_v37, %v13475_v55  ;;  %v9643_v55 = vcombine.high %v1774_v24, %v1778_v42 }
 0x2e2   :  { %6405 = vmatprep.subr.bf16.mxu0 %v9617_v4  ;;  %7177 = vmatprep.subr.bf16.mxu1 %v9619_v39  ;;  %v9626_v4 = vcombine.low %v1758_v9, %v1762_v50  ;;  %v9633_v39 = vcombine.high %v1765_v53, %v1769_v59  ;;  %v15336_v37 = vld [vmem:[#allocation85_spill] sm:$0xff]  ;;  %v9642_v59 = vcombine.low %v1774_v24, %v1778_v42  ;;  %v15339_v24 = vld [vmem:[#allocation95_spill] sm:$0xff] }
 0x2e3   :  { %5360 = vmatmul.mubr.bf16.gmra.mrb[160].mxu0 %v13171_v10  ;;  %6132 = vmatmul.mubr.bf16.gmra.mrb[160].mxu1 %v13171_v10  ;;  %v1781_v9 = vld [vmem:[#allocation8 + $0x110] sm:$0xff]  ;;  %v1798_v42 = vld [vmem:[#allocation8 + $0x198] sm:$0xff] }
 0x2e4   :  { %5369 = vmatprep.mubr.bf16.mxu0 %v13232_v46  ;;  %6141 = vmatprep.mubr.bf16.mxu1 %v13232_v46  ;;  %v1785_v50 = vld [vmem:[#allocation8 + $0x130] sm:$0xff] }
 0x2e5   :  { %v9648_v45 = vcombine.low %v1781_v9, %v1785_v50 }
 0x2eb   :  { %5370 = vmatmul.mubr.bf16.gmra.mrb[164].mxu0 %v13223_v31  ;;  %6142 = vmatmul.mubr.bf16.gmra.mrb[164].mxu1 %v13223_v31 }
 0x2ec   :  { %5379 = vmatprep.mubr.bf16.mxu0 %v13284_v38  ;;  %6151 = vmatprep.mubr.bf16.mxu1 %v13284_v38 }
 0x2f3   :  { %5380 = vmatmul.mubr.bf16.gmra.mrb[168].mxu0 %v13275_v28  ;;  %6152 = vmatmul.mubr.bf16.gmra.mrb[168].mxu1 %v13275_v28 }
 0x2f4   :  { %5389 = vmatprep.mubr.bf16.mxu0 %v13334_v18  ;;  %6161 = vmatprep.mubr.bf16.mxu1 %v13334_v18 }
 0x2fb   :  { %5390 = vmatmul.mubr.bf16.gmra.mrb[172].mxu0 %v13325_v47  ;;  %6162 = vmatmul.mubr.bf16.gmra.mrb[172].mxu1 %v13325_v47 }
 0x2fc   :  { %5399 = vmatprep.mubr.bf16.mxu0 %v13372_v25  ;;  %6171 = vmatprep.mubr.bf16.mxu1 %v13372_v25 }
 0x303   :  { %5400 = vmatmul.mubr.bf16.gmra.mrb[176].mxu0 %v13364_v40  ;;  %6172 = vmatmul.mubr.bf16.gmra.mrb[176].mxu1 %v13364_v40 }
 0x304   :  { %5409 = vmatprep.mubr.bf16.mxu0 %v13396_v41  ;;  %6181 = vmatprep.mubr.bf16.mxu1 %v13396_v41 }
 0x30b   :  { %5410 = vmatmul.mubr.bf16.gmra.mrb[180].mxu0 %v13391_v30  ;;  %6182 = vmatmul.mubr.bf16.gmra.mrb[180].mxu1 %v13391_v30 }
 0x30c   :  { %5419 = vmatprep.mubr.bf16.mxu0 %v13416_v12  ;;  %6191 = vmatprep.mubr.bf16.mxu1 %v13416_v12 }
 0x313   :  { %5420 = vmatmul.mubr.bf16.gmra.mrb[184].mxu0 %v13411_v44  ;;  %6192 = vmatmul.mubr.bf16.gmra.mrb[184].mxu1 %v13411_v44 }
 0x314   :  { %5429 = vmatprep.mubr.bf16.mxu0 %v13436_v21  ;;  %6201 = vmatprep.mubr.bf16.mxu1 %v13436_v21  ;;  %v15338_v21 = vld [vmem:[#allocation89_spill] sm:$0xff] }
 0x31b   :  { %5430 = vmatmul.mubr.bf16.gmra.mrb[188].mxu0 %v13431_v36  ;;  %6202 = vmatmul.mubr.bf16.gmra.mrb[188].mxu1 %v13431_v36 }
 0x31c   :  { %5472 = vmatprep.mubr.bf16.mxu0 %v15331_v14  ;;  %6244 = vmatprep.mubr.bf16.mxu1 %v15331_v14 }
 0x323   :  { %5473 = vmatmul.mubr.bf16.vlgmr.msra.gmra.mrb[128].mxu0 %v15332_v57  ;;  %6245 = vmatmul.mubr.bf16.vlgmr.msra.gmra.mrb[128].mxu1 %v15332_v57  ;;  %v1773_v57 = vld [vmem:[#allocation8 + $0xd0] sm:$0xff] }
 0x324   :  { %5482 = vmatprep.mubr.bf16.mxu0 %v15333_v15  ;;  %6254 = vmatprep.mubr.bf16.mxu1 %v15333_v15  ;;  %v9635_v15 = vcombine.high %v1766_v22, %v1770_v61  ;;  %v9641_v14 = vcombine.high %v1773_v57, %v1777_v23  ;;  %v9640_v53 = vcombine.low %v1773_v57, %v1777_v23  ;;  %v1797_v23 = vld [vmem:[#allocation8 + $0x190] sm:$0xff] }
 0x325   :  { %6406 = vmatpush1.bf16.msra.mxu0 %v15334_v1  ;;  %7178 = vmatpush1.bf16.msra.mxu1 %v15335_v26  ;;  %v9634_v1 = vcombine.low %v1766_v22, %v1770_v61  ;;  %v1786_v26 = vld [vmem:[#allocation8 + $0x138] sm:$0xff]  ;;  %v9649_v22 = vcombine.high %v1781_v9, %v1785_v50 }
 0x326   :  { %6407 = vmatprep.subr.bf16.mxu0 %v9625_v35  ;;  %7179 = vmatprep.subr.bf16.mxu1 %v9627_v2  ;;  %v15337_v35 = vld [vmem:[#allocation91_spill] sm:$0xff]  ;;  %v1782_v2 = vld [vmem:[#allocation8 + $0x118] sm:$0xff] }
 0x327   :  { %v9651_v61 = vcombine.high %v1782_v2, %v1786_v26 }
 0x329   :  { %6408 = vmatpush1.bf16.msra.mxu0 %v9624_v19  ;;  %7180 = vmatpush1.bf16.msra.mxu1 %v9626_v4  ;;  %v1793_v19 = vld [vmem:[#allocation8 + $0x170] sm:$0xff]  ;;  %v1790_v4 = vld [vmem:[#allocation8 + $0x158] sm:$0xff] }
 0x32a   :  { %6409 = vmatprep.subr.bf16.mxu0 %v9633_v39  ;;  %7181 = vmatprep.subr.bf16.mxu1 %v9635_v15  ;;  %v1789_v15 = vld [vmem:[#allocation8 + $0x150] sm:$0xff]  ;;  %v1794_v39 = vld [vmem:[#allocation8 + $0x178] sm:$0xff] }
 0x32b   :  { %5483 = vmatmul.mubr.bf16.gmra.mrb[132].mxu0 %v15336_v37  ;;  %6255 = vmatmul.mubr.bf16.gmra.mrb[132].mxu1 %v15336_v37  ;;  %v9650_v37 = vcombine.low %v1782_v2, %v1786_v26  ;;  %v9657_v36 = vcombine.high %v1789_v15, %v1793_v19  ;;  %v9659_v57 = vcombine.high %v1790_v4, %v1794_v39  ;;  %v1805_v2 = vld [vmem:[#allocation8 + $0x1d0] sm:$0xff] }
 0x32c   :  { %5492 = vmatprep.mubr.bf16.mxu0 %v15337_v35  ;;  %6264 = vmatprep.mubr.bf16.mxu1 %v15337_v35  ;;  %v1809_v26 = vld [vmem:[#allocation8 + $0x1f0] sm:$0xff] }
 0x32d   :  { %6410 = vmatpush1.bf16.msra.mxu0 %v9632_v58  ;;  %7182 = vmatpush1.bf16.msra.mxu1 %v9634_v1  ;;  %v1802_v58 = vld [vmem:[#allocation8 + $0x1b8] sm:$0xff]  ;;  %v9656_v1 = vcombine.low %v1789_v15, %v1793_v19  ;;  %v15341_v15 = vld [vmem:[#allocation99_spill] sm:$0xff] }
 0x32e   :  { %6411 = vmatprep.subr.bf16.mxu0 %v9641_v14  ;;  %7183 = vmatprep.subr.bf16.mxu1 %v9643_v55  ;;  %v1801_v14 = vld [vmem:[#allocation8 + $0x1b0] sm:$0xff]  ;;  %v9658_v55 = vcombine.low %v1790_v4, %v1794_v39  ;;  %v9667_v50 = vcombine.high %v1798_v42, %v1802_v58  ;;  %v1814_v19 = vld [vmem:[#allocation8 + $0x218] sm:$0xff]  ;;  %v9672_v39 = vcombine.low %v1805_v2, %v1809_v26 }
 0x32f   :  { %v9665_v9 = vcombine.high %v1797_v23, %v1801_v14  ;;  %v15340_v35 = vld [vmem:[#allocation93_spill] sm:$0xff] }
 0x330   :  { %v1818_v4 = vld [vmem:[#allocation8 + $0x238] sm:$0xff] }
 0x331   :  { %6412 = vmatpush1.bf16.msra.mxu0 %v9640_v53  ;;  %7184 = vmatpush1.bf16.msra.mxu1 %v9642_v59  ;;  %v1806_v53 = vld [vmem:[#allocation8 + $0x1d8] sm:$0xff] }
 0x332   :  { %6413 = vmatprep.subr.bf16.mxu0 %v9649_v22  ;;  %7185 = vmatprep.subr.bf16.mxu1 %v9651_v61  ;;  %v1810_v59 = vld [vmem:[#allocation8 + $0x1f8] sm:$0xff]  ;;  %v9664_v22 = vcombine.low %v1797_v23, %v1801_v14  ;;  %v9666_v61 = vcombine.low %v1798_v42, %v1802_v58  ;;  %v9683_v14 = vcombine.high %v1814_v19, %v1818_v4  ;;  %v1821_v42 = vld [vmem:[#allocation8 + $0x250] sm:$0xff] }
 0x333   :  { %5493 = vmatmul.mubr.bf16.gmra.mrb[136].mxu0 %v15338_v21  ;;  %6265 = vmatmul.mubr.bf16.gmra.mrb[136].mxu1 %v15338_v21  ;;  %v9673_v21 = vcombine.high %v1805_v2, %v1809_v26  ;;  %v1825_v58 = vld [vmem:[#allocation8 + $0x270] sm:$0xff] }
 0x334   :  { %5502 = vmatprep.mubr.bf16.mxu0 %v15339_v24  ;;  %6274 = vmatprep.mubr.bf16.mxu1 %v15339_v24  ;;  %v15342_v24 = vld [vmem:[#allocation97_spill] sm:$0xff] }
 0x335   :  { %6414 = vmatpush1.bf16.msra.mxu0 %v9648_v45  ;;  %7186 = vmatpush1.bf16.msra.mxu1 %v9650_v37  ;;  %v9675_v45 = vcombine.high %v1806_v53, %v1810_v59  ;;  %v1813_v37 = vld [vmem:[#allocation8 + $0x210] sm:$0xff] }
 0x336   :  { %6415 = vmatprep.subr.bf16.mxu0 %v9657_v36  ;;  %7187 = vmatprep.subr.bf16.mxu1 %v9659_v57  ;;  %v1817_v36 = vld [vmem:[#allocation8 + $0x230] sm:$0xff]  ;;  %v9674_v57 = vcombine.low %v1806_v53, %v1810_v59  ;;  %v15343_v53 = vld [vmem:[#allocation103_spill] sm:$0xff]  ;;  %v1830_v59 = vld [vmem:[#allocation8 + $0x298] sm:$0xff] }
 0x337   :  { %v9681_v23 = vcombine.high %v1813_v37, %v1817_v36  ;;  %v1829_v26 = vld [vmem:[#allocation8 + $0x290] sm:$0xff] }
 0x339   :  { %6416 = vmatpush1.bf16.msra.mxu0 %v9656_v1  ;;  %7188 = vmatpush1.bf16.msra.mxu1 %v9658_v55  ;;  %v1822_v1 = vld [vmem:[#allocation8 + $0x258] sm:$0xff] }
 0x33a   :  { %6417 = vmatprep.subr.bf16.mxu0 %v9665_v9  ;;  %7189 = vmatprep.subr.bf16.mxu1 %v9667_v50  ;;  %v1826_v55 = vld [vmem:[#allocation8 + $0x278] sm:$0xff]  ;;  %v9680_v9 = vcombine.low %v1813_v37, %v1817_v36  ;;  %v9682_v50 = vcombine.low %v1814_v19, %v1818_v4  ;;  %v1837_v19 = vld [vmem:[#allocation8 + $0x2d0] sm:$0xff] }
 0x33b   :  { %5503 = vmatmul.mubr.bf16.gmra.mrb[140].mxu0 %v15340_v35  ;;  %6275 = vmatmul.mubr.bf16.gmra.mrb[140].mxu1 %v15340_v35  ;;  %v9689_v35 = vcombine.high %v1821_v42, %v1825_v58  ;;  %v9691_v2 = vcombine.high %v1822_v1, %v1826_v55  ;;  %v1841_v4 = vld [vmem:[#allocation8 + $0x2f0] sm:$0xff] }
 0x33c   :  { %5512 = vmatprep.mubr.bf16.mxu0 %v15341_v15  ;;  %6284 = vmatprep.mubr.bf16.mxu1 %v15341_v15  ;;  %v15344_v15 = vld [vmem:[#allocation101_spill] sm:$0xff] }
 0x33d   :  { %6418 = vmatpush1.bf16.msra.mxu0 %v9664_v22  ;;  %7190 = vmatpush1.bf16.msra.mxu1 %v9666_v61  ;;  %v1834_v22 = vld [vmem:[#allocation8 + $0x2b8] sm:$0xff]  ;;  %v9688_v61 = vcombine.low %v1821_v42, %v1825_v58  ;;  %v1845_v58 = vld [vmem:[#allocation8 + $0x310] sm:$0xff] }
 0x33e   :  { %6419 = vmatprep.subr.bf16.mxu0 %v9673_v21  ;;  %7191 = vmatprep.subr.bf16.mxu1 %v9675_v45  ;;  %v1833_v21 = vld [vmem:[#allocation8 + $0x2b0] sm:$0xff]  ;;  %v9690_v45 = vcombine.low %v1822_v1, %v1826_v55  ;;  %v9699_v36 = vcombine.high %v1830_v59, %v1834_v22  ;;  %v1846_v55 = vld [vmem:[#allocation8 + $0x318] sm:$0xff] }
 0x33f   :  { %v9697_v37 = vcombine.high %v1829_v26, %v1833_v21  ;;  %v15345_v1 = vld [vmem:[#allocation105_spill] sm:$0xff] }
 0x341   :  { %6420 = vmatpush1.bf16.msra.mxu0 %v9672_v39  ;;  %7192 = vmatpush1.bf16.msra.mxu1 %v9674_v57  ;;  %v1838_v39 = vld [vmem:[#allocation8 + $0x2d8] sm:$0xff] }
 0x342   :  { %6421 = vmatprep.subr.bf16.mxu0 %v9681_v23  ;;  %7193 = vmatprep.subr.bf16.mxu1 %v9683_v14  ;;  %v1842_v57 = vld [vmem:[#allocation8 + $0x2f8] sm:$0xff]  ;;  %v9696_v23 = vcombine.low %v1829_v26, %v1833_v21  ;;  %v9698_v14 = vcombine.low %v1830_v59, %v1834_v22  ;;  %v1853_v59 = vld [vmem:[#allocation8 + $0x350] sm:$0xff] }
 0x343   :  { %5513 = vmatmul.mubr.bf16.gmra.mrb[144].mxu0 %v15342_v24  ;;  %6285 = vmatmul.mubr.bf16.gmra.mrb[144].mxu1 %v15342_v24  ;;  %v9705_v24 = vcombine.high %v1837_v19, %v1841_v4  ;;  %v9707_v42 = vcombine.high %v1838_v39, %v1842_v57  ;;  %v1857_v22 = vld [vmem:[#allocation8 + $0x370] sm:$0xff] }
 0x344   :  { %5522 = vmatprep.mubr.bf16.mxu0 %v15343_v53  ;;  %6294 = vmatprep.mubr.bf16.mxu1 %v15343_v53  ;;  %v15346_v53 = vld [vmem:[#allocation104_spill] sm:$0xff] }
 0x345   :  { %6422 = vmatpush1.bf16.msra.mxu0 %v9680_v9  ;;  %7194 = vmatpush1.bf16.msra.mxu1 %v9682_v50  ;;  %v1850_v9 = vld [vmem:[#allocation8 + $0x338] sm:$0xff]  ;;  %v9704_v50 = vcombine.low %v1837_v19, %v1841_v4  ;;  %v1861_v4 = vld [vmem:[#allocation8 + $0x390] sm:$0xff] }
 0x346   :  { %6423 = vmatprep.subr.bf16.mxu0 %v9689_v35  ;;  %7195 = vmatprep.subr.bf16.mxu1 %v9691_v2  ;;  %v1849_v35 = vld [vmem:[#allocation8 + $0x330] sm:$0xff]  ;;  %v9706_v2 = vcombine.low %v1838_v39, %v1842_v57  ;;  %v9715_v21 = vcombine.high %v1846_v55, %v1850_v9  ;;  %v15347_v39 = vld [vmem:[#allocation107_spill] sm:$0xff]  ;;  %v1862_v57 = vld [vmem:[#allocation8 + $0x398] sm:$0xff] }
 0x347   :  { %v9713_v26 = vcombine.high %v1845_v58, %v1849_v35 }
 0x349   :  { %6424 = vmatpush1.bf16.msra.mxu0 %v9688_v61  ;;  %7196 = vmatpush1.bf16.msra.mxu1 %v9690_v45  ;;  %v1854_v61 = vld [vmem:[#allocation8 + $0x358] sm:$0xff] }
 0x34a   :  { %6425 = vmatprep.subr.bf16.mxu0 %v9697_v37  ;;  %7197 = vmatprep.subr.bf16.mxu1 %v9699_v36  ;;  %v1858_v45 = vld [vmem:[#allocation8 + $0x378] sm:$0xff]  ;;  %v9712_v37 = vcombine.low %v1845_v58, %v1849_v35  ;;  %v9714_v36 = vcombine.low %v1846_v55, %v1850_v9  ;;  %v1869_v55 = vld [vmem:[#allocation8 + $0x3d0] sm:$0xff] }
 0x34b   :  { %5523 = vmatmul.mubr.bf16.gmra.mrb[148].mxu0 %v15344_v15  ;;  %6295 = vmatmul.mubr.bf16.gmra.mrb[148].mxu1 %v15344_v15  ;;  %v9721_v15 = vcombine.high %v1853_v59, %v1857_v22  ;;  %v9723_v19 = vcombine.high %v1854_v61, %v1858_v45  ;;  %v1873_v9 = vld [vmem:[#allocation8 + $0x3f0] sm:$0xff] }
 0x34c   :  { %5532 = vmatprep.mubr.bf16.mxu0 %v15345_v1  ;;  %6304 = vmatprep.mubr.bf16.mxu1 %v15345_v1  ;;  %v15348_v1 = vld [vmem:[#allocation106_spill] sm:$0xff] }
 0x34d   :  { %6426 = vmatpush1.bf16.msra.mxu0 %v9696_v23  ;;  %7198 = vmatpush1.bf16.msra.mxu1 %v9698_v14  ;;  %v1866_v23 = vld [vmem:[#allocation8 + $0x3b8] sm:$0xff]  ;;  %v9720_v14 = vcombine.low %v1853_v59, %v1857_v22  ;;  %v9736_v22 = vcombine.low %v1869_v55, %v1873_v9 }
 0x34e   :  { %6427 = vmatprep.subr.bf16.mxu0 %v9705_v24  ;;  %7199 = vmatprep.subr.bf16.mxu1 %v9707_v42  ;;  %v1865_v24 = vld [vmem:[#allocation8 + $0x3b0] sm:$0xff]  ;;  %v9722_v42 = vcombine.low %v1854_v61, %v1858_v45  ;;  %v9731_v35 = vcombine.high %v1862_v57, %v1866_v23  ;;  %v9745_v45 = vcombine.high %v13547_v32, %v13549_v13 }
 0x34f   :  { %v9729_v58 = vcombine.high %v1861_v4, %v1865_v24 }
 0x351   :  { %6428 = vmatpush1.bf16.msra.mxu0 %v9704_v50  ;;  %7200 = vmatpush1.bf16.msra.mxu1 %v9706_v2  ;;  %v1870_v50 = vld [vmem:[#allocation8 + $0x3d8] sm:$0xff] }
 0x352   :  { %6429 = vmatprep.subr.bf16.mxu0 %v9713_v26  ;;  %7201 = vmatprep.subr.bf16.mxu1 %v9715_v21  ;;  %v1874_v2 = vld [vmem:[#allocation8 + $0x3f8] sm:$0xff]  ;;  %v9728_v26 = vcombine.low %v1861_v4, %v1865_v24  ;;  %v9730_v21 = vcombine.low %v1862_v57, %v1866_v23  ;;  %v15354_v24 = vld [vmem:[#allocation112_spill] sm:$0xff]  ;;  %v15355_v57 = vld [vmem:[#allocation115_spill] sm:$0xff] }
 0x353   :  { %5533 = vmatmul.mubr.bf16.gmra.mrb[152].mxu0 %v15346_v53  ;;  %6305 = vmatmul.mubr.bf16.gmra.mrb[152].mxu1 %v15346_v53  ;;  %v9737_v53 = vcombine.high %v1869_v55, %v1873_v9  ;;  %v9739_v59 = vcombine.high %v1870_v50, %v1874_v2  ;;  %v9738_v61 = vcombine.low %v1870_v50, %v1874_v2  ;;  %v15353_v4 = vld [vmem:[#allocation113_spill] sm:$0xff]  ;;  %v15356_v23 = vld [vmem:[#allocation114_spill] sm:$0xff] }
 0x354   :  { %5542 = vmatprep.mubr.bf16.mxu0 %v15347_v39  ;;  %6314 = vmatprep.mubr.bf16.mxu1 %v15347_v39  ;;  %v1886_v55 = vld [vmem:[#allocation8 + $0x458] sm:$0xff] }
 0x355   :  { %6430 = vmatpush1.bf16.msra.mxu0 %v9712_v37  ;;  %7202 = vmatpush1.bf16.msra.mxu1 %v9714_v36  ;;  %v9747_v37 = vcombine.high %v13559_v48, %v13561_v7  ;;  %v15350_v36 = vld [vmem:[#allocation108_spill] sm:$0xff]  ;;  %v1890_v9 = vld [vmem:[#allocation8 + $0x478] sm:$0xff] }
 0x356   :  { %6431 = vmatprep.subr.bf16.mxu0 %v9721_v15  ;;  %7203 = vmatprep.subr.bf16.mxu1 %v9723_v19  ;;  %v15349_v15 = vld [vmem:[#allocation109_spill] sm:$0xff]  ;;  %v15351_v19 = vld [vmem:[#allocation111_spill] sm:$0xff] }
 0x357   :  { %v15359_v2 = vld [vmem:[#allocation21_spill] sm:$0xff] }
 0x359   :  { %6432 = vmatpush1.bf16.msra.mxu0 %v9720_v14  ;;  %7204 = vmatpush1.bf16.msra.mxu1 %v9722_v42  ;;  %v15357_v14 = vld [vmem:[#allocation121_spill] sm:$0xff]  ;;  %v15358_v42 = vld [vmem:[#allocation23_spill] sm:$0xff] }
 0x35a   :  { %6433 = vmatprep.subr.bf16.mxu0 %v9729_v58  ;;  %7205 = vmatprep.subr.bf16.mxu1 %v9731_v35  ;;  %v1885_v58 = vld [vmem:[#allocation8 + $0x450] sm:$0xff] }
 0x35b   :  { %5543 = vmatmul.mubr.bf16.gmra.mrb[156].mxu0 %v15348_v1  ;;  %6315 = vmatmul.mubr.bf16.gmra.mrb[156].mxu1 %v15348_v1  ;;  %v1889_v35 = vld [vmem:[#allocation8 + $0x470] sm:$0xff] }
 0x35c   :  { %5552 = vmatprep.mubr.bf16.mxu0 %v15349_v15  ;;  %6324 = vmatprep.mubr.bf16.mxu1 %v15349_v15  ;;  %v9753_v50 = vcombine.high %v1885_v58, %v1889_v35 }
 0x35d   :  { %6434 = vmatpush1.bf16.msra.mxu0 %v9728_v26  ;;  %7206 = vmatpush1.bf16.msra.mxu1 %v9730_v21  ;;  %v9755_v26 = vcombine.high %v1886_v55, %v1890_v9  ;;  %v1893_v21 = vld [vmem:[#allocation8 + $0x490] sm:$0xff] }
 0x35e   :  { %6435 = vmatprep.subr.bf16.mxu0 %v9737_v53  ;;  %7207 = vmatprep.subr.bf16.mxu1 %v9739_v59  ;;  %v15352_v53 = vld [vmem:[#allocation110_spill] sm:$0xff]  ;;  %v1897_v59 = vld [vmem:[#allocation8 + $0x4b0] sm:$0xff] }
 0x361   :  { %6436 = vmatpush1.bf16.msra.mxu0 %v9736_v22  ;;  %7208 = vmatpush1.bf16.msra.mxu1 %v9738_v61  ;;  %v15360_v22 = vld [vmem:[#allocation27_spill] sm:$0xff]  ;;  %v1894_v61 = vld [vmem:[#allocation8 + $0x498] sm:$0xff] }
 0x362   :  { %6598 = vmatprep.subr.bf16.mxu0 %v9745_v45  ;;  %7370 = vmatprep.subr.bf16.mxu1 %v9747_v37  ;;  %v1898_v45 = vld [vmem:[#allocation8 + $0x4b8] sm:$0xff]  ;;  %v15361_v37 = vcombine.low %v13547_v32, %v13549_v13 }
 0x363   :  { %5553 = vmatmul.mubr.bf16.gmra.mrb[160].mxu0 %v15350_v36  ;;  %6325 = vmatmul.mubr.bf16.gmra.mrb[160].mxu1 %v15350_v36  ;;  %v13646_v32 = vld [vmem:[#allocation8 + $0x818] sm:$0xff] }
 0x364   :  { %5562 = vmatprep.mubr.bf16.mxu0 %v15351_v19  ;;  %6334 = vmatprep.mubr.bf16.mxu1 %v15351_v19  ;;  %v1902_v13 = vld [vmem:[#allocation8 + $0x4d8] sm:$0xff] }
 0x36b   :  { %5563 = vmatmul.mubr.bf16.gmra.mrb[164].mxu0 %v15352_v53  ;;  %6335 = vmatmul.mubr.bf16.gmra.mrb[164].mxu1 %v15352_v53 }
 0x36c   :  { %5572 = vmatprep.mubr.bf16.mxu0 %v15353_v4  ;;  %6344 = vmatprep.mubr.bf16.mxu1 %v15353_v4 }
 0x373   :  { %5573 = vmatmul.mubr.bf16.gmra.mrb[168].mxu0 %v15354_v24  ;;  %6345 = vmatmul.mubr.bf16.gmra.mrb[168].mxu1 %v15354_v24  ;;  %v15365_v24 = vld [vmem:[#allocation29_spill] sm:$0xff] }
 0x374   :  { %5582 = vmatprep.mubr.bf16.mxu0 %v15355_v57  ;;  %6354 = vmatprep.mubr.bf16.mxu1 %v15355_v57 }
 0x37b   :  { %5583 = vmatmul.mubr.bf16.gmra.mrb[172].mxu0 %v15356_v23  ;;  %6355 = vmatmul.mubr.bf16.gmra.mrb[172].mxu1 %v15356_v23 }
 0x37c   :  { %5592 = vmatprep.mubr.bf16.mxu0 %v13376_v29  ;;  %6364 = vmatprep.mubr.bf16.mxu1 %v13376_v29  ;;  %v1910_v29 = vld [vmem:[#allocation8 + $0x518] sm:$0xff] }
 0x383   :  { %5593 = vmatmul.mubr.bf16.gmra.mrb[176].mxu0 %v13370_v60  ;;  %6365 = vmatmul.mubr.bf16.gmra.mrb[176].mxu1 %v13370_v60  ;;  %v13644_v60 = vld [vmem:[#allocation8 + $0x830] sm:$0xff] }
 0x384   :  { %5602 = vmatprep.mubr.bf16.mxu0 %v13398_v8  ;;  %6374 = vmatprep.mubr.bf16.mxu1 %v13398_v8  ;;  %v13642_v8 = vld [vmem:[#allocation8 + $0x810] sm:$0xff] }
 0x38b   :  { %5603 = vmatmul.mubr.bf16.gmra.mrb[180].mxu0 %v13394_v33  ;;  %6375 = vmatmul.mubr.bf16.gmra.mrb[180].mxu1 %v13394_v33  ;;  %v9763_v33 = vcombine.high %v1894_v61, %v1898_v45 }
 0x38c   :  { %5612 = vmatprep.mubr.bf16.mxu0 %v13418_v52  ;;  %6384 = vmatprep.mubr.bf16.mxu1 %v13418_v52  ;;  %v1901_v52 = vld [vmem:[#allocation8 + $0x4d0] sm:$0xff] }
 0x393   :  { %5613 = vmatmul.mubr.bf16.gmra.mrb[184].mxu0 %v15357_v14  ;;  %6385 = vmatmul.mubr.bf16.gmra.mrb[184].mxu1 %v15357_v14  ;;  %v9761_v14 = vcombine.high %v1893_v21, %v1897_v59 }
 0x394   :  { %5622 = vmatprep.mubr.bf16.mxu0 %v13438_v27  ;;  %6394 = vmatprep.mubr.bf16.mxu1 %v13438_v27  ;;  %v9754_v27 = vcombine.low %v1886_v55, %v1890_v9  ;;  %v15363_v9 = vld [vmem:[#allocation25_spill] sm:$0xff] }
 0x39b   :  { %5623 = vmatmul.mubr.bf16.gmra.mrb[188].mxu0 %v13434_v3  ;;  %6395 = vmatmul.mubr.bf16.gmra.mrb[188].mxu1 %v13434_v3  ;;  %v15362_v3 = vcombine.low %v13559_v48, %v13561_v7  ;;  %v13650_v48 = vld [vmem:[#allocation8 + $0x838] sm:$0xff] }
 0x39c   :  { %6437 = vmatprep.mubr.bf16.mxu0 %v15358_v42  ;;  %7209 = vmatprep.mubr.bf16.mxu1 %v15358_v42  ;;  %v9752_v42 = vcombine.low %v1885_v58, %v1889_v35  ;;  %v9762_v35 = vcombine.low %v1894_v61, %v1898_v45  ;;  %v15364_v58 = vld [vmem:[#allocation31_spill] sm:$0xff]  ;;  %v1921_v61 = vld [vmem:[#allocation8 + $0x570] sm:$0xff]  ;;  %v1918_v45 = vld [vmem:[#allocation8 + $0x558] sm:$0xff] }
 0x39d   :  { %v1922_v7 = vld [vmem:[#allocation8 + $0x578] sm:$0xff] }
 0x3a3   :  { %6438 = vmatmul.mubr.bf16.vlgmr.msra.gmra.mrb[192].mxu0 %v15359_v2  ;;  %7210 = vmatmul.mubr.bf16.vlgmr.msra.gmra.mrb[192].mxu1 %v15359_v2  ;;  %v1905_v2 = vld [vmem:[#allocation8 + $0x4f0] sm:$0xff] }
 0x3a4   :  { %6447 = vmatprep.mubr.bf16.mxu0 %v15360_v22  ;;  %6599 = vmatpush1.bf16.msra.mxu0 %v15361_v37  ;;  %v9769_v55 = vcombine.high %v1901_v52, %v1905_v2  ;;  %v1913_v37 = vld [vmem:[#allocation8 + $0x530] sm:$0xff] }
 0x3a5   :  { %7219 = vmatprep.mubr.bf16.mxu1 %v15360_v22  ;;  %7371 = vmatpush1.bf16.msra.mxu1 %v15362_v3  ;;  %v1906_v22 = vld [vmem:[#allocation8 + $0x4f8] sm:$0xff]  ;;  %v9760_v3 = vcombine.low %v1893_v21, %v1897_v59  ;;  %v9768_v21 = vcombine.low %v1901_v52, %v1905_v2  ;;  %v9787_v52 = vcombine.high %v1918_v45, %v1922_v7  ;;  %v1925_v2 = vld [vmem:[#allocation8 + $0x590] sm:$0xff] }
 0x3a6   :  { %6600 = vmatprep.subr.bf16.mxu0 %v9753_v50  ;;  %7372 = vmatprep.subr.bf16.mxu1 %v9755_v26  ;;  %v9771_v50 = vcombine.high %v1902_v13, %v1906_v22  ;;  %v1909_v26 = vld [vmem:[#allocation8 + $0x510] sm:$0xff] }
 0x3a8   :  { %6601 = vmatpush1.bf16.msra.mxu0 %v9752_v42  ;;  %v1914_v42 = vld [vmem:[#allocation8 + $0x538] sm:$0xff] }
 0x3a9   :  { %7373 = vmatpush1.bf16.msra.mxu1 %v9754_v27  ;;  %6602 = vmatprep.subr.bf16.mxu0 %v9761_v14  ;;  %v9770_v27 = vcombine.low %v1902_v13, %v1906_v22  ;;  %v9777_v14 = vcombine.high %v1909_v26, %v1913_v37  ;;  %v9779_v59 = vcombine.high %v1910_v29, %v1914_v42  ;;  %v15366_v13 = vld [vmem:[#allocation35_spill] sm:$0xff]  ;;  %v1926_v22 = vld [vmem:[#allocation8 + $0x598] sm:$0xff] }
 0x3aa   :  { %7374 = vmatprep.subr.bf16.mxu1 %v9763_v33  ;;  %v1917_v33 = vld [vmem:[#allocation8 + $0x550] sm:$0xff]  ;;  %v9778_v23 = vcombine.low %v1910_v29, %v1914_v42  ;;  %v9786_v29 = vcombine.low %v1918_v45, %v1922_v7  ;;  %v1934_v42 = vld [vmem:[#allocation8 + $0x5d8] sm:$0xff]  ;;  %v15368_v7 = vld [vmem:[#allocation39_spill] sm:$0xff] }
 0x3ab   :  { %6448 = vmatmul.mubr.bf16.gmra.mrb[196].mxu0 %v15363_v9  ;;  %7220 = vmatmul.mubr.bf16.gmra.mrb[196].mxu1 %v15363_v9  ;;  %v9776_v9 = vcombine.low %v1909_v26, %v1913_v37  ;;  %v9785_v57 = vcombine.high %v1917_v33, %v1921_v61  ;;  %v1933_v26 = vld [vmem:[#allocation8 + $0x5d0] sm:$0xff]  ;;  %v1946_v45 = vld [vmem:[#allocation8 + $0x638] sm:$0xff] }
 0x3ac   :  { %6457 = vmatprep.mubr.bf16.mxu0 %v15364_v58  ;;  %7229 = vmatprep.mubr.bf16.mxu1 %v15364_v58  ;;  %v1929_v58 = vld [vmem:[#allocation8 + $0x5b0] sm:$0xff] }
 0x3ad   :  { %6603 = vmatpush1.bf16.msra.mxu0 %v9760_v3  ;;  %7375 = vmatpush1.bf16.msra.mxu1 %v9762_v35  ;;  %v1930_v3 = vld [vmem:[#allocation8 + $0x5b8] sm:$0xff]  ;;  %v9784_v35 = vcombine.low %v1917_v33, %v1921_v61  ;;  %v1937_v37 = vld [vmem:[#allocation8 + $0x5f0] sm:$0xff] }
 0x3ae   :  { %6604 = vmatprep.subr.bf16.mxu0 %v9769_v55  ;;  %7376 = vmatprep.subr.bf16.mxu1 %v9771_v50  ;;  %v9793_v55 = vcombine.high %v1925_v2, %v1929_v58  ;;  %v9795_v50 = vcombine.high %v1926_v22, %v1930_v3  ;;  %v1942_v61 = vld [vmem:[#allocation8 + $0x618] sm:$0xff] }
 0x3b1   :  { %6605 = vmatpush1.bf16.msra.mxu0 %v9768_v21  ;;  %7377 = vmatpush1.bf16.msra.mxu1 %v9770_v27  ;;  %v1938_v21 = vld [vmem:[#allocation8 + $0x5f8] sm:$0xff]  ;;  %v9794_v27 = vcombine.low %v1926_v22, %v1930_v3  ;;  %v1953_v22 = vld [vmem:[#allocation8 + $0x670] sm:$0xff] }
 0x3b2   :  { %6606 = vmatprep.subr.bf16.mxu0 %v9777_v14  ;;  %7378 = vmatprep.subr.bf16.mxu1 %v9779_v59  ;;  %v9801_v14 = vcombine.high %v1933_v26, %v1937_v37  ;;  %v15367_v59 = vld [vmem:[#allocation33_spill] sm:$0xff]  ;;  %v9803_v33 = vcombine.high %v1934_v42, %v1938_v21 }
 0x3b3   :  { %6458 = vmatmul.mubr.bf16.gmra.mrb[200].mxu0 %v15365_v24  ;;  %7230 = vmatmul.mubr.bf16.gmra.mrb[200].mxu1 %v15365_v24  ;;  %v9792_v24 = vcombine.low %v1925_v2, %v1929_v58  ;;  %v9811_v58 = vcombine.high %v1942_v61, %v1946_v45  ;;  %v1950_v3 = vld [vmem:[#allocation8 + $0x658] sm:$0xff] }
 0x3b4   :  { %6467 = vmatprep.mubr.bf16.mxu0 %v15366_v13  ;;  %7239 = vmatprep.mubr.bf16.mxu1 %v15366_v13  ;;  %v1949_v13 = vld [vmem:[#allocation8 + $0x650] sm:$0xff] }
 0x3b5   :  { %6607 = vmatpush1.bf16.msra.mxu0 %v9776_v9  ;;  %7379 = vmatpush1.bf16.msra.mxu1 %v9778_v23  ;;  %v1941_v23 = vld [vmem:[#allocation8 + $0x610] sm:$0xff]  ;;  %v9800_v9 = vcombine.low %v1933_v26, %v1937_v37 }
 0x3b6   :  { %6608 = vmatprep.subr.bf16.mxu0 %v9785_v57  ;;  %7380 = vmatprep.subr.bf16.mxu1 %v9787_v52  ;;  %v1945_v57 = vld [vmem:[#allocation8 + $0x630] sm:$0xff]  ;;  %v9802_v52 = vcombine.low %v1934_v42, %v1938_v21  ;;  %v15370_v42 = vld [vmem:[#allocation43_spill] sm:$0xff]  ;;  %v1958_v21 = vld [vmem:[#allocation8 + $0x698] sm:$0xff] }
 0x3b7   :  { %v9809_v2 = vcombine.high %v1941_v23, %v1945_v57  ;;  %v1957_v37 = vld [vmem:[#allocation8 + $0x690] sm:$0xff] }
 0x3b9   :  { %6609 = vmatpush1.bf16.msra.mxu0 %v9784_v35  ;;  %7381 = vmatpush1.bf16.msra.mxu1 %v9786_v29  ;;  %v1954_v35 = vld [vmem:[#allocation8 + $0x678] sm:$0xff]  ;;  %v9808_v29 = vcombine.low %v1941_v23, %v1945_v57 }
 0x3ba   :  { %6610 = vmatprep.subr.bf16.mxu0 %v9793_v55  ;;  %7382 = vmatprep.subr.bf16.mxu1 %v9795_v50  ;;  %v9810_v55 = vcombine.low %v1942_v61, %v1946_v45  ;;  %v9817_v50 = vcombine.high %v1949_v13, %v1953_v22  ;;  %v9819_v26 = vcombine.high %v1950_v3, %v1954_v35  ;;  %v1969_v61 = vld [vmem:[#allocation8 + $0x6f0] sm:$0xff]  ;;  %v1966_v45 = vld [vmem:[#allocation8 + $0x6d8] sm:$0xff] }
 0x3bb   :  { %6468 = vmatmul.mubr.bf16.gmra.mrb[204].mxu0 %v15367_v59  ;;  %7240 = vmatmul.mubr.bf16.gmra.mrb[204].mxu1 %v15367_v59  ;;  %v15369_v59 = vld [vmem:[#allocation37_spill] sm:$0xff] }
 0x3bc   :  { %6477 = vmatprep.mubr.bf16.mxu0 %v15368_v7  ;;  %7249 = vmatprep.mubr.bf16.mxu1 %v15368_v7  ;;  %v1965_v7 = vld [vmem:[#allocation8 + $0x6d0] sm:$0xff] }
 0x3bd   :  { %6611 = vmatpush1.bf16.msra.mxu0 %v9792_v24  ;;  %7383 = vmatpush1.bf16.msra.mxu1 %v9794_v27  ;;  %v1961_v24 = vld [vmem:[#allocation8 + $0x6b0] sm:$0xff]  ;;  %v1962_v27 = vld [vmem:[#allocation8 + $0x6b8] sm:$0xff] }
 0x3be   :  { %6612 = vmatprep.subr.bf16.mxu0 %v9801_v14  ;;  %7384 = vmatprep.subr.bf16.mxu1 %v9803_v33  ;;  %v9816_v14 = vcombine.low %v1949_v13, %v1953_v22  ;;  %v9818_v33 = vcombine.low %v1950_v3, %v1954_v35  ;;  %v9825_v23 = vcombine.high %v1957_v37, %v1961_v24  ;;  %v1973_v22 = vld [vmem:[#allocation8 + $0x710] sm:$0xff]  ;;  %v15372_v3 = vld [vmem:[#allocation47_spill] sm:$0xff]  ;;  %v1974_v35 = vld [vmem:[#allocation8 + $0x718] sm:$0xff] }
 0x3bf   :  { %v9827_v57 = vcombine.high %v1958_v21, %v1962_v27 }
 0x3c1   :  { %6613 = vmatpush1.bf16.msra.mxu0 %v9800_v9  ;;  %7385 = vmatpush1.bf16.msra.mxu1 %v9802_v52  ;;  %v1970_v9 = vld [vmem:[#allocation8 + $0x6f8] sm:$0xff]  ;;  %v9824_v52 = vcombine.low %v1957_v37, %v1961_v24 }
 0x3c2   :  { %6614 = vmatprep.subr.bf16.mxu0 %v9809_v2  ;;  %7386 = vmatprep.subr.bf16.mxu1 %v9811_v58  ;;  %v9826_v2 = vcombine.low %v1958_v21, %v1962_v27  ;;  %v9833_v58 = vcombine.high %v1965_v7, %v1969_v61  ;;  %v9835_v13 = vcombine.high %v1966_v45, %v1970_v9  ;;  %v1985_v21 = vld [vmem:[#allocation8 + $0x770] sm:$0xff]  ;;  %v1982_v27 = vld [vmem:[#allocation8 + $0x758] sm:$0xff] }
 0x3c3   :  { %6478 = vmatmul.mubr.bf16.gmra.mrb[208].mxu0 %v15369_v59  ;;  %7250 = vmatmul.mubr.bf16.gmra.mrb[208].mxu1 %v15369_v59  ;;  %v15371_v59 = vld [vmem:[#allocation41_spill] sm:$0xff] }
 0x3c4   :  { %6487 = vmatprep.mubr.bf16.mxu0 %v15370_v42  ;;  %7259 = vmatprep.mubr.bf16.mxu1 %v15370_v42  ;;  %v1981_v42 = vld [vmem:[#allocation8 + $0x750] sm:$0xff] }
 0x3c5   :  { %6615 = vmatpush1.bf16.msra.mxu0 %v9808_v29  ;;  %7387 = vmatpush1.bf16.msra.mxu1 %v9810_v55  ;;  %v1977_v29 = vld [vmem:[#allocation8 + $0x730] sm:$0xff]  ;;  %v1978_v55 = vld [vmem:[#allocation8 + $0x738] sm:$0xff] }
 0x3c6   :  { %6616 = vmatprep.subr.bf16.mxu0 %v9817_v50  ;;  %7388 = vmatprep.subr.bf16.mxu1 %v9819_v26  ;;  %v9832_v50 = vcombine.low %v1965_v7, %v1969_v61  ;;  %v9834_v26 = vcombine.low %v1966_v45, %v1970_v9  ;;  %v9841_v37 = vcombine.high %v1973_v22, %v1977_v29  ;;  %v1989_v61 = vld [vmem:[#allocation8 + $0x790] sm:$0xff]  ;;  %v15374_v45 = vld [vmem:[#allocation51_spill] sm:$0xff]  ;;  %v1990_v9 = vld [vmem:[#allocation8 + $0x798] sm:$0xff] }
 0x3c7   :  { %v9843_v24 = vcombine.high %v1974_v35, %v1978_v55 }
 0x3c9   :  { %6617 = vmatpush1.bf16.msra.mxu0 %v9816_v14  ;;  %7389 = vmatpush1.bf16.msra.mxu1 %v9818_v33  ;;  %v1986_v14 = vld [vmem:[#allocation8 + $0x778] sm:$0xff]  ;;  %v9840_v33 = vcombine.low %v1973_v22, %v1977_v29 }
 0x3ca   :  { %6618 = vmatprep.subr.bf16.mxu0 %v9825_v23  ;;  %7390 = vmatprep.subr.bf16.mxu1 %v9827_v57  ;;  %v9842_v23 = vcombine.low %v1974_v35, %v1978_v55  ;;  %v9849_v57 = vcombine.high %v1981_v42, %v1985_v21  ;;  %v9851_v7 = vcombine.high %v1982_v27, %v1986_v14  ;;  %v2001_v35 = vld [vmem:[#allocation8 + $0x7f0] sm:$0xff]  ;;  %v1998_v55 = vld [vmem:[#allocation8 + $0x7d8] sm:$0xff] }
 0x3cb   :  { %6488 = vmatmul.mubr.bf16.gmra.mrb[212].mxu0 %v15371_v59  ;;  %7260 = vmatmul.mubr.bf16.gmra.mrb[212].mxu1 %v15371_v59  ;;  %v15373_v59 = vld [vmem:[#allocation45_spill] sm:$0xff] }
 0x3cc   :  { %6497 = vmatprep.mubr.bf16.mxu0 %v15372_v3  ;;  %7269 = vmatprep.mubr.bf16.mxu1 %v15372_v3  ;;  %v1997_v3 = vld [vmem:[#allocation8 + $0x7d0] sm:$0xff] }
 0x3cd   :  { %6619 = vmatpush1.bf16.msra.mxu0 %v9824_v52  ;;  %7391 = vmatpush1.bf16.msra.mxu1 %v9826_v2  ;;  %v1993_v52 = vld [vmem:[#allocation8 + $0x7b0] sm:$0xff]  ;;  %v1994_v2 = vld [vmem:[#allocation8 + $0x7b8] sm:$0xff] }
 0x3ce   :  { %6620 = vmatprep.subr.bf16.mxu0 %v9833_v58  ;;  %7392 = vmatprep.subr.bf16.mxu1 %v9835_v13  ;;  %v9848_v58 = vcombine.low %v1981_v42, %v1985_v21  ;;  %v9850_v13 = vcombine.low %v1982_v27, %v1986_v14  ;;  %v9857_v22 = vcombine.high %v1989_v61, %v1993_v52  ;;  %v15376_v21 = vld [vmem:[#allocation55_spill] sm:$0xff] }
 0x3cf   :  { %v9859_v29 = vcombine.high %v1990_v9, %v1994_v2  ;;  %v9864_v27 = vcombine.low %v1997_v3, %v2001_v35 }
 0x3d1   :  { %6621 = vmatpush1.bf16.msra.mxu0 %v9832_v50  ;;  %7393 = vmatpush1.bf16.msra.mxu1 %v9834_v26  ;;  %v2002_v50 = vld [vmem:[#allocation8 + $0x7f8] sm:$0xff]  ;;  %v9856_v26 = vcombine.low %v1989_v61, %v1993_v52  ;;  %v15380_v52 = vld [vmem:[#allocation63_spill] sm:$0xff] }
 0x3d2   :  { %6622 = vmatprep.subr.bf16.mxu0 %v9841_v37  ;;  %7394 = vmatprep.subr.bf16.mxu1 %v9843_v24  ;;  %v9858_v37 = vcombine.low %v1990_v9, %v1994_v2  ;;  %v9865_v24 = vcombine.high %v1997_v3, %v2001_v35  ;;  %v9867_v42 = vcombine.high %v1998_v55, %v2002_v50  ;;  %v15379_v61 = vld [vmem:[#allocation57_spill] sm:$0xff]  ;;  %v15382_v2 = vld [vmem:[#allocation20_spill] sm:$0xff] }
 0x3d3   :  { %6498 = vmatmul.mubr.bf16.gmra.mrb[216].mxu0 %v15373_v59  ;;  %7270 = vmatmul.mubr.bf16.gmra.mrb[216].mxu1 %v15373_v59  ;;  %v15375_v59 = vld [vmem:[#allocation49_spill] sm:$0xff]  ;;  %v9866_v14 = vcombine.low %v1998_v55, %v2002_v50  ;;  %v15386_v35 = vsub.s32 1, %v15382_v2  ;;  %v15387_v50 = vsub.s32 3, %v15382_v2 }
 0x3d4   :  { %6507 = vmatprep.mubr.bf16.mxu0 %v15374_v45  ;;  %7279 = vmatprep.mubr.bf16.mxu1 %v15374_v45  ;;  %v2259_v45 = vld [vmem:[#allocation10] sm:$0xff]  ;;  %v15381_v9 = vld [vmem:[#allocation61_spill] sm:$0xff] }
 0x3d5   :  { %6623 = vmatpush1.bf16.msra.mxu0 %v9840_v33  ;;  %7395 = vmatpush1.bf16.msra.mxu1 %v9842_v23  ;;  %v9873_v33 = vcombine.high %v13642_v8, %v13644_v60  ;;  %v9875_v23 = vcombine.high %v13646_v32, %v13650_v48  ;;  %v13707_v55 = vrot.slane %v2259_v45, %v15386_v35  ;;  %v15388_v35 = vld [vmem:[#allocation65_spill] sm:$0xff] }
 0x3d6   :  { %6624 = vmatprep.subr.bf16.mxu0 %v9849_v57  ;;  %7396 = vmatprep.subr.bf16.mxu1 %v9851_v7  ;;  %v15377_v57 = vld [vmem:[#allocation53_spill] sm:$0xff]  ;;  %v15378_v7 = vld [vmem:[#allocation59_spill] sm:$0xff] }
 0x3d9   :  { %6625 = vmatpush1.bf16.msra.mxu0 %v9848_v58  ;;  %7397 = vmatpush1.bf16.msra.mxu1 %v9850_v13  ;;  %v15383_v58 = vsub.s32 0, %v15382_v2 }
 0x3da   :  { %6626 = vmatprep.subr.bf16.mxu0 %v9857_v22  ;;  %7398 = vmatprep.subr.bf16.mxu1 %v9859_v29  ;;  %v15384_v22 = vld [vmem:[#allocation67_spill] sm:$0xff]  ;;  %v15385_v29 = vsub.s32 2, %v15382_v2 }
 0x3db   :  { %6508 = vmatmul.mubr.bf16.gmra.mrb[220].mxu0 %v15375_v59  ;;  %7280 = vmatmul.mubr.bf16.gmra.mrb[220].mxu1 %v15375_v59  ;;  %v13697_v13 = vrot.slane %v2259_v45, %v15383_v58 }
 0x3dc   :  { %6517 = vmatprep.mubr.bf16.mxu0 %v15376_v21  ;;  %7289 = vmatprep.mubr.bf16.mxu1 %v15376_v21  ;;  %v13703_v3 = vrot.slane %v2259_v45, %v15385_v29 }
 0x3dd   :  { %6627 = vmatpush1.bf16.msra.mxu0 %v9856_v26  ;;  %7399 = vmatpush1.bf16.msra.mxu1 %v9858_v37  ;;  %v13712_v26 = vrot.slane %v2259_v45, %v15387_v50 }
 0x3de   :  { %6628 = vmatprep.subr.bf16.mxu0 %v9865_v24  ;;  %7400 = vmatprep.subr.bf16.mxu1 %v9867_v42 }
 0x3e1   :  { %6629 = vmatpush1.bf16.msra.mxu0 %v9864_v27  ;;  %7401 = vmatpush1.bf16.msra.mxu1 %v9866_v14 }
 0x3e2   :  { %6791 = vmatprep.subr.bf16.mxu0 %v9873_v33  ;;  %7563 = vmatprep.subr.bf16.mxu1 %v9875_v23 }
 0x3e3   :  { %6518 = vmatmul.mubr.bf16.gmra.mrb[224].mxu0 %v15377_v57  ;;  %7290 = vmatmul.mubr.bf16.gmra.mrb[224].mxu1 %v15377_v57 }
 0x3e4   :  { %6527 = vmatprep.mubr.bf16.mxu0 %v15378_v7  ;;  %7299 = vmatprep.mubr.bf16.mxu1 %v15378_v7 }
 0x3eb   :  { %6528 = vmatmul.mubr.bf16.gmra.mrb[228].mxu0 %v15379_v61  ;;  %7300 = vmatmul.mubr.bf16.gmra.mrb[228].mxu1 %v15379_v61 }
 0x3ec   :  { %6537 = vmatprep.mubr.bf16.mxu0 %v15380_v52  ;;  %7309 = vmatprep.mubr.bf16.mxu1 %v15380_v52 }
 0x3f3   :  { %6538 = vmatmul.mubr.bf16.gmra.mrb[232].mxu0 %v15381_v9  ;;  %7310 = vmatmul.mubr.bf16.gmra.mrb[232].mxu1 %v15381_v9 }
 0x3f4   :  { %6547 = vmatprep.mubr.bf16.mxu0 %v15384_v22  ;;  %7319 = vmatprep.mubr.bf16.mxu1 %v15384_v22 }
 0x3f6   :  { %v5474_v37 = vpop.f32.mrb[128].mxu0  ;;  %v6246_v59 = vpop.f32.mrb[128].mxu1 }
 0x3f7   :  { %v10637_v24 = vadd.f32 %v5474_v37, %v13697_v13  ;;  %v5476_v42 = vpop.f32.mrb[129].mxu0  ;;  %v10701_v21 = vadd.f32 %v6246_v59, %v13703_v3  ;;  %v6248_v14 = vpop.f32.mrb[129].mxu1 }
 0x3f8   :  { %v10638_v27 = vadd.f32 %v5476_v42, %v13707_v55  ;;  %v5478_v33 = vpop.f32.mrb[130].mxu0  ;;  %v10702_v23 = vadd.f32 %v6248_v14, %v13712_v26  ;;  %v6250_v7 = vpop.f32.mrb[130].mxu1  ;;  %v15389_v14 = vld [vmem:[#allocation70_spill] sm:$0xff] }
 0x3f9   :  { %v10639_v57 = vadd.f32 %v5478_v33, %v13697_v13  ;;  %v5480_v61 = vpop.f32.mrb[131].mxu0  ;;  %v10703_v52 = vadd.f32 %v6250_v7, %v13703_v3  ;;  %v6252_v9 = vpop.f32.mrb[131].mxu1  ;;  %v7949_v58 = vmax.f32 %v10637_v24, 0.0  ;;  %v7951_v50 = vmax.f32 %v10701_v21, 0.0 }
 0x3fa   :  { %v10640_v45 = vadd.f32 %v5480_v61, %v13707_v55  ;;  %v10704_v29 = vadd.f32 %v6252_v9, %v13712_v26  ;;  %v7950_v37 = vmax.f32 %v10638_v27, 0.0  ;;  %v7952_v33 = vmax.f32 %v10702_v23, 0.0 }
 0x3fb   :  { %v7957_v22 = vmax.f32 %v10639_v57, 0.0  ;;  %6548 = vmatmul.mubr.bf16.gmra.mrb[236].mxu0 %v15388_v35  ;;  %v7959_v59 = vmax.f32 %v10703_v52, 0.0  ;;  %7320 = vmatmul.mubr.bf16.gmra.mrb[236].mxu1 %v15388_v35 }
 0x3fc   :  { %v7958_v42 = vmax.f32 %v10640_v45, 0.0  ;;  %6557 = vmatprep.mubr.bf16.mxu0 %v15389_v14  ;;  %v7960_v7 = vmax.f32 %v10704_v29, 0.0  ;;  %7329 = vmatprep.mubr.bf16.mxu1 %v15389_v14 }
 0x3fd   :  { %v13725_v2 = vpack.c.bf16 %v7957_v22, %v7949_v58  ;;  %v13728_v24 = vpack.c.bf16 %v7959_v59, %v7951_v50 }
 0x3fe   :  { %v13730_v57 = vpack.c.bf16 %v7958_v42, %v7950_v37  ;;  %v5484_v61 = vpop.f32.mrb[132].mxu0  ;;  %v13732_v9 = vpack.c.bf16 %v7960_v7, %v7952_v33  ;;  %v6256_v27 = vpop.f32.mrb[132].mxu1 }
 0x3ff   :  { %15390 = vst [vmem:[#allocation66_spill] sm:$0xff] %v13725_v2  ;;  %15391 = vst [vmem:[#allocation102_spill] sm:$0xff] %v13728_v24  ;;  %v10641_v21 = vadd.f32 %v5484_v61, %v13697_v13  ;;  %v5486_v52 = vpop.f32.mrb[133].mxu0  ;;  %v10705_v45 = vadd.f32 %v6256_v27, %v13703_v3  ;;  %v6258_v58 = vpop.f32.mrb[133].mxu1  ;;  %v15394_v27 = vld [vmem:[#allocation69_spill] sm:$0xff] }
 0x400   :  { %15392 = vst [vmem:[#allocation100_spill] sm:$0xff] %v13730_v57  ;;  %15393 = vst [vmem:[#allocation23_spill] sm:$0xff] %v13732_v9  ;;  %v10642_v23 = vadd.f32 %v5486_v52, %v13707_v55  ;;  %v5488_v22 = vpop.f32.mrb[134].mxu0  ;;  %v10706_v29 = vadd.f32 %v6258_v58, %v13712_v26  ;;  %v6260_v50 = vpop.f32.mrb[134].mxu1  ;;  %v15395_v58 = vld [vmem:[#allocation72_spill] sm:$0xff] }
 0x401   :  { %v10643_v35 = vadd.f32 %v5488_v22, %v13697_v13  ;;  %v5490_v37 = vpop.f32.mrb[135].mxu0  ;;  %v10707_v59 = vadd.f32 %v6260_v50, %v13703_v3  ;;  %v6262_v14 = vpop.f32.mrb[135].mxu1  ;;  %v7965_v33 = vmax.f32 %v10641_v21, 0.0  ;;  %v7967_v52 = vmax.f32 %v10705_v45, 0.0 }
 0x402   :  { %v10644_v42 = vadd.f32 %v5490_v37, %v13707_v55  ;;  %v10708_v61 = vadd.f32 %v6262_v14, %v13712_v26  ;;  %v7966_v24 = vmax.f32 %v10642_v23, 0.0  ;;  %v7968_v22 = vmax.f32 %v10706_v29, 0.0 }
 0x403   :  { %v7973_v7 = vmax.f32 %v10643_v35, 0.0  ;;  %6558 = vmatmul.mubr.bf16.gmra.mrb[240].mxu0 %v15394_v27  ;;  %v7975_v2 = vmax.f32 %v10707_v59, 0.0  ;;  %7330 = vmatmul.mubr.bf16.gmra.mrb[240].mxu1 %v15394_v27 }
 0x404   :  { %v7974_v9 = vmax.f32 %v10644_v42, 0.0  ;;  %6567 = vmatprep.mubr.bf16.mxu0 %v15395_v58  ;;  %v7976_v50 = vmax.f32 %v10708_v61, 0.0  ;;  %7339 = vmatprep.mubr.bf16.mxu1 %v15395_v58 }
 0x405   :  { %v13745_v57 = vpack.c.bf16 %v7973_v7, %v7965_v33  ;;  %v13748_v21 = vpack.c.bf16 %v7975_v2, %v7967_v52 }
 0x406   :  { %v13750_v35 = vpack.c.bf16 %v7974_v9, %v7966_v24  ;;  %v5494_v37 = vpop.f32.mrb[136].mxu0  ;;  %v13752_v14 = vpack.c.bf16 %v7976_v50, %v7968_v22  ;;  %v6266_v23 = vpop.f32.mrb[136].mxu1 }
 0x407   :  { %15396 = vst [vmem:[#allocation21_spill] sm:$0xff] %v13745_v57  ;;  %15397 = vst [vmem:[#allocation27_spill] sm:$0xff] %v13748_v21  ;;  %v10645_v45 = vadd.f32 %v5494_v37, %v13697_v13  ;;  %v5496_v59 = vpop.f32.mrb[137].mxu0  ;;  %v10709_v42 = vadd.f32 %v6266_v23, %v13703_v3  ;;  %v6268_v33 = vpop.f32.mrb[137].mxu1  ;;  %v15400_v23 = vld [vmem:[#allocation71_spill] sm:$0xff] }
 0x408   :  { %15398 = vst [vmem:[#allocation25_spill] sm:$0xff] %v13750_v35  ;;  %15399 = vst [vmem:[#allocation31_spill] sm:$0xff] %v13752_v14  ;;  %v10646_v29 = vadd.f32 %v5496_v59, %v13707_v55  ;;  %v5498_v7 = vpop.f32.mrb[138].mxu0  ;;  %v10710_v61 = vadd.f32 %v6268_v33, %v13712_v26  ;;  %v6270_v27 = vpop.f32.mrb[138].mxu1  ;;  %v15401_v33 = vld [vmem:[#allocation75_spill] sm:$0xff] }
 0x409   :  { %v10647_v2 = vadd.f32 %v5498_v7, %v13697_v13  ;;  %v5500_v24 = vpop.f32.mrb[139].mxu0  ;;  %v10711_v9 = vadd.f32 %v6270_v27, %v13703_v3  ;;  %v6272_v58 = vpop.f32.mrb[139].mxu1  ;;  %v7981_v22 = vmax.f32 %v10645_v45, 0.0  ;;  %v7983_v59 = vmax.f32 %v10709_v42, 0.0 }
 0x40a   :  { %v10648_v52 = vadd.f32 %v5500_v24, %v13707_v55  ;;  %v10712_v37 = vadd.f32 %v6272_v58, %v13712_v26  ;;  %v7982_v21 = vmax.f32 %v10646_v29, 0.0  ;;  %v7984_v7 = vmax.f32 %v10710_v61, 0.0 }
 0x40b   :  { %v7989_v50 = vmax.f32 %v10647_v2, 0.0  ;;  %6568 = vmatmul.mubr.bf16.gmra.mrb[244].mxu0 %v15400_v23  ;;  %v7991_v57 = vmax.f32 %v10711_v9, 0.0  ;;  %7340 = vmatmul.mubr.bf16.gmra.mrb[244].mxu1 %v15400_v23 }
 0x40c   :  { %v7990_v14 = vmax.f32 %v10648_v52, 0.0  ;;  %6577 = vmatprep.mubr.bf16.mxu0 %v15401_v33  ;;  %v7992_v27 = vmax.f32 %v10712_v37, 0.0  ;;  %7349 = vmatprep.mubr.bf16.mxu1 %v15401_v33 }
 0x40d   :  { %v13765_v35 = vpack.c.bf16 %v7989_v50, %v7981_v22  ;;  %v13768_v45 = vpack.c.bf16 %v7991_v57, %v7983_v59 }
 0x40e   :  { %v13770_v2 = vpack.c.bf16 %v7990_v14, %v7982_v21  ;;  %v5504_v24 = vpop.f32.mrb[140].mxu0  ;;  %v13772_v58 = vpack.c.bf16 %v7992_v27, %v7984_v7  ;;  %v6276_v29 = vpop.f32.mrb[140].mxu1 }
 0x40f   :  { %15402 = vst [vmem:[#allocation29_spill] sm:$0xff] %v13765_v35  ;;  %15403 = vst [vmem:[#allocation35_spill] sm:$0xff] %v13768_v45  ;;  %v10649_v42 = vadd.f32 %v5504_v24, %v13697_v13  ;;  %v5506_v9 = vpop.f32.mrb[141].mxu0  ;;  %v10713_v52 = vadd.f32 %v6276_v29, %v13703_v3  ;;  %v6278_v22 = vpop.f32.mrb[141].mxu1  ;;  %v15406_v29 = vld [vmem:[#allocation73_spill] sm:$0xff] }
 0x410   :  { %15404 = vst [vmem:[#allocation33_spill] sm:$0xff] %v13770_v2  ;;  %15405 = vst [vmem:[#allocation39_spill] sm:$0xff] %v13772_v58  ;;  %v10650_v61 = vadd.f32 %v5506_v9, %v13707_v55  ;;  %v5508_v50 = vpop.f32.mrb[142].mxu0  ;;  %v10714_v37 = vadd.f32 %v6278_v22, %v13712_v26  ;;  %v6280_v23 = vpop.f32.mrb[142].mxu1  ;;  %v15407_v22 = vld [vmem:[#allocation78_spill] sm:$0xff] }
 0x411   :  { %v10651_v57 = vadd.f32 %v5508_v50, %v13697_v13  ;;  %v5510_v21 = vpop.f32.mrb[143].mxu0  ;;  %v10715_v14 = vadd.f32 %v6280_v23, %v13703_v3  ;;  %v6282_v33 = vpop.f32.mrb[143].mxu1  ;;  %v7997_v7 = vmax.f32 %v10649_v42, 0.0  ;;  %v7999_v9 = vmax.f32 %v10713_v52, 0.0 }
 0x412   :  { %v10652_v59 = vadd.f32 %v5510_v21, %v13707_v55  ;;  %v10716_v24 = vadd.f32 %v6282_v33, %v13712_v26  ;;  %v7998_v45 = vmax.f32 %v10650_v61, 0.0  ;;  %v8000_v50 = vmax.f32 %v10714_v37, 0.0 }
 0x413   :  { %v8005_v27 = vmax.f32 %v10651_v57, 0.0  ;;  %6578 = vmatmul.mubr.bf16.gmra.mrb[248].mxu0 %v15406_v29  ;;  %v8007_v35 = vmax.f32 %v10715_v14, 0.0  ;;  %7350 = vmatmul.mubr.bf16.gmra.mrb[248].mxu1 %v15406_v29 }
 0x414   :  { %v8006_v58 = vmax.f32 %v10652_v59, 0.0  ;;  %6587 = vmatprep.mubr.bf16.mxu0 %v15407_v22  ;;  %v8008_v23 = vmax.f32 %v10716_v24, 0.0  ;;  %7359 = vmatprep.mubr.bf16.mxu1 %v15407_v22 }
 0x415   :  { %v13785_v2 = vpack.c.bf16 %v8005_v27, %v7997_v7  ;;  %v13788_v42 = vpack.c.bf16 %v8007_v35, %v7999_v9 }
 0x416   :  { %v13790_v57 = vpack.c.bf16 %v8006_v58, %v7998_v45  ;;  %v5514_v21 = vpop.f32.mrb[144].mxu0  ;;  %v13792_v33 = vpack.c.bf16 %v8008_v23, %v8000_v50  ;;  %v6286_v61 = vpop.f32.mrb[144].mxu1 }
 0x417   :  { %15408 = vst [vmem:[#allocation37_spill] sm:$0xff] %v13785_v2  ;;  %15409 = vst [vmem:[#allocation43_spill] sm:$0xff] %v13788_v42  ;;  %v10653_v52 = vadd.f32 %v5514_v21, %v13697_v13  ;;  %v5516_v14 = vpop.f32.mrb[145].mxu0  ;;  %v10717_v59 = vadd.f32 %v6286_v61, %v13703_v3  ;;  %v6288_v7 = vpop.f32.mrb[145].mxu1  ;;  %v15412_v61 = vld [vmem:[#allocation76_spill] sm:$0xff] }
 0x418   :  { %15410 = vst [vmem:[#allocation41_spill] sm:$0xff] %v13790_v57  ;;  %15411 = vst [vmem:[#allocation47_spill] sm:$0xff] %v13792_v33  ;;  %v10654_v37 = vadd.f32 %v5516_v14, %v13707_v55  ;;  %v5518_v27 = vpop.f32.mrb[146].mxu0  ;;  %v10718_v24 = vadd.f32 %v6288_v7, %v13712_v26  ;;  %v6290_v29 = vpop.f32.mrb[146].mxu1  ;;  %v15413_v7 = vld [vmem:[#allocation24_spill] sm:$0xff] }
 0x419   :  { %v10655_v35 = vadd.f32 %v5518_v27, %v13697_v13  ;;  %v5520_v45 = vpop.f32.mrb[147].mxu0  ;;  %v10719_v58 = vadd.f32 %v6290_v29, %v13703_v3  ;;  %v6292_v22 = vpop.f32.mrb[147].mxu1  ;;  %v8013_v50 = vmax.f32 %v10653_v52, 0.0  ;;  %v8015_v14 = vmax.f32 %v10717_v59, 0.0  ;;  %v13814_v59 = vld [vmem:[#allocation8 + $0x870] sm:$0xff] }
 0x41a   :  { %v10656_v9 = vadd.f32 %v5520_v45, %v13707_v55  ;;  %v10720_v21 = vadd.f32 %v6292_v22, %v13712_v26  ;;  %v8014_v42 = vmax.f32 %v10654_v37, 0.0  ;;  %v8016_v27 = vmax.f32 %v10718_v24, 0.0  ;;  %v13812_v22 = vld [vmem:[#allocation8 + $0x850] sm:$0xff] }
 0x41b   :  { %v8021_v23 = vmax.f32 %v10655_v35, 0.0  ;;  %6588 = vmatmul.mubr.bf16.gmra.mrb[252].mxu0 %v15412_v61  ;;  %v8023_v2 = vmax.f32 %v10719_v58, 0.0  ;;  %7360 = vmatmul.mubr.bf16.gmra.mrb[252].mxu1 %v15412_v61 }
 0x41c   :  { %v8022_v33 = vmax.f32 %v10656_v9, 0.0  ;;  %6630 = vmatprep.mubr.bf16.mxu0 %v15413_v7  ;;  %v8024_v29 = vmax.f32 %v10720_v21, 0.0  ;;  %7402 = vmatprep.mubr.bf16.mxu1 %v15413_v7 }
 0x41d   :  { %v13805_v57 = vpack.c.bf16 %v8021_v23, %v8013_v50  ;;  %v13808_v52 = vpack.c.bf16 %v8023_v2, %v8015_v14  ;;  %v13819_v50 = vld [vmem:[#allocation8 + $0x858] sm:$0xff] }
 0x41e   :  { %v13810_v35 = vpack.c.bf16 %v8022_v33, %v8014_v42  ;;  %v5524_v45 = vpop.f32.mrb[148].mxu0  ;;  %v13816_v37 = vpack.c.bf16 %v8024_v29, %v8016_v27  ;;  %v6296_v9 = vpop.f32.mrb[148].mxu1  ;;  %v13821_v23 = vld [vmem:[#allocation8 + $0x878] sm:$0xff]  ;;  %v9880_v29 = vcombine.low %v13812_v22, %v13814_v59 }
 0x41f   :  { %15414 = vst [vmem:[#allocation45_spill] sm:$0xff] %v13805_v57  ;;  %15415 = vst [vmem:[#allocation51_spill] sm:$0xff] %v13808_v52  ;;  %v10657_v58 = vadd.f32 %v5524_v45, %v13697_v13  ;;  %v5526_v24 = vpop.f32.mrb[149].mxu0  ;;  %v10721_v2 = vadd.f32 %v6296_v9, %v13703_v3  ;;  %v6298_v33 = vpop.f32.mrb[149].mxu1  ;;  %v9881_v45 = vcombine.high %v13812_v22, %v13814_v59  ;;  %v15418_v59 = vld [vmem:[#allocation22_spill] sm:$0xff] }
 0x420   :  { %15416 = vst [vmem:[#allocation49_spill] sm:$0xff] %v13810_v35  ;;  %15417 = vst [vmem:[#allocation55_spill] sm:$0xff] %v13816_v37  ;;  %v10658_v42 = vadd.f32 %v5526_v24, %v13707_v55  ;;  %v5528_v21 = vpop.f32.mrb[150].mxu0  ;;  %v10722_v61 = vadd.f32 %v6298_v33, %v13712_v26  ;;  %v6300_v7 = vpop.f32.mrb[150].mxu1  ;;  %v9882_v24 = vcombine.low %v13819_v50, %v13821_v23  ;;  %v13839_v37 = vld [vmem:[#allocation8 + $0x8b0] sm:$0xff] }
 0x421   :  { %v10659_v14 = vadd.f32 %v5528_v21, %v13697_v13  ;;  %v5530_v27 = vpop.f32.mrb[151].mxu0  ;;  %v10723_v52 = vadd.f32 %v6300_v7, %v13703_v3  ;;  %v6302_v57 = vpop.f32.mrb[151].mxu1  ;;  %v9883_v33 = vcombine.high %v13819_v50, %v13821_v23  ;;  %v13837_v21 = vld [vmem:[#allocation8 + $0x890] sm:$0xff]  ;;  %v8029_v35 = vmax.f32 %v10657_v58, 0.0  ;;  %v13849_v23 = vld [vmem:[#allocation8 + $0x898] sm:$0xff] }
 0x422   :  { %v10660_v9 = vadd.f32 %v5530_v27, %v13707_v55  ;;  %v8031_v4 = vmax.f32 %v10721_v2, 0.0  ;;  %v10724_v22 = vadd.f32 %v6302_v57, %v13712_v26  ;;  %v13843_v7 = vld [vmem:[#allocation8 + $0xc10] sm:$0xff]  ;;  %v8030_v19 = vmax.f32 %v10658_v42, 0.0  ;;  %v13851_v58 = vld [vmem:[#allocation8 + $0x8b8] sm:$0xff] }
 0x423   :  { %v8037_v53 = vmax.f32 %v10659_v14, 0.0  ;;  %6631 = vmatmul.mubr.bf16.vlgmr.msra.gmra.mrb[192].mxu0 %v15418_v59  ;;  %v13845_v27 = vld [vmem:[#allocation8 + $0xc30] sm:$0xff]  ;;  %v8039_v36 = vmax.f32 %v10723_v52, 0.0  ;;  %7403 = vmatmul.mubr.bf16.vlgmr.msra.gmra.mrb[192].mxu1 %v15418_v59  ;;  %v8032_v2 = vmax.f32 %v10722_v61, 0.0  ;;  %v15421_v42 = vcombine.low %v13642_v8, %v13644_v60  ;;  %v13865_v59 = vld [vmem:[#allocation8 + $0xc38] sm:$0xff] }
 0x424   :  { %v8038_v15 = vmax.f32 %v10660_v9, 0.0  ;;  %v15419_v50 = vld [vmem:[#allocation28_spill] sm:$0xff]  ;;  %v8040_v1 = vmax.f32 %v10724_v22, 0.0  ;;  %v9889_v52 = vcombine.high %v13837_v21, %v13839_v37  ;;  %v13863_v9 = vld [vmem:[#allocation8 + $0xc18] sm:$0xff] }
 0x425   :  { %6640 = vmatprep.mubr.bf16.mxu0 %v15419_v50  ;;  %v13855_v14 = vpack.c.bf16 %v8037_v53, %v8029_v35  ;;  %6792 = vmatpush1.bf16.msra.mxu0 %v15421_v42  ;;  %v13867_v39 = vpack.c.bf16 %v8039_v36, %v8031_v4  ;;  %v15424_v35 = vcombine.low %v13646_v32, %v13650_v48  ;;  %v13874_v60 = vld [vmem:[#allocation8 + $0x8d0] sm:$0xff] }
 0x426   :  { %7412 = vmatprep.mubr.bf16.mxu1 %v15419_v50  ;;  %v13869_v57 = vpack.c.bf16 %v8038_v15, %v8030_v19  ;;  %v5534_v53 = vpop.f32.mrb[152].mxu0  ;;  %6793 = vmatprep.subr.bf16.mxu0 %v9881_v45  ;;  %v13876_v8 = vld [vmem:[#allocation8 + $0x8f0] sm:$0xff]  ;;  %v13880_v22 = vpack.c.bf16 %v8040_v1, %v8032_v2  ;;  %v6306_v4 = vpop.f32.mrb[152].mxu1  ;;  %v9891_v19 = vcombine.high %v13849_v23, %v13851_v58  ;;  %v13891_v1 = vld [vmem:[#allocation8 + $0x8f8] sm:$0xff] }
 0x427   :  { %15420 = vst [vmem:[#allocation53_spill] sm:$0xff] %v13855_v14  ;;  %15422 = vst [vmem:[#allocation59_spill] sm:$0xff] %v13867_v39  ;;  %7564 = vmatpush1.bf16.msra.mxu1 %v15424_v35  ;;  %v10661_v36 = vadd.f32 %v5534_v53, %v13697_v13  ;;  %v5536_v15 = vpop.f32.mrb[153].mxu0  ;;  %v10725_v32 = vadd.f32 %v6306_v4, %v13703_v3  ;;  %v6308_v45 = vpop.f32.mrb[153].mxu1  ;;  %v9888_v42 = vcombine.low %v13837_v21, %v13839_v37  ;;  %v13889_v35 = vld [vmem:[#allocation8 + $0x8d8] sm:$0xff] }
 0x428   :  { %15423 = vst [vmem:[#allocation57_spill] sm:$0xff] %v13869_v57  ;;  %15425 = vst [vmem:[#allocation63_spill] sm:$0xff] %v13880_v22  ;;  %7565 = vmatprep.subr.bf16.mxu1 %v9883_v33  ;;  %v10662_v48 = vadd.f32 %v5536_v15, %v13707_v55  ;;  %v5538_v50 = vpop.f32.mrb[154].mxu0  ;;  %v10726_v2 = vadd.f32 %v6308_v45, %v13712_v26  ;;  %v6310_v53 = vpop.f32.mrb[154].mxu1  ;;  %v9890_v4 = vcombine.low %v13849_v23, %v13851_v58  ;;  %v15426_v22 = vld [vmem:[#allocation26_spill] sm:$0xff]  ;;  %v13907_v58 = vld [vmem:[#allocation8 + $0x910] sm:$0xff] }
 0x429   :  { %v10663_v33 = vadd.f32 %v5538_v50, %v13697_v13  ;;  %v5540_v61 = vpop.f32.mrb[155].mxu0  ;;  %6794 = vmatpush1.bf16.msra.mxu0 %v9880_v29  ;;  %v9896_v15 = vcombine.low %v13874_v60, %v13876_v8  ;;  %v10727_v39 = vadd.f32 %v6310_v53, %v13703_v3  ;;  %v6312_v21 = vpop.f32.mrb[155].mxu1  ;;  %v9897_v45 = vcombine.high %v13874_v60, %v13876_v8  ;;  %v13909_v53 = vld [vmem:[#allocation8 + $0x930] sm:$0xff]  ;;  %v13913_v8 = vld [vmem:[#allocation8 + $0x918] sm:$0xff] }
 0x42a   :  { %v10664_v37 = vadd.f32 %v5540_v61, %v13707_v55  ;;  %6795 = vmatprep.subr.bf16.mxu0 %v9889_v52  ;;  %v8045_v50 = vmax.f32 %v10661_v36, 0.0  ;;  %v10728_v29 = vadd.f32 %v6312_v21, %v13712_v26  ;;  %v9899_v23 = vcombine.high %v13889_v35, %v13891_v1  ;;  %v15427_v60 = vld [vmem:[#allocation32_spill] sm:$0xff]  ;;  %v13915_v36 = vld [vmem:[#allocation8 + $0x938] sm:$0xff] }
 0x42b   :  { %7566 = vmatpush1.bf16.msra.mxu1 %v9882_v24  ;;  %v8053_v14 = vmax.f32 %v10663_v33, 0.0  ;;  %6641 = vmatmul.mubr.bf16.gmra.mrb[196].mxu0 %v15426_v22  ;;  %v8047_v61 = vmax.f32 %v10725_v32, 0.0  ;;  %v8046_v24 = vmax.f32 %v10662_v48, 0.0  ;;  %v8055_v52 = vmax.f32 %v10727_v39, 0.0 }
 0x42c   :  { %7567 = vmatprep.subr.bf16.mxu1 %v9891_v19  ;;  %v8054_v57 = vmax.f32 %v10664_v37, 0.0  ;;  %7413 = vmatmul.mubr.bf16.gmra.mrb[196].mxu1 %v15426_v22  ;;  %v8048_v19 = vmax.f32 %v10726_v2, 0.0  ;;  %v8056_v21 = vmax.f32 %v10728_v29, 0.0  ;;  %v9898_v32 = vcombine.low %v13889_v35, %v13891_v1  ;;  %v13928_v2 = vld [vmem:[#allocation8 + $0x950] sm:$0xff] }
 0x42d   :  { %6650 = vmatprep.mubr.bf16.mxu0 %v15427_v60  ;;  %v13917_v33 = vpack.c.bf16 %v8053_v14, %v8045_v50  ;;  %7422 = vmatprep.mubr.bf16.mxu1 %v15427_v60  ;;  %v13922_v39 = vpack.c.bf16 %v8055_v52, %v8047_v61  ;;  %v9905_v37 = vcombine.high %v13907_v58, %v13909_v53  ;;  %v13930_v14 = vld [vmem:[#allocation8 + $0x970] sm:$0xff]  ;;  %v13941_v52 = vld [vmem:[#allocation8 + $0x958] sm:$0xff] }
 0x42e   :  { %6796 = vmatpush1.bf16.msra.mxu0 %v9888_v42  ;;  %v13924_v48 = vpack.c.bf16 %v8054_v57, %v8046_v24  ;;  %v5544_v22 = vpop.f32.mrb[156].mxu0  ;;  %v13932_v50 = vpack.c.bf16 %v8056_v21, %v8048_v19  ;;  %v6316_v29 = vpop.f32.mrb[156].mxu1  ;;  %v9907_v57 = vcombine.high %v13913_v8, %v13915_v36  ;;  %v9904_v24 = vcombine.low %v13907_v58, %v13909_v53  ;;  %v13943_v60 = vld [vmem:[#allocation8 + $0x978] sm:$0xff] }
 0x42f   :  { %15428 = vst [vmem:[#allocation61_spill] sm:$0xff] %v13917_v33  ;;  %15429 = vst [vmem:[#allocation67_spill] sm:$0xff] %v13922_v39  ;;  %7568 = vmatpush1.bf16.msra.mxu1 %v9890_v4  ;;  %6797 = vmatprep.subr.bf16.mxu0 %v9897_v45  ;;  %v10665_v42 = vadd.f32 %v5544_v22, %v13697_v13  ;;  %v5546_v35 = vpop.f32.mrb[157].mxu0  ;;  %v10729_v1 = vadd.f32 %v6316_v29, %v13703_v3  ;;  %v6318_v45 = vpop.f32.mrb[157].mxu1 }
 0x430   :  { %15430 = vst [vmem:[#allocation65_spill] sm:$0xff] %v13924_v48  ;;  %15431 = vst [vmem:[#allocation70_spill] sm:$0xff] %v13932_v50  ;;  %7569 = vmatprep.subr.bf16.mxu1 %v9899_v23  ;;  %v10666_v4 = vadd.f32 %v5546_v35, %v13707_v55  ;;  %v5548_v61 = vpop.f32.mrb[158].mxu0  ;;  %v10730_v19 = vadd.f32 %v6318_v45, %v13712_v26  ;;  %v6320_v21 = vpop.f32.mrb[158].mxu1  ;;  %v9906_v29 = vcombine.low %v13913_v8, %v13915_v36  ;;  %v15432_v50 = vld [vmem:[#allocation30_spill] sm:$0xff]  ;;  %v13959_v36 = vld [vmem:[#allocation8 + $0x990] sm:$0xff] }
 0x431   :  { %v10667_v23 = vadd.f32 %v5548_v61, %v13697_v13  ;;  %v5550_v22 = vpop.f32.mrb[159].mxu0  ;;  %v9912_v35 = vcombine.low %v13928_v2, %v13930_v14  ;;  %v10731_v39 = vadd.f32 %v6320_v21, %v13703_v3  ;;  %v6322_v53 = vpop.f32.mrb[159].mxu1  ;;  %v9913_v45 = vcombine.high %v13928_v2, %v13930_v14  ;;  %v13961_v21 = vld [vmem:[#allocation8 + $0x9b0] sm:$0xff]  ;;  %v13965_v14 = vld [vmem:[#allocation8 + $0x998] sm:$0xff] }
 0x432   :  { %6798 = vmatpush1.bf16.msra.mxu0 %v9896_v15  ;;  %v10668_v58 = vadd.f32 %v5550_v22, %v13707_v55  ;;  %v8061_v61 = vmax.f32 %v10665_v42, 0.0  ;;  %v10732_v15 = vadd.f32 %v6322_v53, %v13712_v26  ;;  %v9915_v8 = vcombine.high %v13941_v52, %v13943_v60  ;;  %v15433_v2 = vld [vmem:[#allocation36_spill] sm:$0xff]  ;;  %v13967_v42 = vld [vmem:[#allocation8 + $0x9b8] sm:$0xff] }
 0x433   :  { %7570 = vmatpush1.bf16.msra.mxu1 %v9898_v32  ;;  %6799 = vmatprep.subr.bf16.mxu0 %v9905_v37  ;;  %v8069_v33 = vmax.f32 %v10667_v23, 0.0  ;;  %v8063_v22 = vmax.f32 %v10729_v1, 0.0  ;;  %v8062_v32 = vmax.f32 %v10666_v4, 0.0  ;;  %v8071_v37 = vmax.f32 %v10731_v39, 0.0 }
 0x434   :  { %6651 = vmatmul.mubr.bf16.gmra.mrb[200].mxu0 %v15432_v50  ;;  %7571 = vmatprep.subr.bf16.mxu1 %v9907_v57  ;;  %v8070_v48 = vmax.f32 %v10668_v58, 0.0  ;;  %v8064_v57 = vmax.f32 %v10730_v19, 0.0  ;;  %v8072_v53 = vmax.f32 %v10732_v15, 0.0  ;;  %v9914_v1 = vcombine.low %v13941_v52, %v13943_v60  ;;  %v13980_v19 = vld [vmem:[#allocation8 + $0x9d0] sm:$0xff] }
 0x435   :  { %7423 = vmatmul.mubr.bf16.gmra.mrb[200].mxu1 %v15432_v50  ;;  %6660 = vmatprep.mubr.bf16.mxu0 %v15433_v2  ;;  %v13969_v23 = vpack.c.bf16 %v8069_v33, %v8061_v61  ;;  %v13974_v39 = vpack.c.bf16 %v8071_v37, %v8063_v22  ;;  %v9921_v58 = vcombine.high %v13959_v36, %v13961_v21  ;;  %v13982_v33 = vld [vmem:[#allocation8 + $0x9f0] sm:$0xff]  ;;  %v13993_v37 = vld [vmem:[#allocation8 + $0x9d8] sm:$0xff] }
 0x436   :  { %7432 = vmatprep.mubr.bf16.mxu1 %v15433_v2  ;;  %6800 = vmatpush1.bf16.msra.mxu0 %v9904_v24  ;;  %v13976_v4 = vpack.c.bf16 %v8070_v48, %v8062_v32  ;;  %v5554_v50 = vpop.f32.mrb[160].mxu0  ;;  %v13984_v61 = vpack.c.bf16 %v8072_v53, %v8064_v57  ;;  %v6326_v15 = vpop.f32.mrb[160].mxu1  ;;  %v9923_v48 = vcombine.high %v13965_v14, %v13967_v42  ;;  %v13995_v2 = vld [vmem:[#allocation8 + $0x9f8] sm:$0xff] }
 0x437   :  { %15434 = vst [vmem:[#allocation69_spill] sm:$0xff] %v13969_v23  ;;  %15435 = vst [vmem:[#allocation72_spill] sm:$0xff] %v13974_v39  ;;  %7572 = vmatpush1.bf16.msra.mxu1 %v9906_v29  ;;  %6801 = vmatprep.subr.bf16.mxu0 %v9913_v45  ;;  %v10669_v24 = vadd.f32 %v5554_v50, %v13697_v13  ;;  %v5556_v52 = vpop.f32.mrb[161].mxu0  ;;  %v10733_v60 = vadd.f32 %v6326_v15, %v13703_v3  ;;  %v6328_v45 = vpop.f32.mrb[161].mxu1 }
 0x438   :  { %15436 = vst [vmem:[#allocation71_spill] sm:$0xff] %v13976_v4  ;;  %15437 = vst [vmem:[#allocation75_spill] sm:$0xff] %v13984_v61  ;;  %7573 = vmatprep.subr.bf16.mxu1 %v9915_v8  ;;  %v10670_v29 = vadd.f32 %v5556_v52, %v13707_v55  ;;  %v5558_v22 = vpop.f32.mrb[162].mxu0  ;;  %v9920_v32 = vcombine.low %v13959_v36, %v13961_v21  ;;  %v10734_v57 = vadd.f32 %v6328_v45, %v13712_v26  ;;  %v6330_v53 = vpop.f32.mrb[162].mxu1  ;;  %v15438_v61 = vld [vmem:[#allocation34_spill] sm:$0xff] }
 0x439   :  { %v10671_v8 = vadd.f32 %v5558_v22, %v13697_v13  ;;  %v5560_v50 = vpop.f32.mrb[163].mxu0  ;;  %v9922_v15 = vcombine.low %v13965_v14, %v13967_v42  ;;  %v9928_v52 = vcombine.low %v13980_v19, %v13982_v33  ;;  %v10735_v39 = vadd.f32 %v6330_v53, %v13703_v3  ;;  %v6332_v21 = vpop.f32.mrb[163].mxu1  ;;  %v14011_v42 = vld [vmem:[#allocation8 + $0xa10] sm:$0xff] }
 0x43a   :  { %6802 = vmatpush1.bf16.msra.mxu0 %v9912_v35  ;;  %v10672_v36 = vadd.f32 %v5560_v50, %v13707_v55  ;;  %v9929_v45 = vcombine.high %v13980_v19, %v13982_v33  ;;  %v8077_v22 = vmax.f32 %v10669_v24, 0.0  ;;  %v10736_v35 = vadd.f32 %v6332_v21, %v13712_v26  ;;  %v14013_v53 = vld [vmem:[#allocation8 + $0xa30] sm:$0xff]  ;;  %v14017_v33 = vld [vmem:[#allocation8 + $0xa18] sm:$0xff] }
 0x43b   :  { %7574 = vmatpush1.bf16.msra.mxu1 %v9914_v1  ;;  %6803 = vmatprep.subr.bf16.mxu0 %v9921_v58  ;;  %v8085_v23 = vmax.f32 %v10671_v8, 0.0  ;;  %v9931_v14 = vcombine.high %v13993_v37, %v13995_v2  ;;  %v8079_v50 = vmax.f32 %v10733_v60, 0.0  ;;  %v8078_v1 = vmax.f32 %v10670_v29, 0.0  ;;  %v15439_v19 = vld [vmem:[#allocation40_spill] sm:$0xff]  ;;  %v14019_v24 = vld [vmem:[#allocation8 + $0xa38] sm:$0xff] }
 0x43c   :  { %6661 = vmatmul.mubr.bf16.gmra.mrb[204].mxu0 %v15438_v61  ;;  %7575 = vmatprep.subr.bf16.mxu1 %v9923_v48  ;;  %v8087_v58 = vmax.f32 %v10735_v39, 0.0  ;;  %v8086_v4 = vmax.f32 %v10672_v36, 0.0  ;;  %v8080_v48 = vmax.f32 %v10734_v57, 0.0  ;;  %v8088_v21 = vmax.f32 %v10736_v35, 0.0  ;;  %v14032_v57 = vld [vmem:[#allocation8 + $0xa50] sm:$0xff] }
 0x43d   :  { %7433 = vmatmul.mubr.bf16.gmra.mrb[204].mxu1 %v15438_v61  ;;  %6670 = vmatprep.mubr.bf16.mxu0 %v15439_v19  ;;  %v14021_v8 = vpack.c.bf16 %v8085_v23, %v8077_v22  ;;  %v9930_v60 = vcombine.low %v13993_v37, %v13995_v2  ;;  %v9937_v36 = vcombine.high %v14011_v42, %v14013_v53  ;;  %v14034_v23 = vld [vmem:[#allocation8 + $0xa70] sm:$0xff] }
 0x43e   :  { %7442 = vmatprep.mubr.bf16.mxu1 %v15439_v19  ;;  %6804 = vmatpush1.bf16.msra.mxu0 %v9920_v32  ;;  %v14026_v39 = vpack.c.bf16 %v8087_v58, %v8079_v50  ;;  %v14028_v29 = vpack.c.bf16 %v8086_v4, %v8078_v1  ;;  %v5564_v61 = vpop.f32.mrb[164].mxu0  ;;  %v14036_v22 = vpack.c.bf16 %v8088_v21, %v8080_v48  ;;  %v6336_v35 = vpop.f32.mrb[164].mxu1  ;;  %v14045_v58 = vld [vmem:[#allocation8 + $0xa58] sm:$0xff] }
 0x43f   :  { %15440 = vst [vmem:[#allocation73_spill] sm:$0xff] %v14021_v8  ;;  %7576 = vmatpush1.bf16.msra.mxu1 %v9922_v15  ;;  %6805 = vmatprep.subr.bf16.mxu0 %v9929_v45  ;;  %v10673_v32 = vadd.f32 %v5564_v61, %v13697_v13  ;;  %v5566_v37 = vpop.f32.mrb[165].mxu0  ;;  %v9939_v4 = vcombine.high %v14017_v33, %v14019_v24  ;;  %v6338_v45 = vpop.f32.mrb[165].mxu1  ;;  %v14047_v19 = vld [vmem:[#allocation8 + $0xa78] sm:$0xff] }
 0x440   :  { %15441 = vst [vmem:[#allocation78_spill] sm:$0xff] %v14026_v39  ;;  %15442 = vst [vmem:[#allocation76_spill] sm:$0xff] %v14028_v29  ;;  %7577 = vmatprep.subr.bf16.mxu1 %v9931_v14  ;;  %v10737_v2 = vadd.f32 %v6336_v35, %v13703_v3  ;;  %v10674_v15 = vadd.f32 %v5566_v37, %v13707_v55  ;;  %v5568_v50 = vpop.f32.mrb[166].mxu0  ;;  %v9936_v1 = vcombine.low %v14011_v42, %v14013_v53  ;;  %v6340_v21 = vpop.f32.mrb[166].mxu1 }
 0x441   :  { %15443 = vst [vmem:[#allocation24_spill] sm:$0xff] %v14036_v22  ;;  %v10738_v48 = vadd.f32 %v6338_v45, %v13712_v26  ;;  %v10675_v14 = vadd.f32 %v5568_v50, %v13697_v13  ;;  %v5570_v61 = vpop.f32.mrb[167].mxu0  ;;  %v9938_v35 = vcombine.low %v14017_v33, %v14019_v24  ;;  %v9944_v37 = vcombine.low %v14032_v57, %v14034_v23  ;;  %v6342_v53 = vpop.f32.mrb[167].mxu1  ;;  %v15444_v22 = vld [vmem:[#allocation38_spill] sm:$0xff]  ;;  %v14063_v24 = vld [vmem:[#allocation8 + $0xa90] sm:$0xff] }
 0x442   :  { %6806 = vmatpush1.bf16.msra.mxu0 %v9928_v52  ;;  %v10739_v39 = vadd.f32 %v6340_v21, %v13703_v3  ;;  %v10676_v42 = vadd.f32 %v5570_v61, %v13707_v55  ;;  %v9945_v45 = vcombine.high %v14032_v57, %v14034_v23  ;;  %v8093_v50 = vmax.f32 %v10673_v32, 0.0  ;;  %v14065_v21 = vld [vmem:[#allocation8 + $0xab0] sm:$0xff]  ;;  %v14069_v23 = vld [vmem:[#allocation8 + $0xa98] sm:$0xff] }
 0x443   :  { %7578 = vmatpush1.bf16.msra.mxu1 %v9930_v60  ;;  %6807 = vmatprep.subr.bf16.mxu0 %v9937_v36  ;;  %v8101_v8 = vmax.f32 %v10675_v14, 0.0  ;;  %v10740_v52 = vadd.f32 %v6342_v53, %v13712_v26  ;;  %v9947_v33 = vcombine.high %v14045_v58, %v14047_v19  ;;  %v8095_v61 = vmax.f32 %v10737_v2, 0.0  ;;  %v15445_v57 = vld [vmem:[#allocation44_spill] sm:$0xff]  ;;  %v14071_v32 = vld [vmem:[#allocation8 + $0xab8] sm:$0xff] }
 0x444   :  { %6671 = vmatmul.mubr.bf16.gmra.mrb[208].mxu0 %v15444_v22  ;;  %7579 = vmatprep.subr.bf16.mxu1 %v9939_v4  ;;  %v8094_v60 = vmax.f32 %v10674_v15, 0.0  ;;  %v8103_v36 = vmax.f32 %v10739_v39, 0.0  ;;  %v8102_v29 = vmax.f32 %v10676_v42, 0.0  ;;  %v8096_v4 = vmax.f32 %v10738_v48, 0.0  ;;  %v14084_v48 = vld [vmem:[#allocation8 + $0xad0] sm:$0xff] }
 0x445   :  { %7443 = vmatmul.mubr.bf16.gmra.mrb[208].mxu1 %v15444_v22  ;;  %6680 = vmatprep.mubr.bf16.mxu0 %v15445_v57  ;;  %v14073_v14 = vpack.c.bf16 %v8101_v8, %v8093_v50  ;;  %v8104_v53 = vmax.f32 %v10740_v52, 0.0  ;;  %v9946_v2 = vcombine.low %v14045_v58, %v14047_v19  ;;  %v9953_v42 = vcombine.high %v14063_v24, %v14065_v21  ;;  %v14086_v8 = vld [vmem:[#allocation8 + $0xaf0] sm:$0xff] }
 0x446   :  { %7452 = vmatprep.mubr.bf16.mxu1 %v15445_v57  ;;  %6808 = vmatpush1.bf16.msra.mxu0 %v9936_v1  ;;  %v14078_v39 = vpack.c.bf16 %v8103_v36, %v8095_v61  ;;  %v14080_v15 = vpack.c.bf16 %v8102_v29, %v8094_v60  ;;  %v5574_v22 = vpop.f32.mrb[168].mxu0  ;;  %v6346_v52 = vpop.f32.mrb[168].mxu1  ;;  %v9955_v29 = vcombine.high %v14069_v23, %v14071_v32  ;;  %v14097_v36 = vld [vmem:[#allocation8 + $0xad8] sm:$0xff] }
 0x447   :  { %15446 = vst [vmem:[#allocation22_spill] sm:$0xff] %v14073_v14  ;;  %7580 = vmatpush1.bf16.msra.mxu1 %v9938_v35  ;;  %6809 = vmatprep.subr.bf16.mxu0 %v9945_v45  ;;  %v14088_v50 = vpack.c.bf16 %v8104_v53, %v8096_v4  ;;  %v10677_v1 = vadd.f32 %v5574_v22, %v13697_v13  ;;  %v5576_v58 = vpop.f32.mrb[169].mxu0  ;;  %v6348_v45 = vpop.f32.mrb[169].mxu1  ;;  %v14099_v57 = vld [vmem:[#allocation8 + $0xaf8] sm:$0xff] }
 0x448   :  { %15447 = vst [vmem:[#allocation28_spill] sm:$0xff] %v14078_v39  ;;  %15448 = vst [vmem:[#allocation26_spill] sm:$0xff] %v14080_v15  ;;  %7581 = vmatprep.subr.bf16.mxu1 %v9947_v33  ;;  %v10741_v19 = vadd.f32 %v6346_v52, %v13703_v3  ;;  %v10678_v35 = vadd.f32 %v5576_v58, %v13707_v55  ;;  %v5578_v61 = vpop.f32.mrb[170].mxu0  ;;  %v9952_v60 = vcombine.low %v14063_v24, %v14065_v21  ;;  %v6350_v53 = vpop.f32.mrb[170].mxu1 }
 0x449   :  { %15449 = vst [vmem:[#allocation32_spill] sm:$0xff] %v14088_v50  ;;  %v10742_v4 = vadd.f32 %v6348_v45, %v13712_v26  ;;  %v10679_v33 = vadd.f32 %v5578_v61, %v13697_v13  ;;  %v5580_v22 = vpop.f32.mrb[171].mxu0  ;;  %v9954_v52 = vcombine.low %v14069_v23, %v14071_v32  ;;  %v9960_v58 = vcombine.low %v14084_v48, %v14086_v8  ;;  %v6352_v21 = vpop.f32.mrb[171].mxu1  ;;  %v15450_v50 = vld [vmem:[#allocation42_spill] sm:$0xff]  ;;  %v14115_v32 = vld [vmem:[#allocation8 + $0xb10] sm:$0xff] }
 0x44a   :  { %6810 = vmatpush1.bf16.msra.mxu0 %v9944_v37  ;;  %v10743_v39 = vadd.f32 %v6350_v53, %v13703_v3  ;;  %v10680_v24 = vadd.f32 %v5580_v22, %v13707_v55  ;;  %v9961_v45 = vcombine.high %v14084_v48, %v14086_v8  ;;  %v8109_v61 = vmax.f32 %v10677_v1, 0.0  ;;  %v14117_v53 = vld [vmem:[#allocation8 + $0xb30] sm:$0xff]  ;;  %v14121_v8 = vld [vmem:[#allocation8 + $0xb18] sm:$0xff] }
 0x44b   :  { %7582 = vmatpush1.bf16.msra.mxu1 %v9946_v2  ;;  %6811 = vmatprep.subr.bf16.mxu0 %v9953_v42  ;;  %v8117_v14 = vmax.f32 %v10679_v33, 0.0  ;;  %v10744_v37 = vadd.f32 %v6352_v21, %v13712_v26  ;;  %v9963_v23 = vcombine.high %v14097_v36, %v14099_v57  ;;  %v8111_v22 = vmax.f32 %v10741_v19, 0.0  ;;  %v15451_v48 = vld [vmem:[#allocation48_spill] sm:$0xff]  ;;  %v14123_v1 = vld [vmem:[#allocation8 + $0xb38] sm:$0xff] }
 0x44c   :  { %6681 = vmatmul.mubr.bf16.gmra.mrb[212].mxu0 %v15450_v50  ;;  %7583 = vmatprep.subr.bf16.mxu1 %v9955_v29  ;;  %v8110_v2 = vmax.f32 %v10678_v35, 0.0  ;;  %v8119_v42 = vmax.f32 %v10743_v39, 0.0  ;;  %v8118_v15 = vmax.f32 %v10680_v24, 0.0  ;;  %v8112_v29 = vmax.f32 %v10742_v4, 0.0  ;;  %v14136_v4 = vld [vmem:[#allocation8 + $0xb50] sm:$0xff] }
 0x44d   :  { %7453 = vmatmul.mubr.bf16.gmra.mrb[212].mxu1 %v15450_v50  ;;  %6690 = vmatprep.mubr.bf16.mxu0 %v15451_v48  ;;  %v14125_v33 = vpack.c.bf16 %v8117_v14, %v8109_v61  ;;  %v8120_v21 = vmax.f32 %v10744_v37, 0.0  ;;  %v9962_v19 = vcombine.low %v14097_v36, %v14099_v57  ;;  %v9969_v24 = vcombine.high %v14115_v32, %v14117_v53  ;;  %v14138_v14 = vld [vmem:[#allocation8 + $0xb70] sm:$0xff] }
 0x44e   :  { %7462 = vmatprep.mubr.bf16.mxu1 %v15451_v48  ;;  %6812 = vmatpush1.bf16.msra.mxu0 %v9952_v60  ;;  %v14130_v39 = vpack.c.bf16 %v8119_v42, %v8111_v22  ;;  %v14132_v35 = vpack.c.bf16 %v8118_v15, %v8110_v2  ;;  %v5584_v50 = vpop.f32.mrb[172].mxu0  ;;  %v6356_v37 = vpop.f32.mrb[172].mxu1  ;;  %v9971_v15 = vcombine.high %v14121_v8, %v14123_v1  ;;  %v14149_v42 = vld [vmem:[#allocation8 + $0xb58] sm:$0xff] }
 0x44f   :  { %15452 = vst [vmem:[#allocation30_spill] sm:$0xff] %v14125_v33  ;;  %7584 = vmatpush1.bf16.msra.mxu1 %v9954_v52  ;;  %6813 = vmatprep.subr.bf16.mxu0 %v9961_v45  ;;  %v14140_v61 = vpack.c.bf16 %v8120_v21, %v8112_v29  ;;  %v10681_v60 = vadd.f32 %v5584_v50, %v13697_v13  ;;  %v5586_v36 = vpop.f32.mrb[173].mxu0  ;;  %v6358_v45 = vpop.f32.mrb[173].mxu1  ;;  %v14151_v48 = vld [vmem:[#allocation8 + $0xb78] sm:$0xff] }
 0x450   :  { %15453 = vst [vmem:[#allocation36_spill] sm:$0xff] %v14130_v39  ;;  %15454 = vst [vmem:[#allocation34_spill] sm:$0xff] %v14132_v35  ;;  %7585 = vmatprep.subr.bf16.mxu1 %v9963_v23  ;;  %v10745_v57 = vadd.f32 %v6356_v37, %v13703_v3  ;;  %v10682_v52 = vadd.f32 %v5586_v36, %v13707_v55  ;;  %v5588_v22 = vpop.f32.mrb[174].mxu0  ;;  %v9968_v2 = vcombine.low %v14115_v32, %v14117_v53  ;;  %v6360_v21 = vpop.f32.mrb[174].mxu1 }
 0x451   :  { %15455 = vst [vmem:[#allocation40_spill] sm:$0xff] %v14140_v61  ;;  %v10746_v29 = vadd.f32 %v6358_v45, %v13712_v26  ;;  %v10683_v23 = vadd.f32 %v5588_v22, %v13697_v13  ;;  %v5590_v50 = vpop.f32.mrb[175].mxu0  ;;  %v9970_v37 = vcombine.low %v14121_v8, %v14123_v1  ;;  %v9976_v36 = vcombine.low %v14136_v4, %v14138_v14  ;;  %v6362_v53 = vpop.f32.mrb[175].mxu1  ;;  %v15456_v61 = vld [vmem:[#allocation46_spill] sm:$0xff]  ;;  %v14167_v1 = vld [vmem:[#allocation8 + $0xb90] sm:$0xff] }
 0x452   :  { %6814 = vmatpush1.bf16.msra.mxu0 %v9960_v58  ;;  %v10747_v39 = vadd.f32 %v6360_v21, %v13703_v3  ;;  %v10684_v32 = vadd.f32 %v5590_v50, %v13707_v55  ;;  %v9977_v45 = vcombine.high %v14136_v4, %v14138_v14  ;;  %v8125_v22 = vmax.f32 %v10681_v60, 0.0  ;;  %v14169_v21 = vld [vmem:[#allocation8 + $0xbb0] sm:$0xff]  ;;  %v14173_v14 = vld [vmem:[#allocation8 + $0xb98] sm:$0xff] }
 0x453   :  { %7586 = vmatpush1.bf16.msra.mxu1 %v9962_v19  ;;  %6815 = vmatprep.subr.bf16.mxu0 %v9969_v24  ;;  %v8133_v33 = vmax.f32 %v10683_v23, 0.0  ;;  %v10748_v58 = vadd.f32 %v6362_v53, %v13712_v26  ;;  %v9979_v8 = vcombine.high %v14149_v42, %v14151_v48  ;;  %v8127_v50 = vmax.f32 %v10745_v57, 0.0  ;;  %v15457_v4 = vld [vmem:[#allocation52_spill] sm:$0xff]  ;;  %v2122_v60 = vld [vmem:[#allocation8 + $0xbb8] sm:$0xff] }
 0x454   :  { %6691 = vmatmul.mubr.bf16.gmra.mrb[216].mxu0 %v15456_v61  ;;  %7587 = vmatprep.subr.bf16.mxu1 %v9971_v15  ;;  %v8126_v19 = vmax.f32 %v10682_v52, 0.0  ;;  %v8135_v24 = vmax.f32 %v10747_v39, 0.0  ;;  %v8134_v35 = vmax.f32 %v10684_v32, 0.0  ;;  %v8128_v23 = vmax.f32 %v10746_v29, 0.0  ;;  %v14186_v29 = vld [vmem:[#allocation8 + $0xbd0] sm:$0xff] }
 0x455   :  { %7463 = vmatmul.mubr.bf16.gmra.mrb[216].mxu1 %v15456_v61  ;;  %6700 = vmatprep.mubr.bf16.mxu0 %v15457_v4  ;;  %v14175_v15 = vpack.c.bf16 %v8133_v33, %v8125_v22  ;;  %v8136_v53 = vmax.f32 %v10748_v58, 0.0  ;;  %v9978_v57 = vcombine.low %v14149_v42, %v14151_v48  ;;  %v9985_v32 = vcombine.high %v14167_v1, %v14169_v21  ;;  %v14188_v33 = vld [vmem:[#allocation8 + $0xbf0] sm:$0xff] }
 0x456   :  { %7472 = vmatprep.mubr.bf16.mxu1 %v15457_v4  ;;  %6816 = vmatpush1.bf16.msra.mxu0 %v9968_v2  ;;  %v14180_v52 = vpack.c.bf16 %v8135_v24, %v8127_v50  ;;  %v14182_v39 = vpack.c.bf16 %v8134_v35, %v8126_v19  ;;  %v5594_v61 = vpop.f32.mrb[176].mxu0  ;;  %v6366_v58 = vpop.f32.mrb[176].mxu1  ;;  %v9987_v35 = vcombine.high %v14173_v14, %v2122_v60  ;;  %v2126_v24 = vld [vmem:[#allocation8 + $0xbd8] sm:$0xff] }
 0x457   :  { %15458 = vst [vmem:[#allocation38_spill] sm:$0xff] %v14175_v15  ;;  %7588 = vmatpush1.bf16.msra.mxu1 %v9970_v37  ;;  %6817 = vmatprep.subr.bf16.mxu0 %v9977_v45  ;;  %v14190_v22 = vpack.c.bf16 %v8136_v53, %v8128_v23  ;;  %v10685_v2 = vadd.f32 %v5594_v61, %v13697_v13  ;;  %v5596_v42 = vpop.f32.mrb[177].mxu0  ;;  %v6368_v45 = vpop.f32.mrb[177].mxu1  ;;  %v2130_v4 = vld [vmem:[#allocation8 + $0xbf8] sm:$0xff] }
 0x458   :  { %15459 = vst [vmem:[#allocation44_spill] sm:$0xff] %v14180_v52  ;;  %15460 = vst [vmem:[#allocation42_spill] sm:$0xff] %v14182_v39  ;;  %7589 = vmatprep.subr.bf16.mxu1 %v9979_v8  ;;  %v10749_v48 = vadd.f32 %v6366_v58, %v13703_v3  ;;  %v10686_v37 = vadd.f32 %v5596_v42, %v13707_v55  ;;  %v5598_v50 = vpop.f32.mrb[178].mxu0  ;;  %v9984_v19 = vcombine.low %v14167_v1, %v14169_v21  ;;  %v6370_v61 = vpop.f32.mrb[178].mxu1 }
 0x459   :  { %15461 = vst [vmem:[#allocation48_spill] sm:$0xff] %v14190_v22  ;;  %v10750_v23 = vadd.f32 %v6368_v45, %v13712_v26  ;;  %v10687_v53 = vadd.f32 %v5598_v50, %v13697_v13  ;;  %v5600_v52 = vpop.f32.mrb[179].mxu0  ;;  %v9986_v8 = vcombine.low %v14173_v14, %v2122_v60  ;;  %v9992_v58 = vcombine.low %v14186_v29, %v14188_v33  ;;  %v6372_v22 = vpop.f32.mrb[179].mxu1 }
 0x45a   :  { %6818 = vmatpush1.bf16.msra.mxu0 %v9976_v36  ;;  %v10751_v42 = vadd.f32 %v6370_v61, %v13703_v3  ;;  %v10688_v15 = vadd.f32 %v5600_v52, %v13707_v55  ;;  %v9993_v1 = vcombine.high %v14186_v29, %v14188_v33  ;;  %v8141_v21 = vmax.f32 %v10685_v2, 0.0  ;;  %v15462_v36 = vld [vmem:[#allocation50_spill] sm:$0xff]  ;;  %v15463_v52 = vld [vmem:[#allocation56_spill] sm:$0xff] }
 0x45b   :  { %7590 = vmatpush1.bf16.msra.mxu1 %v9978_v57  ;;  %6819 = vmatprep.subr.bf16.mxu0 %v9985_v32  ;;  %v8149_v45 = vmax.f32 %v10687_v53, 0.0  ;;  %v10752_v50 = vadd.f32 %v6372_v22, %v13712_v26  ;;  %v9995_v14 = vcombine.high %v2126_v24, %v2130_v4  ;;  %v8143_v60 = vmax.f32 %v10749_v48, 0.0 }
 0x45c   :  { %6701 = vmatmul.mubr.bf16.gmra.mrb[220].mxu0 %v15462_v36  ;;  %7591 = vmatprep.subr.bf16.mxu1 %v9987_v35  ;;  %v8142_v39 = vmax.f32 %v10686_v37, 0.0  ;;  %v8151_v44 = vmax.f32 %v10751_v42, 0.0  ;;  %v8150_v61 = vmax.f32 %v10688_v15, 0.0  ;;  %v8144_v57 = vmax.f32 %v10750_v23, 0.0 }
 0x45d   :  { %7473 = vmatmul.mubr.bf16.gmra.mrb[220].mxu1 %v15462_v36  ;;  %6710 = vmatprep.mubr.bf16.mxu0 %v15463_v52  ;;  %v14211_v32 = vpack.c.bf16 %v8149_v45, %v8141_v21  ;;  %v8152_v29 = vmax.f32 %v10752_v50, 0.0  ;;  %v9994_v33 = vcombine.low %v2126_v24, %v2130_v4  ;;  %v10001_v15 = vcombine.high %v13843_v7, %v13845_v27 }
 0x45e   :  { %7482 = vmatprep.mubr.bf16.mxu1 %v15463_v52  ;;  %6820 = vmatpush1.bf16.msra.mxu0 %v9984_v19  ;;  %v14214_v22 = vpack.c.bf16 %v8151_v44, %v8143_v60  ;;  %v14216_v2 = vpack.c.bf16 %v8150_v61, %v8142_v39  ;;  %v5604_v35 = vpop.f32.mrb[180].mxu0  ;;  %v6376_v23 = vpop.f32.mrb[180].mxu1  ;;  %v10003_v19 = vcombine.high %v13863_v9, %v13865_v59  ;;  %v15464_v52 = vld [vmem:[#allocation54_spill] sm:$0xff] }
 0x45f   :  { %7592 = vmatpush1.bf16.msra.mxu1 %v9986_v8  ;;  %6821 = vmatprep.subr.bf16.mxu0 %v9993_v1  ;;  %v14220_v48 = vpack.c.bf16 %v8152_v29, %v8144_v57  ;;  %v10689_v37 = vadd.f32 %v5604_v35, %v13697_v13  ;;  %v5606_v53 = vpop.f32.mrb[181].mxu0  ;;  %v10753_v44 = vadd.f32 %v6376_v23, %v13703_v3  ;;  %v6378_v24 = vpop.f32.mrb[181].mxu1 }
 0x460   :  { %7593 = vmatprep.subr.bf16.mxu1 %v9995_v14  ;;  %v10690_v39 = vadd.f32 %v5606_v53, %v13707_v55  ;;  %v5608_v4 = vpop.f32.mrb[182].mxu0  ;;  %v10754_v8 = vadd.f32 %v6378_v24, %v13712_v26  ;;  %v6380_v1 = vpop.f32.mrb[182].mxu1 }
 0x461   :  { %v10691_v42 = vadd.f32 %v5608_v4, %v13697_v13  ;;  %v5610_v21 = vpop.f32.mrb[183].mxu0  ;;  %v10755_v45 = vadd.f32 %v6380_v1, %v13703_v3  ;;  %v6382_v36 = vpop.f32.mrb[183].mxu1  ;;  %v8157_v14 = vmax.f32 %v10689_v37, 0.0  ;;  %v8159_v57 = vmax.f32 %v10753_v44, 0.0 }
 0x462   :  { %6822 = vmatpush1.bf16.msra.mxu0 %v9992_v58  ;;  %v10692_v50 = vadd.f32 %v5610_v21, %v13707_v55  ;;  %v10756_v61 = vadd.f32 %v6382_v36, %v13712_v26  ;;  %v8158_v29 = vmax.f32 %v10690_v39, 0.0  ;;  %v15465_v58 = vld [vmem:[#allocation60_spill] sm:$0xff]  ;;  %v8160_v53 = vmax.f32 %v10754_v8, 0.0 }
 0x463   :  { %7594 = vmatpush1.bf16.msra.mxu1 %v9994_v33  ;;  %6984 = vmatprep.subr.bf16.mxu0 %v10001_v15  ;;  %v8165_v60 = vmax.f32 %v10691_v42, 0.0  ;;  %v8167_v35 = vmax.f32 %v10755_v45, 0.0 }
 0x464   :  { %6711 = vmatmul.mubr.bf16.gmra.mrb[224].mxu0 %v15464_v52  ;;  %7756 = vmatprep.subr.bf16.mxu1 %v10003_v19  ;;  %v8166_v23 = vmax.f32 %v10692_v50, 0.0  ;;  %v8168_v33 = vmax.f32 %v10756_v61, 0.0 }
 0x465   :  { %7483 = vmatmul.mubr.bf16.gmra.mrb[224].mxu1 %v15464_v52  ;;  %6720 = vmatprep.mubr.bf16.mxu0 %v15465_v58  ;;  %v14235_v24 = vpack.c.bf16 %v8165_v60, %v8157_v14  ;;  %v14238_v15 = vpack.c.bf16 %v8167_v35, %v8159_v57 }
 0x466   :  { %7492 = vmatprep.mubr.bf16.mxu1 %v15465_v58  ;;  %v14240_v37 = vpack.c.bf16 %v8166_v23, %v8158_v29  ;;  %v5614_v4 = vpop.f32.mrb[184].mxu0  ;;  %v14242_v19 = vpack.c.bf16 %v8168_v33, %v8160_v53  ;;  %v6386_v39 = vpop.f32.mrb[184].mxu1  ;;  %v15466_v58 = vld [vmem:[#allocation58_spill] sm:$0xff] }
 0x467   :  { %v10693_v44 = vadd.f32 %v5614_v4, %v13697_v13  ;;  %v5616_v42 = vpop.f32.mrb[185].mxu0  ;;  %v10757_v1 = vadd.f32 %v6386_v39, %v13703_v3  ;;  %v6388_v21 = vpop.f32.mrb[185].mxu1 }
 0x468   :  { %v10694_v8 = vadd.f32 %v5616_v42, %v13707_v55  ;;  %v5618_v45 = vpop.f32.mrb[186].mxu0  ;;  %v10758_v50 = vadd.f32 %v6388_v21, %v13712_v26  ;;  %v6390_v14 = vpop.f32.mrb[186].mxu1  ;;  %v15467_v42 = vld [vmem:[#allocation64_spill] sm:$0xff] }
 0x469   :  { %v10695_v36 = vadd.f32 %v5618_v45, %v13697_v13  ;;  %v5620_v60 = vpop.f32.mrb[187].mxu0  ;;  %v10759_v61 = vadd.f32 %v6390_v14, %v13703_v3  ;;  %v6392_v57 = vpop.f32.mrb[187].mxu1  ;;  %v8173_v29 = vmax.f32 %v10693_v44, 0.0  ;;  %v8175_v53 = vmax.f32 %v10757_v1, 0.0 }
 0x46a   :  { %v10696_v52 = vadd.f32 %v5620_v60, %v13707_v55  ;;  %v10760_v23 = vadd.f32 %v6392_v57, %v13712_v26  ;;  %v8174_v33 = vmax.f32 %v10694_v8, 0.0  ;;  %v8176_v21 = vmax.f32 %v10758_v50, 0.0 }
 0x46b   :  { %v8181_v35 = vmax.f32 %v10695_v36, 0.0  ;;  %v8183_v4 = vmax.f32 %v10759_v61, 0.0 }
 0x46c   :  { %6721 = vmatmul.mubr.bf16.gmra.mrb[228].mxu0 %v15466_v58  ;;  %v8182_v39 = vmax.f32 %v10696_v52, 0.0  ;;  %v8184_v14 = vmax.f32 %v10760_v23, 0.0 }
 0x46d   :  { %7493 = vmatmul.mubr.bf16.gmra.mrb[228].mxu1 %v15466_v58  ;;  %6730 = vmatprep.mubr.bf16.mxu0 %v15467_v42  ;;  %v14255_v45 = vpack.c.bf16 %v8181_v35, %v8173_v29  ;;  %v14258_v44 = vpack.c.bf16 %v8183_v4, %v8175_v53 }
 0x46e   :  { %7502 = vmatprep.mubr.bf16.mxu1 %v15467_v42  ;;  %v14260_v36 = vpack.c.bf16 %v8182_v39, %v8174_v33  ;;  %v5624_v60 = vpop.f32.mrb[188].mxu0  ;;  %v14262_v57 = vpack.c.bf16 %v8184_v14, %v8176_v21  ;;  %v6396_v8 = vpop.f32.mrb[188].mxu1 }
 0x46f   :  { %15468 = vst [vmem:[#allocation46_spill] sm:$0xff] %v14255_v45  ;;  %15469 = vst [vmem:[#allocation52_spill] sm:$0xff] %v14258_v44  ;;  %v10697_v1 = vadd.f32 %v5624_v60, %v13697_v13  ;;  %v5626_v61 = vpop.f32.mrb[189].mxu0  ;;  %v10761_v52 = vadd.f32 %v6396_v8, %v13703_v3  ;;  %v6398_v29 = vpop.f32.mrb[189].mxu1 }
 0x470   :  { %v10698_v50 = vadd.f32 %v5626_v61, %v13707_v55  ;;  %v5628_v35 = vpop.f32.mrb[190].mxu0  ;;  %v10762_v23 = vadd.f32 %v6398_v29, %v13712_v26  ;;  %v6400_v53 = vpop.f32.mrb[190].mxu1 }
 0x471   :  { %v10699_v58 = vadd.f32 %v5628_v35, %v13697_v13  ;;  %v5630_v33 = vpop.f32.mrb[191].mxu0  ;;  %v10763_v4 = vadd.f32 %v6400_v53, %v13703_v3  ;;  %v6402_v42 = vpop.f32.mrb[191].mxu1  ;;  %v8189_v21 = vmax.f32 %v10697_v1, 0.0  ;;  %v8191_v8 = vmax.f32 %v10761_v52, 0.0  ;;  %v2153_v35 = vld [vmem:[#allocation8 + $0xcb0] sm:$0xff]  ;;  %v2154_v53 = vld [vmem:[#allocation8 + $0xcb8] sm:$0xff] }
 0x472   :  { %v10700_v39 = vadd.f32 %v5630_v33, %v13707_v55  ;;  %v10764_v60 = vadd.f32 %v6402_v42, %v13712_v26  ;;  %v8190_v61 = vmax.f32 %v10698_v50, 0.0  ;;  %v8192_v13 = vmax.f32 %v10762_v23, 0.0  ;;  %v2149_v50 = vld [vmem:[#allocation8 + $0xc90] sm:$0xff]  ;;  %v15475_v23 = vld [vmem:[#allocation86_spill] sm:$0xff] }
 0x473   :  { %v8197_v14 = vmax.f32 %v10699_v58, 0.0  ;;  %v8199_v44 = vmax.f32 %v10763_v4, 0.0  ;;  %v2150_v58 = vld [vmem:[#allocation8 + $0xc98] sm:$0xff]  ;;  %v15476_v33 = vcombine.low %v13843_v7, %v13845_v27 }
 0x474   :  { %6731 = vmatmul.mubr.bf16.gmra.mrb[232].mxu0 %v15315_v0  ;;  %v8198_v45 = vmax.f32 %v10700_v39, 0.0  ;;  %v8200_v3 = vmax.f32 %v10764_v60, 0.0  ;;  %v15477_v39 = vcombine.low %v13863_v9, %v13865_v59  ;;  %v2157_v60 = vld [vmem:[#allocation8 + $0xcd0] sm:$0xff]  ;;  %v10018_v7 = vcombine.low %v2150_v58, %v2154_v53 }
 0x475   :  { %7503 = vmatmul.mubr.bf16.gmra.mrb[232].mxu1 %v15315_v0  ;;  %6740 = vmatprep.mubr.bf16.mxu0 %v15316_v16  ;;  %v14275_v29 = vpack.c.bf16 %v8197_v14, %v8189_v21  ;;  %v14278_v55 = vpack.c.bf16 %v8199_v44, %v8191_v8  ;;  %v15470_v0 = vld [vmem:[#allocation74_spill] sm:$0xff]  ;;  %v15474_v44 = vld [vmem:[#allocation80_spill] sm:$0xff]  ;;  %v10017_v21 = vcombine.high %v2149_v50, %v2153_v35 }
 0x476   :  { %7512 = vmatprep.mubr.bf16.mxu1 %v15316_v16  ;;  %v14280_v1 = vpack.c.bf16 %v8198_v45, %v8190_v61  ;;  %v14282_v26 = vpack.c.bf16 %v8200_v3, %v8192_v13  ;;  %v2145_v16 = vld [vmem:[#allocation8 + $0xc70] sm:$0xff]  ;;  %v10019_v14 = vcombine.high %v2150_v58, %v2154_v53  ;;  %v2158_v61 = vld [vmem:[#allocation8 + $0xcd8] sm:$0xff]  ;;  %v10016_v3 = vcombine.low %v2149_v50, %v2153_v35 }
 0x477   :  { %v2161_v8 = vld [vmem:[#allocation8 + $0xcf0] sm:$0xff]  ;;  %v2162_v13 = vld [vmem:[#allocation8 + $0xcf8] sm:$0xff] }
 0x478   :  { %v10025_v27 = vcombine.high %v2157_v60, %v2161_v8  ;;  %v10027_v9 = vcombine.high %v2158_v61, %v2162_v13  ;;  %v2165_v59 = vld [vmem:[#allocation8 + $0xd10] sm:$0xff]  ;;  %v2174_v50 = vld [vmem:[#allocation8 + $0xd58] sm:$0xff] }
 0x479   :  { %v2178_v35 = vld [vmem:[#allocation8 + $0xd78] sm:$0xff] }
 0x47c   :  { %6741 = vmatmul.mubr.bf16.gmra.mrb[236].mxu0 %v15321_v62 }
 0x47d   :  { %7513 = vmatmul.mubr.bf16.gmra.mrb[236].mxu1 %v15321_v62  ;;  %6750 = vmatprep.mubr.bf16.mxu0 %v12782_v63  ;;  %v2142_v62 = vld [vmem:[#allocation8 + $0xc58] sm:$0xff] }
 0x47e   :  { %7522 = vmatprep.mubr.bf16.mxu1 %v12782_v63  ;;  %v15471_v63 = vld [vmem:[#allocation79_spill] sm:$0xff] }
 0x484   :  { %6751 = vmatmul.mubr.bf16.gmra.mrb[240].mxu0 %v12776_v34 }
 0x485   :  { %7523 = vmatmul.mubr.bf16.gmra.mrb[240].mxu1 %v12776_v34  ;;  %6760 = vmatprep.mubr.bf16.mxu0 %v12804_v54  ;;  %v15472_v34 = vld [vmem:[#allocation77_spill] sm:$0xff] }
 0x486   :  { %7532 = vmatprep.mubr.bf16.mxu1 %v12804_v54  ;;  %v15473_v54 = vld [vmem:[#allocation82_spill] sm:$0xff] }
 0x48c   :  { %6761 = vmatmul.mubr.bf16.gmra.mrb[244].mxu0 %v12800_v5 }
 0x48d   :  { %7533 = vmatmul.mubr.bf16.gmra.mrb[244].mxu1 %v12800_v5  ;;  %6770 = vmatprep.mubr.bf16.mxu0 %v12826_v20  ;;  %v2141_v5 = vld [vmem:[#allocation8 + $0xc50] sm:$0xff] }
 0x48e   :  { %7542 = vmatprep.mubr.bf16.mxu1 %v12826_v20  ;;  %v2146_v20 = vld [vmem:[#allocation8 + $0xc78] sm:$0xff]  ;;  %v10009_v45 = vcombine.high %v2141_v5, %v2145_v16  ;;  %v10008_v4 = vcombine.low %v2141_v5, %v2145_v16  ;;  %v10024_v16 = vcombine.low %v2157_v60, %v2161_v8 }
 0x48f   :  { %v10011_v52 = vcombine.high %v2142_v62, %v2146_v20  ;;  %v10010_v42 = vcombine.low %v2142_v62, %v2146_v20  ;;  %v2170_v5 = vld [vmem:[#allocation8 + $0xd38] sm:$0xff]  ;;  %v10026_v62 = vcombine.low %v2158_v61, %v2162_v13  ;;  %v10042_v61 = vcombine.low %v2174_v50, %v2178_v35 }
 0x490   :  { %v2186_v60 = vld [vmem:[#allocation8 + $0xdb8] sm:$0xff] }
 0x494   :  { %6771 = vmatmul.mubr.bf16.gmra.mrb[248].mxu0 %v15470_v0 }
 0x495   :  { %7543 = vmatmul.mubr.bf16.gmra.mrb[248].mxu1 %v15470_v0  ;;  %6780 = vmatprep.mubr.bf16.mxu0 %v15471_v63  ;;  %v15478_v0 = vld [vmem:[#allocation84_spill] sm:$0xff] }
 0x496   :  { %7552 = vmatprep.mubr.bf16.mxu1 %v15471_v63  ;;  %v2169_v63 = vld [vmem:[#allocation8 + $0xd30] sm:$0xff] }
 0x497   :  { %v10033_v20 = vcombine.high %v2165_v59, %v2169_v63 }
 0x49c   :  { %6781 = vmatmul.mubr.bf16.gmra.mrb[252].mxu0 %v15472_v34 }
 0x49d   :  { %7553 = vmatmul.mubr.bf16.gmra.mrb[252].mxu1 %v15472_v34  ;;  %6823 = vmatprep.mubr.bf16.mxu0 %v15473_v54  ;;  %v15479_v34 = vld [vmem:[#allocation90_spill] sm:$0xff] }
 0x49e   :  { %7595 = vmatprep.mubr.bf16.mxu1 %v15473_v54  ;;  %v2166_v54 = vld [vmem:[#allocation8 + $0xd18] sm:$0xff] }
 0x49f   :  { %v10034_v58 = vcombine.low %v2166_v54, %v2170_v5 }
 0x4a4   :  { %6824 = vmatmul.mubr.bf16.vlgmr.msra.gmra.mrb[192].mxu0 %v15474_v44 }
 0x4a5   :  { %7596 = vmatmul.mubr.bf16.vlgmr.msra.gmra.mrb[192].mxu1 %v15474_v44  ;;  %6833 = vmatprep.mubr.bf16.mxu0 %v15475_v23  ;;  %v2173_v44 = vld [vmem:[#allocation8 + $0xd50] sm:$0xff] }
 0x4a6   :  { %6985 = vmatpush1.bf16.msra.mxu0 %v15476_v33  ;;  %7605 = vmatprep.mubr.bf16.mxu1 %v15475_v23  ;;  %v10032_v23 = vcombine.low %v2165_v59, %v2169_v63  ;;  %v15480_v33 = vld [vmem:[#allocation88_spill] sm:$0xff] }
 0x4a7   :  { %7757 = vmatpush1.bf16.msra.mxu1 %v15477_v39  ;;  %6986 = vmatprep.subr.bf16.mxu0 %v10009_v45  ;;  %v10035_v45 = vcombine.high %v2166_v54, %v2170_v5  ;;  %v2181_v39 = vld [vmem:[#allocation8 + $0xd90] sm:$0xff] }
 0x4a8   :  { %7758 = vmatprep.subr.bf16.mxu1 %v10011_v52  ;;  %v2177_v52 = vld [vmem:[#allocation8 + $0xd70] sm:$0xff] }
 0x4a9   :  { %v10041_v53 = vcombine.high %v2173_v44, %v2177_v52  ;;  %v10040_v8 = vcombine.low %v2173_v44, %v2177_v52  ;;  %v15482_v54 = vld [vmem:[#allocation92_spill] sm:$0xff]  ;;  %v2202_v44 = vld [vmem:[#allocation8 + $0xe38] sm:$0xff] }
 0x4aa   :  { %6987 = vmatpush1.bf16.msra.mxu0 %v10008_v4  ;;  %v10043_v4 = vcombine.high %v2174_v50, %v2178_v35 }
 0x4ab   :  { %7759 = vmatpush1.bf16.msra.mxu1 %v10010_v42  ;;  %6988 = vmatprep.subr.bf16.mxu0 %v10017_v21  ;;  %v2185_v42 = vld [vmem:[#allocation8 + $0xdb0] sm:$0xff]  ;;  %v15481_v21 = vld [vmem:[#allocation94_spill] sm:$0xff] }
 0x4ac   :  { %6834 = vmatmul.mubr.bf16.gmra.mrb[196].mxu0 %v15478_v0  ;;  %7760 = vmatprep.subr.bf16.mxu1 %v10019_v14  ;;  %v2182_v14 = vld [vmem:[#allocation8 + $0xd98] sm:$0xff]  ;;  %v10049_v13 = vcombine.high %v2181_v39, %v2185_v42  ;;  %v10048_v59 = vcombine.low %v2181_v39, %v2185_v42 }
 0x4ad   :  { %7606 = vmatmul.mubr.bf16.gmra.mrb[196].mxu1 %v15478_v0  ;;  %6843 = vmatprep.mubr.bf16.mxu0 %v15479_v34  ;;  %v2190_v0 = vld [vmem:[#allocation8 + $0xdd8] sm:$0xff]  ;;  %v10050_v63 = vcombine.low %v2182_v14, %v2186_v60 }
 0x4ae   :  { %7615 = vmatprep.mubr.bf16.mxu1 %v15479_v34  ;;  %6989 = vmatpush1.bf16.msra.mxu0 %v10016_v3  ;;  %v10051_v3 = vcombine.high %v2182_v14, %v2186_v60  ;;  %v15484_v14 = vld [vmem:[#allocation96_spill] sm:$0xff] }
 0x4af   :  { %7761 = vmatpush1.bf16.msra.mxu1 %v10018_v7  ;;  %6990 = vmatprep.subr.bf16.mxu0 %v10025_v27  ;;  %v2189_v7 = vld [vmem:[#allocation8 + $0xdd0] sm:$0xff] }
 0x4b0   :  { %7762 = vmatprep.subr.bf16.mxu1 %v10027_v9  ;;  %v2193_v27 = vld [vmem:[#allocation8 + $0xdf0] sm:$0xff]  ;;  %v2194_v9 = vld [vmem:[#allocation8 + $0xdf8] sm:$0xff] }
 0x4b1   :  { %v10057_v34 = vcombine.high %v2189_v7, %v2193_v27  ;;  %v10059_v5 = vcombine.high %v2190_v0, %v2194_v9  ;;  %v10056_v52 = vcombine.low %v2189_v7, %v2193_v27  ;;  %v10058_v50 = vcombine.low %v2190_v0, %v2194_v9 }
 0x4b2   :  { %6991 = vmatpush1.bf16.msra.mxu0 %v10024_v16  ;;  %v2197_v16 = vld [vmem:[#allocation8 + $0xe10] sm:$0xff] }
 0x4b3   :  { %7763 = vmatpush1.bf16.msra.mxu1 %v10026_v62  ;;  %6992 = vmatprep.subr.bf16.mxu0 %v10033_v20  ;;  %v2201_v62 = vld [vmem:[#allocation8 + $0xe30] sm:$0xff]  ;;  %v15483_v20 = vld [vmem:[#allocation98_spill] sm:$0xff] }
 0x4b4   :  { %6844 = vmatmul.mubr.bf16.gmra.mrb[200].mxu0 %v15480_v33  ;;  %7764 = vmatprep.subr.bf16.mxu1 %v10035_v45  ;;  %v2198_v45 = vld [vmem:[#allocation8 + $0xe18] sm:$0xff]  ;;  %v10065_v35 = vcombine.high %v2197_v16, %v2201_v62  ;;  %v10064_v39 = vcombine.low %v2197_v16, %v2201_v62 }
 0x4b5   :  { %7616 = vmatmul.mubr.bf16.gmra.mrb[200].mxu1 %v15480_v33  ;;  %6853 = vmatprep.mubr.bf16.mxu0 %v15481_v21  ;;  %v2206_v33 = vld [vmem:[#allocation8 + $0xe58] sm:$0xff]  ;;  %v10066_v42 = vcombine.low %v2198_v45, %v2202_v44 }
 0x4b6   :  { %7625 = vmatprep.mubr.bf16.mxu1 %v15481_v21  ;;  %6993 = vmatpush1.bf16.msra.mxu0 %v10032_v23  ;;  %v10067_v23 = vcombine.high %v2198_v45, %v2202_v44  ;;  %v2233_v45 = vld [vmem:[#allocation8 + $0xf30] sm:$0xff]  ;;  %v2230_v44 = vld [vmem:[#allocation8 + $0xf18] sm:$0xff] }
 0x4b7   :  { %7765 = vmatpush1.bf16.msra.mxu1 %v10034_v58  ;;  %6994 = vmatprep.subr.bf16.mxu0 %v10041_v53  ;;  %v2205_v58 = vld [vmem:[#allocation8 + $0xe50] sm:$0xff] }
 0x4b8   :  { %7766 = vmatprep.subr.bf16.mxu1 %v10043_v4  ;;  %v2209_v53 = vld [vmem:[#allocation8 + $0xe70] sm:$0xff]  ;;  %v2210_v4 = vld [vmem:[#allocation8 + $0xe78] sm:$0xff] }
 0x4b9   :  { %v10073_v21 = vcombine.high %v2205_v58, %v2209_v53  ;;  %v10075_v60 = vcombine.high %v2206_v33, %v2210_v4  ;;  %v10072_v7 = vcombine.low %v2205_v58, %v2209_v53  ;;  %v10074_v27 = vcombine.low %v2206_v33, %v2210_v4  ;;  %v2237_v53 = vld [vmem:[#allocation8 + $0xf50] sm:$0xff]  ;;  %v2238_v4 = vld [vmem:[#allocation8 + $0xf58] sm:$0xff] }
 0x4ba   :  { %6995 = vmatpush1.bf16.msra.mxu0 %v10040_v8  ;;  %v2213_v8 = vld [vmem:[#allocation8 + $0xe90] sm:$0xff] }
 0x4bb   :  { %7767 = vmatpush1.bf16.msra.mxu1 %v10042_v61  ;;  %6996 = vmatprep.subr.bf16.mxu0 %v10049_v13  ;;  %v2217_v61 = vld [vmem:[#allocation8 + $0xeb0] sm:$0xff]  ;;  %v2214_v13 = vld [vmem:[#allocation8 + $0xe98] sm:$0xff] }
 0x4bc   :  { %6854 = vmatmul.mubr.bf16.gmra.mrb[204].mxu0 %v15482_v54  ;;  %7768 = vmatprep.subr.bf16.mxu1 %v10051_v3  ;;  %v2218_v3 = vld [vmem:[#allocation8 + $0xeb8] sm:$0xff]  ;;  %v10081_v0 = vcombine.high %v2213_v8, %v2217_v61  ;;  %v2241_v33 = vld [vmem:[#allocation8 + $0xf70] sm:$0xff] }
 0x4bd   :  { %7626 = vmatmul.mubr.bf16.gmra.mrb[204].mxu1 %v15482_v54  ;;  %6863 = vmatprep.mubr.bf16.mxu0 %v15483_v20  ;;  %v10083_v9 = vcombine.high %v2214_v13, %v2218_v3  ;;  %v2226_v54 = vld [vmem:[#allocation8 + $0xef8] sm:$0xff]  ;;  %v10082_v16 = vcombine.low %v2214_v13, %v2218_v3  ;;  %v10104_v13 = vcombine.low %v2237_v53, %v2241_v33 }
 0x4be   :  { %7635 = vmatprep.mubr.bf16.mxu1 %v15483_v20  ;;  %6997 = vmatpush1.bf16.msra.mxu0 %v10048_v59  ;;  %v2221_v59 = vld [vmem:[#allocation8 + $0xed0] sm:$0xff] }
 0x4bf   :  { %7769 = vmatpush1.bf16.msra.mxu1 %v10050_v63  ;;  %6998 = vmatprep.subr.bf16.mxu0 %v10057_v34  ;;  %v2225_v63 = vld [vmem:[#allocation8 + $0xef0] sm:$0xff]  ;;  %v2222_v34 = vld [vmem:[#allocation8 + $0xed8] sm:$0xff] }
 0x4c0   :  { %7770 = vmatprep.subr.bf16.mxu1 %v10059_v5  ;;  %v10080_v5 = vcombine.low %v2213_v8, %v2217_v61  ;;  %v10089_v62 = vcombine.high %v2221_v59, %v2225_v63  ;;  %v2229_v20 = vld [vmem:[#allocation8 + $0xf10] sm:$0xff]  ;;  %v2246_v8 = vld [vmem:[#allocation8 + $0xf98] sm:$0xff] }
 0x4c1   :  { %v2250_v61 = vld [vmem:[#allocation8 + $0xfb8] sm:$0xff] }
 0x4c2   :  { %6999 = vmatpush1.bf16.msra.mxu0 %v10056_v52  ;;  %v2234_v52 = vld [vmem:[#allocation8 + $0xf38] sm:$0xff] }
 0x4c3   :  { %7771 = vmatpush1.bf16.msra.mxu1 %v10058_v50  ;;  %7000 = vmatprep.subr.bf16.mxu0 %v10065_v35  ;;  %v10088_v50 = vcombine.low %v2221_v59, %v2225_v63  ;;  %v10090_v35 = vcombine.low %v2222_v34, %v2226_v54  ;;  %v10099_v58 = vcombine.high %v2230_v44, %v2234_v52  ;;  %v2254_v59 = vld [vmem:[#allocation8 + $0xfd8] sm:$0xff] }
 0x4c4   :  { %6864 = vmatmul.mubr.bf16.gmra.mrb[208].mxu0 %v15484_v14  ;;  %7772 = vmatprep.subr.bf16.mxu1 %v10067_v23  ;;  %v10097_v23 = vcombine.high %v2229_v20, %v2233_v45  ;;  %v2258_v63 = vld [vmem:[#allocation8 + $0xff8] sm:$0xff] }
 0x4c5   :  { %7636 = vmatmul.mubr.bf16.gmra.mrb[208].mxu1 %v15484_v14  ;;  %6873 = vmatprep.mubr.bf16.mxu0 %v15329_v43  ;;  %v2245_v14 = vld [vmem:[#allocation8 + $0xf90] sm:$0xff] }
 0x4c6   :  { %7645 = vmatprep.mubr.bf16.mxu1 %v15329_v43  ;;  %7001 = vmatpush1.bf16.msra.mxu0 %v10064_v39  ;;  %v10091_v43 = vcombine.high %v2222_v34, %v2226_v54  ;;  %v2242_v39 = vld [vmem:[#allocation8 + $0xf78] sm:$0xff]  ;;  %v10114_v34 = vcombine.low %v2246_v8, %v2250_v61 }
 0x4c7   :  { %7773 = vmatpush1.bf16.msra.mxu1 %v10066_v42  ;;  %7002 = vmatprep.subr.bf16.mxu0 %v10073_v21  ;;  %v10098_v42 = vcombine.low %v2230_v44, %v2234_v52  ;;  %v10105_v21 = vcombine.high %v2237_v53, %v2241_v33  ;;  %v10106_v3 = vcombine.low %v2238_v4, %v2242_v39  ;;  %v11688_v44 = vld [vmem:[#allocation11 + $0x58] sm:$0xff]   ;;  %v15491_v52 = vld [vmem:[#allocation85_spill] sm:$0xff]  ;;  %v11692_v53 = vld [vmem:[#allocation11 + $0x60] sm:$0xff]  }
 0x4c8   :  { %7774 = vmatprep.subr.bf16.mxu1 %v10075_v60  ;;  %v2249_v60 = vld [vmem:[#allocation8 + $0xfb0] sm:$0xff]  ;;  %v11694_v33 = vld [vmem:[#allocation11 + $0xe0] sm:$0xff]  }
 0x4ca   :  { %7003 = vmatpush1.bf16.msra.mxu0 %v10072_v7  ;;  %v10113_v7 = vcombine.high %v2245_v14, %v2249_v60 }
 0x4cb   :  { %7775 = vmatpush1.bf16.msra.mxu1 %v10074_v27  ;;  %7004 = vmatprep.subr.bf16.mxu0 %v10081_v0  ;;  %v10115_v27 = vcombine.high %v2246_v8, %v2250_v61  ;;  %v2253_v0 = vld [vmem:[#allocation8 + $0xfd0] sm:$0xff]  ;;  %v11700_v8 = vld [vmem:[#allocation11 + $0x70] sm:$0xff]  }
 0x4cc   :  { %6874 = vmatmul.mubr.bf16.gmra.mrb[212].mxu0 %v15330_v6  ;;  %7776 = vmatprep.subr.bf16.mxu1 %v10083_v9  ;;  %v2257_v9 = vld [vmem:[#allocation8 + $0xff0] sm:$0xff]  ;;  %v11702_v61 = vld [vmem:[#allocation11 + $0xf0] sm:$0xff]  }
 0x4cd   :  { %7646 = vmatmul.mubr.bf16.gmra.mrb[212].mxu1 %v15330_v6  ;;  %6883 = vmatprep.mubr.bf16.mxu0 %v13076_v17  ;;  %v10096_v6 = vcombine.low %v2229_v20, %v2233_v45  ;;  %v10121_v54 = vcombine.high %v2253_v0, %v2257_v9  ;;  %v11685_v20 = vld [vmem:[#allocation11 + $0x10] sm:$0xff]  }
 0x4ce   :  { %7655 = vmatprep.mubr.bf16.mxu1 %v13076_v17  ;;  %7005 = vmatpush1.bf16.msra.mxu0 %v10080_v5  ;;  %v10107_v17 = vcombine.high %v2238_v4, %v2242_v39  ;;  %v10120_v5 = vcombine.low %v2253_v0, %v2257_v9  ;;  %v11687_v45 = vld [vmem:[#allocation11 + $0x90] sm:$0xff]   ;;  %v11693_v4 = vld [vmem:[#allocation11 + $0x20] sm:$0xff]   ;;  %v11706_v0 = vld [vmem:[#allocation11 + $0xf8] sm:$0xff]  }
 0x4cf   :  { %7777 = vmatpush1.bf16.msra.mxu1 %v10082_v16  ;;  %7006 = vmatprep.subr.bf16.mxu0 %v10089_v62  ;;  %v10122_v16 = vcombine.low %v2254_v59, %v2258_v63  ;;  %v11676_v62 = vld [vmem:[#allocation11 + $0x40] sm:$0xff]  }
 0x4d0   :  { %7778 = vmatprep.subr.bf16.mxu1 %v10091_v43  ;;  %v11678_v43 = vld [vmem:[#allocation11 + $0xc0] sm:$0xff]  }
 0x4d1   :  { %v11695_v39 = vld [vmem:[#allocation11 + $0xa0] sm:$0xff]  }
 0x4d2   :  { %7007 = vmatpush1.bf16.msra.mxu0 %v10088_v50  ;;  %v11690_v50 = vld [vmem:[#allocation11 + $0xd8] sm:$0xff]  }
 0x4d3   :  { %7779 = vmatpush1.bf16.msra.mxu1 %v10090_v35  ;;  %7008 = vmatprep.subr.bf16.mxu0 %v10097_v23  ;;  %v15492_v35 = vld [vmem:[#allocation91_spill] sm:$0xff] }
 0x4d4   :  { %6884 = vmatmul.mubr.bf16.gmra.mrb[216].mxu0 %v13067_v11  ;;  %7780 = vmatprep.subr.bf16.mxu1 %v10099_v58  ;;  %v11689_v23 = vld [vmem:[#allocation11 + $0x18] sm:$0xff]  }
 0x4d5   :  { %7656 = vmatmul.mubr.bf16.gmra.mrb[216].mxu1 %v13067_v11  ;;  %6893 = vmatprep.mubr.bf16.mxu0 %v13128_v56  ;;  %v10112_v11 = vcombine.low %v2245_v14, %v2249_v60  ;;  %v11691_v58 = vld [vmem:[#allocation11 + $0x98] sm:$0xff]   ;;  %v11697_v14 = vld [vmem:[#allocation11 + $0x28] sm:$0xff]  }
 0x4d6   :  { %7665 = vmatprep.mubr.bf16.mxu1 %v13128_v56  ;;  %7009 = vmatpush1.bf16.msra.mxu0 %v10096_v6  ;;  %v10123_v56 = vcombine.high %v2254_v59, %v2258_v63  ;;  %v11696_v6 = vld [vmem:[#allocation11 + $0x68] sm:$0xff]   ;;  %v15496_v9 = vld [vmem:[#allocation99_spill] sm:$0xff] }
 0x4d7   :  { %7781 = vmatpush1.bf16.msra.mxu1 %v10098_v42  ;;  %7010 = vmatprep.subr.bf16.mxu0 %v10105_v21  ;;  %v15493_v42 = vld [vmem:[#allocation89_spill] sm:$0xff]  ;;  %v11705_v59 = vld [vmem:[#allocation11 + $0x38] sm:$0xff]  }
 0x4d8   :  { %7782 = vmatprep.subr.bf16.mxu1 %v10107_v17  ;;  %v11698_v21 = vld [vmem:[#allocation11 + $0xe8] sm:$0xff]   ;;  %v15494_v17 = vld [vmem:[#allocation95_spill] sm:$0xff] }
 0x4d9   :  { %v11699_v60 = vld [vmem:[#allocation11 + $0xa8] sm:$0xff]   ;;  %v11707_v63 = vld [vmem:[#allocation11 + $0xb8] sm:$0xff]  }
 0x4da   :  { %7011 = vmatpush1.bf16.msra.mxu0 %v10104_v13  ;;  %v11701_v13 = vld [vmem:[#allocation11 + $0x30] sm:$0xff]  }
 0x4db   :  { %7783 = vmatpush1.bf16.msra.mxu1 %v10106_v3  ;;  %7012 = vmatprep.subr.bf16.mxu0 %v10113_v7  ;;  %v11703_v3 = vld [vmem:[#allocation11 + $0xb0] sm:$0xff]   ;;  %v11704_v7 = vld [vmem:[#allocation11 + $0x78] sm:$0xff]  }
 0x4dc   :  { %6894 = vmatmul.mubr.bf16.gmra.mrb[220].mxu0 %v13119_v51  ;;  %7784 = vmatprep.subr.bf16.mxu1 %v10115_v27  ;;  %v15495_v27 = vld [vmem:[#allocation93_spill] sm:$0xff] }
 0x4dd   :  { %7666 = vmatmul.mubr.bf16.gmra.mrb[220].mxu1 %v13119_v51  ;;  %6903 = vmatprep.mubr.bf16.mxu0 %v13180_v49  ;;  %v15485_v51 = vld [vmem:[#allocation120_spill] sm:$0xff] }
 0x4de   :  { %7675 = vmatprep.mubr.bf16.mxu1 %v13180_v49  ;;  %7013 = vmatpush1.bf16.msra.mxu0 %v10112_v11  ;;  %v15487_v49 = vld [vmem:[#allocation62_spill] sm:$0xff]  ;;  %v11708_v11 = vld [vmem:[#allocation11 + $0x140] sm:$0xff]  }
 0x4df   :  { %7785 = vmatpush1.bf16.msra.mxu1 %v10114_v34  ;;  %7014 = vmatprep.subr.bf16.mxu0 %v10121_v54  ;;  %v11710_v34 = vld [vmem:[#allocation11 + $0x1c0] sm:$0xff]   ;;  %v15497_v54 = vld [vmem:[#allocation97_spill] sm:$0xff] }
 0x4e0   :  { %7786 = vmatprep.subr.bf16.mxu1 %v10123_v56  ;;  %v15498_v56 = vld [vmem:[#allocation103_spill] sm:$0xff] }
 0x4e2   :  { %7015 = vmatpush1.bf16.msra.mxu0 %v10120_v5  ;;  %v15499_v5 = vld [vmem:[#allocation101_spill] sm:$0xff] }
 0x4e3   :  { %7787 = vmatpush1.bf16.msra.mxu1 %v10122_v16  ;;  %10189 = vmatprep.subr.bf16.mxu0 %v11676_v62  ;;  %v15500_v16 = vld [vmem:[#allocation105_spill] sm:$0xff]  ;;  %v15501_v62 = vld [vmem:[#allocation104_spill] sm:$0xff] }
 0x4e4   :  { %6904 = vmatmul.mubr.bf16.gmra.mrb[224].mxu0 %v13171_v10  ;;  %10301 = vmatprep.subr.bf16.mxu1 %v11678_v43  ;;  %v15502_v43 = vld [vmem:[#allocation107_spill] sm:$0xff] }
 0x4e5   :  { %7676 = vmatmul.mubr.bf16.gmra.mrb[224].mxu1 %v13171_v10  ;;  %6913 = vmatprep.mubr.bf16.mxu0 %v13232_v46  ;;  %v15486_v10 = vld [vmem:[#allocation123_spill] sm:$0xff] }
 0x4e6   :  { %7685 = vmatprep.mubr.bf16.mxu1 %v13232_v46  ;;  %v11677_v46 = vld [vmem:[#allocation11] sm:$0xff]  }
 0x4ec   :  { %6914 = vmatmul.mubr.bf16.gmra.mrb[228].mxu0 %v13223_v31 }
 0x4ed   :  { %7686 = vmatmul.mubr.bf16.gmra.mrb[228].mxu1 %v13223_v31  ;;  %6923 = vmatprep.mubr.bf16.mxu0 %v13284_v38  ;;  %v15488_v31 = vld [vmem:[#allocation83_spill] sm:$0xff] }
 0x4ee   :  { %7695 = vmatprep.mubr.bf16.mxu1 %v13284_v38  ;;  %v11680_v38 = vld [vmem:[#allocation11 + $0x48] sm:$0xff]  }
 0x4f4   :  { %6924 = vmatmul.mubr.bf16.gmra.mrb[232].mxu0 %v13275_v28 }
 0x4f5   :  { %7696 = vmatmul.mubr.bf16.gmra.mrb[232].mxu1 %v13275_v28  ;;  %6933 = vmatprep.mubr.bf16.mxu0 %v13334_v18  ;;  %v11679_v28 = vld [vmem:[#allocation11 + $0x80] sm:$0xff]  }
 0x4f6   :  { %7705 = vmatprep.mubr.bf16.mxu1 %v13334_v18  ;;  %v11682_v18 = vld [vmem:[#allocation11 + $0xc8] sm:$0xff]  }
 0x4fc   :  { %6934 = vmatmul.mubr.bf16.gmra.mrb[236].mxu0 %v13325_v47 }
 0x4fd   :  { %7706 = vmatmul.mubr.bf16.gmra.mrb[236].mxu1 %v13325_v47  ;;  %6943 = vmatprep.mubr.bf16.mxu0 %v13372_v25  ;;  %v15489_v47 = vld [vmem:[#allocation81_spill] sm:$0xff] }
 0x4fe   :  { %7715 = vmatprep.mubr.bf16.mxu1 %v13372_v25  ;;  %v11681_v25 = vld [vmem:[#allocation11 + $0x8] sm:$0xff]  }
 0x504   :  { %6944 = vmatmul.mubr.bf16.gmra.mrb[240].mxu0 %v13364_v40 }
 0x505   :  { %7716 = vmatmul.mubr.bf16.gmra.mrb[240].mxu1 %v13364_v40  ;;  %6953 = vmatprep.mubr.bf16.mxu0 %v13396_v41  ;;  %v15490_v40 = vld [vmem:[#allocation87_spill] sm:$0xff] }
 0x506   :  { %7725 = vmatprep.mubr.bf16.mxu1 %v13396_v41  ;;  %v11684_v41 = vld [vmem:[#allocation11 + $0x50] sm:$0xff]  }
 0x50c   :  { %6954 = vmatmul.mubr.bf16.gmra.mrb[244].mxu0 %v13391_v30 }
 0x50d   :  { %7726 = vmatmul.mubr.bf16.gmra.mrb[244].mxu1 %v13391_v30  ;;  %6963 = vmatprep.mubr.bf16.mxu0 %v13416_v12  ;;  %v11683_v30 = vld [vmem:[#allocation11 + $0x88] sm:$0xff]  }
 0x50e   :  { %7735 = vmatprep.mubr.bf16.mxu1 %v13416_v12  ;;  %v11686_v12 = vld [vmem:[#allocation11 + $0xd0] sm:$0xff]  }
 0x514   :  { %6964 = vmatmul.mubr.bf16.gmra.mrb[248].mxu0 %v15485_v51 }
 0x515   :  { %7736 = vmatmul.mubr.bf16.gmra.mrb[248].mxu1 %v15485_v51  ;;  %6973 = vmatprep.mubr.bf16.mxu0 %v15486_v10  ;;  %v15503_v51 = vld [vmem:[#allocation106_spill] sm:$0xff] }
 0x516   :  { %7745 = vmatprep.mubr.bf16.mxu1 %v15486_v10  ;;  %v15504_v10 = vld [vmem:[#allocation109_spill] sm:$0xff] }
 0x51c   :  { %6974 = vmatmul.mubr.bf16.gmra.mrb[252].mxu0 %v15487_v49 }
 0x51d   :  { %7746 = vmatmul.mubr.bf16.gmra.mrb[252].mxu1 %v15487_v49  ;;  %7016 = vmatprep.mubr.bf16.mxu0 %v15488_v31  ;;  %v15505_v49 = vld [vmem:[#allocation108_spill] sm:$0xff] }
 0x51e   :  { %7788 = vmatprep.mubr.bf16.mxu1 %v15488_v31  ;;  %v15506_v31 = vld [vmem:[#allocation111_spill] sm:$0xff] }
 0x524   :  { %7017 = vmatmul.mubr.bf16.vlgmr.msra.gmra.mrb[192].mxu0 %v15489_v47 }
 0x525   :  { %7789 = vmatmul.mubr.bf16.vlgmr.msra.gmra.mrb[192].mxu1 %v15489_v47  ;;  %7026 = vmatprep.mubr.bf16.mxu0 %v15490_v40  ;;  %v15510_v47 = vld [vmem:[#allocation115_spill] sm:$0xff] }
 0x526   :  { %7798 = vmatprep.mubr.bf16.mxu1 %v15490_v40  ;;  %10190 = vmatpush3.bf16.msra.mxu0 %v11677_v46  ;;  %v15507_v46 = vld [vmem:[#allocation110_spill] sm:$0xff]  ;;  %v15512_v40 = vld [vmem:[#allocation117_spill] sm:$0xff] }
 0x527   :  { %10302 = vmatpush3.bf16.msra.mxu1 %v11679_v28  ;;  %10191 = vmatprep.subr.bf16.mxu0 %v11680_v38  ;;  %v15508_v28 = vld [vmem:[#allocation113_spill] sm:$0xff]  ;;  %v15509_v38 = vld [vmem:[#allocation112_spill] sm:$0xff] }
 0x528   :  { %10303 = vmatprep.subr.bf16.mxu1 %v11682_v18  ;;  %v15511_v18 = vld [vmem:[#allocation114_spill] sm:$0xff] }
 0x52a   :  { %10192 = vmatpush3.bf16.msra.mxu0 %v11681_v25  ;;  %v15513_v25 = vld [vmem:[#allocation116_spill] sm:$0xff] }
 0x52b   :  { %10304 = vmatpush3.bf16.msra.mxu1 %v11683_v30  ;;  %10193 = vmatprep.subr.bf16.mxu0 %v11684_v41  ;;  %v15514_v30 = vld [vmem:[#allocation119_spill] sm:$0xff]  ;;  %v15515_v41 = vld [vmem:[#allocation118_spill] sm:$0xff] }
 0x52c   :  { %7027 = vmatmul.mubr.bf16.gmra.mrb[196].mxu0 %v15491_v52  ;;  %10305 = vmatprep.subr.bf16.mxu1 %v11686_v12  ;;  %v15516_v12 = vld [vmem:[#allocation122_spill] sm:$0xff] }
 0x52d   :  { %7799 = vmatmul.mubr.bf16.gmra.mrb[196].mxu1 %v15491_v52  ;;  %7036 = vmatprep.mubr.bf16.mxu0 %v15492_v35  ;;  %v15520_v52 = vld [vmem:[#allocation100_spill] sm:$0xff] }
 0x52e   :  { %7808 = vmatprep.mubr.bf16.mxu1 %v15492_v35  ;;  %10194 = vmatpush3.bf16.msra.mxu0 %v11685_v20  ;;  %v15517_v20 = vld [vmem:[#allocation121_spill] sm:$0xff]  ;;  %v11709_v35 = vld [vmem:[#allocation11 + $0x100] sm:$0xff]  }
 0x52f   :  { %10306 = vmatpush3.bf16.msra.mxu1 %v11687_v45  ;;  %10195 = vmatprep.subr.bf16.mxu0 %v11688_v44  ;;  %v15518_v45 = vld [vmem:[#allocation124_spill] sm:$0xff] }
 0x530   :  { %10307 = vmatprep.subr.bf16.mxu1 %v11690_v50  ;;  %v15519_v44 = vld [vmem:[#allocation68_spill] sm:$0xff]  ;;  %v15521_v50 = vld [vmem:[#allocation23_spill] sm:$0xff] }
 0x532   :  { %10196 = vmatpush3.bf16.msra.mxu0 %v11689_v23  ;;  %v11711_v23 = vld [vmem:[#allocation11 + $0x180] sm:$0xff]  }
 0x533   :  { %10308 = vmatpush3.bf16.msra.mxu1 %v11691_v58  ;;  %10197 = vmatprep.subr.bf16.mxu0 %v11692_v53  ;;  %v11712_v58 = vld [vmem:[#allocation11 + $0x148] sm:$0xff]   ;;  %v15522_v53 = vld [vmem:[#allocation66_spill] sm:$0xff] }
 0x534   :  { %7037 = vmatmul.mubr.bf16.gmra.mrb[200].mxu0 %v15493_v42  ;;  %10309 = vmatprep.subr.bf16.mxu1 %v11694_v33  ;;  %v11714_v33 = vld [vmem:[#allocation11 + $0x1c8] sm:$0xff]  }
 0x535   :  { %7809 = vmatmul.mubr.bf16.gmra.mrb[200].mxu1 %v15493_v42  ;;  %7046 = vmatprep.mubr.bf16.mxu0 %v15494_v17  ;;  %v11713_v42 = vld [vmem:[#allocation11 + $0x108] sm:$0xff]  }
 0x536   :  { %7818 = vmatprep.mubr.bf16.mxu1 %v15494_v17  ;;  %10198 = vmatpush3.bf16.msra.mxu0 %v11693_v4  ;;  %v15523_v4 = vld [vmem:[#allocation102_spill] sm:$0xff] }
 0x537   :  { %10310 = vmatpush3.bf16.msra.mxu1 %v11695_v39  ;;  %10199 = vmatprep.subr.bf16.mxu0 %v11696_v6  ;;  %v15524_v39 = vld [vmem:[#allocation25_spill] sm:$0xff]  ;;  %v15525_v6 = vld [vmem:[#allocation31_spill] sm:$0xff] }
 0x538   :  { %10311 = vmatprep.subr.bf16.mxu1 %v11698_v21  ;;  %v11715_v21 = vld [vmem:[#allocation11 + $0x188] sm:$0xff]   ;;  %v11716_v17 = vld [vmem:[#allocation11 + $0x150] sm:$0xff]  }
 0x53a   :  { %10200 = vmatpush3.bf16.msra.mxu0 %v11697_v14  ;;  %v11718_v14 = vld [vmem:[#allocation11 + $0x1d0] sm:$0xff]  }
 0x53b   :  { %10312 = vmatpush3.bf16.msra.mxu1 %v11699_v60  ;;  %10201 = vmatprep.subr.bf16.mxu0 %v11700_v8  ;;  %v11717_v60 = vld [vmem:[#allocation11 + $0x110] sm:$0xff]  }
 0x53c   :  { %7047 = vmatmul.mubr.bf16.gmra.mrb[204].mxu0 %v15495_v27  ;;  %10313 = vmatprep.subr.bf16.mxu1 %v11702_v61  ;;  %v11719_v8 = vld [vmem:[#allocation11 + $0x190] sm:$0xff]   ;;  %v11720_v61 = vld [vmem:[#allocation11 + $0x158] sm:$0xff]  }
 0x53d   :  { %7819 = vmatmul.mubr.bf16.gmra.mrb[204].mxu1 %v15495_v27  ;;  %7056 = vmatprep.mubr.bf16.mxu0 %v15496_v9  ;;  %v15528_v27 = vld [vmem:[#allocation33_spill] sm:$0xff] }
 0x53e   :  { %7828 = vmatprep.mubr.bf16.mxu1 %v15496_v9  ;;  %10202 = vmatpush3.bf16.msra.mxu0 %v11701_v13  ;;  %v15526_v13 = vld [vmem:[#allocation21_spill] sm:$0xff]  ;;  %v11721_v9 = vld [vmem:[#allocation11 + $0x118] sm:$0xff]  }
 0x53f   :  { %10314 = vmatpush3.bf16.msra.mxu1 %v11703_v3  ;;  %10203 = vmatprep.subr.bf16.mxu0 %v11704_v7  ;;  %v11722_v3 = vld [vmem:[#allocation11 + $0x1d8] sm:$0xff]  }
 0x540   :  { %10315 = vmatprep.subr.bf16.mxu1 %v11706_v0  ;;  %v15527_v7 = vld [vmem:[#allocation27_spill] sm:$0xff] }
 0x541   :  { %v15529_v0 = vld [vmem:[#allocation39_spill] sm:$0xff] }
 0x542   :  { %10204 = vmatpush3.bf16.msra.mxu0 %v11705_v59  ;;  %v11723_v59 = vld [vmem:[#allocation11 + $0x198] sm:$0xff]  }
 0x543   :  { %10316 = vmatpush3.bf16.msra.mxu1 %v11707_v63  ;;  %10413 = vmatprep.subr.bf16.mxu0 %v11708_v11  ;;  %v11724_v63 = vld [vmem:[#allocation11 + $0x160] sm:$0xff]  }
 0x544   :  { %7057 = vmatmul.mubr.bf16.gmra.mrb[208].mxu0 %v15497_v54  ;;  %10525 = vmatprep.subr.bf16.mxu1 %v11710_v34  ;;  %v11726_v11 = vld [vmem:[#allocation11 + $0x1e0] sm:$0xff]  }
 0x545   :  { %7829 = vmatmul.mubr.bf16.gmra.mrb[208].mxu1 %v15497_v54  ;;  %7066 = vmatprep.mubr.bf16.mxu0 %v15498_v56  ;;  %v11725_v34 = vld [vmem:[#allocation11 + $0x120] sm:$0xff]  }
 0x546   :  { %7838 = vmatprep.mubr.bf16.mxu1 %v15498_v56  ;;  %v11727_v54 = vld [vmem:[#allocation11 + $0x1a0] sm:$0xff]   ;;  %v11728_v56 = vld [vmem:[#allocation11 + $0x168] sm:$0xff]  }
 0x54c   :  { %7067 = vmatmul.mubr.bf16.gmra.mrb[212].mxu0 %v15499_v5 }
 0x54d   :  { %7839 = vmatmul.mubr.bf16.gmra.mrb[212].mxu1 %v15499_v5  ;;  %7076 = vmatprep.mubr.bf16.mxu0 %v15500_v16  ;;  %v15530_v5 = vld [vmem:[#allocation29_spill] sm:$0xff] }
 0x54e   :  { %7848 = vmatprep.mubr.bf16.mxu1 %v15500_v16  ;;  %v11730_v16 = vld [vmem:[#allocation11 + $0x1e8] sm:$0xff]  }
 0x554   :  { %7077 = vmatmul.mubr.bf16.gmra.mrb[216].mxu0 %v15501_v62 }
 0x555   :  { %7849 = vmatmul.mubr.bf16.gmra.mrb[216].mxu1 %v15501_v62  ;;  %7086 = vmatprep.mubr.bf16.mxu0 %v15502_v43  ;;  %v15531_v62 = vld [vmem:[#allocation35_spill] sm:$0xff] }
 0x556   :  { %7858 = vmatprep.mubr.bf16.mxu1 %v15502_v43  ;;  %v15532_v43 = vld [vmem:[#allocation41_spill] sm:$0xff] }
 0x55c   :  { %7087 = vmatmul.mubr.bf16.gmra.mrb[220].mxu0 %v15503_v51 }
 0x55d   :  { %7859 = vmatmul.mubr.bf16.gmra.mrb[220].mxu1 %v15503_v51  ;;  %7096 = vmatprep.mubr.bf16.mxu0 %v15504_v10  ;;  %v15533_v51 = vld [vmem:[#allocation47_spill] sm:$0xff] }
 0x55e   :  { %7868 = vmatprep.mubr.bf16.mxu1 %v15504_v10  ;;  %v11729_v10 = vld [vmem:[#allocation11 + $0x128] sm:$0xff]  }
 0x564   :  { %7097 = vmatmul.mubr.bf16.gmra.mrb[224].mxu0 %v15505_v49 }
 0x565   :  { %7869 = vmatmul.mubr.bf16.gmra.mrb[224].mxu1 %v15505_v49  ;;  %7106 = vmatprep.mubr.bf16.mxu0 %v15506_v31  ;;  %v11731_v49 = vld [vmem:[#allocation11 + $0x1a8] sm:$0xff]  }
 0x566   :  { %7878 = vmatprep.mubr.bf16.mxu1 %v15506_v31  ;;  %v11732_v31 = vld [vmem:[#allocation11 + $0x170] sm:$0xff]  }
 0x56c   :  { %7107 = vmatmul.mubr.bf16.gmra.mrb[228].mxu0 %v15507_v46 }
 0x56d   :  { %7879 = vmatmul.mubr.bf16.gmra.mrb[228].mxu1 %v15507_v46  ;;  %7116 = vmatprep.mubr.bf16.mxu0 %v15508_v28  ;;  %v11734_v46 = vld [vmem:[#allocation11 + $0x1f0] sm:$0xff]  }
 0x56e   :  { %7888 = vmatprep.mubr.bf16.mxu1 %v15508_v28  ;;  %v11733_v28 = vld [vmem:[#allocation11 + $0x130] sm:$0xff]  }
 0x574   :  { %7117 = vmatmul.mubr.bf16.gmra.mrb[232].mxu0 %v15509_v38 }
 0x575   :  { %7889 = vmatmul.mubr.bf16.gmra.mrb[232].mxu1 %v15509_v38  ;;  %7126 = vmatprep.mubr.bf16.mxu0 %v15510_v47  ;;  %v11735_v38 = vld [vmem:[#allocation11 + $0x1b0] sm:$0xff]  }
 0x576   :  { %7898 = vmatprep.mubr.bf16.mxu1 %v15510_v47  ;;  %v11736_v47 = vld [vmem:[#allocation11 + $0x178] sm:$0xff]  }
 0x57c   :  { %7127 = vmatmul.mubr.bf16.gmra.mrb[236].mxu0 %v15511_v18 }
 0x57d   :  { %7899 = vmatmul.mubr.bf16.gmra.mrb[236].mxu1 %v15511_v18  ;;  %7136 = vmatprep.mubr.bf16.mxu0 %v15512_v40  ;;  %v15534_v18 = vld [vmem:[#allocation37_spill] sm:$0xff] }
 0x57e   :  { %7908 = vmatprep.mubr.bf16.mxu1 %v15512_v40  ;;  %v11738_v40 = vld [vmem:[#allocation11 + $0x1f8] sm:$0xff]  }
 0x584   :  { %7137 = vmatmul.mubr.bf16.gmra.mrb[240].mxu0 %v15513_v25 }
 0x585   :  { %7909 = vmatmul.mubr.bf16.gmra.mrb[240].mxu1 %v15513_v25  ;;  %7146 = vmatprep.mubr.bf16.mxu0 %v15514_v30  ;;  %v15535_v25 = vld [vmem:[#allocation43_spill] sm:$0xff] }
 0x586   :  { %7918 = vmatprep.mubr.bf16.mxu1 %v15514_v30  ;;  %v15536_v30 = vld [vmem:[#allocation49_spill] sm:$0xff] }
 0x58c   :  { %7147 = vmatmul.mubr.bf16.gmra.mrb[244].mxu0 %v15515_v41 }
 0x58d   :  { %7919 = vmatmul.mubr.bf16.gmra.mrb[244].mxu1 %v15515_v41  ;;  %7156 = vmatprep.mubr.bf16.mxu0 %v15516_v12  ;;  %v15537_v41 = vld [vmem:[#allocation55_spill] sm:$0xff] }
 0x58e   :  { %7928 = vmatprep.mubr.bf16.mxu1 %v15516_v12  ;;  %v11737_v12 = vld [vmem:[#allocation11 + $0x138] sm:$0xff]  }
 0x594   :  { %7157 = vmatmul.mubr.bf16.gmra.mrb[248].mxu0 %v15517_v20 }
 0x595   :  { %7929 = vmatmul.mubr.bf16.gmra.mrb[248].mxu1 %v15517_v20  ;;  %7166 = vmatprep.mubr.bf16.mxu0 %v15518_v45  ;;  %v11739_v20 = vld [vmem:[#allocation11 + $0x1b8] sm:$0xff]  }
 0x596   :  { %7938 = vmatprep.mubr.bf16.mxu1 %v15518_v45  ;;  %v15538_v45 = vld [vmem:[#allocation45_spill] sm:$0xff] }
 0x59c   :  { %7167 = vmatmul.mubr.bf16.gmra.mrb[252].mxu0 %v15519_v44 }
 0x59d   :  { %7939 = vmatmul.mubr.bf16.gmra.mrb[252].mxu1 %v15519_v44  ;;  %8884 = vmatprep.mubr.bf16.mxu0 %v15520_v52  ;;  %v15539_v44 = vld [vmem:[#allocation51_spill] sm:$0xff]  ;;  %v15540_v52 = vld [vmem:[#allocation57_spill] sm:$0xff] }
 0x59e   :  { %9045 = vmatprep.mubr.bf16.mxu1 %v15521_v50  ;;  %v15541_v50 = vld [vmem:[#allocation63_spill] sm:$0xff] }
 0x5a4   :  { %8885 = vmatmul.mubr.bf16.vlgmr.msra.gmra.mrb[0].mxu0 %v15522_v53  ;;  %v15545_v53 = vld [vmem:[#allocation70_spill] sm:$0xff] }
 0x5a5   :  { %9046 = vmatmul.mubr.bf16.vlgmr.msra.gmra.mrb[0].mxu1 %v15523_v4  ;;  %8892 = vmatprep.mubr.bf16.mxu0 %v15524_v39  ;;  %v15547_v4 = vld [vmem:[#allocation67_spill] sm:$0xff] }
 0x5a6   :  { %9053 = vmatprep.mubr.bf16.mxu1 %v15525_v6  ;;  %10414 = vmatpush3.bf16.msra.mxu0 %v11709_v35  ;;  %v15542_v35 = vld [vmem:[#allocation53_spill] sm:$0xff]  ;;  %v15548_v39 = vld [vmem:[#allocation71_spill] sm:$0xff] }
 0x5a7   :  { %10526 = vmatpush3.bf16.msra.mxu1 %v11711_v23  ;;  %10415 = vmatprep.subr.bf16.mxu0 %v11712_v58  ;;  %v15543_v23 = vld [vmem:[#allocation59_spill] sm:$0xff]  ;;  %v15544_v58 = vld [vmem:[#allocation65_spill] sm:$0xff] }
 0x5a8   :  { %10527 = vmatprep.subr.bf16.mxu1 %v11714_v33  ;;  %v15546_v33 = vld [vmem:[#allocation61_spill] sm:$0xff]  ;;  %v15549_v6 = vld [vmem:[#allocation75_spill] sm:$0xff] }
 0x5aa   :  { %10416 = vmatpush3.bf16.msra.mxu0 %v11713_v42  ;;  %v15550_v42 = vld [vmem:[#allocation69_spill] sm:$0xff] }
 0x5ab   :  { %10528 = vmatpush3.bf16.msra.mxu1 %v11715_v21  ;;  %10417 = vmatprep.subr.bf16.mxu0 %v11716_v17  ;;  %v15551_v21 = vld [vmem:[#allocation72_spill] sm:$0xff] }
 0x5ac   :  { %8893 = vmatmul.mubr.bf16.gmra.mrb[4].mxu0 %v15526_v13  ;;  %10529 = vmatprep.subr.bf16.mxu1 %v11718_v14  ;;  %v15552_v17 = vld [vmem:[#allocation76_spill] sm:$0xff] }
 0x5ad   :  { %9054 = vmatmul.mubr.bf16.gmra.mrb[4].mxu1 %v15527_v7  ;;  %8900 = vmatprep.mubr.bf16.mxu0 %v15528_v27  ;;  %v15553_v14 = vld [vmem:[#allocation24_spill] sm:$0xff]  ;;  %v15560_v27 = vld [vmem:[#allocation34_spill] sm:$0xff] }
 0x5ae   :  { %9061 = vmatprep.mubr.bf16.mxu1 %v15529_v0  ;;  %10418 = vmatpush3.bf16.msra.mxu0 %v11717_v60  ;;  %v15554_v60 = vld [vmem:[#allocation73_spill] sm:$0xff]  ;;  %v15557_v13 = vld [vmem:[#allocation32_spill] sm:$0xff] }
 0x5af   :  { %10530 = vmatpush3.bf16.msra.mxu1 %v11719_v8  ;;  %10419 = vmatprep.subr.bf16.mxu0 %v11720_v61  ;;  %v15555_v8 = vld [vmem:[#allocation78_spill] sm:$0xff]  ;;  %v15559_v7 = vld [vmem:[#allocation28_spill] sm:$0xff] }
 0x5b0   :  { %10531 = vmatprep.subr.bf16.mxu1 %v11722_v3  ;;  %v15556_v61 = vld [vmem:[#allocation26_spill] sm:$0xff]  ;;  %v15561_v0 = vld [vmem:[#allocation40_spill] sm:$0xff] }
 0x5b1   :  { %v15558_v3 = vld [vmem:[#allocation22_spill] sm:$0xff] }
 0x5b2   :  { %10420 = vmatpush3.bf16.msra.mxu0 %v11721_v9  ;;  %v15562_v9 = vld [vmem:[#allocation30_spill] sm:$0xff] }
 0x5b3   :  { %10532 = vmatpush3.bf16.msra.mxu1 %v11723_v59  ;;  %10421 = vmatprep.subr.bf16.mxu0 %v11724_v63  ;;  %v11741_v59 = vld [vmem:[#allocation10] sm:$0xff]  ;;  %v15563_v63 = vld [vmem:[#allocation20_spill] sm:$0xff] }
 0x5b4   :  { %8901 = vmatmul.mubr.bf16.gmra.mrb[8].mxu0 %v15530_v5  ;;  %10533 = vmatprep.subr.bf16.mxu1 %v11726_v11  ;;  %v15564_v11 = vsub.s32 4, %v15563_v63  ;;  %v15567_v5 = vsub.s32 6, %v15563_v63 }
 0x5b5   :  { %9062 = vmatmul.mubr.bf16.gmra.mrb[8].mxu1 %v15531_v62  ;;  %8908 = vmatprep.mubr.bf16.mxu0 %v15532_v43  ;;  %v15568_v62 = vsub.s32 5, %v15563_v63 }
 0x5b6   :  { %9069 = vmatprep.mubr.bf16.mxu1 %v15533_v51  ;;  %10422 = vmatpush3.bf16.msra.mxu0 %v11725_v34  ;;  %v14481_v34 = vrot.slane %v11741_v59, %v15564_v11  ;;  %v15569_v51 = vld [vmem:[#allocation48_spill] sm:$0xff] }
 0x5b7   :  { %10534 = vmatpush3.bf16.msra.mxu1 %v11727_v54  ;;  %10423 = vmatprep.subr.bf16.mxu0 %v11728_v56  ;;  %v15565_v54 = vld [vmem:[#allocation36_spill] sm:$0xff]  ;;  %v15566_v56 = vld [vmem:[#allocation42_spill] sm:$0xff]  ;;  %v14491_v43 = vrot.slane %v11741_v59, %v15568_v62 }
 0x5b8   :  { %10535 = vmatprep.subr.bf16.mxu1 %v11730_v16  ;;  %v14487_v16 = vrot.slane %v11741_v59, %v15567_v5 }
 0x5ba   :  { %10424 = vmatpush3.bf16.msra.mxu0 %v11729_v10  ;;  %v15570_v10 = vsub.s32 7, %v15563_v63 }
 0x5bb   :  { %10536 = vmatpush3.bf16.msra.mxu1 %v11731_v49  ;;  %10425 = vmatprep.subr.bf16.mxu0 %v11732_v31 }
 0x5bc   :  { %8909 = vmatmul.mubr.bf16.gmra.mrb[12].mxu0 %v15534_v18  ;;  %10537 = vmatprep.subr.bf16.mxu1 %v11734_v46  ;;  %v14496_v49 = vrot.slane %v11741_v59, %v15570_v10 }
 0x5bd   :  { %9070 = vmatmul.mubr.bf16.gmra.mrb[12].mxu1 %v15535_v25  ;;  %8916 = vmatprep.mubr.bf16.mxu0 %v15536_v30 }
 0x5be   :  { %9077 = vmatprep.mubr.bf16.mxu1 %v15537_v41  ;;  %10426 = vmatpush3.bf16.msra.mxu0 %v11733_v28 }
 0x5bf   :  { %10538 = vmatpush3.bf16.msra.mxu1 %v11735_v38  ;;  %10427 = vmatprep.subr.bf16.mxu0 %v11736_v47 }
 0x5c0   :  { %10539 = vmatprep.subr.bf16.mxu1 %v11738_v40 }
 0x5c2   :  { %10428 = vmatpush3.bf16.msra.mxu0 %v11737_v12 }
 0x5c3   :  { %10540 = vmatpush3.bf16.msra.mxu1 %v11739_v20 }
 0x5c4   :  { %8917 = vmatmul.mubr.bf16.gmra.mrb[16].mxu0 %v15538_v45 }
 0x5c5   :  { %9078 = vmatmul.mubr.bf16.gmra.mrb[16].mxu1 %v15539_v44  ;;  %8924 = vmatprep.mubr.bf16.mxu0 %v15540_v52 }
 0x5c6   :  { %9085 = vmatprep.mubr.bf16.mxu1 %v15541_v50 }
 0x5cc   :  { %8925 = vmatmul.mubr.bf16.gmra.mrb[20].mxu0 %v15542_v35 }
 0x5cd   :  { %9086 = vmatmul.mubr.bf16.gmra.mrb[20].mxu1 %v15543_v23  ;;  %8932 = vmatprep.mubr.bf16.mxu0 %v15544_v58  ;;  %v15571_v58 = vld [vmem:[#allocation38_spill] sm:$0xff] }
 0x5ce   :  { %9093 = vmatprep.mubr.bf16.mxu1 %v15545_v53 }
 0x5d4   :  { %8933 = vmatmul.mubr.bf16.gmra.mrb[24].mxu0 %v15546_v33 }
 0x5d5   :  { %9094 = vmatmul.mubr.bf16.gmra.mrb[24].mxu1 %v15547_v4  ;;  %8940 = vmatprep.mubr.bf16.mxu0 %v15548_v39 }
 0x5d6   :  { %9101 = vmatprep.mubr.bf16.mxu1 %v15549_v6  ;;  %v15572_v6 = vld [vmem:[#allocation44_spill] sm:$0xff] }
 0x5dc   :  { %8941 = vmatmul.mubr.bf16.gmra.mrb[28].mxu0 %v15550_v42 }
 0x5dd   :  { %9102 = vmatmul.mubr.bf16.gmra.mrb[28].mxu1 %v15551_v21  ;;  %8948 = vmatprep.mubr.bf16.mxu0 %v15552_v17 }
 0x5de   :  { %9109 = vmatprep.mubr.bf16.mxu1 %v15553_v14 }
 0x5e4   :  { %8949 = vmatmul.mubr.bf16.gmra.mrb[32].mxu0 %v15554_v60 }
 0x5e5   :  { %9110 = vmatmul.mubr.bf16.gmra.mrb[32].mxu1 %v15555_v8  ;;  %8956 = vmatprep.mubr.bf16.mxu0 %v15556_v61 }
 0x5e6   :  { %9117 = vmatprep.mubr.bf16.mxu1 %v15557_v13 }
 0x5ec   :  { %8957 = vmatmul.mubr.bf16.gmra.mrb[36].mxu0 %v15558_v3 }
 0x5ed   :  { %9118 = vmatmul.mubr.bf16.gmra.mrb[36].mxu1 %v15559_v7  ;;  %8964 = vmatprep.mubr.bf16.mxu0 %v15560_v27 }
 0x5ee   :  { %9125 = vmatprep.mubr.bf16.mxu1 %v15561_v0 }
 0x5f4   :  { %8965 = vmatmul.mubr.bf16.gmra.mrb[40].mxu0 %v15562_v9 }
 0x5f5   :  { %9126 = vmatmul.mubr.bf16.gmra.mrb[40].mxu1 %v15565_v54  ;;  %8972 = vmatprep.mubr.bf16.mxu0 %v15566_v56 }
 0x5f6   :  { %9133 = vmatprep.mubr.bf16.mxu1 %v15569_v51 }
 0x5f7   :  { %v7018_v31 = vpop.f32.mrb[192].mxu0 }
 0x5f8   :  { %v10765_v46 = vadd.f32 %v7018_v31, %v14481_v34  ;;  %v7790_v28 = vpop.f32.mrb[192].mxu1  ;;  %v7020_v38 = vpop.f32.mrb[193].mxu0 }
 0x5f9   :  { %v10829_v47 = vadd.f32 %v7790_v28, %v14487_v16  ;;  %v10766_v18 = vadd.f32 %v7020_v38, %v14491_v43  ;;  %v7792_v40 = vpop.f32.mrb[193].mxu1  ;;  %v7022_v25 = vpop.f32.mrb[194].mxu0 }
 0x5fa   :  { %v10830_v30 = vadd.f32 %v7792_v40, %v14496_v49  ;;  %v10767_v41 = vadd.f32 %v7022_v25, %v14481_v34  ;;  %v7794_v12 = vpop.f32.mrb[194].mxu1  ;;  %v7024_v20 = vpop.f32.mrb[195].mxu0  ;;  %v7953_v50 = vmax.f32 %v10765_v46, 0.0 }
 0x5fb   :  { %v10831_v45 = vadd.f32 %v7794_v12, %v14487_v16  ;;  %v10768_v44 = vadd.f32 %v7024_v20, %v14491_v43  ;;  %v7796_v52 = vpop.f32.mrb[195].mxu1  ;;  %v7955_v53 = vmax.f32 %v10829_v47, 0.0  ;;  %v7954_v33 = vmax.f32 %v10766_v18, 0.0 }
 0x5fc   :  { %v7961_v35 = vmax.f32 %v10767_v41, 0.0  ;;  %v10832_v23 = vadd.f32 %v7796_v52, %v14496_v49  ;;  %8973 = vmatmul.mubr.bf16.gmra.mrb[44].mxu0 %v15571_v58  ;;  %v7956_v42 = vmax.f32 %v10830_v30, 0.0 }
 0x5fd   :  { %v7963_v4 = vmax.f32 %v10831_v45, 0.0  ;;  %v7962_v39 = vmax.f32 %v10768_v44, 0.0  ;;  %9134 = vmatmul.mubr.bf16.gmra.mrb[44].mxu1 %v15572_v6  ;;  %8980 = vmatprep.mubr.bf16.mxu0 %v14216_v2 }
 0x5fe   :  { %v14509_v21 = vpack.c.bf16 %v7961_v35, %v7953_v50  ;;  %v7964_v17 = vmax.f32 %v10832_v23, 0.0  ;;  %9141 = vmatprep.mubr.bf16.mxu1 %v14220_v48 }
 0x5ff   :  { %v14512_v14 = vpack.c.bf16 %v7963_v4, %v7955_v53  ;;  %v14514_v60 = vpack.c.bf16 %v7962_v39, %v7954_v33  ;;  %v7028_v8 = vpop.f32.mrb[196].mxu0 }
 0x600   :  { %v14516_v61 = vpack.c.bf16 %v7964_v17, %v7956_v42  ;;  %v10769_v13 = vadd.f32 %v7028_v8, %v14481_v34  ;;  %v7800_v3 = vpop.f32.mrb[196].mxu1  ;;  %v7030_v7 = vpop.f32.mrb[197].mxu0 }
 0x601   :  { %v10833_v27 = vadd.f32 %v7800_v3, %v14487_v16  ;;  %v10770_v2 = vadd.f32 %v7030_v7, %v14491_v43  ;;  %v7802_v0 = vpop.f32.mrb[197].mxu1  ;;  %v7032_v9 = vpop.f32.mrb[198].mxu0 }
 0x602   :  { %v10834_v59 = vadd.f32 %v7802_v0, %v14496_v49  ;;  %v10771_v48 = vadd.f32 %v7032_v9, %v14481_v34  ;;  %v7804_v63 = vpop.f32.mrb[198].mxu1  ;;  %v7034_v11 = vpop.f32.mrb[199].mxu0  ;;  %v7969_v62 = vmax.f32 %v10769_v13, 0.0 }
 0x603   :  { %v10835_v54 = vadd.f32 %v7804_v63, %v14487_v16  ;;  %v10772_v56 = vadd.f32 %v7034_v11, %v14491_v43  ;;  %v7806_v5 = vpop.f32.mrb[199].mxu1  ;;  %v7971_v31 = vmax.f32 %v10833_v27, 0.0  ;;  %v7970_v46 = vmax.f32 %v10770_v2, 0.0 }
 0x604   :  { %v7977_v51 = vmax.f32 %v10771_v48, 0.0  ;;  %v10836_v10 = vadd.f32 %v7806_v5, %v14496_v49  ;;  %8981 = vmatmul.mubr.bf16.gmra.mrb[48].mxu0 %v14211_v32  ;;  %v7972_v47 = vmax.f32 %v10834_v59, 0.0 }
 0x605   :  { %v7979_v28 = vmax.f32 %v10835_v54, 0.0  ;;  %v7978_v38 = vmax.f32 %v10772_v56, 0.0  ;;  %9142 = vmatmul.mubr.bf16.gmra.mrb[48].mxu1 %v14214_v22  ;;  %8988 = vmatprep.mubr.bf16.mxu0 %v14240_v37 }
 0x606   :  { %v14529_v18 = vpack.c.bf16 %v7977_v51, %v7969_v62  ;;  %v7980_v40 = vmax.f32 %v10836_v10, 0.0  ;;  %9149 = vmatprep.mubr.bf16.mxu1 %v14242_v19 }
 0x607   :  { %v14532_v25 = vpack.c.bf16 %v7979_v28, %v7971_v31  ;;  %v14534_v30 = vpack.c.bf16 %v7978_v38, %v7970_v46  ;;  %v7038_v41 = vpop.f32.mrb[200].mxu0 }
 0x608   :  { %v14536_v32 = vpack.c.bf16 %v7980_v40, %v7972_v47  ;;  %v10773_v12 = vadd.f32 %v7038_v41, %v14481_v34  ;;  %v7810_v20 = vpop.f32.mrb[200].mxu1  ;;  %v7040_v45 = vpop.f32.mrb[201].mxu0  ;;  %v15573_v47 = vld [vmem:[#allocation46_spill] sm:$0xff] }
 0x609   :  { %v10837_v22 = vadd.f32 %v7810_v20, %v14487_v16  ;;  %v10774_v37 = vadd.f32 %v7040_v45, %v14491_v43  ;;  %v7812_v44 = vpop.f32.mrb[201].mxu1  ;;  %v7042_v52 = vpop.f32.mrb[202].mxu0  ;;  %v15574_v45 = vld [vmem:[#allocation52_spill] sm:$0xff] }
 0x60a   :  { %v10838_v50 = vadd.f32 %v7812_v44, %v14496_v49  ;;  %v10775_v19 = vadd.f32 %v7042_v52, %v14481_v34  ;;  %v7814_v35 = vpop.f32.mrb[202].mxu1  ;;  %v7044_v23 = vpop.f32.mrb[203].mxu0  ;;  %v7985_v4 = vmax.f32 %v10773_v12, 0.0 }
 0x60b   :  { %v10839_v58 = vadd.f32 %v7814_v35, %v14487_v16  ;;  %v10776_v53 = vadd.f32 %v7044_v23, %v14491_v43  ;;  %v7816_v33 = vpop.f32.mrb[203].mxu1  ;;  %v7987_v42 = vmax.f32 %v10837_v22, 0.0  ;;  %v7986_v17 = vmax.f32 %v10774_v37, 0.0 }
 0x60c   :  { %v7993_v39 = vmax.f32 %v10775_v19, 0.0  ;;  %v10840_v6 = vadd.f32 %v7816_v33, %v14496_v49  ;;  %8989 = vmatmul.mubr.bf16.gmra.mrb[52].mxu0 %v14235_v24  ;;  %v7988_v3 = vmax.f32 %v10838_v50, 0.0 }
 0x60d   :  { %v7995_v8 = vmax.f32 %v10839_v58, 0.0  ;;  %v7994_v13 = vmax.f32 %v10776_v53, 0.0  ;;  %9150 = vmatmul.mubr.bf16.gmra.mrb[52].mxu1 %v14238_v15  ;;  %8996 = vmatprep.mubr.bf16.mxu0 %v14260_v36 }
 0x60e   :  { %v14549_v7 = vpack.c.bf16 %v7993_v39, %v7985_v4  ;;  %v7996_v27 = vmax.f32 %v10840_v6, 0.0  ;;  %9157 = vmatprep.mubr.bf16.mxu1 %v14262_v57 }
 0x60f   :  { %v14552_v2 = vpack.c.bf16 %v7995_v8, %v7987_v42  ;;  %v14554_v0 = vpack.c.bf16 %v7994_v13, %v7986_v17  ;;  %v7048_v9 = vpop.f32.mrb[204].mxu0 }
 0x610   :  { %v14556_v24 = vpack.c.bf16 %v7996_v27, %v7988_v3  ;;  %v10777_v59 = vadd.f32 %v7048_v9, %v14481_v34  ;;  %v7820_v48 = vpop.f32.mrb[204].mxu1  ;;  %v7050_v63 = vpop.f32.mrb[205].mxu0 }
 0x611   :  { %v10841_v15 = vadd.f32 %v7820_v48, %v14487_v16  ;;  %v10778_v36 = vadd.f32 %v7050_v63, %v14491_v43  ;;  %v7822_v11 = vpop.f32.mrb[205].mxu1  ;;  %v7052_v54 = vpop.f32.mrb[206].mxu0 }
 0x612   :  { %v10842_v56 = vadd.f32 %v7822_v11, %v14496_v49  ;;  %v10779_v57 = vadd.f32 %v7052_v54, %v14481_v34  ;;  %v7824_v5 = vpop.f32.mrb[206].mxu1  ;;  %v7054_v62 = vpop.f32.mrb[207].mxu0  ;;  %v8001_v46 = vmax.f32 %v10777_v59, 0.0 }
 0x613   :  { %v10843_v51 = vadd.f32 %v7824_v5, %v14487_v16  ;;  %v10780_v10 = vadd.f32 %v7054_v62, %v14491_v43  ;;  %v7826_v31 = vpop.f32.mrb[207].mxu1  ;;  %v8003_v40 = vmax.f32 %v10841_v15, 0.0  ;;  %v8002_v41 = vmax.f32 %v10778_v36, 0.0 }
 0x614   :  { %v8009_v28 = vmax.f32 %v10779_v57, 0.0  ;;  %v10844_v38 = vadd.f32 %v7826_v31, %v14496_v49  ;;  %8997 = vmatmul.mubr.bf16.gmra.mrb[56].mxu0 %v15573_v47  ;;  %v8004_v22 = vmax.f32 %v10842_v56, 0.0 }
 0x615   :  { %v8011_v12 = vmax.f32 %v10843_v51, 0.0  ;;  %v8010_v20 = vmax.f32 %v10780_v10, 0.0  ;;  %9158 = vmatmul.mubr.bf16.gmra.mrb[56].mxu1 %v15574_v45  ;;  %9004 = vmatprep.mubr.bf16.mxu0 %v14280_v1 }
 0x616   :  { %v14569_v37 = vpack.c.bf16 %v8009_v28, %v8001_v46  ;;  %v8012_v44 = vmax.f32 %v10844_v38, 0.0  ;;  %9165 = vmatprep.mubr.bf16.mxu1 %v14282_v26 }
 0x617   :  { %v14572_v52 = vpack.c.bf16 %v8011_v12, %v8003_v40  ;;  %v14574_v50 = vpack.c.bf16 %v8010_v20, %v8002_v41  ;;  %v7058_v19 = vpop.f32.mrb[208].mxu0 }
 0x618   :  { %v14576_v35 = vpack.c.bf16 %v8012_v44, %v8004_v22  ;;  %v10781_v23 = vadd.f32 %v7058_v19, %v14481_v34  ;;  %v7830_v58 = vpop.f32.mrb[208].mxu1  ;;  %v7060_v53 = vpop.f32.mrb[209].mxu0 }
 0x619   :  { %v10845_v33 = vadd.f32 %v7830_v58, %v14487_v16  ;;  %v10782_v1 = vadd.f32 %v7060_v53, %v14491_v43  ;;  %v7832_v4 = vpop.f32.mrb[209].mxu1  ;;  %v7062_v39 = vpop.f32.mrb[210].mxu0 }
 0x61a   :  { %v10846_v6 = vadd.f32 %v7832_v4, %v14496_v49  ;;  %v10783_v26 = vadd.f32 %v7062_v39, %v14481_v34  ;;  %v7834_v42 = vpop.f32.mrb[210].mxu1  ;;  %v7064_v17 = vpop.f32.mrb[211].mxu0  ;;  %v8017_v27 = vmax.f32 %v10781_v23, 0.0 }
 0x61b   :  { %v10847_v8 = vadd.f32 %v7834_v42, %v14487_v16  ;;  %v10784_v13 = vadd.f32 %v7064_v17, %v14491_v43  ;;  %v7836_v3 = vpop.f32.mrb[211].mxu1  ;;  %v8019_v48 = vmax.f32 %v10845_v33, 0.0  ;;  %v8018_v63 = vmax.f32 %v10782_v1, 0.0 }
 0x61c   :  { %v8025_v9 = vmax.f32 %v10783_v26, 0.0  ;;  %v10848_v59 = vadd.f32 %v7836_v3, %v14496_v49  ;;  %9005 = vmatmul.mubr.bf16.gmra.mrb[60].mxu0 %v14275_v29  ;;  %v8020_v11 = vmax.f32 %v10846_v6, 0.0 }
 0x61d   :  { %v8027_v15 = vmax.f32 %v10847_v8, 0.0  ;;  %v8026_v36 = vmax.f32 %v10784_v13, 0.0  ;;  %9166 = vmatmul.mubr.bf16.gmra.mrb[60].mxu1 %v14278_v55  ;;  %9206 = vmatprep.mubr.bf16.mxu0 %v14514_v60 }
 0x61e   :  { %v14589_v54 = vpack.c.bf16 %v8025_v9, %v8017_v27  ;;  %v8028_v56 = vmax.f32 %v10848_v59, 0.0  ;;  %9367 = vmatprep.mubr.bf16.mxu1 %v14516_v61 }
 0x61f   :  { %v14592_v57 = vpack.c.bf16 %v8027_v15, %v8019_v48  ;;  %v14594_v5 = vpack.c.bf16 %v8026_v36, %v8018_v63  ;;  %v7068_v62 = vpop.f32.mrb[212].mxu0 }
 0x620   :  { %v14596_v29 = vpack.c.bf16 %v8028_v56, %v8020_v11  ;;  %v10785_v51 = vadd.f32 %v7068_v62, %v14481_v34  ;;  %v7840_v10 = vpop.f32.mrb[212].mxu1  ;;  %v7070_v31 = vpop.f32.mrb[213].mxu0 }
 0x621   :  { %v10849_v55 = vadd.f32 %v7840_v10, %v14487_v16  ;;  %v10786_v60 = vadd.f32 %v7070_v31, %v14491_v43  ;;  %v7842_v46 = vpop.f32.mrb[213].mxu1  ;;  %v7072_v28 = vpop.f32.mrb[214].mxu0 }
 0x622   :  { %v10850_v38 = vadd.f32 %v7842_v46, %v14496_v49  ;;  %v10787_v61 = vadd.f32 %v7072_v28, %v14481_v34  ;;  %v7844_v47 = vpop.f32.mrb[214].mxu1  ;;  %v7074_v40 = vpop.f32.mrb[215].mxu0  ;;  %v8033_v45 = vmax.f32 %v10785_v51, 0.0 }
 0x623   :  { %v10851_v41 = vadd.f32 %v7844_v47, %v14487_v16  ;;  %v10788_v12 = vadd.f32 %v7074_v40, %v14491_v43  ;;  %v7846_v20 = vpop.f32.mrb[215].mxu1  ;;  %v8035_v19 = vmax.f32 %v10849_v55, 0.0  ;;  %v8034_v23 = vmax.f32 %v10786_v60, 0.0 }
 0x624   :  { %v8041_v22 = vmax.f32 %v10787_v61, 0.0  ;;  %v10852_v44 = vadd.f32 %v7846_v20, %v14496_v49  ;;  %9207 = vmatmul.mubr.bf16.vlgmr.msra.gmra.mrb[64].mxu0 %v14509_v21  ;;  %v8036_v33 = vmax.f32 %v10850_v38, 0.0 }
 0x625   :  { %v8043_v58 = vmax.f32 %v10851_v41, 0.0  ;;  %v8042_v53 = vmax.f32 %v10788_v12, 0.0  ;;  %9368 = vmatmul.mubr.bf16.vlgmr.msra.gmra.mrb[64].mxu1 %v14512_v14  ;;  %9214 = vmatprep.mubr.bf16.mxu0 %v14534_v30 }
 0x626   :  { %v14609_v1 = vpack.c.bf16 %v8041_v22, %v8033_v45  ;;  %v8044_v4 = vmax.f32 %v10852_v44, 0.0  ;;  %9375 = vmatprep.mubr.bf16.mxu1 %v14536_v32 }
 0x627   :  { %v14612_v39 = vpack.c.bf16 %v8043_v58, %v8035_v19  ;;  %v14614_v6 = vpack.c.bf16 %v8042_v53, %v8034_v23  ;;  %v7078_v26 = vpop.f32.mrb[216].mxu0 }
 0x628   :  { %v14616_v21 = vpack.c.bf16 %v8044_v4, %v8036_v33  ;;  %v10789_v42 = vadd.f32 %v7078_v26, %v14481_v34  ;;  %v7850_v17 = vpop.f32.mrb[216].mxu1  ;;  %v7080_v8 = vpop.f32.mrb[217].mxu0 }
 0x629   :  { %v10853_v14 = vadd.f32 %v7850_v17, %v14487_v16  ;;  %v10790_v30 = vadd.f32 %v7080_v8, %v14491_v43  ;;  %v7852_v13 = vpop.f32.mrb[217].mxu1  ;;  %v7082_v3 = vpop.f32.mrb[218].mxu0 }
 0x62a   :  { %v10854_v27 = vadd.f32 %v7852_v13, %v14496_v49  ;;  %v10791_v32 = vadd.f32 %v7082_v3, %v14481_v34  ;;  %v7854_v9 = vpop.f32.mrb[218].mxu1  ;;  %v7084_v59 = vpop.f32.mrb[219].mxu0  ;;  %v8049_v36 = vmax.f32 %v10789_v42, 0.0 }
 0x62b   :  { %v10855_v48 = vadd.f32 %v7854_v9, %v14487_v16  ;;  %v10792_v63 = vadd.f32 %v7084_v59, %v14491_v43  ;;  %v7856_v15 = vpop.f32.mrb[219].mxu1  ;;  %v8051_v62 = vmax.f32 %v10853_v14, 0.0  ;;  %v8050_v51 = vmax.f32 %v10790_v30, 0.0 }
 0x62c   :  { %v8057_v11 = vmax.f32 %v10791_v32, 0.0  ;;  %v10856_v56 = vadd.f32 %v7856_v15, %v14496_v49  ;;  %9215 = vmatmul.mubr.bf16.gmra.mrb[68].mxu0 %v14529_v18  ;;  %v8052_v55 = vmax.f32 %v10854_v27, 0.0 }
 0x62d   :  { %v8059_v10 = vmax.f32 %v10855_v48, 0.0  ;;  %v8058_v31 = vmax.f32 %v10792_v63, 0.0  ;;  %9376 = vmatmul.mubr.bf16.gmra.mrb[68].mxu1 %v14532_v25  ;;  %9222 = vmatprep.mubr.bf16.mxu0 %v14554_v0 }
 0x62e   :  { %v14629_v60 = vpack.c.bf16 %v8057_v11, %v8049_v36  ;;  %v8060_v46 = vmax.f32 %v10856_v56, 0.0  ;;  %9383 = vmatprep.mubr.bf16.mxu1 %v14556_v24 }
 0x62f   :  { %v14632_v28 = vpack.c.bf16 %v8059_v10, %v8051_v62  ;;  %v14634_v38 = vpack.c.bf16 %v8058_v31, %v8050_v51  ;;  %v7088_v61 = vpop.f32.mrb[220].mxu0 }
 0x630   :  { %v14636_v18 = vpack.c.bf16 %v8060_v46, %v8052_v55  ;;  %v10793_v47 = vadd.f32 %v7088_v61, %v14481_v34  ;;  %v7860_v40 = vpop.f32.mrb[220].mxu1  ;;  %v7090_v41 = vpop.f32.mrb[221].mxu0 }
 0x631   :  { %v10857_v25 = vadd.f32 %v7860_v40, %v14487_v16  ;;  %v10794_v0 = vadd.f32 %v7090_v41, %v14491_v43  ;;  %v7862_v12 = vpop.f32.mrb[221].mxu1  ;;  %v7092_v20 = vpop.f32.mrb[222].mxu0 }
 0x632   :  { %v10858_v45 = vadd.f32 %v7862_v12, %v14496_v49  ;;  %v10795_v24 = vadd.f32 %v7092_v20, %v14481_v34  ;;  %v7864_v22 = vpop.f32.mrb[222].mxu1  ;;  %v7094_v44 = vpop.f32.mrb[223].mxu0  ;;  %v8065_v53 = vmax.f32 %v10793_v47, 0.0 }
 0x633   :  { %v10859_v19 = vadd.f32 %v7864_v22, %v14487_v16  ;;  %v10796_v23 = vadd.f32 %v7094_v44, %v14491_v43  ;;  %v7866_v58 = vpop.f32.mrb[223].mxu1  ;;  %v8067_v26 = vmax.f32 %v10857_v25, 0.0  ;;  %v8066_v42 = vmax.f32 %v10794_v0, 0.0 }
 0x634   :  { %v8073_v33 = vmax.f32 %v10795_v24, 0.0  ;;  %v10860_v4 = vadd.f32 %v7866_v58, %v14496_v49  ;;  %9223 = vmatmul.mubr.bf16.gmra.mrb[72].mxu0 %v14549_v7  ;;  %v8068_v14 = vmax.f32 %v10858_v45, 0.0 }
 0x635   :  { %v8075_v17 = vmax.f32 %v10859_v19, 0.0  ;;  %v8074_v8 = vmax.f32 %v10796_v23, 0.0  ;;  %9384 = vmatmul.mubr.bf16.gmra.mrb[72].mxu1 %v14552_v2  ;;  %9230 = vmatprep.mubr.bf16.mxu0 %v14574_v50 }
 0x636   :  { %v14649_v30 = vpack.c.bf16 %v8073_v33, %v8065_v53  ;;  %v8076_v13 = vmax.f32 %v10860_v4, 0.0  ;;  %9391 = vmatprep.mubr.bf16.mxu1 %v14576_v35 }
 0x637   :  { %v14652_v3 = vpack.c.bf16 %v8075_v17, %v8067_v26  ;;  %v14654_v27 = vpack.c.bf16 %v8074_v8, %v8066_v42  ;;  %v7098_v32 = vpop.f32.mrb[224].mxu0 }
 0x638   :  { %v14656_v7 = vpack.c.bf16 %v8076_v13, %v8068_v14  ;;  %v10797_v9 = vadd.f32 %v7098_v32, %v14481_v34  ;;  %v7870_v59 = vpop.f32.mrb[224].mxu1  ;;  %v7100_v48 = vpop.f32.mrb[225].mxu0 }
 0x639   :  { %v10861_v2 = vadd.f32 %v7870_v59, %v14487_v16  ;;  %v10798_v50 = vadd.f32 %v7100_v48, %v14491_v43  ;;  %v7872_v63 = vpop.f32.mrb[225].mxu1  ;;  %v7102_v15 = vpop.f32.mrb[226].mxu0 }
 0x63a   :  { %v10862_v36 = vadd.f32 %v7872_v63, %v14496_v49  ;;  %v10799_v35 = vadd.f32 %v7102_v15, %v14481_v34  ;;  %v7874_v11 = vpop.f32.mrb[226].mxu1  ;;  %v7104_v56 = vpop.f32.mrb[227].mxu0  ;;  %v8081_v31 = vmax.f32 %v10797_v9, 0.0 }
 0x63b   :  { %v10863_v62 = vadd.f32 %v7874_v11, %v14487_v16  ;;  %v10800_v51 = vadd.f32 %v7104_v56, %v14491_v43  ;;  %v7876_v10 = vpop.f32.mrb[227].mxu1  ;;  %v8083_v61 = vmax.f32 %v10861_v2, 0.0  ;;  %v8082_v47 = vmax.f32 %v10798_v50, 0.0 }
 0x63c   :  { %v8089_v55 = vmax.f32 %v10799_v35, 0.0  ;;  %v10864_v46 = vadd.f32 %v7876_v10, %v14496_v49  ;;  %9231 = vmatmul.mubr.bf16.gmra.mrb[76].mxu0 %v14569_v37  ;;  %v8084_v25 = vmax.f32 %v10862_v36, 0.0 }
 0x63d   :  { %v8091_v40 = vmax.f32 %v10863_v62, 0.0  ;;  %v8090_v41 = vmax.f32 %v10800_v51, 0.0  ;;  %9392 = vmatmul.mubr.bf16.gmra.mrb[76].mxu1 %v14572_v52  ;;  %9238 = vmatprep.mubr.bf16.mxu0 %v14594_v5 }
 0x63e   :  { %v14669_v0 = vpack.c.bf16 %v8089_v55, %v8081_v31  ;;  %v8092_v12 = vmax.f32 %v10864_v46, 0.0  ;;  %9399 = vmatprep.mubr.bf16.mxu1 %v14596_v29 }
 0x63f   :  { %v14672_v20 = vpack.c.bf16 %v8091_v40, %v8083_v61  ;;  %v14674_v45 = vpack.c.bf16 %v8090_v41, %v8082_v47  ;;  %v7108_v24 = vpop.f32.mrb[228].mxu0 }
 0x640   :  { %v14676_v37 = vpack.c.bf16 %v8092_v12, %v8084_v25  ;;  %v10801_v22 = vadd.f32 %v7108_v24, %v14481_v34  ;;  %v7880_v44 = vpop.f32.mrb[228].mxu1  ;;  %v7110_v19 = vpop.f32.mrb[229].mxu0 }
 0x641   :  { %v10865_v52 = vadd.f32 %v7880_v44, %v14487_v16  ;;  %v10802_v5 = vadd.f32 %v7110_v19, %v14491_v43  ;;  %v7882_v23 = vpop.f32.mrb[229].mxu1  ;;  %v7112_v58 = vpop.f32.mrb[230].mxu0 }
 0x642   :  { %v10866_v53 = vadd.f32 %v7882_v23, %v14496_v49  ;;  %v10803_v29 = vadd.f32 %v7112_v58, %v14481_v34  ;;  %v7884_v33 = vpop.f32.mrb[230].mxu1  ;;  %v7114_v4 = vpop.f32.mrb[231].mxu0  ;;  %v8097_v8 = vmax.f32 %v10801_v22, 0.0 }
 0x643   :  { %v10867_v26 = vadd.f32 %v7884_v33, %v14487_v16  ;;  %v10804_v42 = vadd.f32 %v7114_v4, %v14491_v43  ;;  %v7886_v17 = vpop.f32.mrb[231].mxu1  ;;  %v8099_v32 = vmax.f32 %v10865_v52, 0.0  ;;  %v8098_v9 = vmax.f32 %v10802_v5, 0.0 }
 0x644   :  { %v8105_v14 = vmax.f32 %v10803_v29, 0.0  ;;  %v10868_v13 = vadd.f32 %v7886_v17, %v14496_v49  ;;  %9239 = vmatmul.mubr.bf16.gmra.mrb[80].mxu0 %v14589_v54  ;;  %v8100_v2 = vmax.f32 %v10866_v53, 0.0 }
 0x645   :  { %v8107_v59 = vmax.f32 %v10867_v26, 0.0  ;;  %v8106_v48 = vmax.f32 %v10804_v42, 0.0  ;;  %9400 = vmatmul.mubr.bf16.gmra.mrb[80].mxu1 %v14592_v57  ;;  %9246 = vmatprep.mubr.bf16.mxu0 %v14614_v6 }
 0x646   :  { %v14689_v50 = vpack.c.bf16 %v8105_v14, %v8097_v8  ;;  %v8108_v63 = vmax.f32 %v10868_v13, 0.0  ;;  %9407 = vmatprep.mubr.bf16.mxu1 %v14616_v21 }
 0x647   :  { %v14692_v15 = vpack.c.bf16 %v8107_v59, %v8099_v32  ;;  %v14694_v36 = vpack.c.bf16 %v8106_v48, %v8098_v9  ;;  %v7118_v35 = vpop.f32.mrb[232].mxu0 }
 0x648   :  { %v14696_v54 = vpack.c.bf16 %v8108_v63, %v8100_v2  ;;  %v10805_v11 = vadd.f32 %v7118_v35, %v14481_v34  ;;  %v7890_v56 = vpop.f32.mrb[232].mxu1  ;;  %v7120_v62 = vpop.f32.mrb[233].mxu0 }
 0x649   :  { %v10869_v57 = vadd.f32 %v7890_v56, %v14487_v16  ;;  %v10806_v6 = vadd.f32 %v7120_v62, %v14491_v43  ;;  %v7892_v51 = vpop.f32.mrb[233].mxu1  ;;  %v7122_v10 = vpop.f32.mrb[234].mxu0 }
 0x64a   :  { %v10870_v31 = vadd.f32 %v7892_v51, %v14496_v49  ;;  %v10807_v21 = vadd.f32 %v7122_v10, %v14481_v34  ;;  %v7894_v55 = vpop.f32.mrb[234].mxu1  ;;  %v7124_v46 = vpop.f32.mrb[235].mxu0  ;;  %v8113_v41 = vmax.f32 %v10805_v11, 0.0 }
 0x64b   :  { %v10871_v61 = vadd.f32 %v7894_v55, %v14487_v16  ;;  %v10808_v47 = vadd.f32 %v7124_v46, %v14491_v43  ;;  %v7896_v40 = vpop.f32.mrb[235].mxu1  ;;  %v8115_v24 = vmax.f32 %v10869_v57, 0.0  ;;  %v8114_v22 = vmax.f32 %v10806_v6, 0.0 }
 0x64c   :  { %v8121_v25 = vmax.f32 %v10807_v21, 0.0  ;;  %v10872_v12 = vadd.f32 %v7896_v40, %v14496_v49  ;;  %9247 = vmatmul.mubr.bf16.gmra.mrb[84].mxu0 %v14609_v1  ;;  %v8116_v52 = vmax.f32 %v10870_v31, 0.0 }
 0x64d   :  { %v8123_v44 = vmax.f32 %v10871_v61, 0.0  ;;  %v8122_v19 = vmax.f32 %v10808_v47, 0.0  ;;  %9408 = vmatmul.mubr.bf16.gmra.mrb[84].mxu1 %v14612_v39  ;;  %9254 = vmatprep.mubr.bf16.mxu0 %v14634_v38 }
 0x64e   :  { %v14709_v5 = vpack.c.bf16 %v8121_v25, %v8113_v41  ;;  %v8124_v23 = vmax.f32 %v10872_v12, 0.0  ;;  %9415 = vmatprep.mubr.bf16.mxu1 %v14636_v18 }
 0x64f   :  { %v14712_v58 = vpack.c.bf16 %v8123_v44, %v8115_v24  ;;  %v14714_v53 = vpack.c.bf16 %v8122_v19, %v8114_v22  ;;  %v7128_v29 = vpop.f32.mrb[236].mxu0 }
 0x650   :  { %v14716_v1 = vpack.c.bf16 %v8124_v23, %v8116_v52  ;;  %v10809_v33 = vadd.f32 %v7128_v29, %v14481_v34  ;;  %v7900_v4 = vpop.f32.mrb[236].mxu1  ;;  %v7130_v26 = vpop.f32.mrb[237].mxu0 }
 0x651   :  { %v10873_v39 = vadd.f32 %v7900_v4, %v14487_v16  ;;  %v10810_v38 = vadd.f32 %v7130_v26, %v14491_v43  ;;  %v7902_v42 = vpop.f32.mrb[237].mxu1  ;;  %v7132_v17 = vpop.f32.mrb[238].mxu0 }
 0x652   :  { %v10874_v8 = vadd.f32 %v7902_v42, %v14496_v49  ;;  %v10811_v18 = vadd.f32 %v7132_v17, %v14481_v34  ;;  %v7904_v14 = vpop.f32.mrb[238].mxu1  ;;  %v7134_v13 = vpop.f32.mrb[239].mxu0  ;;  %v8129_v48 = vmax.f32 %v10809_v33, 0.0 }
 0x653   :  { %v10875_v32 = vadd.f32 %v7904_v14, %v14487_v16  ;;  %v10812_v9 = vadd.f32 %v7134_v13, %v14491_v43  ;;  %v7906_v59 = vpop.f32.mrb[239].mxu1  ;;  %v8131_v35 = vmax.f32 %v10873_v39, 0.0  ;;  %v8130_v11 = vmax.f32 %v10810_v38, 0.0 }
 0x654   :  { %v8137_v2 = vmax.f32 %v10811_v18, 0.0  ;;  %v10876_v63 = vadd.f32 %v7906_v59, %v14496_v49  ;;  %9255 = vmatmul.mubr.bf16.gmra.mrb[88].mxu0 %v14629_v60  ;;  %v8132_v57 = vmax.f32 %v10874_v8, 0.0 }
 0x655   :  { %v8139_v56 = vmax.f32 %v10875_v32, 0.0  ;;  %v8138_v62 = vmax.f32 %v10812_v9, 0.0  ;;  %9416 = vmatmul.mubr.bf16.gmra.mrb[88].mxu1 %v14632_v28  ;;  %9262 = vmatprep.mubr.bf16.mxu0 %v14654_v27 }
 0x656   :  { %v14729_v6 = vpack.c.bf16 %v8137_v2, %v8129_v48  ;;  %v8140_v51 = vmax.f32 %v10876_v63, 0.0  ;;  %9423 = vmatprep.mubr.bf16.mxu1 %v14656_v7 }
 0x657   :  { %v14732_v10 = vpack.c.bf16 %v8139_v56, %v8131_v35  ;;  %v14734_v31 = vpack.c.bf16 %v8138_v62, %v8130_v11  ;;  %v7138_v21 = vpop.f32.mrb[240].mxu0 }
 0x658   :  { %v14736_v60 = vpack.c.bf16 %v8140_v51, %v8132_v57  ;;  %v10813_v55 = vadd.f32 %v7138_v21, %v14481_v34  ;;  %v7910_v46 = vpop.f32.mrb[240].mxu1  ;;  %v7140_v61 = vpop.f32.mrb[241].mxu0 }
 0x659   :  { %v10877_v28 = vadd.f32 %v7910_v46, %v14487_v16  ;;  %v10814_v27 = vadd.f32 %v7140_v61, %v14491_v43  ;;  %v7912_v47 = vpop.f32.mrb[241].mxu1  ;;  %v7142_v40 = vpop.f32.mrb[242].mxu0 }
 0x65a   :  { %v10878_v41 = vadd.f32 %v7912_v47, %v14496_v49  ;;  %v10815_v7 = vadd.f32 %v7142_v40, %v14481_v34  ;;  %v7914_v25 = vpop.f32.mrb[242].mxu1  ;;  %v7144_v12 = vpop.f32.mrb[243].mxu0  ;;  %v8145_v19 = vmax.f32 %v10813_v55, 0.0 }
 0x65b   :  { %v10879_v24 = vadd.f32 %v7914_v25, %v14487_v16  ;;  %v10816_v22 = vadd.f32 %v7144_v12, %v14491_v43  ;;  %v7916_v44 = vpop.f32.mrb[243].mxu1  ;;  %v8147_v29 = vmax.f32 %v10877_v28, 0.0  ;;  %v8146_v33 = vmax.f32 %v10814_v27, 0.0 }
 0x65c   :  { %v8153_v52 = vmax.f32 %v10815_v7, 0.0  ;;  %v10880_v23 = vadd.f32 %v7916_v44, %v14496_v49  ;;  %9263 = vmatmul.mubr.bf16.gmra.mrb[92].mxu0 %v14649_v30  ;;  %v8148_v39 = vmax.f32 %v10878_v41, 0.0 }
 0x65d   :  { %v8155_v4 = vmax.f32 %v10879_v24, 0.0  ;;  %v8154_v26 = vmax.f32 %v10816_v22, 0.0  ;;  %9424 = vmatmul.mubr.bf16.gmra.mrb[92].mxu1 %v14652_v3  ;;  %9270 = vmatprep.mubr.bf16.mxu0 %v14674_v45 }
 0x65e   :  { %v14749_v38 = vpack.c.bf16 %v8153_v52, %v8145_v19  ;;  %v8156_v42 = vmax.f32 %v10880_v23, 0.0  ;;  %9431 = vmatprep.mubr.bf16.mxu1 %v14676_v37 }
 0x65f   :  { %v14752_v17 = vpack.c.bf16 %v8155_v4, %v8147_v29  ;;  %v14754_v8 = vpack.c.bf16 %v8154_v26, %v8146_v33  ;;  %v7148_v18 = vpop.f32.mrb[244].mxu0 }
 0x660   :  { %v14756_v30 = vpack.c.bf16 %v8156_v42, %v8148_v39  ;;  %v10817_v14 = vadd.f32 %v7148_v18, %v14481_v34  ;;  %v7920_v13 = vpop.f32.mrb[244].mxu1  ;;  %v7150_v32 = vpop.f32.mrb[245].mxu0 }
 0x661   :  { %v10881_v3 = vadd.f32 %v7920_v13, %v14487_v16  ;;  %v10818_v45 = vadd.f32 %v7150_v32, %v14491_v43  ;;  %v7922_v9 = vpop.f32.mrb[245].mxu1  ;;  %v7152_v59 = vpop.f32.mrb[246].mxu0 }
 0x662   :  { %v10882_v48 = vadd.f32 %v7922_v9, %v14496_v49  ;;  %v10819_v37 = vadd.f32 %v7152_v59, %v14481_v34  ;;  %v7924_v2 = vpop.f32.mrb[246].mxu1  ;;  %v7154_v63 = vpop.f32.mrb[247].mxu0  ;;  %v8161_v62 = vmax.f32 %v10817_v14, 0.0 }
 0x663   :  { %v10883_v35 = vadd.f32 %v7924_v2, %v14487_v16  ;;  %v10820_v11 = vadd.f32 %v7154_v63, %v14491_v43  ;;  %v7926_v56 = vpop.f32.mrb[247].mxu1  ;;  %v8163_v21 = vmax.f32 %v10881_v3, 0.0  ;;  %v8162_v55 = vmax.f32 %v10818_v45, 0.0 }
 0x664   :  { %v8169_v57 = vmax.f32 %v10819_v37, 0.0  ;;  %v10884_v51 = vadd.f32 %v7926_v56, %v14496_v49  ;;  %9271 = vmatmul.mubr.bf16.gmra.mrb[96].mxu0 %v14669_v0  ;;  %v8164_v28 = vmax.f32 %v10882_v48, 0.0 }
 0x665   :  { %v8171_v46 = vmax.f32 %v10883_v35, 0.0  ;;  %v8170_v61 = vmax.f32 %v10820_v11, 0.0  ;;  %9432 = vmatmul.mubr.bf16.gmra.mrb[96].mxu1 %v14672_v20  ;;  %9278 = vmatprep.mubr.bf16.mxu0 %v14694_v36 }
 0x666   :  { %v14769_v27 = vpack.c.bf16 %v8169_v57, %v8161_v62  ;;  %v8172_v47 = vmax.f32 %v10884_v51, 0.0  ;;  %9439 = vmatprep.mubr.bf16.mxu1 %v14696_v54 }
 0x667   :  { %v14772_v40 = vpack.c.bf16 %v8171_v46, %v8163_v21  ;;  %v14774_v41 = vpack.c.bf16 %v8170_v61, %v8162_v55  ;;  %v7158_v7 = vpop.f32.mrb[248].mxu0 }
 0x668   :  { %v14776_v0 = vpack.c.bf16 %v8172_v47, %v8164_v28  ;;  %v10821_v25 = vadd.f32 %v7158_v7, %v14481_v34  ;;  %v7930_v12 = vpop.f32.mrb[248].mxu1  ;;  %v7160_v24 = vpop.f32.mrb[249].mxu0 }
 0x669   :  { %v10885_v20 = vadd.f32 %v7930_v12, %v14487_v16  ;;  %v10822_v36 = vadd.f32 %v7160_v24, %v14491_v43  ;;  %v7932_v22 = vpop.f32.mrb[249].mxu1  ;;  %v7162_v44 = vpop.f32.mrb[250].mxu0 }
 0x66a   :  { %v10886_v19 = vadd.f32 %v7932_v22, %v14496_v49  ;;  %v10823_v54 = vadd.f32 %v7162_v44, %v14481_v34  ;;  %v7934_v52 = vpop.f32.mrb[250].mxu1  ;;  %v7164_v23 = vpop.f32.mrb[251].mxu0  ;;  %v8177_v26 = vmax.f32 %v10821_v25, 0.0  ;;  %v14818_v44 = vld [vmem:[#allocation13] ss:$0 sm:$0xff] }
 0x66b   :  { %v10887_v29 = vadd.f32 %v7934_v52, %v14487_v16  ;;  %v10824_v33 = vadd.f32 %v7164_v23, %v14491_v43  ;;  %v7936_v4 = vpop.f32.mrb[251].mxu1  ;;  %v8179_v18 = vmax.f32 %v10885_v20, 0.0  ;;  %v8178_v14 = vmax.f32 %v10822_v36, 0.0 }
 0x66c   :  { %v8185_v39 = vmax.f32 %v10823_v54, 0.0  ;;  %v10888_v42 = vadd.f32 %v7936_v4, %v14496_v49  ;;  %9279 = vmatmul.mubr.bf16.gmra.mrb[100].mxu0 %v14689_v50  ;;  %v8180_v3 = vmax.f32 %v10886_v19, 0.0 }
 0x66d   :  { %v8187_v13 = vmax.f32 %v10887_v29, 0.0  ;;  %v8186_v32 = vmax.f32 %v10824_v33, 0.0  ;;  %9440 = vmatmul.mubr.bf16.gmra.mrb[100].mxu1 %v14692_v15  ;;  %9286 = vmatprep.mubr.bf16.mxu0 %v14714_v53 }
 0x66e   :  { %v14789_v45 = vpack.c.bf16 %v8185_v39, %v8177_v26  ;;  %v8188_v9 = vmax.f32 %v10888_v42, 0.0  ;;  %9447 = vmatprep.mubr.bf16.mxu1 %v14716_v1 }
 0x66f   :  { %v14792_v59 = vpack.c.bf16 %v8187_v13, %v8179_v18  ;;  %v14794_v48 = vpack.c.bf16 %v8186_v32, %v8178_v14  ;;  %v7168_v37 = vpop.f32.mrb[252].mxu0 }
 0x670   :  { %v14796_v50 = vpack.c.bf16 %v8188_v9, %v8180_v3  ;;  %v10825_v2 = vadd.f32 %v7168_v37, %v14481_v34  ;;  %v7940_v63 = vpop.f32.mrb[252].mxu1  ;;  %v7170_v35 = vpop.f32.mrb[253].mxu0 }
 0x671   :  { %v10889_v15 = vadd.f32 %v7940_v63, %v14487_v16  ;;  %v10826_v53 = vadd.f32 %v7170_v35, %v14491_v43  ;;  %v7942_v11 = vpop.f32.mrb[253].mxu1  ;;  %v7172_v56 = vpop.f32.mrb[254].mxu0 }
 0x672   :  { %v10890_v62 = vadd.f32 %v7942_v11, %v14496_v49  ;;  %v10827_v1 = vadd.f32 %v7172_v56, %v14481_v34  ;;  %v7944_v57 = vpop.f32.mrb[254].mxu1  ;;  %v7174_v51 = vpop.f32.mrb[255].mxu0  ;;  %v8193_v61 = vmax.f32 %v10825_v2, 0.0 }
 0x673   :  { %v10891_v21 = vadd.f32 %v7944_v57, %v14487_v16  ;;  %v10828_v55 = vadd.f32 %v7174_v51, %v14491_v43  ;;  %v7946_v46 = vpop.f32.mrb[255].mxu1  ;;  %v8195_v7 = vmax.f32 %v10889_v15, 0.0  ;;  %v8194_v25 = vmax.f32 %v10826_v53, 0.0 }
 0x674   :  { %v8201_v28 = vmax.f32 %v10827_v1, 0.0  ;;  %v10892_v47 = vadd.f32 %v7946_v46, %v14496_v49  ;;  %9287 = vmatmul.mubr.bf16.gmra.mrb[104].mxu0 %v14709_v5  ;;  %v8196_v34 = vmax.f32 %v10890_v62, 0.0 }
 0x675   :  { %v8203_v12 = vmax.f32 %v10891_v21, 0.0  ;;  %v8202_v24 = vmax.f32 %v10828_v55, 0.0  ;;  %9448 = vmatmul.mubr.bf16.gmra.mrb[104].mxu1 %v14712_v58  ;;  %9294 = vmatprep.mubr.bf16.mxu0 %v14734_v31 }
 0x676   :  { %v14809_v20 = vpack.c.bf16 %v8201_v28, %v8193_v61  ;;  %v8204_v16 = vmax.f32 %v10892_v47, 0.0  ;;  %9455 = vmatprep.mubr.bf16.mxu1 %v14736_v60 }
 0x677   :  { %v14812_v43 = vpack.c.bf16 %v8203_v12, %v8195_v7  ;;  %v14814_v36 = vpack.c.bf16 %v8202_v24, %v8194_v25  ;;  %v10205_v49 = vpop.f32.mrb[0].mxu0 }
 0x678   :  { %v14816_v5 = vpack.c.bf16 %v8204_v16, %v8196_v34  ;;  %v10317_v22 = vpop.f32.mrb[0].mxu1  ;;  %v10206_v19 = vpop.f32.mrb[1].mxu0 }
 0x679   :  { %v10207_v58 = vadd.f32 %v10206_v19, %v10205_v49  ;;  %v10318_v54 = vpop.f32.mrb[1].mxu1  ;;  %v10208_v31 = vpop.f32.mrb[2].mxu0 }
 0x67a   :  { %v10319_v52 = vadd.f32 %v10318_v54, %v10317_v22  ;;  %v10320_v23 = vpop.f32.mrb[2].mxu1  ;;  %v10209_v29 = vpop.f32.mrb[3].mxu0 }
 0x67b   :  { %v8887_v33 = vadd.f32 %v10207_v58, %v14818_v44  ;;  %v10210_v60 = vadd.f32 %v10209_v29, %v10208_v31  ;;  %v10321_v4 = vpop.f32.mrb[3].mxu1 }
 0x67c   :  { %v10322_v26 = vadd.f32 %v10321_v4, %v10320_v23  ;;  %9295 = vmatmul.mubr.bf16.gmra.mrb[108].mxu0 %v14729_v6 }
 0x67d   :  { %v14822_v39 = vadd.f32 %v10319_v52, %v8887_v33  ;;  %v8890_v42 = vadd.f32 %v10210_v60, %v14818_v44  ;;  %9456 = vmatmul.mubr.bf16.gmra.mrb[108].mxu1 %v14732_v10  ;;  %9302 = vmatprep.mubr.bf16.mxu0 %v14754_v8 }
 0x67e   :  { %9463 = vmatprep.mubr.bf16.mxu1 %v14756_v30 }
 0x67f   :  { %v14828_v18 = vadd.f32 %v10322_v26, %v8890_v42  ;;  %v10211_v14 = vpop.f32.mrb[4].mxu0 }
 0x680   :  { %v10323_v13 = vpop.f32.mrb[4].mxu1  ;;  %v10212_v32 = vpop.f32.mrb[5].mxu0 }
 0x681   :  { %v10213_v3 = vadd.f32 %v10212_v32, %v10211_v14  ;;  %v10324_v9 = vpop.f32.mrb[5].mxu1  ;;  %v10214_v37 = vpop.f32.mrb[6].mxu0 }
 0x682   :  { %v10325_v2 = vadd.f32 %v10324_v9, %v10323_v13  ;;  %v10326_v6 = vpop.f32.mrb[6].mxu1  ;;  %v10215_v63 = vpop.f32.mrb[7].mxu0 }
 0x683   :  { %v8895_v35 = vadd.f32 %v10213_v3, %v14818_v44  ;;  %v10216_v15 = vadd.f32 %v10215_v63, %v10214_v37  ;;  %v10327_v53 = vpop.f32.mrb[7].mxu1 }
 0x684   :  { %v10328_v10 = vadd.f32 %v10327_v53, %v10326_v6  ;;  %9303 = vmatmul.mubr.bf16.gmra.mrb[112].mxu0 %v14749_v38 }
 0x685   :  { %v14832_v8 = vadd.f32 %v10325_v2, %v8895_v35  ;;  %v8898_v30 = vadd.f32 %v10216_v15, %v14818_v44  ;;  %9464 = vmatmul.mubr.bf16.gmra.mrb[112].mxu1 %v14752_v17  ;;  %9310 = vmatprep.mubr.bf16.mxu0 %v14774_v41 }
 0x686   :  { %9471 = vmatprep.mubr.bf16.mxu1 %v14776_v0 }
 0x687   :  { %v14838_v11 = vadd.f32 %v10328_v10, %v8898_v30  ;;  %v10217_v56 = vpop.f32.mrb[8].mxu0 }
 0x688   :  { %v10329_v62 = vpop.f32.mrb[8].mxu1  ;;  %v10218_v1 = vpop.f32.mrb[9].mxu0 }
 0x689   :  { %v10219_v57 = vadd.f32 %v10218_v1, %v10217_v56  ;;  %v10330_v51 = vpop.f32.mrb[9].mxu1  ;;  %v10220_v21 = vpop.f32.mrb[10].mxu0 }
 0x68a   :  { %v10331_v55 = vadd.f32 %v10330_v51, %v10329_v62  ;;  %v10332_v38 = vpop.f32.mrb[10].mxu1  ;;  %v10221_v46 = vpop.f32.mrb[11].mxu0 }
 0x68b   :  { %v8903_v61 = vadd.f32 %v10219_v57, %v14818_v44  ;;  %v10222_v28 = vadd.f32 %v10221_v46, %v10220_v21  ;;  %v10333_v47 = vpop.f32.mrb[11].mxu1 }
 0x68c   :  { %v10334_v17 = vadd.f32 %v10333_v47, %v10332_v38  ;;  %9311 = vmatmul.mubr.bf16.gmra.mrb[116].mxu0 %v14769_v27 }
 0x68d   :  { %v14842_v41 = vadd.f32 %v10331_v55, %v8903_v61  ;;  %v8906_v0 = vadd.f32 %v10222_v28, %v14818_v44  ;;  %9472 = vmatmul.mubr.bf16.gmra.mrb[116].mxu1 %v14772_v40  ;;  %9318 = vmatprep.mubr.bf16.mxu0 %v14794_v48 }
 0x68e   :  { %9479 = vmatprep.mubr.bf16.mxu1 %v14796_v50 }
 0x68f   :  { %v14848_v7 = vadd.f32 %v10334_v17, %v8906_v0  ;;  %v10223_v25 = vpop.f32.mrb[12].mxu0 }
 0x690   :  { %v10335_v12 = vpop.f32.mrb[12].mxu1  ;;  %v10224_v24 = vpop.f32.mrb[13].mxu0 }
 0x691   :  { %v10225_v34 = vadd.f32 %v10224_v24, %v10223_v25  ;;  %v10336_v16 = vpop.f32.mrb[13].mxu1  ;;  %v10226_v49 = vpop.f32.mrb[14].mxu0 }
 0x692   :  { %v10337_v22 = vadd.f32 %v10336_v16, %v10335_v12  ;;  %v10338_v27 = vpop.f32.mrb[14].mxu1  ;;  %v10227_v19 = vpop.f32.mrb[15].mxu0 }
 0x693   :  { %v8911_v58 = vadd.f32 %v10225_v34, %v14818_v44  ;;  %v10228_v54 = vadd.f32 %v10227_v19, %v10226_v49  ;;  %v10339_v31 = vpop.f32.mrb[15].mxu1 }
 0x694   :  { %v10340_v40 = vadd.f32 %v10339_v31, %v10338_v27  ;;  %9319 = vmatmul.mubr.bf16.gmra.mrb[120].mxu0 %v14789_v45 }
 0x695   :  { %v14852_v48 = vadd.f32 %v10337_v22, %v8911_v58  ;;  %v8914_v50 = vadd.f32 %v10228_v54, %v14818_v44  ;;  %9480 = vmatmul.mubr.bf16.gmra.mrb[120].mxu1 %v14792_v59  ;;  %9326 = vmatprep.mubr.bf16.mxu0 %v14814_v36 }
 0x696   :  { %9487 = vmatprep.mubr.bf16.mxu1 %v14816_v5 }
 0x697   :  { %v14858_v52 = vadd.f32 %v10340_v40, %v8914_v50  ;;  %v10229_v23 = vpop.f32.mrb[16].mxu0 }
 0x698   :  { %v10341_v29 = vpop.f32.mrb[16].mxu1  ;;  %v10230_v33 = vpop.f32.mrb[17].mxu0 }
 0x699   :  { %v10231_v60 = vadd.f32 %v10230_v33, %v10229_v23  ;;  %v10342_v4 = vpop.f32.mrb[17].mxu1  ;;  %v10232_v26 = vpop.f32.mrb[18].mxu0 }
 0x69a   :  { %v10343_v42 = vadd.f32 %v10342_v4, %v10341_v29  ;;  %v10344_v45 = vpop.f32.mrb[18].mxu1  ;;  %v10233_v14 = vpop.f32.mrb[19].mxu0 }
 0x69b   :  { %v8919_v13 = vadd.f32 %v10231_v60, %v14818_v44  ;;  %v10234_v32 = vadd.f32 %v10233_v14, %v10232_v26  ;;  %v10345_v3 = vpop.f32.mrb[19].mxu1 }
 0x69c   :  { %v10346_v59 = vadd.f32 %v10345_v3, %v10344_v45  ;;  %9327 = vmatmul.mubr.bf16.gmra.mrb[124].mxu0 %v14809_v20 }
 0x69d   :  { %v14862_v36 = vadd.f32 %v10343_v42, %v8919_v13  ;;  %v8922_v5 = vadd.f32 %v10234_v32, %v14818_v44  ;;  %9488 = vmatmul.mubr.bf16.gmra.mrb[124].mxu1 %v14812_v43 }
 0x69f   :  { %v14866_v9 = vadd.f32 %v10346_v59, %v8922_v5  ;;  %v10235_v37 = vpop.f32.mrb[20].mxu0 }
 0x6a0   :  { %v10347_v2 = vpop.f32.mrb[20].mxu1  ;;  %v10236_v6 = vpop.f32.mrb[21].mxu0 }
 0x6a1   :  { %v10237_v63 = vadd.f32 %v10236_v6, %v10235_v37  ;;  %v10348_v35 = vpop.f32.mrb[21].mxu1  ;;  %v10238_v15 = vpop.f32.mrb[22].mxu0 }
 0x6a2   :  { %v10349_v53 = vadd.f32 %v10348_v35, %v10347_v2  ;;  %v10350_v10 = vpop.f32.mrb[22].mxu1  ;;  %v10239_v30 = vpop.f32.mrb[23].mxu0 }
 0x6a3   :  { %v8927_v56 = vadd.f32 %v10237_v63, %v14818_v44  ;;  %v10240_v20 = vadd.f32 %v10239_v30, %v10238_v15  ;;  %v10351_v62 = vpop.f32.mrb[23].mxu1 }
 0x6a4   :  { %v10352_v1 = vadd.f32 %v10351_v62, %v10350_v10 }
 0x6a5   :  { %v14869_v57 = vadd.f32 %v10349_v53, %v8927_v56  ;;  %v8930_v43 = vadd.f32 %v10240_v20, %v14818_v44 }
 0x6a7   :  { %v14872_v51 = vadd.f32 %v10352_v1, %v8930_v43  ;;  %v10241_v21 = vpop.f32.mrb[24].mxu0 }
 0x6a8   :  { %v10353_v55 = vpop.f32.mrb[24].mxu1  ;;  %v10242_v38 = vpop.f32.mrb[25].mxu0 }
 0x6a9   :  { %v10243_v46 = vadd.f32 %v10242_v38, %v10241_v21  ;;  %v10354_v61 = vpop.f32.mrb[25].mxu1  ;;  %v10244_v28 = vpop.f32.mrb[26].mxu0 }
 0x6aa   :  { %v10355_v47 = vadd.f32 %v10354_v61, %v10353_v55  ;;  %v10356_v17 = vpop.f32.mrb[26].mxu1  ;;  %v10245_v0 = vpop.f32.mrb[27].mxu0 }
 0x6ab   :  { %v8935_v25 = vadd.f32 %v10243_v46, %v14818_v44  ;;  %v10246_v12 = vadd.f32 %v10245_v0, %v10244_v28  ;;  %v10357_v24 = vpop.f32.mrb[27].mxu1 }
 0x6ac   :  { %v10358_v34 = vadd.f32 %v10357_v24, %v10356_v17 }
 0x6ad   :  { %v14875_v16 = vadd.f32 %v10355_v47, %v8935_v25  ;;  %v8938_v49 = vadd.f32 %v10246_v12, %v14818_v44 }
 0x6af   :  { %v14878_v22 = vadd.f32 %v10358_v34, %v8938_v49  ;;  %v10247_v27 = vpop.f32.mrb[28].mxu0 }
 0x6b0   :  { %v10359_v19 = vpop.f32.mrb[28].mxu1  ;;  %v10248_v58 = vpop.f32.mrb[29].mxu0 }
 0x6b1   :  { %v10249_v54 = vadd.f32 %v10248_v58, %v10247_v27  ;;  %v10360_v31 = vpop.f32.mrb[29].mxu1  ;;  %v10250_v40 = vpop.f32.mrb[30].mxu0 }
 0x6b2   :  { %v10361_v50 = vadd.f32 %v10360_v31, %v10359_v19  ;;  %v10362_v23 = vpop.f32.mrb[30].mxu1  ;;  %v10251_v29 = vpop.f32.mrb[31].mxu0 }
 0x6b3   :  { %v8943_v33 = vadd.f32 %v10249_v54, %v14818_v44  ;;  %v10252_v60 = vadd.f32 %v10251_v29, %v10250_v40  ;;  %v10363_v4 = vpop.f32.mrb[31].mxu1 }
 0x6b4   :  { %v10364_v26 = vadd.f32 %v10363_v4, %v10362_v23 }
 0x6b5   :  { %v14881_v42 = vadd.f32 %v10361_v50, %v8943_v33  ;;  %v8946_v45 = vadd.f32 %v10252_v60, %v14818_v44 }
 0x6b7   :  { %v14884_v14 = vadd.f32 %v10364_v26, %v8946_v45  ;;  %v10253_v13 = vpop.f32.mrb[32].mxu0 }
 0x6b8   :  { %v10365_v32 = vpop.f32.mrb[32].mxu1  ;;  %v10254_v3 = vpop.f32.mrb[33].mxu0 }
 0x6b9   :  { %v10255_v59 = vadd.f32 %v10254_v3, %v10253_v13  ;;  %v10366_v5 = vpop.f32.mrb[33].mxu1  ;;  %v10256_v37 = vpop.f32.mrb[34].mxu0 }
 0x6ba   :  { %v10367_v2 = vadd.f32 %v10366_v5, %v10365_v32  ;;  %v10368_v6 = vpop.f32.mrb[34].mxu1  ;;  %v10257_v63 = vpop.f32.mrb[35].mxu0 }
 0x6bb   :  { %v8951_v35 = vadd.f32 %v10255_v59, %v14818_v44  ;;  %v10258_v15 = vadd.f32 %v10257_v63, %v10256_v37  ;;  %v10369_v53 = vpop.f32.mrb[35].mxu1 }
 0x6bc   :  { %v10370_v10 = vadd.f32 %v10369_v53, %v10368_v6 }
 0x6bd   :  { %v14887_v30 = vadd.f32 %v10367_v2, %v8951_v35  ;;  %v8954_v56 = vadd.f32 %v10258_v15, %v14818_v44 }
 0x6bf   :  { %v14890_v20 = vadd.f32 %v10370_v10, %v8954_v56  ;;  %v10259_v62 = vpop.f32.mrb[36].mxu0 }
 0x6c0   :  { %v10371_v1 = vpop.f32.mrb[36].mxu1  ;;  %v10260_v43 = vpop.f32.mrb[37].mxu0 }
 0x6c1   :  { %v10261_v21 = vadd.f32 %v10260_v43, %v10259_v62  ;;  %v10372_v55 = vpop.f32.mrb[37].mxu1  ;;  %v10262_v38 = vpop.f32.mrb[38].mxu0 }
 0x6c2   :  { %v10373_v46 = vadd.f32 %v10372_v55, %v10371_v1  ;;  %v10374_v61 = vpop.f32.mrb[38].mxu1  ;;  %v10263_v28 = vpop.f32.mrb[39].mxu0 }
 0x6c3   :  { %v8959_v47 = vadd.f32 %v10261_v21, %v14818_v44  ;;  %v10264_v17 = vadd.f32 %v10263_v28, %v10262_v38  ;;  %v10375_v0 = vpop.f32.mrb[39].mxu1 }
 0x6c4   :  { %v10376_v25 = vadd.f32 %v10375_v0, %v10374_v61 }
 0x6c5   :  { %v14893_v12 = vadd.f32 %v10373_v46, %v8959_v47  ;;  %v8962_v24 = vadd.f32 %v10264_v17, %v14818_v44 }
 0x6c7   :  { %v14896_v34 = vadd.f32 %v10376_v25, %v8962_v24  ;;  %v10265_v49 = vpop.f32.mrb[40].mxu0 }
 0x6c8   :  { %v10377_v27 = vpop.f32.mrb[40].mxu1  ;;  %v10266_v19 = vpop.f32.mrb[41].mxu0 }
 0x6c9   :  { %v10267_v58 = vadd.f32 %v10266_v19, %v10265_v49  ;;  %v10378_v54 = vpop.f32.mrb[41].mxu1  ;;  %v10268_v31 = vpop.f32.mrb[42].mxu0 }
 0x6ca   :  { %v10379_v40 = vadd.f32 %v10378_v54, %v10377_v27  ;;  %v10380_v50 = vpop.f32.mrb[42].mxu1  ;;  %v10269_v23 = vpop.f32.mrb[43].mxu0 }
 0x6cb   :  { %v8967_v29 = vadd.f32 %v10267_v58, %v14818_v44  ;;  %v10270_v33 = vadd.f32 %v10269_v23, %v10268_v31  ;;  %v10381_v60 = vpop.f32.mrb[43].mxu1 }
 0x6cc   :  { %v10382_v4 = vadd.f32 %v10381_v60, %v10380_v50 }
 0x6cd   :  { %v14899_v26 = vadd.f32 %v10379_v40, %v8967_v29  ;;  %v8970_v45 = vadd.f32 %v10270_v33, %v14818_v44 }
 0x6cf   :  { %v14902_v13 = vadd.f32 %v10382_v4, %v8970_v45  ;;  %v10271_v32 = vpop.f32.mrb[44].mxu0 }
 0x6d0   :  { %v10383_v3 = vpop.f32.mrb[44].mxu1  ;;  %v10272_v59 = vpop.f32.mrb[45].mxu0 }
 0x6d1   :  { %v10273_v5 = vadd.f32 %v10272_v59, %v10271_v32  ;;  %v10384_v37 = vpop.f32.mrb[45].mxu1  ;;  %v10274_v2 = vpop.f32.mrb[46].mxu0 }
 0x6d2   :  { %v10385_v6 = vadd.f32 %v10384_v37, %v10383_v3  ;;  %v10386_v63 = vpop.f32.mrb[46].mxu1  ;;  %v10275_v35 = vpop.f32.mrb[47].mxu0 }
 0x6d3   :  { %v8975_v15 = vadd.f32 %v10273_v5, %v14818_v44  ;;  %v10276_v53 = vadd.f32 %v10275_v35, %v10274_v2  ;;  %v10387_v10 = vpop.f32.mrb[47].mxu1 }
 0x6d4   :  { %v10388_v56 = vadd.f32 %v10387_v10, %v10386_v63 }
 0x6d5   :  { %v14905_v62 = vadd.f32 %v10385_v6, %v8975_v15  ;;  %v8978_v1 = vadd.f32 %v10276_v53, %v14818_v44 }
 0x6d7   :  { %v14908_v43 = vadd.f32 %v10388_v56, %v8978_v1  ;;  %v10277_v21 = vpop.f32.mrb[48].mxu0 }
 0x6d8   :  { %v10389_v55 = vpop.f32.mrb[48].mxu1  ;;  %v10278_v38 = vpop.f32.mrb[49].mxu0 }
 0x6d9   :  { %v10279_v46 = vadd.f32 %v10278_v38, %v10277_v21  ;;  %v10390_v61 = vpop.f32.mrb[49].mxu1  ;;  %v10280_v28 = vpop.f32.mrb[50].mxu0 }
 0x6da   :  { %v10391_v47 = vadd.f32 %v10390_v61, %v10389_v55  ;;  %v10392_v17 = vpop.f32.mrb[50].mxu1  ;;  %v10281_v0 = vpop.f32.mrb[51].mxu0 }
 0x6db   :  { %v8983_v25 = vadd.f32 %v10279_v46, %v14818_v44  ;;  %v10282_v24 = vadd.f32 %v10281_v0, %v10280_v28  ;;  %v10393_v49 = vpop.f32.mrb[51].mxu1 }
 0x6dc   :  { %v10394_v27 = vadd.f32 %v10393_v49, %v10392_v17 }
 0x6dd   :  { %v14911_v19 = vadd.f32 %v10391_v47, %v8983_v25  ;;  %v8986_v58 = vadd.f32 %v10282_v24, %v14818_v44 }
 0x6df   :  { %v14914_v54 = vadd.f32 %v10394_v27, %v8986_v58  ;;  %v10283_v31 = vpop.f32.mrb[52].mxu0 }
 0x6e0   :  { %v10395_v40 = vpop.f32.mrb[52].mxu1  ;;  %v10284_v50 = vpop.f32.mrb[53].mxu0 }
 0x6e1   :  { %v10285_v23 = vadd.f32 %v10284_v50, %v10283_v31  ;;  %v10396_v29 = vpop.f32.mrb[53].mxu1  ;;  %v10286_v33 = vpop.f32.mrb[54].mxu0 }
 0x6e2   :  { %v10397_v60 = vadd.f32 %v10396_v29, %v10395_v40  ;;  %v10398_v4 = vpop.f32.mrb[54].mxu1  ;;  %v10287_v45 = vpop.f32.mrb[55].mxu0 }
 0x6e3   :  { %v8991_v32 = vadd.f32 %v10285_v23, %v14818_v44  ;;  %v10288_v3 = vadd.f32 %v10287_v45, %v10286_v33  ;;  %v10399_v59 = vpop.f32.mrb[55].mxu1 }
 0x6e4   :  { %v10400_v5 = vadd.f32 %v10399_v59, %v10398_v4 }
 0x6e5   :  { %v14917_v37 = vadd.f32 %v10397_v60, %v8991_v32  ;;  %v8994_v2 = vadd.f32 %v10288_v3, %v14818_v44 }
 0x6e7   :  { %v14920_v6 = vadd.f32 %v10400_v5, %v8994_v2  ;;  %v10289_v63 = vpop.f32.mrb[56].mxu0 }
 0x6e8   :  { %v10401_v35 = vpop.f32.mrb[56].mxu1  ;;  %v10290_v15 = vpop.f32.mrb[57].mxu0 }
 0x6e9   :  { %v10291_v53 = vadd.f32 %v10290_v15, %v10289_v63  ;;  %v10402_v10 = vpop.f32.mrb[57].mxu1  ;;  %v10292_v56 = vpop.f32.mrb[58].mxu0 }
 0x6ea   :  { %v10403_v1 = vadd.f32 %v10402_v10, %v10401_v35  ;;  %v10404_v21 = vpop.f32.mrb[58].mxu1  ;;  %v10293_v55 = vpop.f32.mrb[59].mxu0 }
 0x6eb   :  { %v8999_v38 = vadd.f32 %v10291_v53, %v14818_v44  ;;  %v10294_v46 = vadd.f32 %v10293_v55, %v10292_v56  ;;  %v10405_v61 = vpop.f32.mrb[59].mxu1 }
 0x6ec   :  { %v10406_v28 = vadd.f32 %v10405_v61, %v10404_v21 }
 0x6ed   :  { %v14923_v47 = vadd.f32 %v10403_v1, %v8999_v38  ;;  %v9002_v17 = vadd.f32 %v10294_v46, %v14818_v44 }
 0x6ef   :  { %v14926_v0 = vadd.f32 %v10406_v28, %v9002_v17  ;;  %v10295_v25 = vpop.f32.mrb[60].mxu0 }
 0x6f0   :  { %v10407_v24 = vpop.f32.mrb[60].mxu1  ;;  %v10296_v49 = vpop.f32.mrb[61].mxu0 }
 0x6f1   :  { %v10297_v27 = vadd.f32 %v10296_v49, %v10295_v25  ;;  %v10408_v58 = vpop.f32.mrb[61].mxu1  ;;  %v10298_v31 = vpop.f32.mrb[62].mxu0 }
 0x6f2   :  { %v10409_v40 = vadd.f32 %v10408_v58, %v10407_v24  ;;  %v10410_v50 = vpop.f32.mrb[62].mxu1  ;;  %v10299_v23 = vpop.f32.mrb[63].mxu0 }
 0x6f3   :  { %v9007_v29 = vadd.f32 %v10297_v27, %v14818_v44  ;;  %v10300_v33 = vadd.f32 %v10299_v23, %v10298_v31  ;;  %v10411_v60 = vpop.f32.mrb[63].mxu1 }
 0x6f4   :  { %v10412_v4 = vadd.f32 %v10411_v60, %v10410_v50 }
 0x6f5   :  { %v14929_v45 = vadd.f32 %v10409_v40, %v9007_v29  ;;  %v9010_v32 = vadd.f32 %v10300_v33, %v14818_v44 }
 0x6f7   :  { %v14932_v3 = vadd.f32 %v10412_v4, %v9010_v32  ;;  %v10429_v59 = vpop.f32.mrb[64].mxu0 }
 0x6f8   :  { %v10541_v5 = vpop.f32.mrb[64].mxu1  ;;  %v10430_v2 = vpop.f32.mrb[65].mxu0 }
 0x6f9   :  { %v10431_v63 = vadd.f32 %v10430_v2, %v10429_v59  ;;  %v10542_v35 = vpop.f32.mrb[65].mxu1  ;;  %v10432_v15 = vpop.f32.mrb[66].mxu0 }
 0x6fa   :  { %v10543_v53 = vadd.f32 %v10542_v35, %v10541_v5  ;;  %v10544_v10 = vpop.f32.mrb[66].mxu1  ;;  %v10433_v56 = vpop.f32.mrb[67].mxu0 }
 0x6fb   :  { %v9209_v1 = vadd.f32 %v10431_v63, %v14822_v39  ;;  %v10434_v21 = vadd.f32 %v10433_v56, %v10432_v15  ;;  %v10545_v55 = vpop.f32.mrb[67].mxu1 }
 0x6fc   :  { %v10546_v38 = vadd.f32 %v10545_v55, %v10544_v10 }
 0x6fd   :  { %v9370_v46 = vadd.f32 %v10543_v53, %v9209_v1  ;;  %v9212_v61 = vadd.f32 %v10434_v21, %v14828_v18 }
 0x6ff   :  { %9496 = vst [vmem:[#allocation14] sm:$0xff] %v9370_v46  ;;  %v9373_v44 = vadd.f32 %v10546_v38, %v9212_v61  ;;  %v10435_v28 = vpop.f32.mrb[68].mxu0 }
 0x700   :  { %v10547_v17 = vpop.f32.mrb[68].mxu1  ;;  %v10436_v25 = vpop.f32.mrb[69].mxu0 }
 0x701   :  { %9497 = vst [vmem:[#allocation14 + $0x8] sm:$0xff] %v9373_v44  ;;  %v10437_v24 = vadd.f32 %v10436_v25, %v10435_v28  ;;  %v10548_v49 = vpop.f32.mrb[69].mxu1  ;;  %v10438_v27 = vpop.f32.mrb[70].mxu0 }
 0x702   :  { %v10549_v58 = vadd.f32 %v10548_v49, %v10547_v17  ;;  %v10550_v31 = vpop.f32.mrb[70].mxu1  ;;  %v10439_v40 = vpop.f32.mrb[71].mxu0 }
 0x703   :  { %v9217_v39 = vadd.f32 %v10437_v24, %v14832_v8  ;;  %v10440_v50 = vadd.f32 %v10439_v40, %v10438_v27  ;;  %v10551_v23 = vpop.f32.mrb[71].mxu1 }
 0x704   :  { %v10552_v29 = vadd.f32 %v10551_v23, %v10550_v31 }
 0x705   :  { %v9378_v33 = vadd.f32 %v10549_v58, %v9217_v39  ;;  %v9220_v18 = vadd.f32 %v10440_v50, %v14838_v11 }
 0x707   :  { %9498 = vst [vmem:[#allocation14 + $0x10] sm:$0xff] %v9378_v33  ;;  %v9381_v60 = vadd.f32 %v10552_v29, %v9220_v18  ;;  %v10441_v4 = vpop.f32.mrb[72].mxu0 }
 0x708   :  { %v10553_v32 = vpop.f32.mrb[72].mxu1  ;;  %v10442_v59 = vpop.f32.mrb[73].mxu0 }
 0x709   :  { %9499 = vst [vmem:[#allocation14 + $0x18] sm:$0xff] %v9381_v60  ;;  %v10443_v5 = vadd.f32 %v10442_v59, %v10441_v4  ;;  %v10554_v2 = vpop.f32.mrb[73].mxu1  ;;  %v10444_v63 = vpop.f32.mrb[74].mxu0 }
 0x70a   :  { %v10555_v35 = vadd.f32 %v10554_v2, %v10553_v32  ;;  %v10556_v15 = vpop.f32.mrb[74].mxu1  ;;  %v10445_v53 = vpop.f32.mrb[75].mxu0 }
 0x70b   :  { %v9225_v8 = vadd.f32 %v10443_v5, %v14842_v41  ;;  %v10446_v10 = vadd.f32 %v10445_v53, %v10444_v63  ;;  %v10557_v56 = vpop.f32.mrb[75].mxu1 }
 0x70c   :  { %v10558_v1 = vadd.f32 %v10557_v56, %v10556_v15 }
 0x70d   :  { %v9386_v21 = vadd.f32 %v10555_v35, %v9225_v8  ;;  %v9228_v11 = vadd.f32 %v10446_v10, %v14848_v7 }
 0x70f   :  { %9500 = vst [vmem:[#allocation14 + $0x20] sm:$0xff] %v9386_v21  ;;  %v9389_v55 = vadd.f32 %v10558_v1, %v9228_v11  ;;  %v10447_v38 = vpop.f32.mrb[76].mxu0 }
 0x710   :  { %v10559_v46 = vpop.f32.mrb[76].mxu1  ;;  %v10448_v61 = vpop.f32.mrb[77].mxu0 }
 0x711   :  { %9501 = vst [vmem:[#allocation14 + $0x28] sm:$0xff] %v9389_v55  ;;  %v10449_v44 = vadd.f32 %v10448_v61, %v10447_v38  ;;  %v10560_v28 = vpop.f32.mrb[77].mxu1  ;;  %v10450_v17 = vpop.f32.mrb[78].mxu0 }
 0x712   :  { %v10561_v25 = vadd.f32 %v10560_v28, %v10559_v46  ;;  %v10562_v24 = vpop.f32.mrb[78].mxu1  ;;  %v10451_v49 = vpop.f32.mrb[79].mxu0 }
 0x713   :  { %v9233_v41 = vadd.f32 %v10449_v44, %v14852_v48  ;;  %v10452_v27 = vadd.f32 %v10451_v49, %v10450_v17  ;;  %v10563_v58 = vpop.f32.mrb[79].mxu1 }
 0x714   :  { %v10564_v31 = vadd.f32 %v10563_v58, %v10562_v24 }
 0x715   :  { %v9394_v40 = vadd.f32 %v10561_v25, %v9233_v41  ;;  %v9236_v7 = vadd.f32 %v10452_v27, %v14858_v52 }
 0x717   :  { %9502 = vst [vmem:[#allocation14 + $0x30] sm:$0xff] %v9394_v40  ;;  %v9397_v39 = vadd.f32 %v10564_v31, %v9236_v7  ;;  %v10453_v50 = vpop.f32.mrb[80].mxu0 }
 0x718   :  { %v10565_v23 = vpop.f32.mrb[80].mxu1  ;;  %v10454_v29 = vpop.f32.mrb[81].mxu0 }
 0x719   :  { %9503 = vst [vmem:[#allocation14 + $0x38] sm:$0xff] %v9397_v39  ;;  %v10455_v33 = vadd.f32 %v10454_v29, %v10453_v50  ;;  %v10566_v18 = vpop.f32.mrb[81].mxu1  ;;  %v10456_v60 = vpop.f32.mrb[82].mxu0 }
 0x71a   :  { %v10567_v4 = vadd.f32 %v10566_v18, %v10565_v23  ;;  %v10568_v32 = vpop.f32.mrb[82].mxu1  ;;  %v10457_v59 = vpop.f32.mrb[83].mxu0 }
 0x71b   :  { %v9241_v48 = vadd.f32 %v10455_v33, %v14862_v36  ;;  %v10458_v5 = vadd.f32 %v10457_v59, %v10456_v60  ;;  %v10569_v2 = vpop.f32.mrb[83].mxu1 }
 0x71c   :  { %v10570_v63 = vadd.f32 %v10569_v2, %v10568_v32 }
 0x71d   :  { %v9402_v35 = vadd.f32 %v10567_v4, %v9241_v48  ;;  %v9244_v52 = vadd.f32 %v10458_v5, %v14866_v9 }
 0x71f   :  { %9504 = vst [vmem:[#allocation14 + $0x40] sm:$0xff] %v9402_v35  ;;  %v9405_v15 = vadd.f32 %v10570_v63, %v9244_v52  ;;  %v10459_v53 = vpop.f32.mrb[84].mxu0 }
 0x720   :  { %v10571_v8 = vpop.f32.mrb[84].mxu1  ;;  %v10460_v10 = vpop.f32.mrb[85].mxu0 }
 0x721   :  { %9505 = vst [vmem:[#allocation14 + $0x48] sm:$0xff] %v9405_v15  ;;  %v10461_v56 = vadd.f32 %v10460_v10, %v10459_v53  ;;  %v10572_v1 = vpop.f32.mrb[85].mxu1  ;;  %v10462_v21 = vpop.f32.mrb[86].mxu0 }
 0x722   :  { %v10573_v11 = vadd.f32 %v10572_v1, %v10571_v8  ;;  %v10574_v55 = vpop.f32.mrb[86].mxu1  ;;  %v10463_v38 = vpop.f32.mrb[87].mxu0 }
 0x723   :  { %v9249_v36 = vadd.f32 %v10461_v56, %v14869_v57  ;;  %v10464_v46 = vadd.f32 %v10463_v38, %v10462_v21  ;;  %v10575_v61 = vpop.f32.mrb[87].mxu1 }
 0x724   :  { %v10576_v44 = vadd.f32 %v10575_v61, %v10574_v55 }
 0x725   :  { %v9410_v28 = vadd.f32 %v10573_v11, %v9249_v36  ;;  %v9252_v9 = vadd.f32 %v10464_v46, %v14872_v51 }
 0x727   :  { %9506 = vst [vmem:[#allocation14 + $0x50] sm:$0xff] %v9410_v28  ;;  %v9413_v17 = vadd.f32 %v10576_v44, %v9252_v9  ;;  %v10465_v25 = vpop.f32.mrb[88].mxu0 }
 0x728   :  { %v10577_v24 = vpop.f32.mrb[88].mxu1  ;;  %v10466_v49 = vpop.f32.mrb[89].mxu0 }
 0x729   :  { %9507 = vst [vmem:[#allocation14 + $0x58] sm:$0xff] %v9413_v17  ;;  %v10467_v41 = vadd.f32 %v10466_v49, %v10465_v25  ;;  %v10578_v27 = vpop.f32.mrb[89].mxu1  ;;  %v10468_v58 = vpop.f32.mrb[90].mxu0 }
 0x72a   :  { %v10579_v31 = vadd.f32 %v10578_v27, %v10577_v24  ;;  %v10580_v40 = vpop.f32.mrb[90].mxu1  ;;  %v10469_v7 = vpop.f32.mrb[91].mxu0 }
 0x72b   :  { %v9257_v57 = vadd.f32 %v10467_v41, %v14875_v16  ;;  %v10470_v39 = vadd.f32 %v10469_v7, %v10468_v58  ;;  %v10581_v50 = vpop.f32.mrb[91].mxu1 }
 0x72c   :  { %v10582_v23 = vadd.f32 %v10581_v50, %v10580_v40 }
 0x72d   :  { %v9418_v29 = vadd.f32 %v10579_v31, %v9257_v57  ;;  %v9260_v51 = vadd.f32 %v10470_v39, %v14878_v22 }
 0x72f   :  { %9508 = vst [vmem:[#allocation14 + $0x60] sm:$0xff] %v9418_v29  ;;  %v9421_v33 = vadd.f32 %v10582_v23, %v9260_v51  ;;  %v10471_v18 = vpop.f32.mrb[92].mxu0 }
 0x730   :  { %v10583_v60 = vpop.f32.mrb[92].mxu1  ;;  %v10472_v4 = vpop.f32.mrb[93].mxu0 }
 0x731   :  { %9509 = vst [vmem:[#allocation14 + $0x68] sm:$0xff] %v9421_v33  ;;  %v10473_v32 = vadd.f32 %v10472_v4, %v10471_v18  ;;  %v10584_v59 = vpop.f32.mrb[93].mxu1  ;;  %v10474_v48 = vpop.f32.mrb[94].mxu0 }
 0x732   :  { %v10585_v5 = vadd.f32 %v10584_v59, %v10583_v60  ;;  %v10586_v2 = vpop.f32.mrb[94].mxu1  ;;  %v10475_v63 = vpop.f32.mrb[95].mxu0 }
 0x733   :  { %v9265_v16 = vadd.f32 %v10473_v32, %v14881_v42  ;;  %v10476_v35 = vadd.f32 %v10475_v63, %v10474_v48  ;;  %v10587_v52 = vpop.f32.mrb[95].mxu1 }
 0x734   :  { %v10588_v15 = vadd.f32 %v10587_v52, %v10586_v2 }
 0x735   :  { %v9426_v53 = vadd.f32 %v10585_v5, %v9265_v16  ;;  %v9268_v22 = vadd.f32 %v10476_v35, %v14884_v14 }
 0x737   :  { %9510 = vst [vmem:[#allocation14 + $0x70] sm:$0xff] %v9426_v53  ;;  %v9429_v8 = vadd.f32 %v10588_v15, %v9268_v22  ;;  %v10477_v10 = vpop.f32.mrb[96].mxu0 }
 0x738   :  { %v10589_v56 = vpop.f32.mrb[96].mxu1  ;;  %v10478_v1 = vpop.f32.mrb[97].mxu0 }
 0x739   :  { %9511 = vst [vmem:[#allocation14 + $0x78] sm:$0xff] %v9429_v8  ;;  %v10479_v21 = vadd.f32 %v10478_v1, %v10477_v10  ;;  %v10590_v11 = vpop.f32.mrb[97].mxu1  ;;  %v10480_v55 = vpop.f32.mrb[98].mxu0 }
 0x73a   :  { %v10591_v38 = vadd.f32 %v10590_v11, %v10589_v56  ;;  %v10592_v36 = vpop.f32.mrb[98].mxu1  ;;  %v10481_v46 = vpop.f32.mrb[99].mxu0 }
 0x73b   :  { %v9273_v42 = vadd.f32 %v10479_v21, %v14887_v30  ;;  %v10482_v61 = vadd.f32 %v10481_v46, %v10480_v55  ;;  %v10593_v44 = vpop.f32.mrb[99].mxu1 }
 0x73c   :  { %v10594_v28 = vadd.f32 %v10593_v44, %v10592_v36 }
 0x73d   :  { %v9434_v9 = vadd.f32 %v10591_v38, %v9273_v42  ;;  %v9276_v14 = vadd.f32 %v10482_v61, %v14890_v20 }
 0x73f   :  { %9512 = vst [vmem:[#allocation14 + $0x80] sm:$0xff] %v9434_v9  ;;  %v9437_v17 = vadd.f32 %v10594_v28, %v9276_v14  ;;  %v10483_v25 = vpop.f32.mrb[100].mxu0 }
 0x740   :  { %v10595_v24 = vpop.f32.mrb[100].mxu1  ;;  %v10484_v49 = vpop.f32.mrb[101].mxu0 }
 0x741   :  { %9513 = vst [vmem:[#allocation14 + $0x88] sm:$0xff] %v9437_v17  ;;  %v10485_v41 = vadd.f32 %v10484_v49, %v10483_v25  ;;  %v10596_v27 = vpop.f32.mrb[101].mxu1  ;;  %v10486_v58 = vpop.f32.mrb[102].mxu0 }
 0x742   :  { %v10597_v31 = vadd.f32 %v10596_v27, %v10595_v24  ;;  %v10598_v40 = vpop.f32.mrb[102].mxu1  ;;  %v10487_v7 = vpop.f32.mrb[103].mxu0 }
 0x743   :  { %v9281_v30 = vadd.f32 %v10485_v41, %v14893_v12  ;;  %v10488_v57 = vadd.f32 %v10487_v7, %v10486_v58  ;;  %v10599_v39 = vpop.f32.mrb[103].mxu1 }
 0x744   :  { %v10600_v50 = vadd.f32 %v10599_v39, %v10598_v40 }
 0x745   :  { %v9442_v23 = vadd.f32 %v10597_v31, %v9281_v30  ;;  %v9284_v20 = vadd.f32 %v10488_v57, %v14896_v34 }
 0x747   :  { %9514 = vst [vmem:[#allocation14 + $0x90] sm:$0xff] %v9442_v23  ;;  %v9445_v29 = vadd.f32 %v10600_v50, %v9284_v20  ;;  %v10489_v51 = vpop.f32.mrb[104].mxu0 }
 0x748   :  { %v10601_v33 = vpop.f32.mrb[104].mxu1  ;;  %v10490_v18 = vpop.f32.mrb[105].mxu0 }
 0x749   :  { %9515 = vst [vmem:[#allocation14 + $0x98] sm:$0xff] %v9445_v29  ;;  %v10491_v60 = vadd.f32 %v10490_v18, %v10489_v51  ;;  %v10602_v4 = vpop.f32.mrb[105].mxu1  ;;  %v10492_v32 = vpop.f32.mrb[106].mxu0 }
 0x74a   :  { %v10603_v59 = vadd.f32 %v10602_v4, %v10601_v33  ;;  %v10604_v48 = vpop.f32.mrb[106].mxu1  ;;  %v10493_v5 = vpop.f32.mrb[107].mxu0 }
 0x74b   :  { %v9289_v12 = vadd.f32 %v10491_v60, %v14899_v26  ;;  %v10494_v2 = vadd.f32 %v10493_v5, %v10492_v32  ;;  %v10605_v63 = vpop.f32.mrb[107].mxu1 }
 0x74c   :  { %v10606_v16 = vadd.f32 %v10605_v63, %v10604_v48 }
 0x74d   :  { %v9450_v35 = vadd.f32 %v10603_v59, %v9289_v12  ;;  %v9292_v34 = vadd.f32 %v10494_v2, %v14902_v13 }
 0x74f   :  { %9516 = vst [vmem:[#allocation14 + $0xa0] sm:$0xff] %v9450_v35  ;;  %v9453_v52 = vadd.f32 %v10606_v16, %v9292_v34  ;;  %v10495_v15 = vpop.f32.mrb[108].mxu0 }
 0x750   :  { %v10607_v53 = vpop.f32.mrb[108].mxu1  ;;  %v10496_v22 = vpop.f32.mrb[109].mxu0 }
 0x751   :  { %9517 = vst [vmem:[#allocation14 + $0xa8] sm:$0xff] %v9453_v52  ;;  %v10497_v8 = vadd.f32 %v10496_v22, %v10495_v15  ;;  %v10608_v10 = vpop.f32.mrb[109].mxu1  ;;  %v10498_v56 = vpop.f32.mrb[110].mxu0 }
 0x752   :  { %v10609_v1 = vadd.f32 %v10608_v10, %v10607_v53  ;;  %v10610_v21 = vpop.f32.mrb[110].mxu1  ;;  %v10499_v11 = vpop.f32.mrb[111].mxu0 }
 0x753   :  { %v9297_v26 = vadd.f32 %v10497_v8, %v14905_v62  ;;  %v10500_v55 = vadd.f32 %v10499_v11, %v10498_v56  ;;  %v10611_v38 = vpop.f32.mrb[111].mxu1 }
 0x754   :  { %v10612_v36 = vadd.f32 %v10611_v38, %v10610_v21 }
 0x755   :  { %v9458_v46 = vadd.f32 %v10609_v1, %v9297_v26  ;;  %v9300_v13 = vadd.f32 %v10500_v55, %v14908_v43 }
 0x757   :  { %9518 = vst [vmem:[#allocation14 + $0xb0] sm:$0xff] %v9458_v46  ;;  %v9461_v42 = vadd.f32 %v10612_v36, %v9300_v13  ;;  %v10501_v61 = vpop.f32.mrb[112].mxu0 }
 0x758   :  { %v10613_v44 = vpop.f32.mrb[112].mxu1  ;;  %v10502_v28 = vpop.f32.mrb[113].mxu0 }
 0x759   :  { %9519 = vst [vmem:[#allocation14 + $0xb8] sm:$0xff] %v9461_v42  ;;  %v10503_v9 = vadd.f32 %v10502_v28, %v10501_v61  ;;  %v10614_v14 = vpop.f32.mrb[113].mxu1  ;;  %v10504_v17 = vpop.f32.mrb[114].mxu0 }
 0x75a   :  { %v10615_v25 = vadd.f32 %v10614_v14, %v10613_v44  ;;  %v10616_v24 = vpop.f32.mrb[114].mxu1  ;;  %v10505_v49 = vpop.f32.mrb[115].mxu0 }
 0x75b   :  { %v9305_v62 = vadd.f32 %v10503_v9, %v14911_v19  ;;  %v10506_v41 = vadd.f32 %v10505_v49, %v10504_v17  ;;  %v10617_v27 = vpop.f32.mrb[115].mxu1 }
 0x75c   :  { %v10618_v58 = vadd.f32 %v10617_v27, %v10616_v24 }
 0x75d   :  { %v9466_v31 = vadd.f32 %v10615_v25, %v9305_v62  ;;  %v9308_v43 = vadd.f32 %v10506_v41, %v14914_v54 }
 0x75f   :  { %9520 = vst [vmem:[#allocation14 + $0xc0] sm:$0xff] %v9466_v31  ;;  %v9469_v40 = vadd.f32 %v10618_v58, %v9308_v43  ;;  %v10507_v7 = vpop.f32.mrb[116].mxu0 }
 0x760   :  { %v10619_v30 = vpop.f32.mrb[116].mxu1  ;;  %v10508_v57 = vpop.f32.mrb[117].mxu0 }
 0x761   :  { %9521 = vst [vmem:[#allocation14 + $0xc8] sm:$0xff] %v9469_v40  ;;  %v10509_v39 = vadd.f32 %v10508_v57, %v10507_v7  ;;  %v10620_v50 = vpop.f32.mrb[117].mxu1  ;;  %v10510_v23 = vpop.f32.mrb[118].mxu0 }
 0x762   :  { %v10621_v20 = vadd.f32 %v10620_v50, %v10619_v30  ;;  %v10622_v29 = vpop.f32.mrb[118].mxu1  ;;  %v10511_v51 = vpop.f32.mrb[119].mxu0 }
 0x763   :  { %v9313_v19 = vadd.f32 %v10509_v39, %v14917_v37  ;;  %v10512_v33 = vadd.f32 %v10511_v51, %v10510_v23  ;;  %v10623_v18 = vpop.f32.mrb[119].mxu1 }
 0x764   :  { %v10624_v60 = vadd.f32 %v10623_v18, %v10622_v29 }
 0x765   :  { %v9474_v4 = vadd.f32 %v10621_v20, %v9313_v19  ;;  %v9316_v54 = vadd.f32 %v10512_v33, %v14920_v6 }
 0x767   :  { %9522 = vst [vmem:[#allocation14 + $0xd0] sm:$0xff] %v9474_v4  ;;  %v9477_v32 = vadd.f32 %v10624_v60, %v9316_v54  ;;  %v10513_v59 = vpop.f32.mrb[120].mxu0 }
 0x768   :  { %v10625_v48 = vpop.f32.mrb[120].mxu1  ;;  %v10514_v5 = vpop.f32.mrb[121].mxu0 }
 0x769   :  { %9523 = vst [vmem:[#allocation14 + $0xd8] sm:$0xff] %v9477_v32  ;;  %v10515_v12 = vadd.f32 %v10514_v5, %v10513_v59  ;;  %v10626_v2 = vpop.f32.mrb[121].mxu1  ;;  %v10516_v63 = vpop.f32.mrb[122].mxu0 }
 0x76a   :  { %v10627_v16 = vadd.f32 %v10626_v2, %v10625_v48  ;;  %v10628_v35 = vpop.f32.mrb[122].mxu1  ;;  %v10517_v34 = vpop.f32.mrb[123].mxu0 }
 0x76b   :  { %v9321_v37 = vadd.f32 %v10515_v12, %v14923_v47  ;;  %v10518_v52 = vadd.f32 %v10517_v34, %v10516_v63  ;;  %v10629_v15 = vpop.f32.mrb[123].mxu1 }
 0x76c   :  { %v10630_v53 = vadd.f32 %v10629_v15, %v10628_v35 }
 0x76d   :  { %v9482_v22 = vadd.f32 %v10627_v16, %v9321_v37  ;;  %v9324_v6 = vadd.f32 %v10518_v52, %v14926_v0 }
 0x76f   :  { %9524 = vst [vmem:[#allocation14 + $0xe0] sm:$0xff] %v9482_v22  ;;  %v9485_v8 = vadd.f32 %v10630_v53, %v9324_v6  ;;  %v10519_v10 = vpop.f32.mrb[124].mxu0 }
 0x770   :  { %v10631_v56 = vpop.f32.mrb[124].mxu1  ;;  %v10520_v1 = vpop.f32.mrb[125].mxu0 }
 0x771   :  { %9525 = vst [vmem:[#allocation14 + $0xe8] sm:$0xff] %v9485_v8  ;;  %v10521_v21 = vadd.f32 %v10520_v1, %v10519_v10  ;;  %v10632_v11 = vpop.f32.mrb[125].mxu1  ;;  %v10522_v26 = vpop.f32.mrb[126].mxu0 }
 0x772   :  { %v10633_v55 = vadd.f32 %v10632_v11, %v10631_v56  ;;  %v10634_v38 = vpop.f32.mrb[126].mxu1  ;;  %v10523_v36 = vpop.f32.mrb[127].mxu0 }
 0x773   :  { %v9329_v47 = vadd.f32 %v10521_v21, %v14929_v45  ;;  %v10524_v46 = vadd.f32 %v10523_v36, %v10522_v26  ;;  %v10635_v13 = vpop.f32.mrb[127].mxu1 }
 0x774   :  { %v10636_v42 = vadd.f32 %v10635_v13, %v10634_v38 }
 0x775   :  { %v9490_v0 = vadd.f32 %v10633_v55, %v9329_v47  ;;  %v9332_v61 = vadd.f32 %v10524_v46, %v14932_v3 }
 0x777   :  { %9526 = vst [vmem:[#allocation14 + $0xf0] sm:$0xff] %v9490_v0  ;;  %v9493_v44 = vadd.f32 %v10636_v42, %v9332_v61 }
 0x779   :  { %9527 = vst [vmem:[#allocation14 + $0xf8] sm:$0xff] %v9493_v44 }
 0x77a   :  { %11907 = shalt.err (!%p11904_p4)
}
 0x77b   :  { %s11908_s17 = scalar_lea.hbm %s14988_s7, 4096 }
 0x77c   :  { %p11909_p5 = scmp.ne.s32.totalorder %s14988_s7, %s11908_s17  ;;  %p11912_p6 = scmp.lt.u32.totalorder %s11908_s17, %s14988_s7 }
 0x77e   :  { %p11914_p7 = pnand %p11912_p6, %p11909_p5 }
 0x780   :  { %11917 = shalt.err (!%p11914_p7)
}
 0x781   :  { %9539 = dma.vmem_to_hbm [thread:$0]  %s9534_s12, 4096, %s14988_s7, [#allocation4], %s11936_s5, %s11936_s5, %s11937_s18  }
 0x782   :  { %11926 = dma.done.wait [#allocation4], 4096  }
 0x783   :  { %11927 = vsyncadd [#allocation4], 4294963200 }
 0x784   :  { %9543 = vsyncpa [#allocation3], 1 }
 0x785   :  { %9544 = vsyncpa [#allocation6], 1 }
 0x786   :  { %9545 = vsyncpa [#allocation9], 1 }
 0x787   :  { %9546 = vsyncpa [#allocation12], 1 }
 0x788   :  { %9547 = vsyncpa [#allocation4], 1 }

</bundles_post_ra>
